<compile_context>
chip_gen: v7x
topology: tpu7x:2x2x1
jax: 0.10.0
libtpu: 0.0.40
codegen_flags: <defaults>
</compile_context>

<pallas_src>
import functools

import jax
import jax.numpy as jnp
from jax.experimental import pallas as pl
from jax.experimental.pallas import tpu as pltpu


def _elu(z, alpha):
    # elu(z) = z if z > 0 else alpha * (exp(z) - 1); clamp exp arg for safety.
    return jnp.where(z > 0, z, alpha * (jnp.exp(jnp.minimum(z, 0.0)) - 1.0))


def _skipnet_kernel(x_ref, w_in_ref, b_in_ref, w_mid_ref, b_mid_ref,
                    w_o1_ref, b_o1_ref, w_o2_ref, b_o2_ref, out_ref,
                    cat_ref, *, n_layers, h_dim, out_elu_alpha):
    f32 = jnp.float32
    bf16 = jnp.bfloat16

    # in_layer: Linear -> (Dropout = id at eval) -> ELU(alpha=1)
    z = (jnp.dot(x_ref[...], w_in_ref[...], preferred_element_type=f32)
         + b_in_ref[...])
    h = _elu(z, 1.0)                                   # f32

    # Persistent (batch_tile, 2*h_dim) activation buffer: one half holds h,
    # the other holds prev.  Initially prev == h.
    cat_ref[:, :h_dim] = h
    cat_ref[:, h_dim:] = h

    # mid_layers: Linear(2h -> h) -> (Dropout=id) -> ELU(alpha=1), with skip cat.
    # One K=2h dot per layer; W_mid halves were pre-swapped in the wrapper for
    # odd layers so the resident [slot0 | slot1] buffer multiplies directly as
    # cat([h, prev]) without any in-kernel shuffle.
    for i in range(n_layers):
        cat_bf = cat_ref[...].astype(bf16)
        z = (jnp.dot(cat_bf, w_mid_ref[i], preferred_element_type=f32)
             + b_mid_ref[i])
        h = _elu(z, 1.0)
        # New h overwrites the slot holding the stale prev; the old h (still in
        # the other slot) becomes the new prev.
        if i % 2 == 0:
            cat_ref[:, h_dim:] = h
        else:
            cat_ref[:, :h_dim] = h

    # out_layer: Linear(2h -> h) -> ELU(alpha=dropout) -> Linear(h -> out_dim)
    cat_bf = cat_ref[...].astype(bf16)
    z1 = (jnp.dot(cat_bf, w_o1_ref[...], preferred_element_type=f32)
          + b_o1_ref[...])
    g = _elu(z1, out_elu_alpha).astype(bf16)
    out_ref[...] = (jnp.dot(g, w_o2_ref[...], preferred_element_type=f32)
                    + b_o2_ref[...])


def skipnet_forward(x, params, *, n_layers, h_dim, out_dim, out_elu_alpha,
                    batch_tile=None):
    B, in_dim = x.shape
    assert n_layers >= 1
    if batch_tile is None:
        # Big tiles amortize the ~0.35 us/step pipeline overhead; keep >= 2 grid
        # steps when the batch allows it so both v7x TensorCores get work.
        batch_tile = B // 2 if (B >= 512 and (B // 2) % 16 == 0) else B
    assert B % batch_tile == 0
    assert batch_tile % 16 == 0, "batch tile must be sublane-aligned for bf16"
    assert h_dim % 8 == 0, "h_dim must be sublane-aligned"

    bf16 = jnp.bfloat16
    out_pad = max(128, ((out_dim + 127) // 128) * 128)  # lane-dense output store

    # Pre-swap W_mid halves for odd layers (and W_o1 if n_layers is odd) so the
    # in-kernel h/prev slots (which alternate) line up with the weight rows.
    w_mid = params["w_mid"]
    swapped = jnp.concatenate([w_mid[:, h_dim:, :], w_mid[:, :h_dim, :]], axis=1)
    odd = (jnp.arange(n_layers) % 2 == 1)[:, None, None]
    w_mid_adj = jnp.where(odd, swapped, w_mid)

    w_o1 = params["w_o1"]
    if n_layers % 2 == 1:
        w_o1 = jnp.concatenate([w_o1[h_dim:, :], w_o1[:h_dim, :]], axis=0)

    # Pad the final projection to a lane-dense width (zeros in the padded lanes).
    w_o2 = jnp.zeros((h_dim, out_pad), jnp.float32).at[:, :out_dim].set(params["w_o2"])
    b_o2 = jnp.zeros((1, out_pad), jnp.float32).at[:, :out_dim].set(params["b_o2"])

    # bf16 MXU operands; biases stay f32 (accumulation / ELU are f32 in-kernel).
    x_bf = x.astype(bf16)
    w_in_bf = params["w_in"].astype(bf16)
    w_mid_bf = w_mid_adj.astype(bf16)
    w_o1_bf = w_o1.astype(bf16)
    w_o2_bf = w_o2.astype(bf16)

    kernel = functools.partial(
        _skipnet_kernel,
        n_layers=n_layers, h_dim=h_dim, out_elu_alpha=out_elu_alpha,
    )
    grid = (B // batch_tile,)

    in_specs = [
        pl.BlockSpec((batch_tile, in_dim), lambda i: (i, 0)),             # x
        pl.BlockSpec((in_dim, h_dim), lambda i: (0, 0)),                  # w_in
        pl.BlockSpec((1, h_dim), lambda i: (0, 0)),                       # b_in
        pl.BlockSpec((n_layers, 2 * h_dim, h_dim), lambda i: (0, 0, 0)),  # w_mid
        pl.BlockSpec((n_layers, 1, h_dim), lambda i: (0, 0, 0)),          # b_mid
        pl.BlockSpec((2 * h_dim, h_dim), lambda i: (0, 0)),               # w_o1
        pl.BlockSpec((1, h_dim), lambda i: (0, 0)),                       # b_o1
        pl.BlockSpec((h_dim, out_pad), lambda i: (0, 0)),                 # w_o2
        pl.BlockSpec((1, out_pad), lambda i: (0, 0)),                     # b_o2
    ]
    out_spec = pl.BlockSpec((batch_tile, out_pad), lambda i: (i, 0))

    flops = 2 * B * (in_dim * h_dim
                     + n_layers * 2 * h_dim * h_dim
                     + 2 * h_dim * h_dim
                     + h_dim * out_pad)
    transcendentals = B * h_dim * (n_layers + 2)
    weight_bytes = 2 * (w_in_bf.size + w_mid_bf.size + w_o1_bf.size + w_o2_bf.size)
    bias_bytes = 4 * (h_dim * (n_layers + 2) + out_pad)
    bytes_accessed = 2 * x_bf.size + weight_bytes + bias_bytes + 4 * B * out_pad

    out_padded = pl.pallas_call(
        kernel,
        out_shape=jax.ShapeDtypeStruct((B, out_pad), jnp.float32),
        grid=grid,
        in_specs=in_specs,
        out_specs=out_spec,
        scratch_shapes=[pltpu.VMEM((batch_tile, 2 * h_dim), jnp.float32)],
        compiler_params=pltpu.CompilerParams(
            dimension_semantics=("parallel",),
            vmem_limit_bytes=32 * 1024 * 1024,
        ),
        cost_estimate=pl.CostEstimate(
            flops=flops,
            transcendentals=transcendentals,
            bytes_accessed=bytes_accessed,
        ),
    )(x_bf, w_in_bf, params["b_in"], w_mid_bf, params["b_mid"],
      w_o1_bf, params["b_o1"], w_o2_bf, b_o2)

    return out_padded[:, :out_dim]


def skipnet_reference(x, params, *, n_layers, h_dim, out_elu_alpha):
    """Plain-JAX f32 reference (same math, for sanity checking)."""
    def elu(z, a):
        return jnp.where(z > 0, z, a * (jnp.exp(jnp.minimum(z, 0.0)) - 1.0))

    h = elu(x @ params["w_in"] + params["b_in"], 1.0)
    prev = h
    for i in range(n_layers):
        cat = jnp.concatenate([h, prev], axis=-1)
        temp = h
        h = elu(cat @ params["w_mid"][i] + params["b_mid"][i], 1.0)
        prev = temp
    cat = jnp.concatenate([h, prev], axis=-1)
    g = elu(cat @ params["w_o1"] + params["b_o1"], out_elu_alpha)
    return g @ params["w_o2"] + params["b_o2"]


def init_params(key, in_dim, h_dim, out_dim, n_layers):
    ks = jax.random.split(key, 9)
    s = 0.1
    return {
        "w_in":  s * jax.random.normal(ks[0], (in_dim, h_dim), jnp.float32),
        "b_in":  s * jax.random.normal(ks[1], (1, h_dim), jnp.float32),
        "w_mid": s * jax.random.normal(ks[2], (n_layers, 2 * h_dim, h_dim), jnp.float32),
        "b_mid": s * jax.random.normal(ks[3], (n_layers, 1, h_dim), jnp.float32),
        "w_o1":  s * jax.random.normal(ks[4], (2 * h_dim, h_dim), jnp.float32),
        "b_o1":  s * jax.random.normal(ks[5], (1, h_dim), jnp.float32),
        "w_o2":  s * jax.random.normal(ks[6], (h_dim, out_dim), jnp.float32),
        "b_o2":  s * jax.random.normal(ks[7], (1, out_dim), jnp.float32),
    }


if __name__ == "__main__":
    # Config consistent with SkipNet(in_dim, h_dim, out_dim, n_layers, dropout).
    IN_DIM, H_DIM, OUT_DIM, N_LAYERS, DROPOUT = 16, 32, 4, 3, 0.1
    BATCH = 1024   # 2 grid steps of 512 rows each (both v7x TCs busy, big tiles)

    key = jax.random.PRNGKey(0)
    kx, kp = jax.random.split(key)
    x = jax.random.normal(kx, (BATCH, IN_DIM), jnp.float32)
    params = init_params(kp, IN_DIM, H_DIM, OUT_DIM, N_LAYERS)

    out = skipnet_forward(
        x, params,
        n_layers=N_LAYERS, h_dim=H_DIM, out_dim=OUT_DIM,
        out_elu_alpha=DROPOUT,
    )
    out = jax.block_until_ready(out)

    ref = skipnet_reference(
        x, params, n_layers=N_LAYERS, h_dim=H_DIM, out_elu_alpha=DROPOUT)
    assert out.shape == (BATCH, OUT_DIM)
    # bf16 MXU operands -> slightly looser tolerance than the pure-f32 reference.
    assert jnp.allclose(out, ref, rtol=2e-2, atol=2e-2), "mismatch vs reference"

    print("KERNEL_OK")
</pallas_src>

<mosaic_0001>
module attributes {stable_mosaic.version = 11 : i64} {
  func.func @_skipnet_kernel(%arg0: i32, %arg1: memref<512x16xbf16, #tpu.memory_space<vmem>>, %arg2: memref<16x32xbf16, #tpu.memory_space<vmem>>, %arg3: memref<1x32xf32, #tpu.memory_space<vmem>>, %arg4: memref<3x64x32xbf16, #tpu.memory_space<vmem>>, %arg5: memref<3x1x32xf32, #tpu.memory_space<vmem>>, %arg6: memref<64x32xbf16, #tpu.memory_space<vmem>>, %arg7: memref<1x32xf32, #tpu.memory_space<vmem>>, %arg8: memref<32x128xbf16, #tpu.memory_space<vmem>>, %arg9: memref<1x128xf32, #tpu.memory_space<vmem>>, %arg10: memref<512x128xf32, #tpu.memory_space<vmem>>, %arg11: memref<512x64xf32, #tpu.memory_space<vmem>>) attributes {dimension_semantics = [#tpu.dimension_semantics<parallel>], iteration_bounds = array<i64: 2>, scalar_prefetch = 0 : i64, scratch_operands = 1 : i64, tpu.core_type = #tpu.core_type<tc>, window_params = [{transform_indices = @transform_0, window_bounds = array<i64: 512, 16>}, {pipeline_mode = #tpu.pipeline_mode<synchronous>, transform_indices = @transform_1, window_bounds = array<i64: 16, 32>}, {pipeline_mode = #tpu.pipeline_mode<synchronous>, transform_indices = @transform_2, window_bounds = array<i64: 1, 32>}, {pipeline_mode = #tpu.pipeline_mode<synchronous>, transform_indices = @transform_3, window_bounds = array<i64: 3, 64, 32>}, {pipeline_mode = #tpu.pipeline_mode<synchronous>, transform_indices = @transform_4, window_bounds = array<i64: 3, 1, 32>}, {pipeline_mode = #tpu.pipeline_mode<synchronous>, transform_indices = @transform_5, window_bounds = array<i64: 64, 32>}, {pipeline_mode = #tpu.pipeline_mode<synchronous>, transform_indices = @transform_6, window_bounds = array<i64: 1, 32>}, {pipeline_mode = #tpu.pipeline_mode<synchronous>, transform_indices = @transform_7, window_bounds = array<i64: 32, 128>}, {pipeline_mode = #tpu.pipeline_mode<synchronous>, transform_indices = @transform_8, window_bounds = array<i64: 1, 128>}, {transform_indices = @transform_9, window_bounds = array<i64: 512, 128>}]} {
    %c0 = arith.constant 0 : index
    %c0_0 = arith.constant 0 : index
    %0 = vector.load %arg1[%c0, %c0_0] : memref<512x16xbf16, #tpu.memory_space<vmem>>, vector<512x16xbf16>
    %c0_1 = arith.constant 0 : index
    %c0_2 = arith.constant 0 : index
    %1 = vector.load %arg2[%c0_1, %c0_2] : memref<16x32xbf16, #tpu.memory_space<vmem>>, vector<16x32xbf16>
    %cst = arith.constant dense<0.000000e+00> : vector<512x32xf32>
    %2 = tpu.matmul %0, %1, %cst {dimension_numbers = #tpu.dot_dimension_numbers<[1], [0], [0], [1], [0, 0, 1, 1], [], []>} : vector<512x16xbf16>, vector<16x32xbf16>, vector<512x32xf32> -> vector<512x32xf32>
    %c0_3 = arith.constant 0 : index
    %c0_4 = arith.constant 0 : index
    %3 = vector.load %arg3[%c0_3, %c0_4] : memref<1x32xf32, #tpu.memory_space<vmem>>, vector<1x32xf32>
    %4 = vector.broadcast %3 : vector<1x32xf32> to vector<512x32xf32>
    %5 = arith.addf %2, %4 : vector<512x32xf32>
    %cst_5 = arith.constant 0.000000e+00 : f32
    %6 = vector.broadcast %cst_5 : f32 to vector<512x32xf32>
    %7 = arith.cmpf ogt, %5, %6 : vector<512x32xf32>
    %cst_6 = arith.constant 0.000000e+00 : f32
    %8 = vector.broadcast %cst_6 : f32 to vector<512x32xf32>
    %9 = arith.minimumf %5, %8 : vector<512x32xf32>
    %10 = math.exp %9 : vector<512x32xf32>
    %cst_7 = arith.constant 1.000000e+00 : f32
    %11 = vector.broadcast %cst_7 : f32 to vector<512x32xf32>
    %12 = arith.subf %10, %11 : vector<512x32xf32>
    %cst_8 = arith.constant 1.000000e+00 : f32
    %13 = vector.broadcast %cst_8 : f32 to vector<512x32xf32>
    %14 = arith.mulf %13, %12 : vector<512x32xf32>
    %15 = arith.select %7, %5, %14 : vector<512x32xi1>, vector<512x32xf32>
    %c0_9 = arith.constant 0 : index
    %c0_10 = arith.constant 0 : index
    %16 = vector.load %arg11[%c0_9, %c0_10] : memref<512x64xf32, #tpu.memory_space<vmem>>, vector<512x32xf32>
    tpu.vector_store %arg11[%c0_9, %c0_10], %15 {strides = array<i32>} : memref<512x64xf32, #tpu.memory_space<vmem>>, vector<512x32xf32>,
    %c0_11 = arith.constant 0 : index
    %c32 = arith.constant 32 : index
    %17 = vector.load %arg11[%c0_11, %c32] : memref<512x64xf32, #tpu.memory_space<vmem>>, vector<512x32xf32>
    tpu.vector_store %arg11[%c0_11, %c32], %15 {strides = array<i32>} : memref<512x64xf32, #tpu.memory_space<vmem>>, vector<512x32xf32>,
    %c0_12 = arith.constant 0 : index
    %c0_13 = arith.constant 0 : index
    %18 = vector.load %arg11[%c0_12, %c0_13] : memref<512x64xf32, #tpu.memory_space<vmem>>, vector<512x64xf32>
    %19 = arith.truncf %18 : vector<512x64xf32> to vector<512x64xbf16>
    %c0_14 = arith.constant 0 : index
    %c0_15 = arith.constant 0 : index
    %c0_16 = arith.constant 0 : index
    %20 = vector.load %arg4[%c0_14, %c0_15, %c0_16] : memref<3x64x32xbf16, #tpu.memory_space<vmem>>, vector<1x64x32xbf16>
    %21 = vector.shape_cast %20 : vector<1x64x32xbf16> to vector<64x32xbf16>
    %cst_17 = arith.constant dense<0.000000e+00> : vector<512x32xf32>
    %22 = tpu.matmul %19, %21, %cst_17 {dimension_numbers = #tpu.dot_dimension_numbers<[1], [0], [0], [1], [0, 0, 1, 1], [], []>} : vector<512x64xbf16>, vector<64x32xbf16>, vector<512x32xf32> -> vector<512x32xf32>
    %c0_18 = arith.constant 0 : index
    %c0_19 = arith.constant 0 : index
    %c0_20 = arith.constant 0 : index
    %23 = vector.load %arg5[%c0_18, %c0_19, %c0_20] : memref<3x1x32xf32, #tpu.memory_space<vmem>>, vector<1x1x32xf32>
    %24 = vector.shape_cast %23 : vector<1x1x32xf32> to vector<1x32xf32>
    %25 = vector.broadcast %24 : vector<1x32xf32> to vector<512x32xf32>
    %26 = arith.addf %22, %25 : vector<512x32xf32>
    %cst_21 = arith.constant 0.000000e+00 : f32
    %27 = vector.broadcast %cst_21 : f32 to vector<512x32xf32>
    %28 = arith.cmpf ogt, %26, %27 : vector<512x32xf32>
    %cst_22 = arith.constant 0.000000e+00 : f32
    %29 = vector.broadcast %cst_22 : f32 to vector<512x32xf32>
    %30 = arith.minimumf %26, %29 : vector<512x32xf32>
    %31 = math.exp %30 : vector<512x32xf32>
    %cst_23 = arith.constant 1.000000e+00 : f32
    %32 = vector.broadcast %cst_23 : f32 to vector<512x32xf32>
    %33 = arith.subf %31, %32 : vector<512x32xf32>
    %cst_24 = arith.constant 1.000000e+00 : f32
    %34 = vector.broadcast %cst_24 : f32 to vector<512x32xf32>
    %35 = arith.mulf %34, %33 : vector<512x32xf32>
    %36 = arith.select %28, %26, %35 : vector<512x32xi1>, vector<512x32xf32>
    %c0_25 = arith.constant 0 : index
    %c32_26 = arith.constant 32 : index
    %37 = vector.load %arg11[%c0_25, %c32_26] : memref<512x64xf32, #tpu.memory_space<vmem>>, vector<512x32xf32>
    tpu.vector_store %arg11[%c0_25, %c32_26], %36 {strides = array<i32>} : memref<512x64xf32, #tpu.memory_space<vmem>>, vector<512x32xf32>,
    %c0_27 = arith.constant 0 : index
    %c0_28 = arith.constant 0 : index
    %38 = vector.load %arg11[%c0_27, %c0_28] : memref<512x64xf32, #tpu.memory_space<vmem>>, vector<512x64xf32>
    %39 = arith.truncf %38 : vector<512x64xf32> to vector<512x64xbf16>
    %c1 = arith.constant 1 : index
    %c0_29 = arith.constant 0 : index
    %c0_30 = arith.constant 0 : index
    %40 = vector.load %arg4[%c1, %c0_29, %c0_30] : memref<3x64x32xbf16, #tpu.memory_space<vmem>>, vector<1x64x32xbf16>
    %41 = vector.shape_cast %40 : vector<1x64x32xbf16> to vector<64x32xbf16>
    %cst_31 = arith.constant dense<0.000000e+00> : vector<512x32xf32>
    %42 = tpu.matmul %39, %41, %cst_31 {dimension_numbers = #tpu.dot_dimension_numbers<[1], [0], [0], [1], [0, 0, 1, 1], [], []>} : vector<512x64xbf16>, vector<64x32xbf16>, vector<512x32xf32> -> vector<512x32xf32>
    %c1_32 = arith.constant 1 : index
    %c0_33 = arith.constant 0 : index
    %c0_34 = arith.constant 0 : index
    %43 = vector.load %arg5[%c1_32, %c0_33, %c0_34] : memref<3x1x32xf32, #tpu.memory_space<vmem>>, vector<1x1x32xf32>
    %44 = vector.shape_cast %43 : vector<1x1x32xf32> to vector<1x32xf32>
    %45 = vector.broadcast %44 : vector<1x32xf32> to vector<512x32xf32>
    %46 = arith.addf %42, %45 : vector<512x32xf32>
    %cst_35 = arith.constant 0.000000e+00 : f32
    %47 = vector.broadcast %cst_35 : f32 to vector<512x32xf32>
    %48 = arith.cmpf ogt, %46, %47 : vector<512x32xf32>
    %cst_36 = arith.constant 0.000000e+00 : f32
    %49 = vector.broadcast %cst_36 : f32 to vector<512x32xf32>
    %50 = arith.minimumf %46, %49 : vector<512x32xf32>
    %51 = math.exp %50 : vector<512x32xf32>
    %cst_37 = arith.constant 1.000000e+00 : f32
    %52 = vector.broadcast %cst_37 : f32 to vector<512x32xf32>
    %53 = arith.subf %51, %52 : vector<512x32xf32>
    %cst_38 = arith.constant 1.000000e+00 : f32
    %54 = vector.broadcast %cst_38 : f32 to vector<512x32xf32>
    %55 = arith.mulf %54, %53 : vector<512x32xf32>
    %56 = arith.select %48, %46, %55 : vector<512x32xi1>, vector<512x32xf32>
    %c0_39 = arith.constant 0 : index
    %c0_40 = arith.constant 0 : index
    %57 = vector.load %arg11[%c0_39, %c0_40] : memref<512x64xf32, #tpu.memory_space<vmem>>, vector<512x32xf32>
    tpu.vector_store %arg11[%c0_39, %c0_40], %56 {strides = array<i32>} : memref<512x64xf32, #tpu.memory_space<vmem>>, vector<512x32xf32>,
    %c0_41 = arith.constant 0 : index
    %c0_42 = arith.constant 0 : index
    %58 = vector.load %arg11[%c0_41, %c0_42] : memref<512x64xf32, #tpu.memory_space<vmem>>, vector<512x64xf32>
    %59 = arith.truncf %58 : vector<512x64xf32> to vector<512x64xbf16>
    %c2 = arith.constant 2 : index
    %c0_43 = arith.constant 0 : index
    %c0_44 = arith.constant 0 : index
    %60 = vector.load %arg4[%c2, %c0_43, %c0_44] : memref<3x64x32xbf16, #tpu.memory_space<vmem>>, vector<1x64x32xbf16>
    %61 = vector.shape_cast %60 : vector<1x64x32xbf16> to vector<64x32xbf16>
    %cst_45 = arith.constant dense<0.000000e+00> : vector<512x32xf32>
    %62 = tpu.matmul %59, %61, %cst_45 {dimension_numbers = #tpu.dot_dimension_numbers<[1], [0], [0], [1], [0, 0, 1, 1], [], []>} : vector<512x64xbf16>, vector<64x32xbf16>, vector<512x32xf32> -> vector<512x32xf32>
    %c2_46 = arith.constant 2 : index
    %c0_47 = arith.constant 0 : index
    %c0_48 = arith.constant 0 : index
    %63 = vector.load %arg5[%c2_46, %c0_47, %c0_48] : memref<3x1x32xf32, #tpu.memory_space<vmem>>, vector<1x1x32xf32>
    %64 = vector.shape_cast %63 : vector<1x1x32xf32> to vector<1x32xf32>
    %65 = vector.broadcast %64 : vector<1x32xf32> to vector<512x32xf32>
    %66 = arith.addf %62, %65 : vector<512x32xf32>
    %cst_49 = arith.constant 0.000000e+00 : f32
    %67 = vector.broadcast %cst_49 : f32 to vector<512x32xf32>
    %68 = arith.cmpf ogt, %66, %67 : vector<512x32xf32>
    %cst_50 = arith.constant 0.000000e+00 : f32
    %69 = vector.broadcast %cst_50 : f32 to vector<512x32xf32>
    %70 = arith.minimumf %66, %69 : vector<512x32xf32>
    %71 = math.exp %70 : vector<512x32xf32>
    %cst_51 = arith.constant 1.000000e+00 : f32
    %72 = vector.broadcast %cst_51 : f32 to vector<512x32xf32>
    %73 = arith.subf %71, %72 : vector<512x32xf32>
    %cst_52 = arith.constant 1.000000e+00 : f32
    %74 = vector.broadcast %cst_52 : f32 to vector<512x32xf32>
    %75 = arith.mulf %74, %73 : vector<512x32xf32>
    %76 = arith.select %68, %66, %75 : vector<512x32xi1>, vector<512x32xf32>
    %c0_53 = arith.constant 0 : index
    %c32_54 = arith.constant 32 : index
    %77 = vector.load %arg11[%c0_53, %c32_54] : memref<512x64xf32, #tpu.memory_space<vmem>>, vector<512x32xf32>
    tpu.vector_store %arg11[%c0_53, %c32_54], %76 {strides = array<i32>} : memref<512x64xf32, #tpu.memory_space<vmem>>, vector<512x32xf32>,
    %c0_55 = arith.constant 0 : index
    %c0_56 = arith.constant 0 : index
    %78 = vector.load %arg11[%c0_55, %c0_56] : memref<512x64xf32, #tpu.memory_space<vmem>>, vector<512x64xf32>
    %79 = arith.truncf %78 : vector<512x64xf32> to vector<512x64xbf16>
    %c0_57 = arith.constant 0 : index
    %c0_58 = arith.constant 0 : index
    %80 = vector.load %arg6[%c0_57, %c0_58] : memref<64x32xbf16, #tpu.memory_space<vmem>>, vector<64x32xbf16>
    %cst_59 = arith.constant dense<0.000000e+00> : vector<512x32xf32>
    %81 = tpu.matmul %79, %80, %cst_59 {dimension_numbers = #tpu.dot_dimension_numbers<[1], [0], [0], [1], [0, 0, 1, 1], [], []>} : vector<512x64xbf16>, vector<64x32xbf16>, vector<512x32xf32> -> vector<512x32xf32>
    %c0_60 = arith.constant 0 : index
    %c0_61 = arith.constant 0 : index
    %82 = vector.load %arg7[%c0_60, %c0_61] : memref<1x32xf32, #tpu.memory_space<vmem>>, vector<1x32xf32>
    %83 = vector.broadcast %82 : vector<1x32xf32> to vector<512x32xf32>
    %84 = arith.addf %81, %83 : vector<512x32xf32>
    %cst_62 = arith.constant 0.000000e+00 : f32
    %85 = vector.broadcast %cst_62 : f32 to vector<512x32xf32>
    %86 = arith.cmpf ogt, %84, %85 : vector<512x32xf32>
    %cst_63 = arith.constant 0.000000e+00 : f32
    %87 = vector.broadcast %cst_63 : f32 to vector<512x32xf32>
    %88 = arith.minimumf %84, %87 : vector<512x32xf32>
    %89 = math.exp %88 : vector<512x32xf32>
    %cst_64 = arith.constant 1.000000e+00 : f32
    %90 = vector.broadcast %cst_64 : f32 to vector<512x32xf32>
    %91 = arith.subf %89, %90 : vector<512x32xf32>
    %cst_65 = arith.constant 1.000000e-01 : f32
    %92 = vector.broadcast %cst_65 : f32 to vector<512x32xf32>
    %93 = arith.mulf %92, %91 : vector<512x32xf32>
    %94 = arith.select %86, %84, %93 : vector<512x32xi1>, vector<512x32xf32>
    %95 = arith.truncf %94 : vector<512x32xf32> to vector<512x32xbf16>
    %c0_66 = arith.constant 0 : index
    %c0_67 = arith.constant 0 : index
    %96 = vector.load %arg8[%c0_66, %c0_67] : memref<32x128xbf16, #tpu.memory_space<vmem>>, vector<32x128xbf16>
    %cst_68 = arith.constant dense<0.000000e+00> : vector<512x128xf32>
    %97 = tpu.matmul %95, %96, %cst_68 {dimension_numbers = #tpu.dot_dimension_numbers<[1], [0], [0], [1], [0, 0, 1, 1], [], []>} : vector<512x32xbf16>, vector<32x128xbf16>, vector<512x128xf32> -> vector<512x128xf32>
    %c0_69 = arith.constant 0 : index
    %c0_70 = arith.constant 0 : index
    %98 = vector.load %arg9[%c0_69, %c0_70] : memref<1x128xf32, #tpu.memory_space<vmem>>, vector<1x128xf32>
    %99 = vector.broadcast %98 : vector<1x128xf32> to vector<512x128xf32>
    %100 = arith.addf %97, %99 : vector<512x128xf32>
    %c0_71 = arith.constant 0 : index
    %c0_72 = arith.constant 0 : index
    %101 = vector.load %arg10[%c0_71, %c0_72] : memref<512x128xf32, #tpu.memory_space<vmem>>, vector<512x128xf32>
    tpu.vector_store %arg10[%c0_71, %c0_72], %100 {strides = array<i32>} : memref<512x128xf32, #tpu.memory_space<vmem>>, vector<512x128xf32>,
    return
  }
  func.func @transform_0(%arg0: i32) -> (i32, i32) {
    %c0_i32 = arith.constant 0 : i32
    %c0_i32_0 = arith.constant 0 : i32
    return %arg0, %c0_i32 : i32, i32
  }
  func.func @transform_1(%arg0: i32) -> (i32, i32) {
    %c0_i32 = arith.constant 0 : i32
    %c0_i32_0 = arith.constant 0 : i32
    %c0_i32_1 = arith.constant 0 : i32
    return %c0_i32, %c0_i32_0 : i32, i32
  }
  func.func @transform_2(%arg0: i32) -> (i32, i32) {
    %c0_i32 = arith.constant 0 : i32
    %c0_i32_0 = arith.constant 0 : i32
    %c0_i32_1 = arith.constant 0 : i32
    return %c0_i32, %c0_i32_0 : i32, i32
  }
  func.func @transform_3(%arg0: i32) -> (i32, i32, i32) {
    %c0_i32 = arith.constant 0 : i32
    %c0_i32_0 = arith.constant 0 : i32
    %c0_i32_1 = arith.constant 0 : i32
    %c0_i32_2 = arith.constant 0 : i32
    return %c0_i32, %c0_i32_0, %c0_i32_1 : i32, i32, i32
  }
  func.func @transform_4(%arg0: i32) -> (i32, i32, i32) {
    %c0_i32 = arith.constant 0 : i32
    %c0_i32_0 = arith.constant 0 : i32
    %c0_i32_1 = arith.constant 0 : i32
    %c0_i32_2 = arith.constant 0 : i32
    return %c0_i32, %c0_i32_0, %c0_i32_1 : i32, i32, i32
  }
  func.func @transform_5(%arg0: i32) -> (i32, i32) {
    %c0_i32 = arith.constant 0 : i32
    %c0_i32_0 = arith.constant 0 : i32
    %c0_i32_1 = arith.constant 0 : i32
    return %c0_i32, %c0_i32_0 : i32, i32
  }
  func.func @transform_6(%arg0: i32) -> (i32, i32) {
    %c0_i32 = arith.constant 0 : i32
    %c0_i32_0 = arith.constant 0 : i32
    %c0_i32_1 = arith.constant 0 : i32
    return %c0_i32, %c0_i32_0 : i32, i32
  }
  func.func @transform_7(%arg0: i32) -> (i32, i32) {
    %c0_i32 = arith.constant 0 : i32
    %c0_i32_0 = arith.constant 0 : i32
    %c0_i32_1 = arith.constant 0 : i32
    return %c0_i32, %c0_i32_0 : i32, i32
  }
  func.func @transform_8(%arg0: i32) -> (i32, i32) {
    %c0_i32 = arith.constant 0 : i32
    %c0_i32_0 = arith.constant 0 : i32
    %c0_i32_1 = arith.constant 0 : i32
    return %c0_i32, %c0_i32_0 : i32, i32
  }
  func.func @transform_9(%arg0: i32) -> (i32, i32) {
    %c0_i32 = arith.constant 0 : i32
    %c0_i32_0 = arith.constant 0 : i32
    return %arg0, %c0_i32 : i32, i32
  }
}

</mosaic_0001>

<bundles_post_ra>
// kernel: tpu_custom_call.1
= control target key start
LH: loop header
LB: loop body
LE: loop exit
PB: predicated region body
PF: predicated region fallthrough
CT: control target
= control target key end

     0   :  { %14 = vsyncpa [#allocation4], 0  ;;  %s11853_s0 = inlined_call_operand.vmem [shape: bf16[1024,16], index: 0, kind: input, shape index: {}]   ;;  %s11854_s1 = inlined_call_operand.vmem [shape: bf16[16,32], index: 1, kind: input, shape index: {}]   ;;  %s11855_s2 = inlined_call_operand.vmem [shape: f32[1,32], index: 2, kind: input, shape index: {}]   ;;  %s11856_s3 = inlined_call_operand.vmem [shape: bf16[3,64,32], index: 3, kind: input, shape index: {}]   ;;  %s11857_s4 = inlined_call_operand.vmem [shape: f32[3,1,32], index: 4, kind: input, shape index: {}]   ;;  %s11858_s5 = inlined_call_operand.vmem [shape: bf16[64,32], index: 5, kind: input, shape index: {}]   ;;  %s11859_s6 = inlined_call_operand.vmem [shape: f32[1,32], index: 6, kind: input, shape index: {}]   ;;  %s11860_s7 = inlined_call_operand.vmem [shape: bf16[32,128], index: 7, kind: input, shape index: {}]   ;;  %s11861_s8 = inlined_call_operand.vmem [shape: f32[1,128], index: 8, kind: input, shape index: {}]   ;;  %s11862_s9 = inlined_call_operand.hbm [shape: f32[1024,128], index: 9, kind: output, shape index: {}]  }
   0x1   :  { %16 = vsyncpa [#allocation4 + $0x1], 0  ;;  %s8788_s30 = smov 0   ;;  %s8790_s10 = smov 0  }
   0x2   :  { %s8792_s11 = smov 0   ;;  %s8794_s12 = smov 0  }
   0x3 LB: > { %s8809_s13 = sadd.s32 4294967295, %s8732_s12   ;;  %s6699_s14 = sadd.s32 4294967294, %s8732_s12   ;;  %s8732_s12 = sphi %s8794_s12, %s11868_s12   ;;  %s8728_s11 = sphi %s8792_s11, %s11867_s11   ;;  %s8724_s10 = sphi %s8790_s10, %s11866_s10   ;;  %s8720_s30 = sphi %s8788_s30, %s11865_s30  }
   0x4   : > { %s8813_s15 = sadd.s32 1, %s8732_s12   ;;  %s223_s16 = sadd.s32 1, %s8728_s11 }
   0x5   : > { %s220_s17 = ssub.s32 %s8732_s12, %s8813_s15  ;;  %p233_p0 = scmp.ne.s32.totalorder %s8728_s11, %s8724_s10 }
   0x6   : > { %p221_p1 = scmp.eq.s32.totalorder %s220_s17, 0  ;;  %p234_p2 = scmp.eq.s32.totalorder %s8809_s13, 1 }
   0x7   : > { %p239_p3 = scmp.ne.s32.totalorder %s8724_s10, %s8720_s30  ;;  %p240_p4 = scmp.eq.s32.totalorder %s6699_s14, 1 }
   0x8   : > { %s8824_s18 = scalar_select %p221_p1, %s8728_s11, %s223_s16  }
   0x9   : > { %p8826_p5 = por %p234_p2, %p233_p0  ;;  %p8830_p6 = por %p240_p4, %p239_p3 }
   0xa   : > { %p6702_p7 = scmp.ge.s32.totalorder %s8732_s12, 1  ;;  %p291_p8 = scmp.lt.s32.totalorder %s8732_s12, 3 }
   0xc   : > { %p292_p9 = pnand %p6702_p7, %p291_p8 }
   0xd   : > { %v7974_v0 = vld [vmem:[%s11854_s1] sm:$0xff] (!%p292_p9)   ;;  %s6704_s23 = sshll.u32 (!%p292_p9), %s8809_s13, 6  ;;  %vm574_vm0 = vcmask (!%p292_p9), 130048   ;;  %v8008_v61 = vld [vmem:[%s11856_s3 + $0x8] sm:$0xff] (!%p292_p9)   ;;  %vm1344_vm2 = vcmask (!%p292_p9), 261120   ;;  %s8734_s26 = smov (!%p292_p9), 32  }
   0xe   : > { %295 = sbr.rel (%p292_p9) target bundleno = 1967 (0x7af), region = 56  ;;  %p328_p10 = scmp.lt.s32.totalorder (!%p292_p9), %s6704_s23, 127  ;;  %7510 = vmatprep.subr.bf16.mxu0 (!%p292_p9), %v7974_v0  ;;  %v8912_v33 = vld [vmem:[%s11855_s2] ss:$0 sm:$0xff] (!%p292_p9) }
   0xf   : > { %7511 = vmatpush3.bf16.msra.mxu0 (!%p292_p9), %v7974_v0  ;;  %v8007_v51 = vld [vmem:[%s11856_s3] sm:$0xff] (!%p292_p9)   ;;  %s324_s28 = sand.u32 (!%p292_p9), 1, %s8724_s10   ;;  %s7298_s21 = sshll.u32 (!%p292_p9), %s8809_s13, 13 }
  0x10   : > { %7576 = vmatprep.subr.bf16.mxu1 (!%p292_p9), %v8007_v51  ;;  %s6703_s29 = sshll.u32 (!%p292_p9), %s324_s28, 9  ;;  %s11812_s13 = scalar_lea.sflag (!%p292_p9), [#allocation4], %s324_s28 }
  0x11   : > { %7577 = vmatpush3.bf16.msra.mxu1 (!%p292_p9), %v8007_v51  ;;  %s11673_s17 = scalar_lea.vmem (!%p292_p9), [#allocation3], %s6703_s29 }
  0x12   : > { %7578 = vmatprep.subr.bf16.mxu1 (!%p292_p9), %v8008_v61  ;;  %s6637_s22 = sshll.u32 (!%p292_p9), %s11673_s17, 4  ;;  %s11804_s22 = int_to_ptr.vmem [resolvable:$true] %s6637_s22 }
  0x13   : > { %s8670_s25 = scalar_lea.vmem (!%p292_p9), %s11804_s22, 8192 }
  0x14   : > { %p8671_p11 = scmp.ne.s32.totalorder (!%p292_p9), %s11804_s22, %s8670_s25 }
  0x15   : > { %s11870_s23 = smov (!%p328_p10, %s6704_s23), 127  ;;  %7579 = vmatpush3.bf16.msra.mxu1 %v8008_v61 }
  0x16   : > { %s6705_s24 = sshll.u32 %s11870_s23, 2  ;;  %p8672_p12 = pnand %p8671_p11, %p8826_p5 }
  0x17   : > { %s8843_s27 = scalar_lea.vmem %s11853_s0, %s6705_s24  ;;  %s11802_s24 = scalar_lea.hbm %s11862_s9, %s7298_s21 }
  0x18   : > { %v7975_v1 = vld [vmem:[%s8843_s27] sm:$0xff]   ;;  %v7976_v2 = vld [vmem:[%s8843_s27 + $0x8] sm:$0xff]   ;;  %v7977_v3 = vld [vmem:[%s8843_s27 + $0x10] sm:$0xff]   ;;  %p8673_p13 = pneg %p8672_p12 }
  0x19   : > { %7512 = vmatprep.mubr.msk.bf16.mxu0 %vm574_vm0, %v7975_v1  ;;  %v7978_v4 = vld [vmem:[%s8843_s27 + $0x18] sm:$0xff]   ;;  %v7979_v5 = vld [vmem:[%s8843_s27 + $0x20] sm:$0xff]   ;;  %v7980_v6 = vld [vmem:[%s8843_s27 + $0x28] sm:$0xff]  }
  0x1a   : > { %7513 = vmatmul.mubr.msk.bf16.vlgmr.msra.gmra.mrb[0].mxu0 %vm574_vm0, %v7976_v2  ;;  %v7981_v7 = vld [vmem:[%s8843_s27 + $0x30] sm:$0xff]   ;;  %v7982_v8 = vld [vmem:[%s8843_s27 + $0x38] sm:$0xff]   ;;  %v7983_v9 = vld [vmem:[%s8843_s27 + $0x40] sm:$0xff]  }
  0x1b   : > { %7516 = vmatprep.mubr.msk.bf16.mxu0 %vm574_vm0, %v7977_v3  ;;  %v7984_v10 = vld [vmem:[%s8843_s27 + $0x48] sm:$0xff]   ;;  %v7985_v11 = vld [vmem:[%s8843_s27 + $0x50] sm:$0xff]   ;;  %v7986_v12 = vld [vmem:[%s8843_s27 + $0x58] sm:$0xff]  }
  0x1c   : > { %v7987_v13 = vld [vmem:[%s8843_s27 + $0x60] sm:$0xff]   ;;  %v7988_v14 = vld [vmem:[%s8843_s27 + $0x68] sm:$0xff]   ;;  %v7989_v15 = vld [vmem:[%s8843_s27 + $0x70] sm:$0xff]  }
  0x1d   : > { %v7990_v16 = vld [vmem:[%s8843_s27 + $0x78] sm:$0xff]   ;;  %v7991_v17 = vld [vmem:[%s8843_s27 + $0x80] sm:$0xff]   ;;  %v7992_v18 = vld [vmem:[%s8843_s27 + $0x88] sm:$0xff]  }
  0x1e   : > { %v7993_v19 = vld [vmem:[%s8843_s27 + $0x90] sm:$0xff]   ;;  %v7994_v20 = vld [vmem:[%s8843_s27 + $0x98] sm:$0xff]   ;;  %v7995_v21 = vld [vmem:[%s8843_s27 + $0xa0] sm:$0xff]  }
  0x1f   : > { %v7996_v22 = vld [vmem:[%s8843_s27 + $0xa8] sm:$0xff]   ;;  %v7997_v23 = vld [vmem:[%s8843_s27 + $0xb0] sm:$0xff]   ;;  %v7998_v24 = vld [vmem:[%s8843_s27 + $0xb8] sm:$0xff]  }
  0x20   : > { %v7999_v25 = vld [vmem:[%s8843_s27 + $0xc0] sm:$0xff]   ;;  %v8000_v26 = vld [vmem:[%s8843_s27 + $0xc8] sm:$0xff]   ;;  %v8001_v27 = vld [vmem:[%s8843_s27 + $0xd0] sm:$0xff]  }
  0x21   : > { %v8002_v28 = vld [vmem:[%s8843_s27 + $0xd8] sm:$0xff]   ;;  %v8003_v29 = vld [vmem:[%s8843_s27 + $0xe0] sm:$0xff]   ;;  %v8004_v30 = vld [vmem:[%s8843_s27 + $0xe8] sm:$0xff]  }
  0x22   : > { %7517 = vmatmul.mubr.msk.bf16.gmra.mrb[4].mxu0 %vm574_vm0, %v7978_v4  ;;  %v8005_v31 = vld [vmem:[%s8843_s27 + $0xf0] sm:$0xff]   ;;  %v8006_v32 = vld [vmem:[%s8843_s27 + $0xf8] sm:$0xff]   ;;  %s8735_s27 = smov [#allocation3]  }
  0x23   : > { %7520 = vmatprep.mubr.msk.bf16.mxu0 %vm574_vm0, %v7979_v5  ;;  %v8009_v2 = vld [vmem:[%s11856_s3 + $0x10] sm:$0xff]   ;;  %s8674_s29 = sshll.u32 %s8735_s27, 4  ;;  %s8675_s29 = int_to_ptr.vmem [resolvable:$false] %s8674_s29 }
  0x24   : > { %7580 = vmatprep.subr.bf16.mxu1 %v8009_v2  ;;  %s8676_s14 = scalar_lea.vmem %s8675_s29, 16384  ;;  %p8677_p0 = scmp.lt.s32.totalorder %s11804_s22, %s8675_s29 }
  0x25   : > { %7581 = vmatpush3.bf16.msra.mxu1 %v8009_v2  ;;  %p8678_p1 = scmp.lt.s32.totalorder %s8676_s14, %s8670_s25 }
  0x27   : > { %p8679_p2 = por %p8678_p1, %p8677_p0 }
  0x29   : > { %p8680_p3 = pnand %p8679_p2, %p8673_p13 }
  0x2a   : > { %7521 = vmatmul.mubr.msk.bf16.gmra.mrb[8].mxu0 %vm574_vm0, %v7980_v6 }
  0x2b   : > { %7524 = vmatprep.mubr.msk.bf16.mxu0 %vm574_vm0, %v7981_v7 }
  0x32   : > { %7525 = vmatmul.mubr.msk.bf16.gmra.mrb[12].mxu0 %vm574_vm0, %v7982_v8 }
  0x33   : > { %7528 = vmatprep.mubr.msk.bf16.mxu0 %vm574_vm0, %v7983_v9 }
  0x3a   : > { %7529 = vmatmul.mubr.msk.bf16.gmra.mrb[16].mxu0 %vm574_vm0, %v7984_v10 }
  0x3b   : > { %7532 = vmatprep.mubr.msk.bf16.mxu0 %vm574_vm0, %v7985_v11 }
  0x42   : > { %7533 = vmatmul.mubr.msk.bf16.gmra.mrb[20].mxu0 %vm574_vm0, %v7986_v12 }
  0x43   : > { %7536 = vmatprep.mubr.msk.bf16.mxu0 %vm574_vm0, %v7987_v13 }
  0x4a   : > { %7537 = vmatmul.mubr.msk.bf16.gmra.mrb[24].mxu0 %vm574_vm0, %v7988_v14 }
  0x4b   : > { %7540 = vmatprep.mubr.msk.bf16.mxu0 %vm574_vm0, %v7989_v15 }
  0x52   : > { %7541 = vmatmul.mubr.msk.bf16.gmra.mrb[28].mxu0 %vm574_vm0, %v7990_v16 }
  0x53   : > { %7544 = vmatprep.mubr.msk.bf16.mxu0 %vm574_vm0, %v7991_v17 }
  0x5a   : > { %7545 = vmatmul.mubr.msk.bf16.gmra.mrb[32].mxu0 %vm574_vm0, %v7992_v18  ;;  %v8010_v18 = vld [vmem:[%s11856_s3 + $0x18] sm:$0xff]  }
  0x5b   : > { %7548 = vmatprep.mubr.msk.bf16.mxu0 %vm574_vm0, %v7993_v19  ;;  %7582 = vmatprep.subr.bf16.mxu1 %v8010_v18 }
  0x5c   : > { %7583 = vmatpush3.bf16.msra.mxu1 %v8010_v18 }
  0x62   : > { %7549 = vmatmul.mubr.msk.bf16.gmra.mrb[36].mxu0 %vm574_vm0, %v7994_v20 }
  0x63   : > { %7552 = vmatprep.mubr.msk.bf16.mxu0 %vm574_vm0, %v7995_v21 }
  0x6a   : > { %7553 = vmatmul.mubr.msk.bf16.gmra.mrb[40].mxu0 %vm574_vm0, %v7996_v22 }
  0x6b   : > { %7556 = vmatprep.mubr.msk.bf16.mxu0 %vm574_vm0, %v7997_v23 }
  0x72   : > { %7557 = vmatmul.mubr.msk.bf16.gmra.mrb[44].mxu0 %vm574_vm0, %v7998_v24 }
  0x73   : > { %7560 = vmatprep.mubr.msk.bf16.mxu0 %vm574_vm0, %v7999_v25 }
  0x7a   : > { %7561 = vmatmul.mubr.msk.bf16.gmra.mrb[48].mxu0 %vm574_vm0, %v8000_v26 }
  0x7b   : > { %7564 = vmatprep.mubr.msk.bf16.mxu0 %vm574_vm0, %v8001_v27 }
  0x82   : > { %7565 = vmatmul.mubr.msk.bf16.gmra.mrb[52].mxu0 %vm574_vm0, %v8002_v28 }
  0x83   : > { %7568 = vmatprep.mubr.msk.bf16.mxu0 %vm574_vm0, %v8003_v29 }
  0x8a   : > { %7569 = vmatmul.mubr.msk.bf16.gmra.mrb[56].mxu0 %vm574_vm0, %v8004_v30 }
  0x8b   : > { %7572 = vmatprep.mubr.msk.bf16.mxu0 %vm574_vm0, %v8005_v31 }
  0x92   : > { %7573 = vmatmul.mubr.msk.bf16.gmra.mrb[60].mxu0 %vm574_vm0, %v8006_v32 }
  0xed   : > { %v7514_v34 = vpop.f32.mrb[0].mxu0 }
  0xee   : > { %v8915_v35 = vadd.f32 %v7514_v34, %v8912_v33  ;;  %v705_v36 = vpop.f32.mrb[1].mxu0 }
  0xef   : > { %v8918_v37 = vadd.f32 %v8912_v33, %v705_v36  ;;  %v7515_v38 = vpop.f32.mrb[2].mxu0 }
  0xf0   : > { %v1026_v39 = vmin.f32 %v8915_v35, 0.0  ;;  %v8922_v40 = vadd.f32 %v7515_v38, %v8912_v33  ;;  %v708_v41 = vpop.f32.mrb[3].mxu0  ;;  %vm962_vm1 = vcmp.gt.f32.partialorder %v8915_v35, 0.0 }
  0xf1   : > { %v1024_v42 = vmin.f32 %v8918_v37, 0.0  ;;  %v8926_v43 = vadd.f32 %v8912_v33, %v708_v41  ;;  %vm960_vm3 = vcmp.gt.f32.partialorder %v8918_v37, 0.0 }
  0xf2   : > { %v1092_v44 = vmul.f32 1.442695, %v1026_v39  ;;  %v1027_v45 = vmin.f32 %v8922_v40, 0.0  ;;  %vm963_vm4 = vcmp.gt.f32.partialorder %v8922_v40, 0.0 }
  0xf3   : > { %v1088_v46 = vmul.f32 1.442695, %v1024_v42  ;;  %v1025_v47 = vmin.f32 %v8926_v43, 0.0  ;;  %vm961_vm5 = vcmp.gt.f32.partialorder %v8926_v43, 0.0 }
  0xf4   : > { %8025 = vpow2.f32 %v1092_v44  ;;  %v1094_v48 = vmul.f32 1.442695, %v1027_v45 }
  0xf5   : > { %8027 = vpow2.f32 %v1088_v46  ;;  %v1090_v49 = vmul.f32 1.442695, %v1025_v47  ;;  %v7518_v50 = vpop.f32.mrb[4].mxu0 }
  0xf6   : > { %8029 = vpow2.f32 %v1094_v48  ;;  %v8934_v52 = vadd.f32 %v7518_v50, %v8912_v33  ;;  %v721_v53 = vpop.f32.mrb[5].mxu0 }
  0xf7   : > { %8031 = vpow2.f32 %v1090_v49  ;;  %v8937_v54 = vadd.f32 %v8912_v33, %v721_v53  ;;  %v7519_v55 = vpop.f32.mrb[6].mxu0 }
  0xf8   : > { %v1030_v56 = vmin.f32 %v8934_v52, 0.0  ;;  %v8941_v57 = vadd.f32 %v7519_v55, %v8912_v33  ;;  %v724_v58 = vpop.f32.mrb[7].mxu0  ;;  %vm966_vm6 = vcmp.gt.f32.partialorder %v8934_v52, 0.0 }
  0xf9   : > { %v1028_v59 = vmin.f32 %v8937_v54, 0.0  ;;  %v8945_v60 = vadd.f32 %v8912_v33, %v724_v58  ;;  %vm964_vm7 = vcmp.gt.f32.partialorder %v8937_v54, 0.0 }
  0xfa   : > { %v1100_v62 = vmul.f32 1.442695, %v1030_v56  ;;  %v1031_v63 = vmin.f32 %v8941_v57, 0.0  ;;  %vm967_vm8 = vcmp.gt.f32.partialorder %v8941_v57, 0.0 }
  0xfb   : > { %v1096_v0 = vmul.f32 1.442695, %v1028_v59  ;;  %v1029_v1 = vmin.f32 %v8945_v60, 0.0  ;;  %vm965_vm9 = vcmp.gt.f32.partialorder %v8945_v60, 0.0 }
  0xfc   : > { %8033 = vpow2.f32 %v1100_v62  ;;  %v1102_v3 = vmul.f32 1.442695, %v1031_v63 }
  0xfd   : > { %8035 = vpow2.f32 %v1096_v0  ;;  %v1098_v4 = vmul.f32 1.442695, %v1029_v1  ;;  %v7522_v5 = vpop.f32.mrb[8].mxu0 }
  0xfe   : > { %v8026_v6 = vpop.eup %8025  ;;  %8037 = vpow2.f32 %v1102_v3  ;;  %v8956_v7 = vadd.f32 %v7522_v5, %v8912_v33  ;;  %v737_v8 = vpop.f32.mrb[9].mxu0 }
  0xff   : > { %v8028_v9 = vpop.eup %8027  ;;  %8039 = vpow2.f32 %v1098_v4  ;;  %v8960_v10 = vadd.f32 %v8912_v33, %v737_v8  ;;  %v7523_v11 = vpop.f32.mrb[10].mxu0  ;;  %v6774_v12 = vadd.f32 -1.0, %v8026_v6 }
 0x100   : > { %v8030_v13 = vpop.eup %8029  ;;  %v1034_v14 = vmin.f32 %v8956_v7, 0.0  ;;  %v8965_v15 = vadd.f32 %v7523_v11, %v8912_v33  ;;  %v740_v16 = vpop.f32.mrb[11].mxu0  ;;  %v6772_v17 = vadd.f32 -1.0, %v8028_v9  ;;  %vm970_vm10 = vcmp.gt.f32.partialorder %v8956_v7, 0.0 }
 0x101   : > { %v8032_v19 = vpop.eup %8031  ;;  %v1032_v20 = vmin.f32 %v8960_v10, 0.0  ;;  %v8973_v21 = vadd.f32 %v8912_v33, %v740_v16  ;;  %v1282_v22 = vsel %vm962_vm1, %v8915_v35, %v6774_v12  ;;  %v6775_v23 = vadd.f32 -1.0, %v8030_v13 }
 0x102   : > { %v1108_v24 = vmul.f32 1.442695, %v1034_v14  ;;  %v1035_v25 = vmin.f32 %v8965_v15, 0.0  ;;  %1477 = vrot.lane.b32.xlu1 %v1282_v22, %s8734_s26  ;;  %1347 = vst.msk [vmem:[#allocation2 + $0x10] sm:$0xff] %vm1344_vm2, %v1282_v22  ;;  %v1280_v26 = vsel %vm960_vm3, %v8918_v37, %v6772_v17  ;;  %v6773_v27 = vadd.f32 -1.0, %v8032_v19 }
 0x103   : > { %v1104_v28 = vmul.f32 1.442695, %v1032_v20  ;;  %v1033_v29 = vmin.f32 %v8973_v21, 0.0  ;;  %1473 = vrot.lane.b32.xlu0 %v1280_v26, %s8734_s26  ;;  %1345 = vst.msk [vmem:[#allocation2] sm:$0xff] %vm1344_vm2, %v1280_v26  ;;  %v1283_v30 = vsel %vm963_vm4, %v8922_v40, %v6775_v23  ;;  %vm968_vm11 = vcmp.gt.f32.partialorder %v8960_v10, 0.0 }
 0x104   : > { %8041 = vpow2.f32 %v1108_v24  ;;  %v1110_v31 = vmul.f32 1.442695, %v1035_v25  ;;  %1348 = vst.msk [vmem:[#allocation2 + $0x18] sm:$0xff] %vm1344_vm2, %v1283_v30  ;;  %v1281_v32 = vsel %vm961_vm5, %v8926_v43, %v6773_v27  ;;  %vm971_vm12 = vcmp.gt.f32.partialorder %v8965_v15, 0.0 }
 0x105   : > { %8043 = vpow2.f32 %v1104_v28  ;;  %v1106_v34 = vmul.f32 1.442695, %v1033_v29  ;;  %v7526_v35 = vpop.f32.mrb[12].mxu0  ;;  %1346 = vst.msk [vmem:[#allocation2 + $0x8] sm:$0xff] %vm1344_vm2, %v1281_v32  ;;  %vm969_vm13 = vcmp.gt.f32.partialorder %v8973_v21, 0.0 }
 0x106   : > { %v8034_v36 = vpop.eup %8033  ;;  %8045 = vpow2.f32 %v1110_v31  ;;  %v8995_v37 = vadd.f32 %v7526_v35, %v8912_v33  ;;  %1479 = vrot.lane.b32.xlu1 %v1283_v30, %s8734_s26  ;;  %v753_v38 = vpop.f32.mrb[13].mxu0 }
 0x107   : > { %v8036_v39 = vpop.eup %8035  ;;  %8047 = vpow2.f32 %v1106_v34  ;;  %v9000_v40 = vadd.f32 %v8912_v33, %v753_v38  ;;  %v7527_v41 = vpop.f32.mrb[14].mxu0  ;;  %1475 = vrot.lane.b32.xlu0 %v1281_v32, %s8734_s26  ;;  %v6778_v42 = vadd.f32 -1.0, %v8034_v36 }
 0x108   : > { %v8038_v43 = vpop.eup %8037  ;;  %v1038_v44 = vmin.f32 %v8995_v37, 0.0  ;;  %v9006_v45 = vadd.f32 %v7527_v41, %v8912_v33  ;;  %v756_v46 = vpop.f32.mrb[15].mxu0  ;;  %v6776_v47 = vadd.f32 -1.0, %v8036_v39  ;;  %vm974_vm14 = vcmp.gt.f32.partialorder %v8995_v37, 0.0 }
 0x109   : > { %v8040_v48 = vpop.eup %8039  ;;  %v1036_v49 = vmin.f32 %v9000_v40, 0.0  ;;  %v9011_v50 = vadd.f32 %v8912_v33, %v756_v46  ;;  %v1286_v51 = vsel %vm966_vm6, %v8934_v52, %v6778_v42  ;;  %v6779_v53 = vadd.f32 -1.0, %v8038_v43 }
 0x10a   : > { %v1116_v55 = vmul.f32 1.442695, %v1038_v44  ;;  %v1039_v56 = vmin.f32 %v9006_v45, 0.0  ;;  %v1284_v58 = vsel %vm964_vm7, %v8937_v54, %v6776_v47  ;;  %v6777_v59 = vadd.f32 -1.0, %v8040_v48  ;;  %1351 = vst.msk [vmem:[#allocation2 + $0x30] sm:$0xff] %vm1344_vm2, %v1286_v51 }
 0x10b   : > { %v1112_v61 = vmul.f32 1.442695, %v1036_v49  ;;  %v1037_v62 = vmin.f32 %v9011_v50, 0.0  ;;  %1349 = vst.msk [vmem:[#allocation2 + $0x20] sm:$0xff] %vm1344_vm2, %v1284_v58  ;;  %1481 = vrot.lane.b32.xlu0 %v1284_v58, %s8734_s26  ;;  %v1287_v52 = vsel %vm967_vm8, %v8941_v57, %v6779_v53  ;;  %vm972_vm15 = vcmp.gt.f32.partialorder %v9000_v40, 0.0 }
 0x10c   : > { %8049 = vpow2.f32 %v1116_v55  ;;  %v1118_v63 = vmul.f32 1.442695, %v1039_v56  ;;  %v1285_v54 = vsel %vm965_vm9, %v8945_v60, %v6777_v59  ;;  %1352 = vst.msk [vmem:[#allocation2 + $0x38] sm:$0xff] %vm1344_vm2, %v1287_v52  ;;  %vm975_vm0 = vcmp.gt.f32.partialorder %v9006_v45, 0.0 }
 0x10d   : > { %8051 = vpow2.f32 %v1112_v61  ;;  %v1114_v0 = vmul.f32 1.442695, %v1037_v62  ;;  %v7530_v1 = vpop.f32.mrb[16].mxu0  ;;  %1483 = vrot.lane.b32.xlu1 %v1285_v54, %s8734_s26  ;;  %1350 = vst.msk [vmem:[#allocation2 + $0x28] sm:$0xff] %vm1344_vm2, %v1285_v54  ;;  %vm973_vm1 = vcmp.gt.f32.partialorder %v9011_v50, 0.0 }
 0x10e   : > { %v8042_v2 = vpop.eup %8041  ;;  %8053 = vpow2.f32 %v1118_v63  ;;  %v9031_v3 = vadd.f32 %v7530_v1, %v8912_v33  ;;  %v769_v4 = vpop.f32.mrb[17].mxu0 }
 0x10f   : > { %v8044_v57 = vpop.eup %8043  ;;  %8055 = vpow2.f32 %v1114_v0  ;;  %v9035_v60 = vadd.f32 %v8912_v33, %v769_v4  ;;  %v7531_v5 = vpop.f32.mrb[18].mxu0  ;;  %1485 = vrot.lane.b32.xlu0 %v1286_v51, %s8734_s26  ;;  %v6782_v6 = vadd.f32 -1.0, %v8042_v2 }
 0x110   : > { %v8046_v8 = vpop.eup %8045  ;;  %v1042_v9 = vmin.f32 %v9031_v3, 0.0  ;;  %v9041_v11 = vadd.f32 %v7531_v5, %v8912_v33  ;;  %v772_v12 = vpop.f32.mrb[19].mxu0  ;;  %v6780_v13 = vadd.f32 -1.0, %v8044_v57  ;;  %vm978_vm3 = vcmp.gt.f32.partialorder %v9031_v3, 0.0 }
 0x111   : > { %v8048_v14 = vpop.eup %8047  ;;  %v1040_v16 = vmin.f32 %v9035_v60, 0.0  ;;  %v9046_v17 = vadd.f32 %v8912_v33, %v772_v12  ;;  %1487 = vrot.lane.b32.xlu1 %v1287_v52, %s8734_s26  ;;  %v1290_v18 = vsel %vm970_vm10, %v8956_v7, %v6782_v6  ;;  %v6783_v19 = vadd.f32 -1.0, %v8046_v8 }
 0x112   : > { %v1124_v20 = vmul.f32 1.442695, %v1042_v9  ;;  %v1043_v22 = vmin.f32 %v9041_v11, 0.0  ;;  %v1288_v23 = vsel %vm968_vm11, %v8960_v10, %v6780_v13  ;;  %v6781_v24 = vadd.f32 -1.0, %v8048_v14  ;;  %1355 = vst.msk [vmem:[#allocation2 + $0x50] sm:$0xff] %vm1344_vm2, %v1290_v18 }
 0x113   : > { %v1120_v25 = vmul.f32 1.442695, %v1040_v16  ;;  %v1041_v26 = vmin.f32 %v9046_v17, 0.0  ;;  %1353 = vst.msk [vmem:[#allocation2 + $0x40] sm:$0xff] %vm1344_vm2, %v1288_v23  ;;  %1489 = vrot.lane.b32.xlu0 %v1288_v23, %s8734_s26  ;;  %v1291_v7 = vsel %vm971_vm12, %v8965_v15, %v6783_v19  ;;  %vm976_vm4 = vcmp.gt.f32.partialorder %v9035_v60, 0.0 }
 0x114   : > { %8057 = vpow2.f32 %v1124_v20  ;;  %v1126_v27 = vmul.f32 1.442695, %v1043_v22  ;;  %v1289_v10 = vsel %vm969_vm13, %v8973_v21, %v6781_v24  ;;  %1356 = vst.msk [vmem:[#allocation2 + $0x58] sm:$0xff] %vm1344_vm2, %v1291_v7  ;;  %vm979_vm5 = vcmp.gt.f32.partialorder %v9041_v11, 0.0 }
 0x115   : > { %8059 = vpow2.f32 %v1120_v25  ;;  %v1122_v28 = vmul.f32 1.442695, %v1041_v26  ;;  %v7534_v29 = vpop.f32.mrb[20].mxu0  ;;  %1354 = vst.msk [vmem:[#allocation2 + $0x48] sm:$0xff] %vm1344_vm2, %v1289_v10  ;;  %1491 = vrot.lane.b32.xlu1 %v1289_v10, %s8734_s26  ;;  %vm977_vm6 = vcmp.gt.f32.partialorder %v9046_v17, 0.0 }
 0x116   : > { %v8050_v30 = vpop.eup %8049  ;;  %8061 = vpow2.f32 %v1126_v27  ;;  %v9069_v31 = vadd.f32 %v7534_v29, %v8912_v33  ;;  %v785_v32 = vpop.f32.mrb[21].mxu0 }
 0x117   : > { %v8052_v15 = vpop.eup %8051  ;;  %8063 = vpow2.f32 %v1122_v28  ;;  %v9073_v21 = vadd.f32 %v8912_v33, %v785_v32  ;;  %v7535_v34 = vpop.f32.mrb[22].mxu0  ;;  %1493 = vrot.lane.b32.xlu0 %v1290_v18, %s8734_s26  ;;  %v6786_v35 = vadd.f32 -1.0, %v8050_v30 }
 0x118   : > { %v8054_v36 = vpop.eup %8053  ;;  %v1046_v38 = vmin.f32 %v9069_v31, 0.0  ;;  %v9079_v39 = vadd.f32 %v7535_v34, %v8912_v33  ;;  %v788_v41 = vpop.f32.mrb[23].mxu0  ;;  %v6784_v42 = vadd.f32 -1.0, %v8052_v15  ;;  %vm982_vm7 = vcmp.gt.f32.partialorder %v9069_v31, 0.0 }
 0x119   : > { %v8056_v43 = vpop.eup %8055  ;;  %v1044_v44 = vmin.f32 %v9073_v21, 0.0  ;;  %v9084_v46 = vadd.f32 %v8912_v33, %v788_v41  ;;  %1495 = vrot.lane.b32.xlu1 %v1291_v7, %s8734_s26  ;;  %v1294_v47 = vsel %vm974_vm14, %v8995_v37, %v6786_v35  ;;  %v6787_v48 = vadd.f32 -1.0, %v8054_v36 }
 0x11a   : > { %v1132_v49 = vmul.f32 1.442695, %v1046_v38  ;;  %v1047_v51 = vmin.f32 %v9079_v39, 0.0  ;;  %v1292_v53 = vsel %vm972_vm15, %v9000_v40, %v6784_v42  ;;  %v6785_v55 = vadd.f32 -1.0, %v8056_v43  ;;  %1359 = vst.msk [vmem:[#allocation2 + $0x70] sm:$0xff] %vm1344_vm2, %v1294_v47 }
 0x11b   : > { %v1128_v56 = vmul.f32 1.442695, %v1044_v44  ;;  %v1045_v58 = vmin.f32 %v9084_v46, 0.0  ;;  %1357 = vst.msk [vmem:[#allocation2 + $0x60] sm:$0xff] %vm1344_vm2, %v1292_v53  ;;  %1497 = vrot.lane.b32.xlu0 %v1292_v53, %s8734_s26  ;;  %v1295_v37 = vsel %vm975_vm0, %v9006_v45, %v6787_v48  ;;  %vm980_vm8 = vcmp.gt.f32.partialorder %v9073_v21, 0.0 }
 0x11c   : > { %8065 = vpow2.f32 %v1132_v49  ;;  %v1134_v59 = vmul.f32 1.442695, %v1047_v51  ;;  %v1293_v40 = vsel %vm973_vm1, %v9011_v50, %v6785_v55  ;;  %1360 = vst.msk [vmem:[#allocation2 + $0x78] sm:$0xff] %vm1344_vm2, %v1295_v37  ;;  %vm983_vm9 = vcmp.gt.f32.partialorder %v9079_v39, 0.0 }
 0x11d   : > { %8067 = vpow2.f32 %v1128_v56  ;;  %v1130_v61 = vmul.f32 1.442695, %v1045_v58  ;;  %v7538_v62 = vpop.f32.mrb[24].mxu0  ;;  %1358 = vst.msk [vmem:[#allocation2 + $0x68] sm:$0xff] %vm1344_vm2, %v1293_v40  ;;  %1499 = vrot.lane.b32.xlu1 %v1293_v40, %s8734_s26  ;;  %vm981_vm10 = vcmp.gt.f32.partialorder %v9084_v46, 0.0 }
 0x11e   : > { %v8058_v52 = vpop.eup %8057  ;;  %8069 = vpow2.f32 %v1134_v59  ;;  %v9107_v63 = vadd.f32 %v7538_v62, %v8912_v33  ;;  %v801_v54 = vpop.f32.mrb[25].mxu0 }
 0x11f   : > { %v8060_v45 = vpop.eup %8059  ;;  %8071 = vpow2.f32 %v1130_v61  ;;  %v9111_v50 = vadd.f32 %v8912_v33, %v801_v54  ;;  %v7539_v0 = vpop.f32.mrb[26].mxu0  ;;  %1501 = vrot.lane.b32.xlu0 %v1294_v47, %s8734_s26  ;;  %v6790_v1 = vadd.f32 -1.0, %v8058_v52 }
 0x120   : > { %v8062_v2 = vpop.eup %8061  ;;  %v1050_v4 = vmin.f32 %v9107_v63, 0.0  ;;  %v9117_v57 = vadd.f32 %v7539_v0, %v8912_v33  ;;  %v804_v5 = vpop.f32.mrb[27].mxu0  ;;  %v6788_v6 = vadd.f32 -1.0, %v8060_v45  ;;  %vm986_vm11 = vcmp.gt.f32.partialorder %v9107_v63, 0.0 }
 0x121   : > { %v8064_v8 = vpop.eup %8063  ;;  %v1048_v9 = vmin.f32 %v9111_v50, 0.0  ;;  %v9122_v12 = vadd.f32 %v8912_v33, %v804_v5  ;;  %1503 = vrot.lane.b32.xlu1 %v1295_v37, %s8734_s26  ;;  %v1298_v13 = vsel %vm978_vm3, %v9031_v3, %v6790_v1  ;;  %v6791_v14 = vadd.f32 -1.0, %v8062_v2 }
 0x122   : > { %v1140_v16 = vmul.f32 1.442695, %v1050_v4  ;;  %v1051_v18 = vmin.f32 %v9117_v57, 0.0  ;;  %v1296_v19 = vsel %vm976_vm4, %v9035_v60, %v6788_v6  ;;  %v6789_v20 = vadd.f32 -1.0, %v8064_v8  ;;  %1363 = vst.msk [vmem:[#allocation2 + $0x90] sm:$0xff] %vm1344_vm2, %v1298_v13 }
 0x123   : > { %v1136_v22 = vmul.f32 1.442695, %v1048_v9  ;;  %v1049_v23 = vmin.f32 %v9122_v12, 0.0  ;;  %1361 = vst.msk [vmem:[#allocation2 + $0x80] sm:$0xff] %vm1344_vm2, %v1296_v19  ;;  %1505 = vrot.lane.b32.xlu0 %v1296_v19, %s8734_s26  ;;  %v1299_v3 = vsel %vm979_vm5, %v9041_v11, %v6791_v14  ;;  %vm984_vm12 = vcmp.gt.f32.partialorder %v9111_v50, 0.0 }
 0x124   : > { %8073 = vpow2.f32 %v1140_v16  ;;  %v1142_v24 = vmul.f32 1.442695, %v1051_v18  ;;  %v1297_v60 = vsel %vm977_vm6, %v9046_v17, %v6789_v20  ;;  %1364 = vst.msk [vmem:[#allocation2 + $0x98] sm:$0xff] %vm1344_vm2, %v1299_v3  ;;  %vm987_vm13 = vcmp.gt.f32.partialorder %v9117_v57, 0.0 }
 0x125   : > { %8075 = vpow2.f32 %v1136_v22  ;;  %v1138_v25 = vmul.f32 1.442695, %v1049_v23  ;;  %v7542_v26 = vpop.f32.mrb[28].mxu0  ;;  %1362 = vst.msk [vmem:[#allocation2 + $0x88] sm:$0xff] %vm1344_vm2, %v1297_v60  ;;  %1507 = vrot.lane.b32.xlu1 %v1297_v60, %s8734_s26  ;;  %vm985_vm14 = vcmp.gt.f32.partialorder %v9122_v12, 0.0 }
 0x126   : > { %v8066_v7 = vpop.eup %8065  ;;  %8077 = vpow2.f32 %v1142_v24  ;;  %v9145_v27 = vadd.f32 %v7542_v26, %v8912_v33  ;;  %v817_v10 = vpop.f32.mrb[29].mxu0 }
 0x127   : > { %v8068_v11 = vpop.eup %8067  ;;  %8079 = vpow2.f32 %v1138_v25  ;;  %v9149_v17 = vadd.f32 %v8912_v33, %v817_v10  ;;  %v7543_v28 = vpop.f32.mrb[30].mxu0  ;;  %1509 = vrot.lane.b32.xlu0 %v1298_v13, %s8734_s26  ;;  %v6794_v29 = vadd.f32 -1.0, %v8066_v7 }
 0x128   : > { %v8070_v30 = vpop.eup %8069  ;;  %v1054_v32 = vmin.f32 %v9145_v27, 0.0  ;;  %v9155_v15 = vadd.f32 %v7543_v28, %v8912_v33  ;;  %v820_v34 = vpop.f32.mrb[31].mxu0  ;;  %v6792_v35 = vadd.f32 -1.0, %v8068_v11  ;;  %vm990_vm15 = vcmp.gt.f32.partialorder %v9145_v27, 0.0 }
 0x129   : > { %v8072_v36 = vpop.eup %8071  ;;  %v1052_v38 = vmin.f32 %v9149_v17, 0.0  ;;  %v9160_v41 = vadd.f32 %v8912_v33, %v820_v34  ;;  %1511 = vrot.lane.b32.xlu1 %v1299_v3, %s8734_s26  ;;  %v1302_v42 = vsel %vm982_vm7, %v9069_v31, %v6794_v29  ;;  %v6795_v43 = vadd.f32 -1.0, %v8070_v30 }
 0x12a   : > { %v1148_v44 = vmul.f32 1.442695, %v1054_v32  ;;  %v1055_v47 = vmin.f32 %v9155_v15, 0.0  ;;  %v1300_v48 = vsel %vm980_vm8, %v9073_v21, %v6792_v35  ;;  %v6793_v49 = vadd.f32 -1.0, %v8072_v36  ;;  %1367 = vst.msk [vmem:[#allocation2 + $0xb0] sm:$0xff] %vm1344_vm2, %v1302_v42 }
 0x12b   : > { %v1144_v51 = vmul.f32 1.442695, %v1052_v38  ;;  %v1053_v53 = vmin.f32 %v9160_v41, 0.0  ;;  %1365 = vst.msk [vmem:[#allocation2 + $0xa0] sm:$0xff] %vm1344_vm2, %v1300_v48  ;;  %1513 = vrot.lane.b32.xlu0 %v1300_v48, %s8734_s26  ;;  %v1303_v31 = vsel %vm983_vm9, %v9079_v39, %v6795_v43  ;;  %vm988_vm0 = vcmp.gt.f32.partialorder %v9149_v17, 0.0 }
 0x12c   : > { %8081 = vpow2.f32 %v1148_v44  ;;  %v1150_v55 = vmul.f32 1.442695, %v1055_v47  ;;  %v1301_v21 = vsel %vm981_vm10, %v9084_v46, %v6793_v49  ;;  %1368 = vst.msk [vmem:[#allocation2 + $0xb8] sm:$0xff] %vm1344_vm2, %v1303_v31  ;;  %vm991_vm1 = vcmp.gt.f32.partialorder %v9155_v15, 0.0 }
 0x12d   : > { %8083 = vpow2.f32 %v1144_v51  ;;  %v1146_v56 = vmul.f32 1.442695, %v1053_v53  ;;  %v7546_v58 = vpop.f32.mrb[32].mxu0  ;;  %1366 = vst.msk [vmem:[#allocation2 + $0xa8] sm:$0xff] %vm1344_vm2, %v1301_v21  ;;  %1515 = vrot.lane.b32.xlu1 %v1301_v21, %s8734_s26  ;;  %vm989_vm3 = vcmp.gt.f32.partialorder %v9160_v41, 0.0 }
 0x12e   : > { %v8074_v37 = vpop.eup %8073  ;;  %8085 = vpow2.f32 %v1150_v55  ;;  %v9183_v59 = vadd.f32 %v7546_v58, %v8912_v33  ;;  %v833_v40 = vpop.f32.mrb[33].mxu0 }
 0x12f   : > { %v8076_v39 = vpop.eup %8075  ;;  %8087 = vpow2.f32 %v1146_v56  ;;  %v9187_v46 = vadd.f32 %v8912_v33, %v833_v40  ;;  %v7547_v61 = vpop.f32.mrb[34].mxu0  ;;  %1517 = vrot.lane.b32.xlu0 %v1302_v42, %s8734_s26  ;;  %v6798_v62 = vadd.f32 -1.0, %v8074_v37 }
 0x130   : > { %v8078_v52 = vpop.eup %8077  ;;  %v1058_v54 = vmin.f32 %v9183_v59, 0.0  ;;  %v9193_v45 = vadd.f32 %v7547_v61, %v8912_v33  ;;  %v836_v0 = vpop.f32.mrb[35].mxu0  ;;  %v6796_v1 = vadd.f32 -1.0, %v8076_v39  ;;  %vm994_vm4 = vcmp.gt.f32.partialorder %v9183_v59, 0.0 }
 0x131   : > { %v8080_v2 = vpop.eup %8079  ;;  %v1056_v4 = vmin.f32 %v9187_v46, 0.0  ;;  %v9198_v5 = vadd.f32 %v8912_v33, %v836_v0  ;;  %1519 = vrot.lane.b32.xlu1 %v1303_v31, %s8734_s26  ;;  %v1306_v6 = vsel %vm986_vm11, %v9107_v63, %v6798_v62  ;;  %v6799_v8 = vadd.f32 -1.0, %v8078_v52 }
 0x132   : > { %v1156_v9 = vmul.f32 1.442695, %v1058_v54  ;;  %v1059_v13 = vmin.f32 %v9193_v45, 0.0  ;;  %v1304_v14 = vsel %vm984_vm12, %v9111_v50, %v6796_v1  ;;  %v6797_v16 = vadd.f32 -1.0, %v8080_v2  ;;  %1371 = vst.msk [vmem:[#allocation2 + $0xd0] sm:$0xff] %vm1344_vm2, %v1306_v6 }
 0x133   : > { %v1152_v18 = vmul.f32 1.442695, %v1056_v4  ;;  %v1057_v19 = vmin.f32 %v9198_v5, 0.0  ;;  %1369 = vst.msk [vmem:[#allocation2 + $0xc0] sm:$0xff] %vm1344_vm2, %v1304_v14  ;;  %1521 = vrot.lane.b32.xlu0 %v1304_v14, %s8734_s26  ;;  %v1307_v63 = vsel %vm987_vm13, %v9117_v57, %v6799_v8  ;;  %vm992_vm5 = vcmp.gt.f32.partialorder %v9187_v46, 0.0 }
 0x134   : > { %8089 = vpow2.f32 %v1156_v9  ;;  %v1158_v20 = vmul.f32 1.442695, %v1059_v13  ;;  %v1305_v50 = vsel %vm985_vm14, %v9122_v12, %v6797_v16  ;;  %1372 = vst.msk [vmem:[#allocation2 + $0xd8] sm:$0xff] %vm1344_vm2, %v1307_v63  ;;  %vm995_vm6 = vcmp.gt.f32.partialorder %v9193_v45, 0.0 }
 0x135   : > { %8091 = vpow2.f32 %v1152_v18  ;;  %v1154_v22 = vmul.f32 1.442695, %v1057_v19  ;;  %v7550_v23 = vpop.f32.mrb[36].mxu0  ;;  %1370 = vst.msk [vmem:[#allocation2 + $0xc8] sm:$0xff] %vm1344_vm2, %v1305_v50  ;;  %1523 = vrot.lane.b32.xlu1 %v1305_v50, %s8734_s26  ;;  %vm993_vm7 = vcmp.gt.f32.partialorder %v9198_v5, 0.0 }
 0x136   : > { %v8082_v3 = vpop.eup %8081  ;;  %8093 = vpow2.f32 %v1158_v20  ;;  %v9221_v24 = vadd.f32 %v7550_v23, %v8912_v33  ;;  %v849_v60 = vpop.f32.mrb[37].mxu0 }
 0x137   : > { %v8084_v57 = vpop.eup %8083  ;;  %8095 = vpow2.f32 %v1154_v22  ;;  %v9225_v12 = vadd.f32 %v8912_v33, %v849_v60  ;;  %v7551_v25 = vpop.f32.mrb[38].mxu0  ;;  %1525 = vrot.lane.b32.xlu0 %v1306_v6, %s8734_s26  ;;  %v6802_v26 = vadd.f32 -1.0, %v8082_v3 }
 0x138   : > { %v8086_v7 = vpop.eup %8085  ;;  %v1062_v10 = vmin.f32 %v9221_v24, 0.0  ;;  %v9231_v11 = vadd.f32 %v7551_v25, %v8912_v33  ;;  %v852_v28 = vpop.f32.mrb[39].mxu0  ;;  %v6800_v29 = vadd.f32 -1.0, %v8084_v57  ;;  %vm998_vm8 = vcmp.gt.f32.partialorder %v9221_v24, 0.0 }
 0x139   : > { %v8088_v30 = vpop.eup %8087  ;;  %v1060_v32 = vmin.f32 %v9225_v12, 0.0  ;;  %v9236_v34 = vadd.f32 %v8912_v33, %v852_v28  ;;  %1527 = vrot.lane.b32.xlu1 %v1307_v63, %s8734_s26  ;;  %v1310_v35 = vsel %vm990_vm15, %v9145_v27, %v6802_v26  ;;  %v6803_v36 = vadd.f32 -1.0, %v8086_v7 }
 0x13a   : > { %v1164_v38 = vmul.f32 1.442695, %v1062_v10  ;;  %v1063_v42 = vmin.f32 %v9231_v11, 0.0  ;;  %v1308_v43 = vsel %vm988_vm0, %v9149_v17, %v6800_v29  ;;  %v6801_v44 = vadd.f32 -1.0, %v8088_v30  ;;  %1375 = vst.msk [vmem:[#allocation2 + $0xf0] sm:$0xff] %vm1344_vm2, %v1310_v35 }
 0x13b   : > { %v1160_v47 = vmul.f32 1.442695, %v1060_v32  ;;  %v1061_v48 = vmin.f32 %v9236_v34, 0.0  ;;  %1373 = vst.msk [vmem:[#allocation2 + $0xe0] sm:$0xff] %vm1344_vm2, %v1308_v43  ;;  %1529 = vrot.lane.b32.xlu0 %v1308_v43, %s8734_s26  ;;  %v1311_v27 = vsel %vm991_vm1, %v9155_v15, %v6803_v36  ;;  %vm996_vm9 = vcmp.gt.f32.partialorder %v9225_v12, 0.0 }
 0x13c   : > { %8097 = vpow2.f32 %v1164_v38  ;;  %v1166_v49 = vmul.f32 1.442695, %v1063_v42  ;;  %v1309_v17 = vsel %vm989_vm3, %v9160_v41, %v6801_v44  ;;  %1376 = vst.msk [vmem:[#allocation2 + $0xf8] sm:$0xff] %vm1344_vm2, %v1311_v27  ;;  %vm999_vm10 = vcmp.gt.f32.partialorder %v9231_v11, 0.0 }
 0x13d   : > { %8099 = vpow2.f32 %v1160_v47  ;;  %v1162_v51 = vmul.f32 1.442695, %v1061_v48  ;;  %v7554_v53 = vpop.f32.mrb[40].mxu0  ;;  %1374 = vst.msk [vmem:[#allocation2 + $0xe8] sm:$0xff] %vm1344_vm2, %v1309_v17  ;;  %1531 = vrot.lane.b32.xlu1 %v1309_v17, %s8734_s26  ;;  %vm997_vm11 = vcmp.gt.f32.partialorder %v9236_v34, 0.0 }
 0x13e   : > { %v8090_v31 = vpop.eup %8089  ;;  %8101 = vpow2.f32 %v1166_v49  ;;  %v9259_v55 = vadd.f32 %v7554_v53, %v8912_v33  ;;  %v865_v21 = vpop.f32.mrb[41].mxu0 }
 0x13f   : > { %v8092_v15 = vpop.eup %8091  ;;  %8103 = vpow2.f32 %v1162_v51  ;;  %v9263_v41 = vadd.f32 %v8912_v33, %v865_v21  ;;  %v7555_v56 = vpop.f32.mrb[42].mxu0  ;;  %1533 = vrot.lane.b32.xlu0 %v1310_v35, %s8734_s26  ;;  %v6806_v58 = vadd.f32 -1.0, %v8090_v31 }
 0x140   : > { %v8094_v37 = vpop.eup %8093  ;;  %v1066_v40 = vmin.f32 %v9259_v55, 0.0  ;;  %v9269_v39 = vadd.f32 %v7555_v56, %v8912_v33  ;;  %v868_v61 = vpop.f32.mrb[43].mxu0  ;;  %v6804_v62 = vadd.f32 -1.0, %v8092_v15  ;;  %vm1002_vm12 = vcmp.gt.f32.partialorder %v9259_v55, 0.0 }
 0x141   : > { %v8096_v52 = vpop.eup %8095  ;;  %v1064_v54 = vmin.f32 %v9263_v41, 0.0  ;;  %v9274_v0 = vadd.f32 %v8912_v33, %v868_v61  ;;  %1535 = vrot.lane.b32.xlu1 %v1311_v27, %s8734_s26  ;;  %v1314_v1 = vsel %vm994_vm4, %v9183_v59, %v6806_v58  ;;  %v6807_v2 = vadd.f32 -1.0, %v8094_v37  ;;  %v9352_v61 = vld [vmem:[%s11855_s2] ss:$0 sm:$0xff] }
 0x142   : > { %v1172_v4 = vmul.f32 1.442695, %v1066_v40  ;;  %v1067_v6 = vmin.f32 %v9269_v39, 0.0  ;;  %v1312_v8 = vsel %vm992_vm5, %v9187_v46, %v6804_v62  ;;  %v6805_v9 = vadd.f32 -1.0, %v8096_v52  ;;  %1379 = vst.msk [vmem:[#allocation2 + $0x110] sm:$0xff] %vm1344_vm2, %v1314_v1 }
 0x143   : > { %v1168_v13 = vmul.f32 1.442695, %v1064_v54  ;;  %v1065_v14 = vmin.f32 %v9274_v0, 0.0  ;;  %1377 = vst.msk [vmem:[#allocation2 + $0x100] sm:$0xff] %vm1344_vm2, %v1312_v8  ;;  %1537 = vrot.lane.b32.xlu0 %v1312_v8, %s8734_s26  ;;  %v1315_v59 = vsel %vm995_vm6, %v9193_v45, %v6807_v2  ;;  %vm1000_vm13 = vcmp.gt.f32.partialorder %v9263_v41, 0.0 }
 0x144   : > { %8105 = vpow2.f32 %v1172_v4  ;;  %v1174_v16 = vmul.f32 1.442695, %v1067_v6  ;;  %v1313_v46 = vsel %vm993_vm7, %v9198_v5, %v6805_v9  ;;  %1380 = vst.msk [vmem:[#allocation2 + $0x118] sm:$0xff] %vm1344_vm2, %v1315_v59  ;;  %vm1003_vm14 = vcmp.gt.f32.partialorder %v9269_v39, 0.0 }
 0x145   : > { %8107 = vpow2.f32 %v1168_v13  ;;  %v1170_v18 = vmul.f32 1.442695, %v1065_v14  ;;  %v7558_v19 = vpop.f32.mrb[44].mxu0  ;;  %1378 = vst.msk [vmem:[#allocation2 + $0x108] sm:$0xff] %vm1344_vm2, %v1313_v46  ;;  %1539 = vrot.lane.b32.xlu1 %v1313_v46, %s8734_s26  ;;  %vm1001_vm15 = vcmp.gt.f32.partialorder %v9274_v0, 0.0 }
 0x146   : > { %v8098_v63 = vpop.eup %8097  ;;  %8109 = vpow2.f32 %v1174_v16  ;;  %v9297_v20 = vadd.f32 %v7558_v19, %v8912_v33  ;;  %v881_v50 = vpop.f32.mrb[45].mxu0 }
 0x147   : > { %v8100_v45 = vpop.eup %8099  ;;  %8111 = vpow2.f32 %v1170_v18  ;;  %v9301_v5 = vadd.f32 %v8912_v33, %v881_v50  ;;  %v7559_v22 = vpop.f32.mrb[46].mxu0  ;;  %1541 = vrot.lane.b32.xlu0 %v1314_v1, %s8734_s26  ;;  %v6810_v23 = vadd.f32 -1.0, %v8098_v63 }
 0x148   : > { %v8102_v3 = vpop.eup %8101  ;;  %v1070_v60 = vmin.f32 %v9297_v20, 0.0  ;;  %v9307_v57 = vadd.f32 %v7559_v22, %v8912_v33  ;;  %v884_v25 = vpop.f32.mrb[47].mxu0  ;;  %v6808_v26 = vadd.f32 -1.0, %v8100_v45  ;;  %vm1006_vm0 = vcmp.gt.f32.partialorder %v9297_v20, 0.0 }
 0x149   : > { %v8104_v7 = vpop.eup %8103  ;;  %v1068_v10 = vmin.f32 %v9301_v5, 0.0  ;;  %v9312_v28 = vadd.f32 %v8912_v33, %v884_v25  ;;  %1543 = vrot.lane.b32.xlu1 %v1315_v59, %s8734_s26  ;;  %v1318_v29 = vsel %vm998_vm8, %v9221_v24, %v6810_v23  ;;  %v6811_v30 = vadd.f32 -1.0, %v8102_v3 }
 0x14a   : > { %v1180_v32 = vmul.f32 1.442695, %v1070_v60  ;;  %v1071_v35 = vmin.f32 %v9307_v57, 0.0  ;;  %v1316_v36 = vsel %vm996_vm9, %v9225_v12, %v6808_v26  ;;  %v6809_v38 = vadd.f32 -1.0, %v8104_v7  ;;  %1383 = vst.msk [vmem:[#allocation2 + $0x130] sm:$0xff] %vm1344_vm2, %v1318_v29 }
 0x14b   : > { %v1176_v42 = vmul.f32 1.442695, %v1068_v10  ;;  %v1069_v43 = vmin.f32 %v9312_v28, 0.0  ;;  %1381 = vst.msk [vmem:[#allocation2 + $0x120] sm:$0xff] %vm1344_vm2, %v1316_v36  ;;  %1545 = vrot.lane.b32.xlu0 %v1316_v36, %s8734_s26  ;;  %v1319_v24 = vsel %vm999_vm10, %v9231_v11, %v6811_v30  ;;  %vm1004_vm1 = vcmp.gt.f32.partialorder %v9301_v5, 0.0 }
 0x14c   : > { %8113 = vpow2.f32 %v1180_v32  ;;  %v1182_v44 = vmul.f32 1.442695, %v1071_v35  ;;  %v1317_v12 = vsel %vm997_vm11, %v9236_v34, %v6809_v38  ;;  %1384 = vst.msk [vmem:[#allocation2 + $0x138] sm:$0xff] %vm1344_vm2, %v1319_v24  ;;  %vm1007_vm3 = vcmp.gt.f32.partialorder %v9307_v57, 0.0 }
 0x14d   : > { %8115 = vpow2.f32 %v1176_v42  ;;  %v1178_v47 = vmul.f32 1.442695, %v1069_v43  ;;  %v7562_v48 = vpop.f32.mrb[48].mxu0  ;;  %1382 = vst.msk [vmem:[#allocation2 + $0x128] sm:$0xff] %vm1344_vm2, %v1317_v12  ;;  %1547 = vrot.lane.b32.xlu1 %v1317_v12, %s8734_s26  ;;  %vm1005_vm4 = vcmp.gt.f32.partialorder %v9312_v28, 0.0 }
 0x14e   : > { %v8106_v27 = vpop.eup %8105  ;;  %8117 = vpow2.f32 %v1182_v44  ;;  %v9335_v49 = vadd.f32 %v7562_v48, %v8912_v33  ;;  %v897_v17 = vpop.f32.mrb[49].mxu0 }
 0x14f   : > { %v8108_v11 = vpop.eup %8107  ;;  %8119 = vpow2.f32 %v1178_v47  ;;  %v9339_v34 = vadd.f32 %v8912_v33, %v897_v17  ;;  %v7563_v51 = vpop.f32.mrb[50].mxu0  ;;  %1549 = vrot.lane.b32.xlu0 %v1318_v29, %s8734_s26  ;;  %v6814_v53 = vadd.f32 -1.0, %v8106_v27 }
 0x150   : > { %v8110_v31 = vpop.eup %8109  ;;  %v1074_v21 = vmin.f32 %v9335_v49, 0.0  ;;  %v9345_v15 = vadd.f32 %v7563_v51, %v8912_v33  ;;  %v900_v56 = vpop.f32.mrb[51].mxu0  ;;  %v6812_v58 = vadd.f32 -1.0, %v8108_v11  ;;  %vm1010_vm5 = vcmp.gt.f32.partialorder %v9335_v49, 0.0 }
 0x151   : > { %v8112_v37 = vpop.eup %8111  ;;  %v1072_v40 = vmin.f32 %v9339_v34, 0.0  ;;  %v9355_v62 = vadd.f32 %v9352_v61, %v900_v56  ;;  %1551 = vrot.lane.b32.xlu1 %v1319_v24, %s8734_s26  ;;  %v1322_v33 = vsel %vm1002_vm12, %v9259_v55, %v6814_v53  ;;  %v6815_v52 = vadd.f32 -1.0, %v8110_v31 }
 0x152   : > { %v1188_v54 = vmul.f32 1.442695, %v1074_v21  ;;  %v1075_v1 = vmin.f32 %v9345_v15, 0.0  ;;  %v1320_v2 = vsel %vm1000_vm13, %v9263_v41, %v6812_v58  ;;  %v6813_v4 = vadd.f32 -1.0, %v8112_v37  ;;  %1387 = vst.msk [vmem:[#allocation2 + $0x150] sm:$0xff] %vm1344_vm2, %v1322_v33 }
 0x153   : > { %v1184_v6 = vmul.f32 1.442695, %v1072_v40  ;;  %v1073_v8 = vmin.f32 %v9355_v62, 0.0  ;;  %1385 = vst.msk [vmem:[#allocation2 + $0x140] sm:$0xff] %vm1344_vm2, %v1320_v2  ;;  %1553 = vrot.lane.b32.xlu0 %v1320_v2, %s8734_s26  ;;  %v1323_v55 = vsel %vm1003_vm14, %v9269_v39, %v6815_v52  ;;  %vm1008_vm6 = vcmp.gt.f32.partialorder %v9339_v34, 0.0 }
 0x154   : > { %8121 = vpow2.f32 %v1188_v54  ;;  %v1190_v9 = vmul.f32 1.442695, %v1075_v1  ;;  %v1321_v41 = vsel %vm1001_vm15, %v9274_v0, %v6813_v4  ;;  %1388 = vst.msk [vmem:[#allocation2 + $0x158] sm:$0xff] %vm1344_vm2, %v1323_v55  ;;  %vm1011_vm7 = vcmp.gt.f32.partialorder %v9345_v15, 0.0 }
 0x155   : > { %8123 = vpow2.f32 %v1184_v6  ;;  %v1186_v13 = vmul.f32 1.442695, %v1073_v8  ;;  %v7566_v14 = vpop.f32.mrb[52].mxu0  ;;  %1386 = vst.msk [vmem:[#allocation2 + $0x148] sm:$0xff] %vm1344_vm2, %v1321_v41  ;;  %1555 = vrot.lane.b32.xlu1 %v1321_v41, %s8734_s26  ;;  %vm1009_vm8 = vcmp.gt.f32.partialorder %v9355_v62, 0.0  ;;  %vm1665_vm15 = vcmask 523520  }
 0x156   : > { %v8114_v59 = vpop.eup %8113  ;;  %8125 = vpow2.f32 %v1190_v9  ;;  %v9378_v16 = vadd.f32 %v9352_v61, %v7566_v14  ;;  %v913_v46 = vpop.f32.mrb[53].mxu0 }
 0x157   : > { %v8116_v39 = vpop.eup %8115  ;;  %8127 = vpow2.f32 %v1186_v13  ;;  %v9382_v0 = vadd.f32 %v9352_v61, %v913_v46  ;;  %v7567_v18 = vpop.f32.mrb[54].mxu0  ;;  %1557 = vrot.lane.b32.xlu0 %v1322_v33, %s8734_s26  ;;  %v6818_v19 = vadd.f32 -1.0, %v8114_v59 }
 0x158   : > { %v8118_v63 = vpop.eup %8117  ;;  %v1078_v50 = vmin.f32 %v9378_v16, 0.0  ;;  %v9388_v45 = vadd.f32 %v9352_v61, %v7567_v18  ;;  %v916_v22 = vpop.f32.mrb[55].mxu0  ;;  %v6816_v23 = vadd.f32 -1.0, %v8116_v39  ;;  %vm1014_vm9 = vcmp.gt.f32.partialorder %v9378_v16, 0.0 }
 0x159   : > { %v8120_v3 = vpop.eup %8119  ;;  %v1076_v60 = vmin.f32 %v9382_v0, 0.0  ;;  %v9393_v25 = vadd.f32 %v9352_v61, %v916_v22  ;;  %1559 = vrot.lane.b32.xlu1 %v1323_v55, %s8734_s26  ;;  %v1326_v26 = vsel %vm1006_vm0, %v9297_v20, %v6818_v19  ;;  %v6819_v7 = vadd.f32 -1.0, %v8118_v63 }
 0x15a   : > { %v1196_v10 = vmul.f32 1.442695, %v1078_v50  ;;  %v1079_v29 = vmin.f32 %v9388_v45, 0.0  ;;  %v1324_v30 = vsel %vm1004_vm1, %v9301_v5, %v6816_v23  ;;  %v6817_v32 = vadd.f32 -1.0, %v8120_v3  ;;  %1391 = vst.msk [vmem:[#allocation2 + $0x170] sm:$0xff] %vm1344_vm2, %v1326_v26 }
 0x15b   : > { %v1192_v35 = vmul.f32 1.442695, %v1076_v60  ;;  %v1077_v36 = vmin.f32 %v9393_v25, 0.0  ;;  %1389 = vst.msk [vmem:[#allocation2 + $0x160] sm:$0xff] %vm1344_vm2, %v1324_v30  ;;  %1561 = vrot.lane.b32.xlu0 %v1324_v30, %s8734_s26  ;;  %v1327_v20 = vsel %vm1007_vm3, %v9307_v57, %v6819_v7  ;;  %vm1012_vm10 = vcmp.gt.f32.partialorder %v9382_v0, 0.0 }
 0x15c   : > { %8129 = vpow2.f32 %v1196_v10  ;;  %v1198_v38 = vmul.f32 1.442695, %v1079_v29  ;;  %v1325_v5 = vsel %vm1005_vm4, %v9312_v28, %v6817_v32  ;;  %1392 = vst.msk [vmem:[#allocation2 + $0x178] sm:$0xff] %vm1344_vm2, %v1327_v20  ;;  %vm1015_vm11 = vcmp.gt.f32.partialorder %v9388_v45, 0.0 }
 0x15d   : > { %8131 = vpow2.f32 %v1192_v35  ;;  %v1194_v42 = vmul.f32 1.442695, %v1077_v36  ;;  %v7570_v43 = vpop.f32.mrb[56].mxu0  ;;  %1390 = vst.msk [vmem:[#allocation2 + $0x168] sm:$0xff] %vm1344_vm2, %v1325_v5  ;;  %1563 = vrot.lane.b32.xlu1 %v1325_v5, %s8734_s26  ;;  %vm1013_vm12 = vcmp.gt.f32.partialorder %v9393_v25, 0.0 }
 0x15e   : > { %v8122_v24 = vpop.eup %8121  ;;  %8133 = vpow2.f32 %v1198_v38  ;;  %v9416_v44 = vadd.f32 %v9352_v61, %v7570_v43  ;;  %v929_v12 = vpop.f32.mrb[57].mxu0 }
 0x15f   : > { %v8124_v57 = vpop.eup %8123  ;;  %8135 = vpow2.f32 %v1194_v42  ;;  %v9420_v28 = vadd.f32 %v9352_v61, %v929_v12  ;;  %v7571_v47 = vpop.f32.mrb[58].mxu0  ;;  %1565 = vrot.lane.b32.xlu0 %v1326_v26, %s8734_s26  ;;  %v6822_v48 = vadd.f32 -1.0, %v8122_v24 }
 0x160   : > { %v8126_v27 = vpop.eup %8125  ;;  %v1082_v17 = vmin.f32 %v9416_v44, 0.0  ;;  %v9426_v11 = vadd.f32 %v9352_v61, %v7571_v47  ;;  %v932_v51 = vpop.f32.mrb[59].mxu0  ;;  %v6820_v53 = vadd.f32 -1.0, %v8124_v57  ;;  %vm1018_vm13 = vcmp.gt.f32.partialorder %v9416_v44, 0.0 }
 0x161   : > { %v8128_v31 = vpop.eup %8127  ;;  %v1080_v21 = vmin.f32 %v9420_v28, 0.0  ;;  %v9431_v56 = vadd.f32 %v9352_v61, %v932_v51  ;;  %1567 = vrot.lane.b32.xlu1 %v1327_v20, %s8734_s26  ;;  %v1330_v58 = vsel %vm1010_vm5, %v9335_v49, %v6822_v48  ;;  %v6823_v37 = vadd.f32 -1.0, %v8126_v27 }
 0x162   : > { %v1204_v40 = vmul.f32 1.442695, %v1082_v17  ;;  %v1083_v33 = vmin.f32 %v9426_v11, 0.0  ;;  %v1328_v52 = vsel %vm1008_vm6, %v9339_v34, %v6820_v53  ;;  %v6821_v54 = vadd.f32 -1.0, %v8128_v31  ;;  %1395 = vst.msk [vmem:[#allocation2 + $0x190] sm:$0xff] %vm1344_vm2, %v1330_v58 }
 0x163   : > { %v1200_v1 = vmul.f32 1.442695, %v1080_v21  ;;  %v1081_v2 = vmin.f32 %v9431_v56, 0.0  ;;  %1393 = vst.msk [vmem:[#allocation2 + $0x180] sm:$0xff] %vm1344_vm2, %v1328_v52  ;;  %1569 = vrot.lane.b32.xlu0 %v1328_v52, %s8734_s26  ;;  %v1331_v49 = vsel %vm1011_vm7, %v9345_v15, %v6823_v37  ;;  %vm1016_vm14 = vcmp.gt.f32.partialorder %v9420_v28, 0.0 }
 0x164   : > { %8137 = vpow2.f32 %v1204_v40  ;;  %v1206_v4 = vmul.f32 1.442695, %v1083_v33  ;;  %v1329_v34 = vsel %vm1009_vm8, %v9355_v62, %v6821_v54  ;;  %1396 = vst.msk [vmem:[#allocation2 + $0x198] sm:$0xff] %vm1344_vm2, %v1331_v49  ;;  %vm1019_vm0 = vcmp.gt.f32.partialorder %v9426_v11, 0.0 }
 0x165   : > { %8139 = vpow2.f32 %v1200_v1  ;;  %v1202_v6 = vmul.f32 1.442695, %v1081_v2  ;;  %v7574_v8 = vpop.f32.mrb[60].mxu0  ;;  %1394 = vst.msk [vmem:[#allocation2 + $0x188] sm:$0xff] %vm1344_vm2, %v1329_v34  ;;  %1571 = vrot.lane.b32.xlu1 %v1329_v34, %s8734_s26  ;;  %vm1017_vm1 = vcmp.gt.f32.partialorder %v9431_v56, 0.0  ;;  %vm1865_vm7 = vcmask 523264  }
 0x166   : > { %v8130_v55 = vpop.eup %8129  ;;  %8141 = vpow2.f32 %v1206_v4  ;;  %v9454_v9 = vadd.f32 %v9352_v61, %v7574_v8  ;;  %v945_v41 = vpop.f32.mrb[61].mxu0 }
 0x167   : > { %v8132_v15 = vpop.eup %8131  ;;  %8143 = vpow2.f32 %v1202_v6  ;;  %v9458_v62 = vadd.f32 %v9352_v61, %v945_v41  ;;  %v7575_v13 = vpop.f32.mrb[62].mxu0  ;;  %1573 = vrot.lane.b32.xlu0 %v1330_v58, %s8734_s26  ;;  %v6826_v14 = vadd.f32 -1.0, %v8130_v55 }
 0x168   : > { %v8134_v59 = vpop.eup %8133  ;;  %v1086_v46 = vmin.f32 %v9454_v9, 0.0  ;;  %v9464_v39 = vadd.f32 %v9352_v61, %v7575_v13  ;;  %v948_v18 = vpop.f32.mrb[63].mxu0  ;;  %v6824_v19 = vadd.f32 -1.0, %v8132_v15  ;;  %vm1022_vm3 = vcmp.gt.f32.partialorder %v9454_v9, 0.0 }
 0x169   : > { %v8136_v63 = vpop.eup %8135  ;;  %v1084_v50 = vmin.f32 %v9458_v62, 0.0  ;;  %v9469_v22 = vadd.f32 %v9352_v61, %v948_v18  ;;  %1575 = vrot.lane.b32.xlu1 %v1331_v49, %s8734_s26  ;;  %v1334_v23 = vsel %vm1014_vm9, %v9378_v16, %v6826_v14  ;;  %v6827_v3 = vadd.f32 -1.0, %v8134_v59 }
 0x16a   : > { %v1212_v60 = vmul.f32 1.442695, %v1086_v46  ;;  %v1087_v26 = vmin.f32 %v9464_v39, 0.0  ;;  %v1332_v7 = vsel %vm1012_vm10, %v9382_v0, %v6824_v19  ;;  %v6825_v10 = vadd.f32 -1.0, %v8136_v63  ;;  %1399 = vst.msk [vmem:[#allocation2 + $0x1b0] sm:$0xff] %vm1344_vm2, %v1334_v23 }
 0x16b   : > { %v1208_v29 = vmul.f32 1.442695, %v1084_v50  ;;  %v1085_v61 = vmin.f32 %v9469_v22, 0.0  ;;  %1397 = vst.msk [vmem:[#allocation2 + $0x1a0] sm:$0xff] %vm1344_vm2, %v1332_v7  ;;  %1577 = vrot.lane.b32.xlu0 %v1332_v7, %s8734_s26  ;;  %v1335_v16 = vsel %vm1015_vm11, %v9388_v45, %v6827_v3  ;;  %vm1020_vm4 = vcmp.gt.f32.partialorder %v9458_v62, 0.0 }
 0x16c   : > { %8145 = vpow2.f32 %v1212_v60  ;;  %v1214_v30 = vmul.f32 1.442695, %v1087_v26  ;;  %v1333_v0 = vsel %vm1013_vm12, %v9393_v25, %v6825_v10  ;;  %1400 = vst.msk [vmem:[#allocation2 + $0x1b8] sm:$0xff] %vm1344_vm2, %v1335_v16  ;;  %vm1023_vm5 = vcmp.gt.f32.partialorder %v9464_v39, 0.0 }
 0x16d   : > { %8147 = vpow2.f32 %v1208_v29  ;;  %v1210_v32 = vmul.f32 1.442695, %v1085_v61  ;;  %1398 = vst.msk [vmem:[#allocation2 + $0x1a8] sm:$0xff] %vm1344_vm2, %v1333_v0  ;;  %1579 = vrot.lane.b32.xlu1 %v1333_v0, %s8734_s26  ;;  %vm1021_vm6 = vcmp.gt.f32.partialorder %v9469_v22, 0.0 }
 0x16e   : > { %v8138_v35 = vpop.eup %8137  ;;  %8149 = vpow2.f32 %v1214_v30 }
 0x16f   : > { %v8140_v36 = vpop.eup %8139  ;;  %8151 = vpow2.f32 %v1210_v32  ;;  %1581 = vrot.lane.b32.xlu0 %v1334_v23, %s8734_s26  ;;  %v6830_v20 = vadd.f32 -1.0, %v8138_v35 }
 0x170   : > { %v8142_v45 = vpop.eup %8141  ;;  %v6828_v38 = vadd.f32 -1.0, %v8140_v36 }
 0x171   : > { %v8144_v25 = vpop.eup %8143  ;;  %1583 = vrot.lane.b32.xlu1 %v1335_v16, %s8734_s26  ;;  %v1338_v5 = vsel %vm1018_vm13, %v9416_v44, %v6830_v20  ;;  %v6831_v42 = vadd.f32 -1.0, %v8142_v45 }
 0x172   : > { %v1336_v43 = vsel %vm1016_vm14, %v9420_v28, %v6828_v38  ;;  %v6829_v24 = vadd.f32 -1.0, %v8144_v25  ;;  %1403 = vst.msk [vmem:[#allocation2 + $0x1d0] sm:$0xff] %vm1344_vm2, %v1338_v5 }
 0x173   : > { %1401 = vst.msk [vmem:[#allocation2 + $0x1c0] sm:$0xff] %vm1344_vm2, %v1336_v43  ;;  %1585 = vrot.lane.b32.xlu0 %v1336_v43, %s8734_s26  ;;  %v1339_v12 = vsel %vm1019_vm0, %v9426_v11, %v6831_v42 }
 0x174   : > { %v1478_v57 = vpop.permute.xlu1 %1477  ;;  %v1337_v44 = vsel %vm1017_vm1, %v9431_v56, %v6829_v24  ;;  %1404 = vst.msk [vmem:[#allocation2 + $0x1d8] sm:$0xff] %vm1344_vm2, %v1339_v12 }
 0x175   : > { %1668 = vst.msk [vmem:[#allocation2 + $0x10] sm:$0xff] %vm1665_vm15, %v1478_v57  ;;  %1587 = vrot.lane.b32.xlu1 %v1337_v44, %s8734_s26  ;;  %v1474_v28 = vpop.permute.xlu0 %1473 }
 0x176   : > { %1402 = vst.msk [vmem:[#allocation2 + $0x1c8] sm:$0xff] %vm1344_vm2, %v1337_v44  ;;  %v8146_v47 = vpop.eup %8145 }
 0x177   : > { %1666 = vst.msk [vmem:[#allocation2] sm:$0xff] %vm1665_vm15, %v1474_v28  ;;  %v8148_v48 = vpop.eup %8147  ;;  %1589 = vrot.lane.b32.xlu0 %v1338_v5, %s8734_s26  ;;  %v6834_v27 = vadd.f32 -1.0, %v8146_v47 }
 0x178   : > { %v8150_v17 = vpop.eup %8149  ;;  %v1480_v11 = vpop.permute.xlu1 %1479  ;;  %v6832_v51 = vadd.f32 -1.0, %v8148_v48 }
 0x179   : > { %v8152_v53 = vpop.eup %8151  ;;  %1669 = vst.msk [vmem:[#allocation2 + $0x18] sm:$0xff] %vm1665_vm15, %v1480_v11  ;;  %1591 = vrot.lane.b32.xlu1 %v1339_v12, %s8734_s26  ;;  %v1476_v31 = vpop.permute.xlu0 %1475  ;;  %v1342_v21 = vsel %vm1022_vm3, %v9454_v9, %v6834_v27  ;;  %v6835_v56 = vadd.f32 -1.0, %v8150_v17 }
 0x17a   : > { %1667 = vst.msk [vmem:[#allocation2 + $0x8] sm:$0xff] %vm1665_vm15, %v1476_v31  ;;  %v1340_v58 = vsel %vm1020_vm4, %v9458_v62, %v6832_v51  ;;  %v6833_v37 = vadd.f32 -1.0, %v8152_v53 }
 0x17b   : > { %1407 = vst.msk [vmem:[#allocation2 + $0x1f0] sm:$0xff] %vm1344_vm2, %v1342_v21  ;;  %1405 = vst.msk [vmem:[#allocation2 + $0x1e0] sm:$0xff] %vm1344_vm2, %v1340_v58  ;;  %1593 = vrot.lane.b32.xlu0 %v1340_v58, %s8734_s26  ;;  %v1343_v40 = vsel %vm1023_vm5, %v9464_v39, %v6835_v56 }
 0x17c   : > { %v1341_v33 = vsel %vm1021_vm6, %v9469_v22, %v6833_v37  ;;  %1408 = vst.msk [vmem:[#allocation2 + $0x1f8] sm:$0xff] %vm1344_vm2, %v1343_v40  ;;  %v1732_v6 = vld [vmem:[#allocation2 + $0x10] sm:$0xff] }
 0x17d   : > { %1406 = vst.msk [vmem:[#allocation2 + $0x1e8] sm:$0xff] %vm1344_vm2, %v1341_v33  ;;  %1595 = vrot.lane.b32.xlu1 %v1341_v33, %s8734_s26  ;;  %v1482_v52 = vpop.permute.xlu0 %1481 }
 0x17e   : > { %1670 = vst.msk [vmem:[#allocation2 + $0x20] sm:$0xff] %vm1665_vm15, %v1482_v52  ;;  %v1730_v49 = vld [vmem:[#allocation2] sm:$0xff] }
 0x17f   : > { %v1484_v54 = vpop.permute.xlu1 %1483  ;;  %1597 = vrot.lane.b32.xlu0 %v1342_v21, %s8734_s26 }
 0x180   : > { %1671 = vst.msk [vmem:[#allocation2 + $0x28] sm:$0xff] %vm1665_vm15, %v1484_v54  ;;  %v1733_v1 = vld [vmem:[#allocation2 + $0x18] sm:$0xff] }
 0x181   : > { %1599 = vrot.lane.b32.xlu1 %v1343_v40, %s8734_s26  ;;  %v1486_v2 = vpop.permute.xlu0 %1485  ;;  %v1731_v4 = vld [vmem:[#allocation2 + $0x8] sm:$0xff]  ;;  %v1795_v55 = vpack.c.bf16 %v1733_v1, %v1732_v6 }
 0x182   : > { %1672 = vst.msk [vmem:[#allocation2 + $0x30] sm:$0xff] %vm1665_vm15, %v1486_v2  ;;  %v1794_v34 = vpack.c.bf16 %v1731_v4, %v1730_v49 }
 0x183   : > { %v1488_v8 = vpop.permute.xlu1 %1487 }
 0x184   : > { %1673 = vst.msk [vmem:[#allocation2 + $0x38] sm:$0xff] %vm1665_vm15, %v1488_v8  ;;  %7584 = vmatprep.mubr.msk.bf16.mxu1 %vm1865_vm7, %v1794_v34 }
 0x185   : > { %v1490_v9 = vpop.permute.xlu0 %1489  ;;  %7585 = vmatmul.mubr.msk.bf16.vlgmr.msra.gmra.mrb[0].mxu1 %vm1865_vm7, %v1795_v55  ;;  %v1734_v15 = vld [vmem:[#allocation2 + $0x20] sm:$0xff] }
 0x186   : > { %1674 = vst.msk [vmem:[#allocation2 + $0x40] sm:$0xff] %vm1665_vm15, %v1490_v9 }
 0x187   : > { %v1492_v41 = vpop.permute.xlu1 %1491  ;;  %v1735_v62 = vld [vmem:[#allocation2 + $0x28] sm:$0xff] }
 0x188   : > { %1675 = vst.msk [vmem:[#allocation2 + $0x48] sm:$0xff] %vm1665_vm15, %v1492_v41  ;;  %v1796_v13 = vpack.c.bf16 %v1735_v62, %v1734_v15 }
 0x189   : > { %v1494_v14 = vpop.permute.xlu0 %1493  ;;  %v1736_v46 = vld [vmem:[#allocation2 + $0x30] sm:$0xff] }
 0x18a   : > { %1676 = vst.msk [vmem:[#allocation2 + $0x50] sm:$0xff] %vm1665_vm15, %v1494_v14  ;;  %7588 = vmatprep.mubr.msk.bf16.mxu1 %vm1865_vm7, %v1796_v13 }
 0x18b   : > { %v1496_v59 = vpop.permute.xlu1 %1495  ;;  %v1737_v39 = vld [vmem:[#allocation2 + $0x38] sm:$0xff] }
 0x18c   : > { %1677 = vst.msk [vmem:[#allocation2 + $0x58] sm:$0xff] %vm1665_vm15, %v1496_v59  ;;  %v1797_v18 = vpack.c.bf16 %v1737_v39, %v1736_v46 }
 0x18d   : > { %v1498_v19 = vpop.permute.xlu0 %1497  ;;  %v1738_v50 = vld [vmem:[#allocation2 + $0x40] sm:$0xff] }
 0x18e   : > { %1678 = vst.msk [vmem:[#allocation2 + $0x60] sm:$0xff] %vm1665_vm15, %v1498_v19  ;;  %7589 = vmatmul.mubr.msk.bf16.gmra.mrb[4].mxu1 %vm1865_vm7, %v1797_v18 }
 0x18f   : > { %v1500_v63 = vpop.permute.xlu1 %1499  ;;  %v1739_v22 = vld [vmem:[#allocation2 + $0x48] sm:$0xff] }
 0x190   : > { %1679 = vst.msk [vmem:[#allocation2 + $0x68] sm:$0xff] %vm1665_vm15, %v1500_v63  ;;  %v1798_v23 = vpack.c.bf16 %v1739_v22, %v1738_v50 }
 0x191   : > { %v1502_v3 = vpop.permute.xlu0 %1501  ;;  %v1740_v26 = vld [vmem:[#allocation2 + $0x50] sm:$0xff] }
 0x192   : > { %1680 = vst.msk [vmem:[#allocation2 + $0x70] sm:$0xff] %vm1665_vm15, %v1502_v3  ;;  %7592 = vmatprep.mubr.msk.bf16.mxu1 %vm1865_vm7, %v1798_v23 }
 0x193   : > { %v1504_v60 = vpop.permute.xlu1 %1503  ;;  %v1741_v7 = vld [vmem:[#allocation2 + $0x58] sm:$0xff] }
 0x194   : > { %1681 = vst.msk [vmem:[#allocation2 + $0x78] sm:$0xff] %vm1665_vm15, %v1504_v60  ;;  %v1799_v10 = vpack.c.bf16 %v1741_v7, %v1740_v26 }
 0x195   : > { %v1506_v29 = vpop.permute.xlu0 %1505  ;;  %v1742_v16 = vld [vmem:[#allocation2 + $0x60] sm:$0xff] }
 0x196   : > { %1682 = vst.msk [vmem:[#allocation2 + $0x80] sm:$0xff] %vm1665_vm15, %v1506_v29  ;;  %7593 = vmatmul.mubr.msk.bf16.gmra.mrb[8].mxu1 %vm1865_vm7, %v1799_v10 }
 0x197   : > { %v1508_v61 = vpop.permute.xlu1 %1507  ;;  %v1743_v30 = vld [vmem:[#allocation2 + $0x68] sm:$0xff] }
 0x198   : > { %1683 = vst.msk [vmem:[#allocation2 + $0x88] sm:$0xff] %vm1665_vm15, %v1508_v61  ;;  %v1800_v0 = vpack.c.bf16 %v1743_v30, %v1742_v16 }
 0x199   : > { %v1510_v32 = vpop.permute.xlu0 %1509  ;;  %v1744_v36 = vld [vmem:[#allocation2 + $0x70] sm:$0xff] }
 0x19a   : > { %1684 = vst.msk [vmem:[#allocation2 + $0x90] sm:$0xff] %vm1665_vm15, %v1510_v32  ;;  %7596 = vmatprep.mubr.msk.bf16.mxu1 %vm1865_vm7, %v1800_v0 }
 0x19b   : > { %v1512_v35 = vpop.permute.xlu1 %1511  ;;  %v1745_v20 = vld [vmem:[#allocation2 + $0x78] sm:$0xff] }
 0x19c   : > { %1685 = vst.msk [vmem:[#allocation2 + $0x98] sm:$0xff] %vm1665_vm15, %v1512_v35  ;;  %v1801_v45 = vpack.c.bf16 %v1745_v20, %v1744_v36 }
 0x19d   : > { %v1514_v38 = vpop.permute.xlu0 %1513  ;;  %v1746_v5 = vld [vmem:[#allocation2 + $0x80] sm:$0xff] }
 0x19e   : > { %1686 = vst.msk [vmem:[#allocation2 + $0xa0] sm:$0xff] %vm1665_vm15, %v1514_v38  ;;  %7597 = vmatmul.mubr.msk.bf16.gmra.mrb[12].mxu1 %vm1865_vm7, %v1801_v45 }
 0x19f   : > { %v1516_v25 = vpop.permute.xlu1 %1515  ;;  %v1747_v42 = vld [vmem:[#allocation2 + $0x88] sm:$0xff] }
 0x1a0   : > { %1687 = vst.msk [vmem:[#allocation2 + $0xa8] sm:$0xff] %vm1665_vm15, %v1516_v25  ;;  %v1802_v43 = vpack.c.bf16 %v1747_v42, %v1746_v5 }
 0x1a1   : > { %v1518_v24 = vpop.permute.xlu0 %1517  ;;  %v1748_v57 = vld [vmem:[#allocation2 + $0x90] sm:$0xff] }
 0x1a2   : > { %1688 = vst.msk [vmem:[#allocation2 + $0xb0] sm:$0xff] %vm1665_vm15, %v1518_v24  ;;  %7600 = vmatprep.mubr.msk.bf16.mxu1 %vm1865_vm7, %v1802_v43 }
 0x1a3   : > { %v1520_v12 = vpop.permute.xlu1 %1519  ;;  %v1749_v44 = vld [vmem:[#allocation2 + $0x98] sm:$0xff] }
 0x1a4   : > { %1689 = vst.msk [vmem:[#allocation2 + $0xb8] sm:$0xff] %vm1665_vm15, %v1520_v12  ;;  %v1803_v28 = vpack.c.bf16 %v1749_v44, %v1748_v57 }
 0x1a5   : > { %v1522_v47 = vpop.permute.xlu0 %1521  ;;  %v1750_v27 = vld [vmem:[#allocation2 + $0xa0] sm:$0xff] }
 0x1a6   : > { %1690 = vst.msk [vmem:[#allocation2 + $0xc0] sm:$0xff] %vm1665_vm15, %v1522_v47  ;;  %7601 = vmatmul.mubr.msk.bf16.gmra.mrb[16].mxu1 %vm1865_vm7, %v1803_v28 }
 0x1a7   : > { %v1524_v48 = vpop.permute.xlu1 %1523  ;;  %v1751_v17 = vld [vmem:[#allocation2 + $0xa8] sm:$0xff] }
 0x1a8   : > { %1691 = vst.msk [vmem:[#allocation2 + $0xc8] sm:$0xff] %vm1665_vm15, %v1524_v48  ;;  %v1804_v11 = vpack.c.bf16 %v1751_v17, %v1750_v27 }
 0x1a9   : > { %v1526_v51 = vpop.permute.xlu0 %1525  ;;  %v1752_v31 = vld [vmem:[#allocation2 + $0xb0] sm:$0xff] }
 0x1aa   : > { %1692 = vst.msk [vmem:[#allocation2 + $0xd0] sm:$0xff] %vm1665_vm15, %v1526_v51  ;;  %7604 = vmatprep.mubr.msk.bf16.mxu1 %vm1865_vm7, %v1804_v11 }
 0x1ab   : > { %v1528_v53 = vpop.permute.xlu1 %1527  ;;  %v1753_v21 = vld [vmem:[#allocation2 + $0xb8] sm:$0xff] }
 0x1ac   : > { %1693 = vst.msk [vmem:[#allocation2 + $0xd8] sm:$0xff] %vm1665_vm15, %v1528_v53  ;;  %v1805_v56 = vpack.c.bf16 %v1753_v21, %v1752_v31 }
 0x1ad   : > { %v1530_v58 = vpop.permute.xlu0 %1529  ;;  %v1754_v40 = vld [vmem:[#allocation2 + $0xc0] sm:$0xff] }
 0x1ae   : > { %1694 = vst.msk [vmem:[#allocation2 + $0xe0] sm:$0xff] %vm1665_vm15, %v1530_v58  ;;  %7605 = vmatmul.mubr.msk.bf16.gmra.mrb[20].mxu1 %vm1865_vm7, %v1805_v56 }
 0x1af   : > { %v1532_v37 = vpop.permute.xlu1 %1531  ;;  %v1755_v33 = vld [vmem:[#allocation2 + $0xc8] sm:$0xff] }
 0x1b0   : > { %1695 = vst.msk [vmem:[#allocation2 + $0xe8] sm:$0xff] %vm1665_vm15, %v1532_v37  ;;  %v1806_v52 = vpack.c.bf16 %v1755_v33, %v1754_v40 }
 0x1b1   : > { %v1534_v54 = vpop.permute.xlu0 %1533  ;;  %v1756_v2 = vld [vmem:[#allocation2 + $0xd0] sm:$0xff] }
 0x1b2   : > { %1696 = vst.msk [vmem:[#allocation2 + $0xf0] sm:$0xff] %vm1665_vm15, %v1534_v54  ;;  %7608 = vmatprep.mubr.msk.bf16.mxu1 %vm1865_vm7, %v1806_v52 }
 0x1b3   : > { %v1536_v1 = vpop.permute.xlu1 %1535  ;;  %v1757_v49 = vld [vmem:[#allocation2 + $0xd8] sm:$0xff] }
 0x1b4   : > { %1697 = vst.msk [vmem:[#allocation2 + $0xf8] sm:$0xff] %vm1665_vm15, %v1536_v1  ;;  %v1807_v4 = vpack.c.bf16 %v1757_v49, %v1756_v2 }
 0x1b5   : > { %v1538_v34 = vpop.permute.xlu0 %1537  ;;  %v1758_v8 = vld [vmem:[#allocation2 + $0xe0] sm:$0xff] }
 0x1b6   : > { %1698 = vst.msk [vmem:[#allocation2 + $0x100] sm:$0xff] %vm1665_vm15, %v1538_v34  ;;  %7609 = vmatmul.mubr.msk.bf16.gmra.mrb[24].mxu1 %vm1865_vm7, %v1807_v4 }
 0x1b7   : > { %v1540_v6 = vpop.permute.xlu1 %1539  ;;  %v1759_v55 = vld [vmem:[#allocation2 + $0xe8] sm:$0xff] }
 0x1b8   : > { %1699 = vst.msk [vmem:[#allocation2 + $0x108] sm:$0xff] %vm1665_vm15, %v1540_v6  ;;  %v1808_v9 = vpack.c.bf16 %v1759_v55, %v1758_v8 }
 0x1b9   : > { %v1542_v41 = vpop.permute.xlu0 %1541  ;;  %v1760_v62 = vld [vmem:[#allocation2 + $0xf0] sm:$0xff] }
 0x1ba   : > { %1700 = vst.msk [vmem:[#allocation2 + $0x110] sm:$0xff] %vm1665_vm15, %v1542_v41  ;;  %7612 = vmatprep.mubr.msk.bf16.mxu1 %vm1865_vm7, %v1808_v9 }
 0x1bb   : > { %v1544_v15 = vpop.permute.xlu1 %1543  ;;  %v1761_v13 = vld [vmem:[#allocation2 + $0xf8] sm:$0xff] }
 0x1bc   : > { %1701 = vst.msk [vmem:[#allocation2 + $0x118] sm:$0xff] %vm1665_vm15, %v1544_v15  ;;  %v1809_v14 = vpack.c.bf16 %v1761_v13, %v1760_v62 }
 0x1bd   : > { %v1546_v59 = vpop.permute.xlu0 %1545  ;;  %v1762_v39 = vld [vmem:[#allocation2 + $0x100] sm:$0xff] }
 0x1be   : > { %1702 = vst.msk [vmem:[#allocation2 + $0x120] sm:$0xff] %vm1665_vm15, %v1546_v59  ;;  %7613 = vmatmul.mubr.msk.bf16.gmra.mrb[28].mxu1 %vm1865_vm7, %v1809_v14 }
 0x1bf   : > { %v1548_v46 = vpop.permute.xlu1 %1547  ;;  %v1763_v18 = vld [vmem:[#allocation2 + $0x108] sm:$0xff] }
 0x1c0   : > { %1703 = vst.msk [vmem:[#allocation2 + $0x128] sm:$0xff] %vm1665_vm15, %v1548_v46  ;;  %v1810_v19 = vpack.c.bf16 %v1763_v18, %v1762_v39 }
 0x1c1   : > { %v1550_v63 = vpop.permute.xlu0 %1549  ;;  %v1764_v22 = vld [vmem:[#allocation2 + $0x110] sm:$0xff] }
 0x1c2   : > { %1704 = vst.msk [vmem:[#allocation2 + $0x130] sm:$0xff] %vm1665_vm15, %v1550_v63  ;;  %7616 = vmatprep.mubr.msk.bf16.mxu1 %vm1865_vm7, %v1810_v19 }
 0x1c3   : > { %v1552_v50 = vpop.permute.xlu1 %1551  ;;  %v1765_v23 = vld [vmem:[#allocation2 + $0x118] sm:$0xff] }
 0x1c4   : > { %1705 = vst.msk [vmem:[#allocation2 + $0x138] sm:$0xff] %vm1665_vm15, %v1552_v50  ;;  %v1811_v3 = vpack.c.bf16 %v1765_v23, %v1764_v22 }
 0x1c5   : > { %v1554_v60 = vpop.permute.xlu0 %1553  ;;  %v1766_v7 = vld [vmem:[#allocation2 + $0x120] sm:$0xff] }
 0x1c6   : > { %1706 = vst.msk [vmem:[#allocation2 + $0x140] sm:$0xff] %vm1665_vm15, %v1554_v60  ;;  %7617 = vmatmul.mubr.msk.bf16.gmra.mrb[32].mxu1 %vm1865_vm7, %v1811_v3  ;;  %v8011_v3 = vld [vmem:[%s11856_s3 + $0x20] sm:$0xff]  }
 0x1c7   : > { %v1556_v26 = vpop.permute.xlu1 %1555  ;;  %v1767_v10 = vld [vmem:[#allocation2 + $0x128] sm:$0xff]  ;;  %7648 = vmatprep.subr.bf16.mxu0 %v8011_v3 }
 0x1c8   : > { %1707 = vst.msk [vmem:[#allocation2 + $0x148] sm:$0xff] %vm1665_vm15, %v1556_v26  ;;  %v1812_v29 = vpack.c.bf16 %v1767_v10, %v1766_v7  ;;  %7649 = vmatpush3.bf16.msra.mxu0 %v8011_v3  ;;  %v8012_v10 = vld [vmem:[%s11856_s3 + $0x28] sm:$0xff]  }
 0x1c9   : > { %v1558_v61 = vpop.permute.xlu0 %1557  ;;  %v1768_v30 = vld [vmem:[#allocation2 + $0x130] sm:$0xff]  ;;  %7650 = vmatprep.subr.bf16.mxu0 %v8012_v10 }
 0x1ca   : > { %1708 = vst.msk [vmem:[#allocation2 + $0x150] sm:$0xff] %vm1665_vm15, %v1558_v61  ;;  %7620 = vmatprep.mubr.msk.bf16.mxu1 %vm1865_vm7, %v1812_v29  ;;  %v8013_v29 = vld [vmem:[%s11856_s3 + $0x30] sm:$0xff]   ;;  %v9633_v61 = vld [vmem:[%s11857_s4] ss:$0 sm:$0xff] }
 0x1cb   : > { %v1560_v16 = vpop.permute.xlu1 %1559  ;;  %v1769_v0 = vld [vmem:[#allocation2 + $0x138] sm:$0xff] }
 0x1cc   : > { %1709 = vst.msk [vmem:[#allocation2 + $0x158] sm:$0xff] %vm1665_vm15, %v1560_v16  ;;  %v1813_v32 = vpack.c.bf16 %v1769_v0, %v1768_v30  ;;  %7651 = vmatpush3.bf16.msra.mxu0 %v8012_v10  ;;  %v8014_v30 = vld [vmem:[%s11856_s3 + $0x38] sm:$0xff]  }
 0x1cd   : > { %v1562_v35 = vpop.permute.xlu0 %1561  ;;  %v1770_v20 = vld [vmem:[#allocation2 + $0x140] sm:$0xff]  ;;  %7652 = vmatprep.subr.bf16.mxu0 %v8013_v29 }
 0x1ce   : > { %1710 = vst.msk [vmem:[#allocation2 + $0x160] sm:$0xff] %vm1665_vm15, %v1562_v35  ;;  %7621 = vmatmul.mubr.msk.bf16.gmra.mrb[36].mxu1 %vm1865_vm7, %v1813_v32 }
 0x1cf   : > { %v1564_v36 = vpop.permute.xlu1 %1563  ;;  %v1771_v45 = vld [vmem:[#allocation2 + $0x148] sm:$0xff] }
 0x1d0   : > { %1711 = vst.msk [vmem:[#allocation2 + $0x168] sm:$0xff] %vm1665_vm15, %v1564_v36  ;;  %v1814_v38 = vpack.c.bf16 %v1771_v45, %v1770_v20  ;;  %7653 = vmatpush3.bf16.msra.mxu0 %v8013_v29 }
 0x1d1   : > { %v1566_v25 = vpop.permute.xlu0 %1565  ;;  %v1772_v42 = vld [vmem:[#allocation2 + $0x150] sm:$0xff]  ;;  %7654 = vmatprep.subr.bf16.mxu0 %v8014_v30 }
 0x1d2   : > { %1712 = vst.msk [vmem:[#allocation2 + $0x170] sm:$0xff] %vm1665_vm15, %v1566_v25  ;;  %7624 = vmatprep.mubr.msk.bf16.mxu1 %vm1865_vm7, %v1814_v38 }
 0x1d3   : > { %v1568_v5 = vpop.permute.xlu1 %1567  ;;  %v1773_v43 = vld [vmem:[#allocation2 + $0x158] sm:$0xff] }
 0x1d4   : > { %1713 = vst.msk [vmem:[#allocation2 + $0x178] sm:$0xff] %vm1665_vm15, %v1568_v5  ;;  %v1815_v24 = vpack.c.bf16 %v1773_v43, %v1772_v42  ;;  %7655 = vmatpush3.bf16.msra.mxu0 %v8014_v30 }
 0x1d5   : > { %v1570_v12 = vpop.permute.xlu0 %1569  ;;  %v1774_v44 = vld [vmem:[#allocation2 + $0x160] sm:$0xff] }
 0x1d6   : > { %1714 = vst.msk [vmem:[#allocation2 + $0x180] sm:$0xff] %vm1665_vm15, %v1570_v12  ;;  %7625 = vmatmul.mubr.msk.bf16.gmra.mrb[40].mxu1 %vm1865_vm7, %v1815_v24 }
 0x1d7   : > { %v1572_v57 = vpop.permute.xlu1 %1571  ;;  %v1775_v28 = vld [vmem:[#allocation2 + $0x168] sm:$0xff] }
 0x1d8   : > { %1715 = vst.msk [vmem:[#allocation2 + $0x188] sm:$0xff] %vm1665_vm15, %v1572_v57  ;;  %v1816_v47 = vpack.c.bf16 %v1775_v28, %v1774_v44 }
 0x1d9   : > { %v1574_v48 = vpop.permute.xlu0 %1573  ;;  %v1776_v17 = vld [vmem:[#allocation2 + $0x170] sm:$0xff] }
 0x1da   : > { %1716 = vst.msk [vmem:[#allocation2 + $0x190] sm:$0xff] %vm1665_vm15, %v1574_v48  ;;  %7628 = vmatprep.mubr.msk.bf16.mxu1 %vm1865_vm7, %v1816_v47 }
 0x1db   : > { %v1576_v27 = vpop.permute.xlu1 %1575  ;;  %v1777_v11 = vld [vmem:[#allocation2 + $0x178] sm:$0xff] }
 0x1dc   : > { %1717 = vst.msk [vmem:[#allocation2 + $0x198] sm:$0xff] %vm1665_vm15, %v1576_v27  ;;  %v1817_v51 = vpack.c.bf16 %v1777_v11, %v1776_v17 }
 0x1dd   : > { %v1578_v53 = vpop.permute.xlu0 %1577  ;;  %v1778_v21 = vld [vmem:[#allocation2 + $0x180] sm:$0xff] }
 0x1de   : > { %1718 = vst.msk [vmem:[#allocation2 + $0x1a0] sm:$0xff] %vm1665_vm15, %v1578_v53  ;;  %7629 = vmatmul.mubr.msk.bf16.gmra.mrb[44].mxu1 %vm1865_vm7, %v1817_v51 }
 0x1df   : > { %v1580_v31 = vpop.permute.xlu1 %1579  ;;  %v1779_v56 = vld [vmem:[#allocation2 + $0x188] sm:$0xff] }
 0x1e0   : > { %1719 = vst.msk [vmem:[#allocation2 + $0x1a8] sm:$0xff] %vm1665_vm15, %v1580_v31  ;;  %v1818_v58 = vpack.c.bf16 %v1779_v56, %v1778_v21 }
 0x1e1   : > { %v1582_v37 = vpop.permute.xlu0 %1581  ;;  %v1780_v33 = vld [vmem:[#allocation2 + $0x190] sm:$0xff] }
 0x1e2   : > { %1720 = vst.msk [vmem:[#allocation2 + $0x1b0] sm:$0xff] %vm1665_vm15, %v1582_v37  ;;  %7632 = vmatprep.mubr.msk.bf16.mxu1 %vm1865_vm7, %v1818_v58 }
 0x1e3   : > { %v1584_v40 = vpop.permute.xlu1 %1583  ;;  %v1781_v52 = vld [vmem:[#allocation2 + $0x198] sm:$0xff] }
 0x1e4   : > { %1721 = vst.msk [vmem:[#allocation2 + $0x1b8] sm:$0xff] %vm1665_vm15, %v1584_v40  ;;  %v1819_v54 = vpack.c.bf16 %v1781_v52, %v1780_v33 }
 0x1e5   : > { %v1586_v1 = vpop.permute.xlu0 %1585  ;;  %v1782_v49 = vld [vmem:[#allocation2 + $0x1a0] sm:$0xff] }
 0x1e6   : > { %1722 = vst.msk [vmem:[#allocation2 + $0x1c0] sm:$0xff] %vm1665_vm15, %v1586_v1  ;;  %7633 = vmatmul.mubr.msk.bf16.gmra.mrb[48].mxu1 %vm1865_vm7, %v1819_v54 }
 0x1e7   : > { %v1588_v2 = vpop.permute.xlu1 %1587  ;;  %v1783_v4 = vld [vmem:[#allocation2 + $0x1a8] sm:$0xff] }
 0x1e8   : > { %1723 = vst.msk [vmem:[#allocation2 + $0x1c8] sm:$0xff] %vm1665_vm15, %v1588_v2  ;;  %v1820_v34 = vpack.c.bf16 %v1783_v4, %v1782_v49 }
 0x1e9   : > { %v1590_v6 = vpop.permute.xlu0 %1589  ;;  %v1784_v55 = vld [vmem:[#allocation2 + $0x1b0] sm:$0xff] }
 0x1ea   : > { %1724 = vst.msk [vmem:[#allocation2 + $0x1d0] sm:$0xff] %vm1665_vm15, %v1590_v6  ;;  %7636 = vmatprep.mubr.msk.bf16.mxu1 %vm1865_vm7, %v1820_v34 }
 0x1eb   : > { %v1592_v8 = vpop.permute.xlu1 %1591  ;;  %v1785_v9 = vld [vmem:[#allocation2 + $0x1b8] sm:$0xff] }
 0x1ec   : > { %1725 = vst.msk [vmem:[#allocation2 + $0x1d8] sm:$0xff] %vm1665_vm15, %v1592_v8  ;;  %v1821_v41 = vpack.c.bf16 %v1785_v9, %v1784_v55 }
 0x1ed   : > { %v1594_v15 = vpop.permute.xlu0 %1593  ;;  %v1786_v13 = vld [vmem:[#allocation2 + $0x1c0] sm:$0xff] }
 0x1ee   : > { %1726 = vst.msk [vmem:[#allocation2 + $0x1e0] sm:$0xff] %vm1665_vm15, %v1594_v15  ;;  %7637 = vmatmul.mubr.msk.bf16.gmra.mrb[52].mxu1 %vm1865_vm7, %v1821_v41 }
 0x1ef   : > { %v1596_v62 = vpop.permute.xlu1 %1595  ;;  %v1787_v14 = vld [vmem:[#allocation2 + $0x1c8] sm:$0xff] }
 0x1f0   : > { %1727 = vst.msk [vmem:[#allocation2 + $0x1e8] sm:$0xff] %vm1665_vm15, %v1596_v62  ;;  %v1822_v59 = vpack.c.bf16 %v1787_v14, %v1786_v13 }
 0x1f1   : > { %v1598_v46 = vpop.permute.xlu0 %1597  ;;  %v1788_v18 = vld [vmem:[#allocation2 + $0x1d0] sm:$0xff] }
 0x1f2   : > { %1728 = vst.msk [vmem:[#allocation2 + $0x1f0] sm:$0xff] %vm1665_vm15, %v1598_v46  ;;  %7640 = vmatprep.mubr.msk.bf16.mxu1 %vm1865_vm7, %v1822_v59 }
 0x1f3   : > { %v1600_v39 = vpop.permute.xlu1 %1599  ;;  %v1789_v19 = vld [vmem:[#allocation2 + $0x1d8] sm:$0xff] }
 0x1f4   : > { %1729 = vst.msk [vmem:[#allocation2 + $0x1f8] sm:$0xff] %vm1665_vm15, %v1600_v39  ;;  %v1823_v63 = vpack.c.bf16 %v1789_v19, %v1788_v18 }
 0x1f5   : > { %v1790_v50 = vld [vmem:[#allocation2 + $0x1e0] sm:$0xff] }
 0x1f6   : > { %7641 = vmatmul.mubr.msk.bf16.gmra.mrb[56].mxu1 %vm1865_vm7, %v1823_v63 }
 0x1f7   : > { %v1791_v22 = vld [vmem:[#allocation2 + $0x1e8] sm:$0xff] }
 0x1f8   : > { %v1824_v23 = vpack.c.bf16 %v1791_v22, %v1790_v50 }
 0x1f9   : > { %v1792_v60 = vld [vmem:[#allocation2 + $0x1f0] sm:$0xff] }
 0x1fa   : > { %7644 = vmatprep.mubr.msk.bf16.mxu1 %vm1865_vm7, %v1824_v23 }
 0x1fb   : > { %v1793_v26 = vld [vmem:[#allocation2 + $0x1f8] sm:$0xff] }
 0x1fc   : > { %v1825_v7 = vpack.c.bf16 %v1793_v26, %v1792_v60 }
 0x1fe   : > { %7645 = vmatmul.mubr.msk.bf16.gmra.mrb[60].mxu1 %vm1865_vm7, %v1825_v7 }
 0x258   : > { %v7586_v16 = vpop.f32.mrb[0].mxu1 }
 0x259   : > { %v9639_v0 = vadd.f32 %v7586_v16, %v9633_v61  ;;  %v1996_v32 = vpop.f32.mrb[1].mxu1 }
 0x25a   : > { %v1997_v35 = vadd.f32 %v9633_v61, %v1996_v32  ;;  %v7587_v36 = vpop.f32.mrb[2].mxu1 }
 0x25b   : > { %v2317_v20 = vmin.f32 %v9639_v0, 0.0  ;;  %v9644_v45 = vadd.f32 %v7587_v36, %v9633_v61  ;;  %v1999_v38 = vpop.f32.mrb[3].mxu1  ;;  %vm2253_vm10 = vcmp.gt.f32.partialorder %v9639_v0, 0.0 }
 0x25c   : > { %v2315_v25 = vmin.f32 %v1997_v35, 0.0  ;;  %v2000_v5 = vadd.f32 %v9633_v61, %v1999_v38  ;;  %vm2251_vm8 = vcmp.gt.f32.partialorder %v1997_v35, 0.0 }
 0x25d   : > { %v2383_v42 = vmul.f32 1.442695, %v2317_v20  ;;  %v2318_v43 = vmin.f32 %v9644_v45, 0.0  ;;  %vm2254_vm11 = vcmp.gt.f32.partialorder %v9644_v45, 0.0 }
 0x25e   : > { %v2379_v24 = vmul.f32 1.442695, %v2315_v25  ;;  %v2316_v12 = vmin.f32 %v2000_v5, 0.0  ;;  %vm2252_vm9 = vcmp.gt.f32.partialorder %v2000_v5, 0.0 }
 0x25f   : > { %8153 = vpow2.f32 %v2383_v42  ;;  %v2385_v57 = vmul.f32 1.442695, %v2318_v43 }
 0x260   : > { %8155 = vpow2.f32 %v2379_v24  ;;  %v2381_v44 = vmul.f32 1.442695, %v2316_v12 }
 0x261   : > { %8157 = vpow2.f32 %v2385_v57  ;;  %v7590_v28 = vpop.f32.mrb[4].mxu1 }
 0x262   : > { %8159 = vpow2.f32 %v2381_v44  ;;  %v9649_v47 = vadd.f32 %v7590_v28, %v9633_v61  ;;  %v2012_v48 = vpop.f32.mrb[5].mxu1 }
 0x263   : > { %v9652_v27 = vadd.f32 %v9633_v61, %v2012_v48  ;;  %v7591_v17 = vpop.f32.mrb[6].mxu1 }
 0x264   : > { %v2321_v11 = vmin.f32 %v9649_v47, 0.0  ;;  %v9656_v51 = vadd.f32 %v7591_v17, %v9633_v61  ;;  %v2015_v53 = vpop.f32.mrb[7].mxu1  ;;  %vm2257_vm14 = vcmp.gt.f32.partialorder %v9649_v47, 0.0 }
 0x265   : > { %v2319_v31 = vmin.f32 %v9652_v27, 0.0  ;;  %v9660_v21 = vadd.f32 %v9633_v61, %v2015_v53  ;;  %vm2255_vm12 = vcmp.gt.f32.partialorder %v9652_v27, 0.0 }
 0x266   : > { %v2391_v56 = vmul.f32 1.442695, %v2321_v11  ;;  %v2322_v58 = vmin.f32 %v9656_v51, 0.0  ;;  %vm2258_vm0 = vcmp.gt.f32.partialorder %v9656_v51, 0.0 }
 0x267   : > { %v2387_v37 = vmul.f32 1.442695, %v2319_v31  ;;  %v2320_v40 = vmin.f32 %v9660_v21, 0.0  ;;  %vm2256_vm13 = vcmp.gt.f32.partialorder %v9660_v21, 0.0 }
 0x268   : > { %8161 = vpow2.f32 %v2391_v56  ;;  %v2393_v33 = vmul.f32 1.442695, %v2322_v58 }
 0x269   : > { %v8154_v52 = vpop.eup %8153  ;;  %8163 = vpow2.f32 %v2387_v37  ;;  %v2389_v54 = vmul.f32 1.442695, %v2320_v40  ;;  %v7594_v1 = vpop.f32.mrb[8].mxu1 }
 0x26a   : > { %v8156_v2 = vpop.eup %8155  ;;  %8165 = vpow2.f32 %v2393_v33  ;;  %v9665_v49 = vadd.f32 %v7594_v1, %v9633_v61  ;;  %v2028_v4 = vpop.f32.mrb[9].mxu1  ;;  %v6875_v13 = vadd.f32 -1.0, %v8154_v52 }
 0x26b   : > { %v8158_v34 = vpop.eup %8157  ;;  %8167 = vpow2.f32 %v2389_v54  ;;  %v9668_v6 = vadd.f32 %v9633_v61, %v2028_v4  ;;  %v7595_v8 = vpop.f32.mrb[10].mxu1  ;;  %v6873_v55 = vadd.f32 -1.0, %v8156_v2 }
 0x26c   : > { %v8160_v9 = vpop.eup %8159  ;;  %v2325_v41 = vmin.f32 %v9665_v49, 0.0  ;;  %v9672_v15 = vadd.f32 %v7595_v8, %v9633_v61  ;;  %v2031_v62 = vpop.f32.mrb[11].mxu1  ;;  %v6876_v23 = vadd.f32 -1.0, %v8158_v34  ;;  %v2573_v7 = vsel %vm2253_vm10, %v9639_v0, %v6875_v13 }
 0x26d   : > { %v2323_v14 = vmin.f32 %v9668_v6, 0.0  ;;  %v9676_v59 = vadd.f32 %v9633_v61, %v2031_v62  ;;  %v2571_v46 = vsel %vm2251_vm8, %v1997_v35, %v6873_v55  ;;  %v6874_v39 = vadd.f32 -1.0, %v8160_v9 }
 0x26e   : > { %v2399_v18 = vmul.f32 1.442695, %v2325_v41  ;;  %v2326_v19 = vmin.f32 %v9672_v15, 0.0  ;;  %2699 = vrot.lane.b32.xlu0 %v2571_v46, %s8734_s26  ;;  %v2574_v36 = vsel %vm2254_vm11, %v9644_v45, %v6876_v23  ;;  %vm2259_vm1 = vcmp.gt.f32.partialorder %v9668_v6, 0.0 }
 0x26f   : > { %v2395_v63 = vmul.f32 1.442695, %v2323_v14  ;;  %v2324_v50 = vmin.f32 %v9676_v59, 0.0  ;;  %v2572_v22 = vsel %vm2252_vm9, %v2000_v5, %v6874_v39  ;;  %vm2260_vm3 = vcmp.gt.f32.partialorder %v9676_v59, 0.0 }
 0x270   : > { %8169 = vpow2.f32 %v2399_v18  ;;  %v2401_v3 = vmul.f32 1.442695, %v2326_v19  ;;  %2701 = vrot.lane.b32.xlu1 %v2572_v22, %s8734_s26  ;;  %vm2261_vm4 = vcmp.gt.f32.partialorder %v9665_v49, 0.0  ;;  %vm2262_vm5 = vcmp.gt.f32.partialorder %v9672_v15, 0.0 }
 0x271   : > { %8171 = vpow2.f32 %v2395_v63  ;;  %v2397_v60 = vmul.f32 1.442695, %v2324_v50  ;;  %v7598_v26 = vpop.f32.mrb[12].mxu1 }
 0x272   : > { %v8162_v10 = vpop.eup %8161  ;;  %8173 = vpow2.f32 %v2401_v3  ;;  %v9685_v29 = vadd.f32 %v7598_v26, %v9633_v61  ;;  %v2044_v16 = vpop.f32.mrb[13].mxu1  ;;  %2703 = vrot.lane.b32.xlu0 %v2573_v7, %s8734_s26 }
 0x273   : > { %v8164_v30 = vpop.eup %8163  ;;  %8175 = vpow2.f32 %v2397_v60  ;;  %v9690_v32 = vadd.f32 %v9633_v61, %v2044_v16  ;;  %v7599_v35 = vpop.f32.mrb[14].mxu1  ;;  %v6879_v12 = vadd.f32 -1.0, %v8162_v10 }
 0x274   : > { %v8166_v20 = vpop.eup %8165  ;;  %v2329_v0 = vmin.f32 %v9685_v29, 0.0  ;;  %v9695_v38 = vadd.f32 %v7599_v35, %v9633_v61  ;;  %v2047_v25 = vpop.f32.mrb[15].mxu1  ;;  %2705 = vrot.lane.b32.xlu1 %v2574_v36, %s8734_s26  ;;  %v6877_v5 = vadd.f32 -1.0, %v8164_v30  ;;  %vm2265_vm9 = vcmp.gt.f32.partialorder %v9685_v29, 0.0 }
 0x275   : > { %v8168_v42 = vpop.eup %8167  ;;  %v2327_v43 = vmin.f32 %v9690_v32, 0.0  ;;  %v9700_v24 = vadd.f32 %v9633_v61, %v2047_v25  ;;  %v6880_v31 = vadd.f32 -1.0, %v8166_v20  ;;  %v2577_v33 = vsel %vm2257_vm14, %v9649_v47, %v6879_v12 }
 0x276   : > { %v2407_v45 = vmul.f32 1.442695, %v2329_v0  ;;  %v2330_v57 = vmin.f32 %v9695_v38, 0.0  ;;  %v2575_v44 = vsel %vm2255_vm12, %v9652_v27, %v6877_v5  ;;  %v6878_v28 = vadd.f32 -1.0, %v8168_v42 }
 0x277   : > { %v2403_v48 = vmul.f32 1.442695, %v2327_v43  ;;  %v2328_v17 = vmin.f32 %v9700_v24, 0.0  ;;  %2707 = vrot.lane.b32.xlu0 %v2575_v44, %s8734_s26  ;;  %v2578_v8 = vsel %vm2258_vm0, %v9656_v51, %v6880_v31  ;;  %vm2263_vm6 = vcmp.gt.f32.partialorder %v9690_v32, 0.0 }
 0x278   : > { %8177 = vpow2.f32 %v2407_v45  ;;  %v2409_v11 = vmul.f32 1.442695, %v2330_v57  ;;  %v2576_v53 = vsel %vm2256_vm13, %v9660_v21, %v6878_v28  ;;  %vm2264_vm8 = vcmp.gt.f32.partialorder %v9700_v24, 0.0 }
 0x279   : > { %8179 = vpow2.f32 %v2403_v48  ;;  %v2405_v56 = vmul.f32 1.442695, %v2328_v17  ;;  %v7602_v58 = vpop.f32.mrb[16].mxu1  ;;  %2709 = vrot.lane.b32.xlu1 %v2576_v53, %s8734_s26  ;;  %vm2266_vm10 = vcmp.gt.f32.partialorder %v9695_v38, 0.0 }
 0x27a   : > { %v8170_v27 = vpop.eup %8169  ;;  %8181 = vpow2.f32 %v2409_v11  ;;  %v9712_v37 = vadd.f32 %v7602_v58, %v9633_v61  ;;  %v2060_v40 = vpop.f32.mrb[17].mxu1 }
 0x27b   : > { %v8172_v52 = vpop.eup %8171  ;;  %8183 = vpow2.f32 %v2405_v56  ;;  %v9716_v21 = vadd.f32 %v9633_v61, %v2060_v40  ;;  %v7603_v54 = vpop.f32.mrb[18].mxu1  ;;  %2711 = vrot.lane.b32.xlu0 %v2577_v33, %s8734_s26  ;;  %v6883_v62 = vadd.f32 -1.0, %v8170_v27 }
 0x27c   : > { %v8174_v1 = vpop.eup %8173  ;;  %v2333_v2 = vmin.f32 %v9712_v37, 0.0  ;;  %v9722_v4 = vadd.f32 %v7603_v54, %v9633_v61  ;;  %v2063_v34 = vpop.f32.mrb[19].mxu1  ;;  %v6881_v47 = vadd.f32 -1.0, %v8172_v52  ;;  %vm2269_vm13 = vcmp.gt.f32.partialorder %v9712_v37, 0.0 }
 0x27d   : > { %v8176_v55 = vpop.eup %8175  ;;  %v2331_v9 = vmin.f32 %v9716_v21, 0.0  ;;  %v9727_v41 = vadd.f32 %v9633_v61, %v2063_v34  ;;  %2713 = vrot.lane.b32.xlu1 %v2578_v8, %s8734_s26  ;;  %v6884_v50 = vadd.f32 -1.0, %v8174_v1  ;;  %v2581_v26 = vsel %vm2261_vm4, %v9665_v49, %v6883_v62 }
 0x27e   : > { %v2415_v13 = vmul.f32 1.442695, %v2333_v2  ;;  %v2334_v14 = vmin.f32 %v9722_v4, 0.0  ;;  %v2579_v46 = vsel %vm2259_vm1, %v9668_v6, %v6881_v47  ;;  %v6882_v39 = vadd.f32 -1.0, %v8176_v55 }
 0x27f   : > { %v2411_v18 = vmul.f32 1.442695, %v2331_v9  ;;  %v2332_v51 = vmin.f32 %v9727_v41, 0.0  ;;  %2715 = vrot.lane.b32.xlu0 %v2579_v46, %s8734_s26  ;;  %v2582_v20 = vsel %vm2262_vm5, %v9672_v15, %v6884_v50  ;;  %vm2267_vm11 = vcmp.gt.f32.partialorder %v9716_v21, 0.0 }
 0x280   : > { %8185 = vpow2.f32 %v2415_v13  ;;  %v2417_v19 = vmul.f32 1.442695, %v2334_v14  ;;  %v2580_v63 = vsel %vm2260_vm3, %v9676_v59, %v6882_v39  ;;  %vm2268_vm12 = vcmp.gt.f32.partialorder %v9727_v41, 0.0 }
 0x281   : > { %8187 = vpow2.f32 %v2411_v18  ;;  %v2413_v22 = vmul.f32 1.442695, %v2332_v51  ;;  %v7606_v23 = vpop.f32.mrb[20].mxu1  ;;  %2717 = vrot.lane.b32.xlu1 %v2580_v63, %s8734_s26  ;;  %vm2270_vm14 = vcmp.gt.f32.partialorder %v9722_v4, 0.0 }
 0x282   : > { %v8178_v6 = vpop.eup %8177  ;;  %8189 = vpow2.f32 %v2417_v19  ;;  %v9740_v3 = vadd.f32 %v7606_v23, %v9633_v61  ;;  %v2076_v60 = vpop.f32.mrb[21].mxu1 }
 0x283   : > { %v8180_v7 = vpop.eup %8179  ;;  %8191 = vpow2.f32 %v2413_v22  ;;  %v9744_v59 = vadd.f32 %v9633_v61, %v2076_v60  ;;  %v7607_v10 = vpop.f32.mrb[22].mxu1  ;;  %2719 = vrot.lane.b32.xlu0 %v2581_v26, %s8734_s26  ;;  %v6887_v42 = vadd.f32 -1.0, %v8178_v6 }
 0x284   : > { %v8182_v16 = vpop.eup %8181  ;;  %v2337_v30 = vmin.f32 %v9740_v3, 0.0  ;;  %v9750_v35 = vadd.f32 %v7607_v10, %v9633_v61  ;;  %v2079_v36 = vpop.f32.mrb[23].mxu1  ;;  %v6885_v49 = vadd.f32 -1.0, %v8180_v7  ;;  %vm2273_vm3 = vcmp.gt.f32.partialorder %v9740_v3, 0.0 }
 0x285   : > { %v8184_v0 = vpop.eup %8183  ;;  %v2335_v25 = vmin.f32 %v9744_v59, 0.0  ;;  %v9755_v5 = vadd.f32 %v9633_v61, %v2079_v36  ;;  %2721 = vrot.lane.b32.xlu1 %v2582_v20, %s8734_s26  ;;  %v6888_v17 = vadd.f32 -1.0, %v8182_v16  ;;  %v2585_v58 = vsel %vm2265_vm9, %v9685_v29, %v6887_v42 }
 0x286   : > { %v2423_v43 = vmul.f32 1.442695, %v2337_v30  ;;  %v2338_v12 = vmin.f32 %v9750_v35, 0.0  ;;  %v2583_v45 = vsel %vm2263_vm6, %v9690_v32, %v6885_v49  ;;  %v6886_v57 = vadd.f32 -1.0, %v8184_v0 }
 0x287   : > { %v2419_v44 = vmul.f32 1.442695, %v2335_v25  ;;  %v2336_v15 = vmin.f32 %v9755_v5, 0.0  ;;  %2723 = vrot.lane.b32.xlu0 %v2583_v45, %s8734_s26  ;;  %v2586_v2 = vsel %vm2266_vm10, %v9695_v38, %v6888_v17  ;;  %vm2271_vm0 = vcmp.gt.f32.partialorder %v9744_v59, 0.0 }
 0x288   : > { %8193 = vpow2.f32 %v2423_v43  ;;  %v2425_v28 = vmul.f32 1.442695, %v2338_v12  ;;  %v2584_v48 = vsel %vm2264_vm8, %v9700_v24, %v6886_v57  ;;  %vm2272_vm1 = vcmp.gt.f32.partialorder %v9755_v5, 0.0 }
 0x289   : > { %8195 = vpow2.f32 %v2419_v44  ;;  %v2421_v11 = vmul.f32 1.442695, %v2336_v15  ;;  %v7610_v53 = vpop.f32.mrb[24].mxu1  ;;  %2725 = vrot.lane.b32.xlu1 %v2584_v48, %s8734_s26  ;;  %vm2274_vm4 = vcmp.gt.f32.partialorder %v9750_v35, 0.0 }
 0x28a   : > { %v8186_v32 = vpop.eup %8185  ;;  %8197 = vpow2.f32 %v2425_v28  ;;  %v9768_v31 = vadd.f32 %v7610_v53, %v9633_v61  ;;  %v2092_v56 = vpop.f32.mrb[25].mxu1 }
 0x28b   : > { %v8188_v27 = vpop.eup %8187  ;;  %8199 = vpow2.f32 %v2421_v11  ;;  %v9772_v24 = vadd.f32 %v9633_v61, %v2092_v56  ;;  %v7611_v40 = vpop.f32.mrb[26].mxu1  ;;  %2727 = vrot.lane.b32.xlu0 %v2585_v58, %s8734_s26  ;;  %v6891_v55 = vadd.f32 -1.0, %v8186_v32 }
 0x28c   : > { %v8190_v33 = vpop.eup %8189  ;;  %v2341_v52 = vmin.f32 %v9768_v31, 0.0  ;;  %v9778_v54 = vadd.f32 %v7611_v40, %v9633_v61  ;;  %v2095_v1 = vpop.f32.mrb[27].mxu1  ;;  %v6889_v29 = vadd.f32 -1.0, %v8188_v27  ;;  %vm2277_vm8 = vcmp.gt.f32.partialorder %v9768_v31, 0.0 }
 0x28d   : > { %v8192_v34 = vpop.eup %8191  ;;  %v2339_v8 = vmin.f32 %v9772_v24, 0.0  ;;  %v9783_v47 = vadd.f32 %v9633_v61, %v2095_v1  ;;  %2729 = vrot.lane.b32.xlu1 %v2586_v2, %s8734_s26  ;;  %v6892_v39 = vadd.f32 -1.0, %v8190_v33  ;;  %v2589_v23 = vsel %vm2269_vm13, %v9712_v37, %v6891_v55 }
 0x28e   : > { %v2431_v9 = vmul.f32 1.442695, %v2341_v52  ;;  %v2342_v62 = vmin.f32 %v9778_v54, 0.0  ;;  %v2587_v13 = vsel %vm2267_vm11, %v9716_v21, %v6889_v29  ;;  %v6890_v14 = vadd.f32 -1.0, %v8192_v34 }
 0x28f   : > { %v2427_v46 = vmul.f32 1.442695, %v2339_v8  ;;  %v2340_v38 = vmin.f32 %v9783_v47, 0.0  ;;  %2731 = vrot.lane.b32.xlu0 %v2587_v13, %s8734_s26  ;;  %v2590_v26 = vsel %vm2270_vm14, %v9722_v4, %v6892_v39  ;;  %vm2275_vm5 = vcmp.gt.f32.partialorder %v9772_v24, 0.0 }
 0x290   : > { %8201 = vpow2.f32 %v2431_v9  ;;  %v2433_v18 = vmul.f32 1.442695, %v2342_v62  ;;  %v2588_v51 = vsel %vm2268_vm12, %v9727_v41, %v6890_v14  ;;  %vm2276_vm6 = vcmp.gt.f32.partialorder %v9783_v47, 0.0 }
 0x291   : > { %8203 = vpow2.f32 %v2427_v46  ;;  %v2429_v19 = vmul.f32 1.442695, %v2340_v38  ;;  %v7614_v63 = vpop.f32.mrb[28].mxu1  ;;  %2733 = vrot.lane.b32.xlu1 %v2588_v51, %s8734_s26  ;;  %vm2278_vm9 = vcmp.gt.f32.partialorder %v9778_v54, 0.0 }
 0x292   : > { %v8194_v21 = vpop.eup %8193  ;;  %v9796_v50 = vadd.f32 %v7614_v63, %v9633_v61  ;;  %v2108_v22 = vpop.f32.mrb[29].mxu1 }
 0x293   : > { %v8196_v6 = vpop.eup %8195  ;;  %8205 = vpow2.f32 %v2429_v19  ;;  %v9801_v41 = vadd.f32 %v9633_v61, %v2108_v22  ;;  %v7615_v60 = vpop.f32.mrb[30].mxu1  ;;  %2735 = vrot.lane.b32.xlu0 %v2589_v23, %s8734_s26  ;;  %v6895_v4 = vadd.f32 -1.0, %v8194_v21 }
 0x294   : > { %v8198_v7 = vpop.eup %8197  ;;  %8207 = vpow2.f32 %v2433_v18  ;;  %v2345_v10 = vmin.f32 %v9796_v50, 0.0  ;;  %v9807_v16 = vadd.f32 %v7615_v60, %v9633_v61  ;;  %v2111_v37 = vpop.f32.mrb[31].mxu1  ;;  %v6893_v30 = vadd.f32 -1.0, %v8196_v6 }
 0x295   : > { %v8200_v36 = vpop.eup %8199  ;;  %v2343_v20 = vmin.f32 %v9801_v41, 0.0  ;;  %v9811_v49 = vadd.f32 %v9633_v61, %v2111_v37  ;;  %2737 = vrot.lane.b32.xlu1 %v2590_v26, %s8734_s26  ;;  %v6896_v57 = vadd.f32 -1.0, %v8198_v7  ;;  %v2593_v53 = vsel %vm2273_vm3, %v9740_v3, %v6895_v4 }
 0x296   : > { %v2439_v0 = vmul.f32 1.442695, %v2345_v10  ;;  %v2346_v25 = vmin.f32 %v9807_v16, 0.0  ;;  %v2591_v42 = vsel %vm2271_vm0, %v9744_v59, %v6893_v30  ;;  %v6894_v43 = vadd.f32 -1.0, %v8200_v36 }
 0x297   : > { %v2435_v12 = vmul.f32 1.442695, %v2343_v20  ;;  %v2344_v45 = vmin.f32 %v9811_v49, 0.0  ;;  %2739 = vrot.lane.b32.xlu0 %v2591_v42, %s8734_s26  ;;  %v2594_v58 = vsel %vm2274_vm4, %v9750_v35, %v6896_v57  ;;  %vm2279_vm10 = vcmp.gt.f32.partialorder %v9801_v41, 0.0 }
 0x298   : > { %8209 = vpow2.f32 %v2439_v0  ;;  %v2441_v44 = vmul.f32 1.442695, %v2346_v25  ;;  %v2592_v15 = vsel %vm2272_vm1, %v9755_v5, %v6894_v43  ;;  %vm2280_vm11 = vcmp.gt.f32.partialorder %v9811_v49, 0.0 }
 0x299   : > { %8211 = vpow2.f32 %v2435_v12  ;;  %v2437_v28 = vmul.f32 1.442695, %v2344_v45  ;;  %v7618_v48 = vpop.f32.mrb[32].mxu1  ;;  %2741 = vrot.lane.b32.xlu1 %v2592_v15, %s8734_s26  ;;  %vm2281_vm12 = vcmp.gt.f32.partialorder %v9796_v50, 0.0  ;;  %vm2282_vm13 = vcmp.gt.f32.partialorder %v9807_v16, 0.0 }
 0x29a   : > { %v8202_v59 = vpop.eup %8201  ;;  %v9824_v17 = vadd.f32 %v7618_v48, %v9633_v61  ;;  %v2124_v11 = vpop.f32.mrb[33].mxu1 }
 0x29b   : > { %v8204_v32 = vpop.eup %8203  ;;  %8213 = vpow2.f32 %v2437_v28  ;;  %v9829_v5 = vadd.f32 %v9633_v61, %v2124_v11  ;;  %v7619_v56 = vpop.f32.mrb[34].mxu1  ;;  %2743 = vrot.lane.b32.xlu0 %v2593_v53, %s8734_s26  ;;  %v6899_v55 = vadd.f32 -1.0, %v8202_v59 }
 0x29c   : > { %8215 = vpow2.f32 %v2441_v44  ;;  %v2349_v27 = vmin.f32 %v9824_v17, 0.0  ;;  %v9835_v40 = vadd.f32 %v7619_v56, %v9633_v61  ;;  %v2127_v33 = vpop.f32.mrb[35].mxu1  ;;  %v6897_v3 = vadd.f32 -1.0, %v8204_v32 }
 0x29d   : > { %v8206_v52 = vpop.eup %8205  ;;  %v2347_v1 = vmin.f32 %v9829_v5, 0.0  ;;  %v9839_v2 = vadd.f32 %v9633_v61, %v2127_v33  ;;  %2745 = vrot.lane.b32.xlu1 %v2594_v58, %s8734_s26  ;;  %v2597_v63 = vsel %vm2277_vm8, %v9768_v31, %v6899_v55  ;;  %vm2283_vm14 = vcmp.gt.f32.partialorder %v9829_v5, 0.0 }
 0x29e   : > { %v8208_v29 = vpop.eup %8207  ;;  %v2447_v35 = vmul.f32 1.442695, %v2349_v27  ;;  %v2350_v34 = vmin.f32 %v9835_v40, 0.0  ;;  %v2595_v8 = vsel %vm2275_vm5, %v9772_v24, %v6897_v3  ;;  %v6898_v13 = vadd.f32 -1.0, %v8206_v52 }
 0x29f   : > { %v2443_v9 = vmul.f32 1.442695, %v2347_v1  ;;  %v2348_v62 = vmin.f32 %v9839_v2, 0.0  ;;  %2747 = vrot.lane.b32.xlu0 %v2595_v8, %s8734_s26  ;;  %v6900_v18 = vadd.f32 -1.0, %v8208_v29  ;;  %vm2285_vm0 = vcmp.gt.f32.partialorder %v9824_v17, 0.0 }
 0x2a0   : > { %8217 = vpow2.f32 %v2447_v35  ;;  %v2449_v14 = vmul.f32 1.442695, %v2350_v34  ;;  %v2596_v39 = vsel %vm2276_vm6, %v9783_v47, %v6898_v13  ;;  %vm2284_vm1 = vcmp.gt.f32.partialorder %v9839_v2, 0.0 }
 0x2a1   : > { %8219 = vpow2.f32 %v2443_v9  ;;  %v2445_v46 = vmul.f32 1.442695, %v2348_v62  ;;  %v7622_v38 = vpop.f32.mrb[36].mxu1  ;;  %2749 = vrot.lane.b32.xlu1 %v2596_v39, %s8734_s26  ;;  %v2598_v37 = vsel %vm2278_vm9, %v9778_v54, %v6900_v18  ;;  %vm2286_vm3 = vcmp.gt.f32.partialorder %v9835_v40, 0.0 }
 0x2a2   : > { %v8210_v24 = vpop.eup %8209  ;;  %v9851_v51 = vadd.f32 %v7622_v38, %v9633_v61  ;;  %v2140_v19 = vpop.f32.mrb[37].mxu1 }
 0x2a3   : > { %v8212_v21 = vpop.eup %8211  ;;  %8221 = vpow2.f32 %v2445_v46  ;;  %v9856_v22 = vadd.f32 %v9633_v61, %v2140_v19  ;;  %v7623_v23 = vpop.f32.mrb[38].mxu1  ;;  %2751 = vrot.lane.b32.xlu0 %v2597_v63, %s8734_s26  ;;  %v6903_v0 = vadd.f32 -1.0, %v8210_v24 }
 0x2a4   : > { %8223 = vpow2.f32 %v2449_v14  ;;  %v2353_v47 = vmin.f32 %v9851_v51, 0.0  ;;  %v9862_v6 = vadd.f32 %v7623_v23, %v9633_v61  ;;  %v2143_v60 = vpop.f32.mrb[39].mxu1  ;;  %v6901_v26 = vadd.f32 -1.0, %v8212_v21 }
 0x2a5   : > { %v8214_v7 = vpop.eup %8213  ;;  %v2351_v31 = vmin.f32 %v9856_v22, 0.0  ;;  %v9866_v10 = vadd.f32 %v9633_v61, %v2143_v60  ;;  %2753 = vrot.lane.b32.xlu1 %v2598_v37, %s8734_s26  ;;  %v2601_v48 = vsel %vm2281_vm12, %v9796_v50, %v6903_v0  ;;  %vm2287_vm4 = vcmp.gt.f32.partialorder %v9856_v22, 0.0 }
 0x2a6   : > { %v8216_v30 = vpop.eup %8215  ;;  %v2455_v36 = vmul.f32 1.442695, %v2353_v47  ;;  %v2354_v20 = vmin.f32 %v9862_v6, 0.0  ;;  %v2599_v4 = vsel %vm2279_vm10, %v9801_v41, %v6901_v26  ;;  %v6902_v43 = vadd.f32 -1.0, %v8214_v7 }
 0x2a7   : > { %v2451_v25 = vmul.f32 1.442695, %v2351_v31  ;;  %v2352_v42 = vmin.f32 %v9866_v10, 0.0  ;;  %2755 = vrot.lane.b32.xlu0 %v2599_v4, %s8734_s26  ;;  %v6904_v44 = vadd.f32 -1.0, %v8216_v30  ;;  %vm2289_vm5 = vcmp.gt.f32.partialorder %v9851_v51, 0.0 }
 0x2a8   : > { %8225 = vpow2.f32 %v2455_v36  ;;  %v2457_v12 = vmul.f32 1.442695, %v2354_v20  ;;  %v2600_v57 = vsel %vm2280_vm11, %v9811_v49, %v6902_v43  ;;  %vm2288_vm6 = vcmp.gt.f32.partialorder %v9866_v10, 0.0 }
 0x2a9   : > { %8227 = vpow2.f32 %v2451_v25  ;;  %v2453_v54 = vmul.f32 1.442695, %v2352_v42  ;;  %v7626_v45 = vpop.f32.mrb[40].mxu1  ;;  %2757 = vrot.lane.b32.xlu1 %v2600_v57, %s8734_s26  ;;  %v2602_v3 = vsel %vm2282_vm13, %v9807_v16, %v6904_v44  ;;  %vm2290_vm8 = vcmp.gt.f32.partialorder %v9862_v6, 0.0 }
 0x2aa   : > { %v8218_v41 = vpop.eup %8217  ;;  %v9879_v15 = vadd.f32 %v7626_v45, %v9633_v61  ;;  %v2156_v28 = vpop.f32.mrb[41].mxu1 }
 0x2ab   : > { %v8220_v59 = vpop.eup %8219  ;;  %8229 = vpow2.f32 %v2453_v54  ;;  %v9884_v11 = vadd.f32 %v9633_v61, %v2156_v28  ;;  %v7627_v53 = vpop.f32.mrb[42].mxu1  ;;  %2759 = vrot.lane.b32.xlu0 %v2601_v48, %s8734_s26  ;;  %v6907_v34 = vadd.f32 -1.0, %v8218_v41 }
 0x2ac   : > { %8231 = vpow2.f32 %v2457_v12  ;;  %v2357_v49 = vmin.f32 %v9879_v15, 0.0  ;;  %v9890_v32 = vadd.f32 %v7627_v53, %v9633_v61  ;;  %v2159_v56 = vpop.f32.mrb[43].mxu1  ;;  %v6905_v58 = vadd.f32 -1.0, %v8220_v59 }
 0x2ad   : > { %v8222_v27 = vpop.eup %8221  ;;  %v2355_v50 = vmin.f32 %v9884_v11, 0.0  ;;  %v9894_v33 = vadd.f32 %v9633_v61, %v2159_v56  ;;  %2761 = vrot.lane.b32.xlu1 %v2602_v3, %s8734_s26  ;;  %v2605_v18 = vsel %vm2285_vm0, %v9824_v17, %v6907_v34  ;;  %vm2291_vm9 = vcmp.gt.f32.partialorder %v9884_v11, 0.0 }
 0x2ae   : > { %v8224_v52 = vpop.eup %8223  ;;  %v2463_v1 = vmul.f32 1.442695, %v2357_v49  ;;  %v2358_v29 = vmin.f32 %v9890_v32, 0.0  ;;  %v2603_v35 = vsel %vm2283_vm14, %v9829_v5, %v6905_v58  ;;  %v6906_v9 = vadd.f32 -1.0, %v8222_v27 }
 0x2af   : > { %v2459_v8 = vmul.f32 1.442695, %v2355_v50  ;;  %v2356_v55 = vmin.f32 %v9894_v33, 0.0  ;;  %2763 = vrot.lane.b32.xlu0 %v2603_v35, %s8734_s26  ;;  %v6908_v46 = vadd.f32 -1.0, %v8224_v52  ;;  %vm2293_vm10 = vcmp.gt.f32.partialorder %v9879_v15, 0.0 }
 0x2b0   : > { %8233 = vpow2.f32 %v2463_v1  ;;  %v2465_v16 = vmul.f32 1.442695, %v2358_v29  ;;  %v2604_v14 = vsel %vm2284_vm1, %v9839_v2, %v6906_v9  ;;  %vm2292_vm11 = vcmp.gt.f32.partialorder %v9894_v33, 0.0 }
 0x2b1   : > { %8235 = vpow2.f32 %v2459_v8  ;;  %v2461_v62 = vmul.f32 1.442695, %v2356_v55  ;;  %v7630_v13 = vpop.f32.mrb[44].mxu1  ;;  %2765 = vrot.lane.b32.xlu1 %v2604_v14, %s8734_s26  ;;  %v2606_v7 = vsel %vm2286_vm3, %v9835_v40, %v6908_v46  ;;  %vm2294_vm12 = vcmp.gt.f32.partialorder %v9890_v32, 0.0 }
 0x2b2   : > { %v8226_v5 = vpop.eup %8225  ;;  %v9907_v38 = vadd.f32 %v7630_v13, %v9633_v61  ;;  %v2172_v39 = vpop.f32.mrb[45].mxu1 }
 0x2b3   : > { %v8228_v24 = vpop.eup %8227  ;;  %8237 = vpow2.f32 %v2461_v62  ;;  %v9913_v19 = vadd.f32 %v9633_v61, %v2172_v39  ;;  %v7631_v63 = vpop.f32.mrb[46].mxu1  ;;  %2767 = vrot.lane.b32.xlu0 %v2605_v18, %s8734_s26  ;;  %v6911_v20 = vadd.f32 -1.0, %v8226_v5 }
 0x2b4   : > { %8239 = vpow2.f32 %v2465_v16  ;;  %v2361_v2 = vmin.f32 %v9907_v38, 0.0  ;;  %v9918_v21 = vadd.f32 %v7631_v63, %v9633_v61  ;;  %v2175_v23 = vpop.f32.mrb[47].mxu1  ;;  %v6909_v47 = vadd.f32 -1.0, %v8228_v24 }
 0x2b5   : > { %v8230_v60 = vpop.eup %8229  ;;  %v2359_v17 = vmin.f32 %v9913_v19, 0.0  ;;  %v9923_v26 = vadd.f32 %v9633_v61, %v2175_v23  ;;  %2769 = vrot.lane.b32.xlu1 %v2606_v7, %s8734_s26  ;;  %v2609_v44 = vsel %vm2289_vm5, %v9851_v51, %v6911_v20  ;;  %vm2295_vm13 = vcmp.gt.f32.partialorder %v9913_v19, 0.0 }
 0x2b6   : > { %v8232_v31 = vpop.eup %8231  ;;  %v2471_v37 = vmul.f32 1.442695, %v2361_v2  ;;  %v2362_v30 = vmin.f32 %v9918_v21, 0.0  ;;  %v2607_v36 = vsel %vm2287_vm4, %v9856_v22, %v6909_v47  ;;  %v6910_v25 = vadd.f32 -1.0, %v8230_v60 }
 0x2b7   : > { %v2467_v4 = vmul.f32 1.442695, %v2359_v17  ;;  %v2360_v0 = vmin.f32 %v9923_v26, 0.0  ;;  %2771 = vrot.lane.b32.xlu0 %v2607_v36, %s8734_s26  ;;  %v6912_v54 = vadd.f32 -1.0, %v8232_v31  ;;  %vm2297_vm14 = vcmp.gt.f32.partialorder %v9907_v38, 0.0 }
 0x2b8   : > { %8241 = vpow2.f32 %v2471_v37  ;;  %v2473_v40 = vmul.f32 1.442695, %v2362_v30  ;;  %v2608_v12 = vsel %vm2288_vm6, %v9866_v10, %v6910_v25  ;;  %vm2296_vm0 = vcmp.gt.f32.partialorder %v9923_v26, 0.0 }
 0x2b9   : > { %8243 = vpow2.f32 %v2467_v4  ;;  %v2469_v42 = vmul.f32 1.442695, %v2360_v0  ;;  %v7634_v43 = vpop.f32.mrb[48].mxu1  ;;  %2773 = vrot.lane.b32.xlu1 %v2608_v12, %s8734_s26  ;;  %v2610_v27 = vsel %vm2290_vm8, %v9862_v6, %v6912_v54  ;;  %vm2298_vm1 = vcmp.gt.f32.partialorder %v9918_v21, 0.0 }
 0x2ba   : > { %v8234_v22 = vpop.eup %8233  ;;  %v9935_v45 = vadd.f32 %v7634_v43, %v9633_v61  ;;  %v2188_v57 = vpop.f32.mrb[49].mxu1 }
 0x2bb   : > { %v8236_v41 = vpop.eup %8235  ;;  %8245 = vpow2.f32 %v2469_v42  ;;  %v9941_v28 = vadd.f32 %v9633_v61, %v2188_v57  ;;  %v7635_v48 = vpop.f32.mrb[50].mxu1  ;;  %2775 = vrot.lane.b32.xlu0 %v2609_v44, %s8734_s26  ;;  %v6915_v29 = vadd.f32 -1.0, %v8234_v22  ;;  %v8666_v42 = vld [vmem:[%s11857_s4] ss:$0 sm:$0xff] }
 0x2bc   : > { %8247 = vpow2.f32 %v2473_v40  ;;  %v2365_v10 = vmin.f32 %v9935_v45, 0.0  ;;  %v9946_v59 = vadd.f32 %v7635_v48, %v9633_v61  ;;  %v2191_v53 = vpop.f32.mrb[51].mxu1  ;;  %v6913_v49 = vadd.f32 -1.0, %v8236_v41 }
 0x2bd   : > { %v8238_v56 = vpop.eup %8237  ;;  %v2363_v51 = vmin.f32 %v9941_v28, 0.0  ;;  %v9951_v58 = vadd.f32 %v9633_v61, %v2191_v53  ;;  %2777 = vrot.lane.b32.xlu1 %v2610_v27, %s8734_s26  ;;  %v2613_v46 = vsel %vm2293_vm10, %v9879_v15, %v6915_v29  ;;  %vm2299_vm3 = vcmp.gt.f32.partialorder %v9941_v28, 0.0 }
 0x2be   : > { %v8240_v50 = vpop.eup %8239  ;;  %v2479_v3 = vmul.f32 1.442695, %v2365_v10  ;;  %v2366_v52 = vmin.f32 %v9946_v59, 0.0  ;;  %v2611_v1 = vsel %vm2291_vm9, %v9884_v11, %v6913_v49  ;;  %v6914_v8 = vadd.f32 -1.0, %v8238_v56 }
 0x2bf   : > { %v2475_v35 = vmul.f32 1.442695, %v2363_v51  ;;  %v2364_v34 = vmin.f32 %v9951_v58, 0.0  ;;  %2779 = vrot.lane.b32.xlu0 %v2611_v1, %s8734_s26  ;;  %v6916_v62 = vadd.f32 -1.0, %v8240_v50  ;;  %vm2301_vm4 = vcmp.gt.f32.partialorder %v9935_v45, 0.0 }
 0x2c0   : > { %8249 = vpow2.f32 %v2479_v3  ;;  %v2481_v6 = vmul.f32 1.442695, %v2366_v52  ;;  %v2612_v16 = vsel %vm2292_vm11, %v9894_v33, %v6914_v8  ;;  %vm2300_vm5 = vcmp.gt.f32.partialorder %v9951_v58, 0.0 }
 0x2c1   : > { %8251 = vpow2.f32 %v2475_v35  ;;  %v2477_v55 = vmul.f32 1.442695, %v2364_v34  ;;  %v7638_v9 = vpop.f32.mrb[52].mxu1  ;;  %2781 = vrot.lane.b32.xlu1 %v2612_v16, %s8734_s26  ;;  %v2614_v60 = vsel %vm2294_vm12, %v9890_v32, %v6916_v62  ;;  %vm2302_vm6 = vcmp.gt.f32.partialorder %v9946_v59, 0.0 }
 0x2c2   : > { %v8242_v11 = vpop.eup %8241  ;;  %v9963_v13 = vadd.f32 %v7638_v9, %v9633_v61  ;;  %v2204_v14 = vpop.f32.mrb[53].mxu1 }
 0x2c3   : > { %v8244_v5 = vpop.eup %8243  ;;  %8253 = vpow2.f32 %v2477_v55  ;;  %v9969_v39 = vadd.f32 %v9633_v61, %v2204_v14  ;;  %v7639_v18 = vpop.f32.mrb[54].mxu1  ;;  %2783 = vrot.lane.b32.xlu0 %v2613_v46, %s8734_s26  ;;  %v6919_v30 = vadd.f32 -1.0, %v8242_v11 }
 0x2c4   : > { %8255 = vpow2.f32 %v2481_v6  ;;  %v2369_v33 = vmin.f32 %v9963_v13, 0.0  ;;  %v9974_v24 = vadd.f32 %v7639_v18, %v9633_v61  ;;  %v2207_v63 = vpop.f32.mrb[55].mxu1  ;;  %v6917_v2 = vadd.f32 -1.0, %v8244_v5 }
 0x2c5   : > { %v8246_v23 = vpop.eup %8245  ;;  %v2367_v15 = vmin.f32 %v9969_v39, 0.0  ;;  %v9979_v47 = vadd.f32 %v9633_v61, %v2207_v63  ;;  %2785 = vrot.lane.b32.xlu1 %v2614_v60, %s8734_s26  ;;  %v2617_v54 = vsel %vm2297_vm14, %v9907_v38, %v6919_v30  ;;  %vm2303_vm8 = vcmp.gt.f32.partialorder %v9969_v39, 0.0 }
 0x2c6   : > { %v8248_v17 = vpop.eup %8247  ;;  %v2487_v7 = vmul.f32 1.442695, %v2369_v33  ;;  %v2370_v31 = vmin.f32 %v9974_v24, 0.0  ;;  %v2615_v37 = vsel %vm2295_vm13, %v9913_v19, %v6917_v2  ;;  %v6918_v4 = vadd.f32 -1.0, %v8246_v23 }
 0x2c7   : > { %v2483_v36 = vmul.f32 1.442695, %v2367_v15  ;;  %v2368_v20 = vmin.f32 %v9979_v47, 0.0  ;;  %2787 = vrot.lane.b32.xlu0 %v2615_v37, %s8734_s26  ;;  %v6920_v40 = vadd.f32 -1.0, %v8248_v17  ;;  %vm2305_vm9 = vcmp.gt.f32.partialorder %v9963_v13, 0.0 }
 0x2c8   : > { %8257 = vpow2.f32 %v2487_v7  ;;  %v2489_v61 = vmul.f32 1.442695, %v2370_v31  ;;  %v2616_v25 = vsel %vm2296_vm0, %v9923_v26, %v6918_v4  ;;  %vm2304_vm10 = vcmp.gt.f32.partialorder %v9979_v47, 0.0 }
 0x2c9   : > { %8259 = vpow2.f32 %v2483_v36  ;;  %v2485_v32 = vmul.f32 1.442695, %v2368_v20  ;;  %v7642_v0 = vpop.f32.mrb[56].mxu1  ;;  %2789 = vrot.lane.b32.xlu1 %v2616_v25, %s8734_s26  ;;  %v2618_v56 = vsel %vm2298_vm1, %v9918_v21, %v6920_v40  ;;  %vm2306_vm11 = vcmp.gt.f32.partialorder %v9974_v24, 0.0 }
 0x2ca   : > { %v8250_v19 = vpop.eup %8249  ;;  %v9993_v43 = vadd.f32 %v8666_v42, %v7642_v0  ;;  %v2220_v12 = vpop.f32.mrb[57].mxu1 }
 0x2cb   : > { %v8252_v22 = vpop.eup %8251  ;;  %8261 = vpow2.f32 %v2485_v32  ;;  %v9998_v57 = vadd.f32 %v8666_v42, %v2220_v12  ;;  %v7643_v26 = vpop.f32.mrb[58].mxu1  ;;  %2791 = vrot.lane.b32.xlu0 %v2617_v54, %s8734_s26  ;;  %v6923_v52 = vadd.f32 -1.0, %v8250_v19 }
 0x2cc   : > { %8263 = vpow2.f32 %v2489_v61  ;;  %v2373_v44 = vmin.f32 %v9993_v43, 0.0  ;;  %v10002_v41 = vadd.f32 %v8666_v42, %v7643_v26  ;;  %v2223_v48 = vpop.f32.mrb[59].mxu1  ;;  %v6921_v10 = vadd.f32 -1.0, %v8252_v22 }
 0x2cd   : > { %v8254_v53 = vpop.eup %8253  ;;  %v2371_v38 = vmin.f32 %v9998_v57, 0.0  ;;  %v10006_v49 = vadd.f32 %v8666_v42, %v2223_v48  ;;  %2793 = vrot.lane.b32.xlu1 %v2618_v56, %s8734_s26  ;;  %v2621_v62 = vsel %vm2301_vm4, %v9935_v45, %v6923_v52  ;;  %vm2307_vm12 = vcmp.gt.f32.partialorder %v9998_v57, 0.0 }
 0x2ce   : > { %v8256_v51 = vpop.eup %8255  ;;  %v2495_v27 = vmul.f32 1.442695, %v2373_v44  ;;  %v2374_v50 = vmin.f32 %v10002_v41, 0.0  ;;  %v2619_v3 = vsel %vm2299_vm3, %v9941_v28, %v6921_v10  ;;  %v6922_v35 = vadd.f32 -1.0, %v8254_v53 }
 0x2cf   : > { %v2491_v1 = vmul.f32 1.442695, %v2371_v38  ;;  %v2372_v29 = vmin.f32 %v10006_v49, 0.0  ;;  %2795 = vrot.lane.b32.xlu0 %v2619_v3, %s8734_s26  ;;  %v6924_v55 = vadd.f32 -1.0, %v8256_v51  ;;  %vm2308_vm13 = vcmp.gt.f32.partialorder %v10006_v49, 0.0  ;;  %v8015_v3 = vld [vmem:[%s11856_s3 + $0x40] sm:$0xff]  }
 0x2d0   : > { %8265 = vpow2.f32 %v2495_v27  ;;  %v2497_v21 = vmul.f32 1.442695, %v2374_v50  ;;  %v2620_v6 = vsel %vm2300_vm5, %v9951_v58, %v6922_v35  ;;  %vm2309_vm14 = vcmp.gt.f32.partialorder %v9993_v43, 0.0  ;;  %7720 = vmatprep.subr.bf16.mxu1 %v8015_v3 }
 0x2d1   : > { %8267 = vpow2.f32 %v2491_v1  ;;  %v2493_v34 = vmul.f32 1.442695, %v2372_v29  ;;  %v7646_v8 = vpop.f32.mrb[60].mxu1  ;;  %2797 = vrot.lane.b32.xlu1 %v2620_v6, %s8734_s26  ;;  %v2622_v23 = vsel %vm2302_vm6, %v9946_v59, %v6924_v55  ;;  %vm2310_vm0 = vcmp.gt.f32.partialorder %v10002_v41, 0.0  ;;  %7721 = vmatpush3.bf16.msra.mxu1 %v8015_v3  ;;  %v8016_v6 = vld [vmem:[%s11856_s3 + $0x48] sm:$0xff]   ;;  %v8017_v55 = vld [vmem:[%s11856_s3 + $0x50] sm:$0xff]  }
 0x2d2   : > { %v8258_v28 = vpop.eup %8257  ;;  %v10017_v9 = vadd.f32 %v8666_v42, %v7646_v8  ;;  %v2236_v16 = vpop.f32.mrb[61].mxu1  ;;  %7722 = vmatprep.subr.bf16.mxu1 %v8016_v6 }
 0x2d3   : > { %v8260_v11 = vpop.eup %8259  ;;  %8269 = vpow2.f32 %v2493_v34  ;;  %v10022_v14 = vadd.f32 %v8666_v42, %v2236_v16  ;;  %v7647_v46 = vpop.f32.mrb[62].mxu1  ;;  %2799 = vrot.lane.b32.xlu0 %v2621_v62, %s8734_s26  ;;  %v6927_v31 = vadd.f32 -1.0, %v8258_v28 }
 0x2d4   : > { %8271 = vpow2.f32 %v2497_v21  ;;  %v2377_v58 = vmin.f32 %v10017_v9, 0.0  ;;  %v10026_v5 = vadd.f32 %v8666_v42, %v7647_v46  ;;  %v2239_v18 = vpop.f32.mrb[63].mxu1  ;;  %v6925_v33 = vadd.f32 -1.0, %v8260_v11 }
 0x2d5   : > { %v8262_v63 = vpop.eup %8261  ;;  %v2375_v45 = vmin.f32 %v10022_v14, 0.0  ;;  %v10030_v2 = vadd.f32 %v8666_v42, %v2239_v18  ;;  %2801 = vrot.lane.b32.xlu1 %v2622_v23, %s8734_s26  ;;  %vm2311_vm1 = vcmp.gt.f32.partialorder %v10022_v14, 0.0  ;;  %vm2313_vm4 = vcmp.gt.f32.partialorder %v10017_v9, 0.0  ;;  %7723 = vmatpush3.bf16.msra.mxu1 %v8016_v6 }
 0x2d6   : > { %v8264_v15 = vpop.eup %8263  ;;  %v2503_v60 = vmul.f32 1.442695, %v2377_v58  ;;  %v2378_v17 = vmin.f32 %v10026_v5, 0.0  ;;  %v2623_v7 = vsel %vm2303_vm8, %v9969_v39, %v6925_v33  ;;  %v6926_v36 = vadd.f32 -1.0, %v8262_v63  ;;  %7724 = vmatprep.subr.bf16.mxu1 %v8017_v55 }
 0x2d7   : > { %v2499_v37 = vmul.f32 1.442695, %v2375_v45  ;;  %v2376_v30 = vmin.f32 %v10030_v2, 0.0  ;;  %2803 = vrot.lane.b32.xlu0 %v2623_v7, %s8734_s26  ;;  %v6928_v61 = vadd.f32 -1.0, %v8264_v15  ;;  %v2625_v39 = vsel %vm2305_vm9, %v9963_v13, %v6927_v31 }
 0x2d8   : > { %8273 = vpow2.f32 %v2503_v60  ;;  %v2505_v59 = vmul.f32 1.442695, %v2378_v17  ;;  %v2624_v4 = vsel %vm2304_vm10, %v9979_v47, %v6926_v36  ;;  %vm2312_vm3 = vcmp.gt.f32.partialorder %v10030_v2, 0.0 }
 0x2d9   : > { %8275 = vpow2.f32 %v2499_v37  ;;  %v2501_v20 = vmul.f32 1.442695, %v2376_v30  ;;  %2805 = vrot.lane.b32.xlu1 %v2624_v4, %s8734_s26  ;;  %v2626_v19 = vsel %vm2306_vm11, %v9974_v24, %v6928_v61  ;;  %vm2314_vm5 = vcmp.gt.f32.partialorder %v10026_v5, 0.0  ;;  %7725 = vmatpush3.bf16.msra.mxu1 %v8017_v55 }
 0x2da   : > { %v8266_v32 = vpop.eup %8265 }
 0x2db   : > { %v8268_v0 = vpop.eup %8267  ;;  %8277 = vpow2.f32 %v2501_v20  ;;  %2807 = vrot.lane.b32.xlu0 %v2625_v39, %s8734_s26  ;;  %v6931_v13 = vadd.f32 -1.0, %v8266_v32 }
 0x2dc   : > { %8279 = vpow2.f32 %v2505_v59  ;;  %v6929_v25 = vadd.f32 -1.0, %v8268_v0 }
 0x2dd   : > { %v8270_v40 = vpop.eup %8269  ;;  %2809 = vrot.lane.b32.xlu1 %v2626_v19, %s8734_s26 }
 0x2de   : > { %v8272_v47 = vpop.eup %8271  ;;  %v2627_v42 = vsel %vm2307_vm12, %v9998_v57, %v6929_v25  ;;  %v6930_v12 = vadd.f32 -1.0, %v8270_v40  ;;  %v2629_v57 = vsel %vm2309_vm14, %v9993_v43, %v6931_v13 }
 0x2df   : > { %2811 = vrot.lane.b32.xlu0 %v2627_v42, %s8734_s26  ;;  %v6932_v26 = vadd.f32 -1.0, %v8272_v47 }
 0x2e0   : > { %v2700_v54 = vpop.permute.xlu0 %2699  ;;  %v2628_v22 = vsel %vm2308_vm13, %v10006_v49, %v6930_v12 }
 0x2e1   : > { %2891 = vst.msk [vmem:[#allocation2] sm:$0xff] %vm1665_vm15, %v2700_v54  ;;  %2813 = vrot.lane.b32.xlu1 %v2628_v22, %s8734_s26  ;;  %v2630_v49 = vsel %vm2310_vm0, %v10002_v41, %v6932_v26 }
 0x2e2   : > { %v8274_v24 = vpop.eup %8273  ;;  %v2702_v44 = vpop.permute.xlu1 %2701 }
 0x2e3   : > { %v8276_v48 = vpop.eup %8275  ;;  %2892 = vst.msk [vmem:[#allocation2 + $0x8] sm:$0xff] %vm1665_vm15, %v2702_v44  ;;  %2815 = vrot.lane.b32.xlu0 %v2629_v57, %s8734_s26  ;;  %v6935_v50 = vadd.f32 -1.0, %v8274_v24 }
 0x2e4   : > { %v2704_v10 = vpop.permute.xlu0 %2703  ;;  %v6933_v53 = vadd.f32 -1.0, %v8276_v48 }
 0x2e5   : > { %v8278_v38 = vpop.eup %8277  ;;  %2893 = vst.msk [vmem:[#allocation2 + $0x10] sm:$0xff] %vm1665_vm15, %v2704_v10  ;;  %2817 = vrot.lane.b32.xlu1 %v2630_v49, %s8734_s26  ;;  %v2633_v29 = vsel %vm2313_vm4, %v10017_v9, %v6935_v50 }
 0x2e6   : > { %v8280_v56 = vpop.eup %8279  ;;  %v2706_v43 = vpop.permute.xlu1 %2705  ;;  %v2631_v51 = vsel %vm2311_vm1, %v10022_v14, %v6933_v53  ;;  %v6934_v27 = vadd.f32 -1.0, %v8278_v38 }
 0x2e7   : > { %2894 = vst.msk [vmem:[#allocation2 + $0x18] sm:$0xff] %vm1665_vm15, %v2706_v43  ;;  %2819 = vrot.lane.b32.xlu0 %v2631_v51, %s8734_s26  ;;  %v6936_v1 = vadd.f32 -1.0, %v8280_v56 }
 0x2e8   : > { %v2632_v41 = vsel %vm2312_vm3, %v10030_v2, %v6934_v27  ;;  %v2955_v35 = vld [vmem:[#allocation2] sm:$0xff] }
 0x2e9   : > { %v2708_v52 = vpop.permute.xlu0 %2707  ;;  %2821 = vrot.lane.b32.xlu1 %v2632_v41, %s8734_s26  ;;  %v2634_v28 = vsel %vm2314_vm5, %v10026_v5, %v6936_v1 }
 0x2ea   : > { %2895 = vst.msk [vmem:[#allocation2 + $0x20] sm:$0xff] %vm1665_vm15, %v2708_v52  ;;  %v2956_v21 = vld [vmem:[#allocation2 + $0x8] sm:$0xff] }
 0x2eb   : > { %v2710_v34 = vpop.permute.xlu1 %2709  ;;  %2823 = vrot.lane.b32.xlu0 %v2633_v29, %s8734_s26  ;;  %v3019_v8 = vpack.c.bf16 %v2956_v21, %v2955_v35 }
 0x2ec   : > { %2896 = vst.msk [vmem:[#allocation2 + $0x28] sm:$0xff] %vm1665_vm15, %v2710_v34  ;;  %v2957_v16 = vld [vmem:[#allocation2 + $0x10] sm:$0xff] }
 0x2ed   : > { %7656 = vmatprep.mubr.msk.bf16.mxu0 %vm1865_vm7, %v3019_v8  ;;  %v2712_v9 = vpop.permute.xlu0 %2711  ;;  %2825 = vrot.lane.b32.xlu1 %v2634_v28, %s8734_s26 }
 0x2ee   : > { %2897 = vst.msk [vmem:[#allocation2 + $0x30] sm:$0xff] %vm1665_vm15, %v2712_v9  ;;  %v2958_v62 = vld [vmem:[#allocation2 + $0x18] sm:$0xff] }
 0x2ef   : > { %v2714_v11 = vpop.permute.xlu1 %2713  ;;  %v3020_v14 = vpack.c.bf16 %v2958_v62, %v2957_v16 }
 0x2f0   : > { %2898 = vst.msk [vmem:[#allocation2 + $0x38] sm:$0xff] %vm1665_vm15, %v2714_v11 }
 0x2f1   : > { %7657 = vmatmul.mubr.msk.bf16.vlgmr.msra.gmra.mrb[64].mxu0 %vm1865_vm7, %v3020_v14  ;;  %v2716_v46 = vpop.permute.xlu0 %2715  ;;  %v2959_v5 = vld [vmem:[#allocation2 + $0x20] sm:$0xff] }
 0x2f2   : > { %2899 = vst.msk [vmem:[#allocation2 + $0x40] sm:$0xff] %vm1665_vm15, %v2716_v46 }
 0x2f3   : > { %v2718_v58 = vpop.permute.xlu1 %2717  ;;  %v2960_v18 = vld [vmem:[#allocation2 + $0x28] sm:$0xff] }
 0x2f4   : > { %2900 = vst.msk [vmem:[#allocation2 + $0x48] sm:$0xff] %vm1665_vm15, %v2718_v58  ;;  %v3021_v33 = vpack.c.bf16 %v2960_v18, %v2959_v5 }
 0x2f5   : > { %v2720_v63 = vpop.permute.xlu0 %2719  ;;  %v2961_v2 = vld [vmem:[#allocation2 + $0x30] sm:$0xff] }
 0x2f6   : > { %2901 = vst.msk [vmem:[#allocation2 + $0x50] sm:$0xff] %vm1665_vm15, %v2720_v63  ;;  %7660 = vmatprep.mubr.msk.bf16.mxu0 %vm1865_vm7, %v3021_v33 }
 0x2f7   : > { %v2722_v45 = vpop.permute.xlu1 %2721  ;;  %v2962_v23 = vld [vmem:[#allocation2 + $0x38] sm:$0xff] }
 0x2f8   : > { %2902 = vst.msk [vmem:[#allocation2 + $0x58] sm:$0xff] %vm1665_vm15, %v2722_v45  ;;  %v3022_v15 = vpack.c.bf16 %v2962_v23, %v2961_v2 }
 0x2f9   : > { %v2724_v60 = vpop.permute.xlu0 %2723  ;;  %v2963_v7 = vld [vmem:[#allocation2 + $0x40] sm:$0xff] }
 0x2fa   : > { %2903 = vst.msk [vmem:[#allocation2 + $0x60] sm:$0xff] %vm1665_vm15, %v2724_v60  ;;  %7661 = vmatmul.mubr.msk.bf16.gmra.mrb[68].mxu0 %vm1865_vm7, %v3022_v15 }
 0x2fb   : > { %v2726_v17 = vpop.permute.xlu1 %2725  ;;  %v2964_v31 = vld [vmem:[#allocation2 + $0x48] sm:$0xff] }
 0x2fc   : > { %2904 = vst.msk [vmem:[#allocation2 + $0x68] sm:$0xff] %vm1665_vm15, %v2726_v17  ;;  %v3023_v37 = vpack.c.bf16 %v2964_v31, %v2963_v7 }
 0x2fd   : > { %v2728_v30 = vpop.permute.xlu0 %2727  ;;  %v2965_v59 = vld [vmem:[#allocation2 + $0x50] sm:$0xff] }
 0x2fe   : > { %2905 = vst.msk [vmem:[#allocation2 + $0x70] sm:$0xff] %vm1665_vm15, %v2728_v30  ;;  %7664 = vmatprep.mubr.msk.bf16.mxu0 %vm1865_vm7, %v3023_v37 }
 0x2ff   : > { %v2730_v36 = vpop.permute.xlu1 %2729  ;;  %v2966_v20 = vld [vmem:[#allocation2 + $0x58] sm:$0xff] }
 0x300   : > { %2906 = vst.msk [vmem:[#allocation2 + $0x78] sm:$0xff] %vm1665_vm15, %v2730_v36  ;;  %v3024_v4 = vpack.c.bf16 %v2966_v20, %v2965_v59 }
 0x301   : > { %v2732_v61 = vpop.permute.xlu0 %2731  ;;  %v2967_v39 = vld [vmem:[#allocation2 + $0x60] sm:$0xff] }
 0x302   : > { %2907 = vst.msk [vmem:[#allocation2 + $0x80] sm:$0xff] %vm1665_vm15, %v2732_v61  ;;  %7665 = vmatmul.mubr.msk.bf16.gmra.mrb[72].mxu0 %vm1865_vm7, %v3024_v4 }
 0x303   : > { %v2734_v32 = vpop.permute.xlu1 %2733  ;;  %v2968_v0 = vld [vmem:[#allocation2 + $0x68] sm:$0xff] }
 0x304   : > { %2908 = vst.msk [vmem:[#allocation2 + $0x88] sm:$0xff] %vm1665_vm15, %v2734_v32  ;;  %v3025_v25 = vpack.c.bf16 %v2968_v0, %v2967_v39 }
 0x305   : > { %v2736_v40 = vpop.permute.xlu0 %2735  ;;  %v2969_v47 = vld [vmem:[#allocation2 + $0x70] sm:$0xff] }
 0x306   : > { %2909 = vst.msk [vmem:[#allocation2 + $0x90] sm:$0xff] %vm1665_vm15, %v2736_v40  ;;  %7668 = vmatprep.mubr.msk.bf16.mxu0 %vm1865_vm7, %v3025_v25 }
 0x307   : > { %v2738_v19 = vpop.permute.xlu1 %2737  ;;  %v2970_v42 = vld [vmem:[#allocation2 + $0x78] sm:$0xff] }
 0x308   : > { %2910 = vst.msk [vmem:[#allocation2 + $0x98] sm:$0xff] %vm1665_vm15, %v2738_v19  ;;  %v3026_v12 = vpack.c.bf16 %v2970_v42, %v2969_v47 }
 0x309   : > { %v2740_v13 = vpop.permute.xlu0 %2739  ;;  %v2971_v22 = vld [vmem:[#allocation2 + $0x80] sm:$0xff] }
 0x30a   : > { %2911 = vst.msk [vmem:[#allocation2 + $0xa0] sm:$0xff] %vm1665_vm15, %v2740_v13  ;;  %7669 = vmatmul.mubr.msk.bf16.gmra.mrb[76].mxu0 %vm1865_vm7, %v3026_v12 }
 0x30b   : > { %v2742_v54 = vpop.permute.xlu1 %2741  ;;  %v2972_v26 = vld [vmem:[#allocation2 + $0x88] sm:$0xff] }
 0x30c   : > { %2912 = vst.msk [vmem:[#allocation2 + $0xa8] sm:$0xff] %vm1665_vm15, %v2742_v54  ;;  %v3027_v24 = vpack.c.bf16 %v2972_v26, %v2971_v22 }
 0x30d   : > { %v2744_v44 = vpop.permute.xlu0 %2743  ;;  %v2973_v48 = vld [vmem:[#allocation2 + $0x90] sm:$0xff] }
 0x30e   : > { %2913 = vst.msk [vmem:[#allocation2 + $0xb0] sm:$0xff] %vm1665_vm15, %v2744_v44  ;;  %7672 = vmatprep.mubr.msk.bf16.mxu0 %vm1865_vm7, %v3027_v24 }
 0x30f   : > { %v2746_v57 = vpop.permute.xlu1 %2745  ;;  %v2974_v10 = vld [vmem:[#allocation2 + $0x98] sm:$0xff] }
 0x310   : > { %2914 = vst.msk [vmem:[#allocation2 + $0xb8] sm:$0xff] %vm1665_vm15, %v2746_v57  ;;  %v3028_v53 = vpack.c.bf16 %v2974_v10, %v2973_v48 }
 0x311   : > { %v2748_v38 = vpop.permute.xlu0 %2747  ;;  %v2975_v49 = vld [vmem:[#allocation2 + $0xa0] sm:$0xff] }
 0x312   : > { %2915 = vst.msk [vmem:[#allocation2 + $0xc0] sm:$0xff] %vm1665_vm15, %v2748_v38  ;;  %7673 = vmatmul.mubr.msk.bf16.gmra.mrb[80].mxu0 %vm1865_vm7, %v3028_v53 }
 0x313   : > { %v2976_v56 = vld [vmem:[#allocation2 + $0xa8] sm:$0xff]  ;;  %v2750_v43 = vpop.permute.xlu1 %2749 }
 0x314   : > { %v3029_v51 = vpack.c.bf16 %v2976_v56, %v2975_v49  ;;  %2916 = vst.msk [vmem:[#allocation2 + $0xc8] sm:$0xff] %vm1665_vm15, %v2750_v43 }
 0x315   : > { %v2752_v27 = vpop.permute.xlu0 %2751  ;;  %v2977_v50 = vld [vmem:[#allocation2 + $0xb0] sm:$0xff] }
 0x316   : > { %2917 = vst.msk [vmem:[#allocation2 + $0xd0] sm:$0xff] %vm1665_vm15, %v2752_v27  ;;  %7676 = vmatprep.mubr.msk.bf16.mxu0 %vm1865_vm7, %v3029_v51 }
 0x317   : > { %v2978_v3 = vld [vmem:[#allocation2 + $0xb8] sm:$0xff]  ;;  %v2754_v41 = vpop.permute.xlu1 %2753 }
 0x318   : > { %v3030_v52 = vpack.c.bf16 %v2978_v3, %v2977_v50  ;;  %2918 = vst.msk [vmem:[#allocation2 + $0xd8] sm:$0xff] %vm1665_vm15, %v2754_v41 }
 0x319   : > { %v2756_v1 = vpop.permute.xlu0 %2755  ;;  %v2979_v35 = vld [vmem:[#allocation2 + $0xc0] sm:$0xff] }
 0x31a   : > { %2919 = vst.msk [vmem:[#allocation2 + $0xe0] sm:$0xff] %vm1665_vm15, %v2756_v1  ;;  %7677 = vmatmul.mubr.msk.bf16.gmra.mrb[84].mxu0 %vm1865_vm7, %v3030_v52 }
 0x31b   : > { %v2758_v29 = vpop.permute.xlu1 %2757  ;;  %v2980_v21 = vld [vmem:[#allocation2 + $0xc8] sm:$0xff] }
 0x31c   : > { %2920 = vst.msk [vmem:[#allocation2 + $0xe8] sm:$0xff] %vm1665_vm15, %v2758_v29  ;;  %v3031_v8 = vpack.c.bf16 %v2980_v21, %v2979_v35 }
 0x31d   : > { %v2760_v34 = vpop.permute.xlu0 %2759  ;;  %v2981_v55 = vld [vmem:[#allocation2 + $0xd0] sm:$0xff] }
 0x31e   : > { %2921 = vst.msk [vmem:[#allocation2 + $0xf0] sm:$0xff] %vm1665_vm15, %v2760_v34  ;;  %7680 = vmatprep.mubr.msk.bf16.mxu0 %vm1865_vm7, %v3031_v8 }
 0x31f   : > { %v2762_v6 = vpop.permute.xlu1 %2761  ;;  %v2982_v28 = vld [vmem:[#allocation2 + $0xd8] sm:$0xff] }
 0x320   : > { %2922 = vst.msk [vmem:[#allocation2 + $0xf8] sm:$0xff] %vm1665_vm15, %v2762_v6  ;;  %v3032_v16 = vpack.c.bf16 %v2982_v28, %v2981_v55 }
 0x321   : > { %v2764_v9 = vpop.permute.xlu0 %2763  ;;  %v2983_v11 = vld [vmem:[#allocation2 + $0xe0] sm:$0xff] }
 0x322   : > { %2923 = vst.msk [vmem:[#allocation2 + $0x100] sm:$0xff] %vm1665_vm15, %v2764_v9  ;;  %7681 = vmatmul.mubr.msk.bf16.gmra.mrb[88].mxu0 %vm1865_vm7, %v3032_v16 }
 0x323   : > { %v2766_v62 = vpop.permute.xlu1 %2765  ;;  %v2984_v14 = vld [vmem:[#allocation2 + $0xe8] sm:$0xff] }
 0x324   : > { %2924 = vst.msk [vmem:[#allocation2 + $0x108] sm:$0xff] %vm1665_vm15, %v2766_v62  ;;  %v3033_v58 = vpack.c.bf16 %v2984_v14, %v2983_v11 }
 0x325   : > { %v2768_v46 = vpop.permute.xlu0 %2767  ;;  %v2985_v18 = vld [vmem:[#allocation2 + $0xf0] sm:$0xff] }
 0x326   : > { %2925 = vst.msk [vmem:[#allocation2 + $0x110] sm:$0xff] %vm1665_vm15, %v2768_v46  ;;  %7684 = vmatprep.mubr.msk.bf16.mxu0 %vm1865_vm7, %v3033_v58 }
 0x327   : > { %v2770_v5 = vpop.permute.xlu1 %2769  ;;  %v2986_v33 = vld [vmem:[#allocation2 + $0xf8] sm:$0xff] }
 0x328   : > { %2926 = vst.msk [vmem:[#allocation2 + $0x118] sm:$0xff] %vm1665_vm15, %v2770_v5  ;;  %v3034_v45 = vpack.c.bf16 %v2986_v33, %v2985_v18 }
 0x329   : > { %v2772_v63 = vpop.permute.xlu0 %2771  ;;  %v2987_v23 = vld [vmem:[#allocation2 + $0x100] sm:$0xff] }
 0x32a   : > { %2927 = vst.msk [vmem:[#allocation2 + $0x120] sm:$0xff] %vm1665_vm15, %v2772_v63  ;;  %7685 = vmatmul.mubr.msk.bf16.gmra.mrb[92].mxu0 %vm1865_vm7, %v3034_v45  ;;  %v8018_v45 = vld [vmem:[%s11856_s3 + $0x58] sm:$0xff]  }
 0x32b   : > { %v2774_v2 = vpop.permute.xlu1 %2773  ;;  %v2988_v15 = vld [vmem:[#allocation2 + $0x108] sm:$0xff]  ;;  %7726 = vmatprep.subr.bf16.mxu1 %v8018_v45 }
 0x32c   : > { %2928 = vst.msk [vmem:[#allocation2 + $0x128] sm:$0xff] %vm1665_vm15, %v2774_v2  ;;  %v3035_v17 = vpack.c.bf16 %v2988_v15, %v2987_v23  ;;  %7727 = vmatpush3.bf16.msra.mxu1 %v8018_v45 }
 0x32d   : > { %v2776_v60 = vpop.permute.xlu0 %2775  ;;  %v2989_v31 = vld [vmem:[#allocation2 + $0x110] sm:$0xff] }
 0x32e   : > { %2929 = vst.msk [vmem:[#allocation2 + $0x130] sm:$0xff] %vm1665_vm15, %v2776_v60  ;;  %7688 = vmatprep.mubr.msk.bf16.mxu0 %vm1865_vm7, %v3035_v17 }
 0x32f   : > { %v2778_v7 = vpop.permute.xlu1 %2777  ;;  %v2990_v37 = vld [vmem:[#allocation2 + $0x118] sm:$0xff] }
 0x330   : > { %2930 = vst.msk [vmem:[#allocation2 + $0x138] sm:$0xff] %vm1665_vm15, %v2778_v7  ;;  %v3036_v36 = vpack.c.bf16 %v2990_v37, %v2989_v31 }
 0x331   : > { %v2780_v30 = vpop.permute.xlu0 %2779  ;;  %v2991_v20 = vld [vmem:[#allocation2 + $0x120] sm:$0xff] }
 0x332   : > { %2931 = vst.msk [vmem:[#allocation2 + $0x140] sm:$0xff] %vm1665_vm15, %v2780_v30  ;;  %7689 = vmatmul.mubr.msk.bf16.gmra.mrb[96].mxu0 %vm1865_vm7, %v3036_v36 }
 0x333   : > { %v2782_v59 = vpop.permute.xlu1 %2781  ;;  %v2992_v4 = vld [vmem:[#allocation2 + $0x128] sm:$0xff] }
 0x334   : > { %2932 = vst.msk [vmem:[#allocation2 + $0x148] sm:$0xff] %vm1665_vm15, %v2782_v59  ;;  %v3037_v32 = vpack.c.bf16 %v2992_v4, %v2991_v20  ;;  %v10182_v4 = vld [vmem:[%s11857_s4 + $0x1] ss:$0 sm:$0xff] }
 0x335   : > { %v2784_v61 = vpop.permute.xlu0 %2783  ;;  %v2993_v0 = vld [vmem:[#allocation2 + $0x130] sm:$0xff] }
 0x336   : > { %2933 = vst.msk [vmem:[#allocation2 + $0x150] sm:$0xff] %vm1665_vm15, %v2784_v61  ;;  %7692 = vmatprep.mubr.msk.bf16.mxu0 %vm1865_vm7, %v3037_v32 }
 0x337   : > { %v2786_v39 = vpop.permute.xlu1 %2785  ;;  %v2994_v25 = vld [vmem:[#allocation2 + $0x138] sm:$0xff] }
 0x338   : > { %2934 = vst.msk [vmem:[#allocation2 + $0x158] sm:$0xff] %vm1665_vm15, %v2786_v39  ;;  %v3038_v19 = vpack.c.bf16 %v2994_v25, %v2993_v0 }
 0x339   : > { %v2788_v40 = vpop.permute.xlu0 %2787  ;;  %v2995_v42 = vld [vmem:[#allocation2 + $0x140] sm:$0xff] }
 0x33a   : > { %2935 = vst.msk [vmem:[#allocation2 + $0x160] sm:$0xff] %vm1665_vm15, %v2788_v40  ;;  %7693 = vmatmul.mubr.msk.bf16.gmra.mrb[100].mxu0 %vm1865_vm7, %v3038_v19 }
 0x33b   : > { %v2790_v47 = vpop.permute.xlu1 %2789  ;;  %v2996_v12 = vld [vmem:[#allocation2 + $0x148] sm:$0xff] }
 0x33c   : > { %2936 = vst.msk [vmem:[#allocation2 + $0x168] sm:$0xff] %vm1665_vm15, %v2790_v47  ;;  %v3039_v54 = vpack.c.bf16 %v2996_v12, %v2995_v42 }
 0x33d   : > { %v2792_v13 = vpop.permute.xlu0 %2791  ;;  %v2997_v26 = vld [vmem:[#allocation2 + $0x150] sm:$0xff] }
 0x33e   : > { %2937 = vst.msk [vmem:[#allocation2 + $0x170] sm:$0xff] %vm1665_vm15, %v2792_v13  ;;  %7696 = vmatprep.mubr.msk.bf16.mxu0 %vm1865_vm7, %v3039_v54 }
 0x33f   : > { %v2794_v22 = vpop.permute.xlu1 %2793  ;;  %v2998_v24 = vld [vmem:[#allocation2 + $0x158] sm:$0xff] }
 0x340   : > { %2938 = vst.msk [vmem:[#allocation2 + $0x178] sm:$0xff] %vm1665_vm15, %v2794_v22  ;;  %v3040_v57 = vpack.c.bf16 %v2998_v24, %v2997_v26 }
 0x341   : > { %v2796_v44 = vpop.permute.xlu0 %2795  ;;  %v2999_v10 = vld [vmem:[#allocation2 + $0x160] sm:$0xff] }
 0x342   : > { %2939 = vst.msk [vmem:[#allocation2 + $0x180] sm:$0xff] %vm1665_vm15, %v2796_v44  ;;  %7697 = vmatmul.mubr.msk.bf16.gmra.mrb[104].mxu0 %vm1865_vm7, %v3040_v57 }
 0x343   : > { %v2798_v48 = vpop.permute.xlu1 %2797  ;;  %v3000_v53 = vld [vmem:[#allocation2 + $0x168] sm:$0xff] }
 0x344   : > { %2940 = vst.msk [vmem:[#allocation2 + $0x188] sm:$0xff] %vm1665_vm15, %v2798_v48  ;;  %v3041_v49 = vpack.c.bf16 %v3000_v53, %v2999_v10 }
 0x345   : > { %v2800_v38 = vpop.permute.xlu0 %2799  ;;  %v3001_v43 = vld [vmem:[#allocation2 + $0x170] sm:$0xff] }
 0x346   : > { %2941 = vst.msk [vmem:[#allocation2 + $0x190] sm:$0xff] %vm1665_vm15, %v2800_v38  ;;  %7700 = vmatprep.mubr.msk.bf16.mxu0 %vm1865_vm7, %v3041_v49 }
 0x347   : > { %v2802_v56 = vpop.permute.xlu1 %2801  ;;  %v3002_v51 = vld [vmem:[#allocation2 + $0x178] sm:$0xff] }
 0x348   : > { %2942 = vst.msk [vmem:[#allocation2 + $0x198] sm:$0xff] %vm1665_vm15, %v2802_v56  ;;  %v3042_v50 = vpack.c.bf16 %v3002_v51, %v3001_v43 }
 0x349   : > { %v2804_v27 = vpop.permute.xlu0 %2803  ;;  %v3003_v41 = vld [vmem:[#allocation2 + $0x180] sm:$0xff] }
 0x34a   : > { %2943 = vst.msk [vmem:[#allocation2 + $0x1a0] sm:$0xff] %vm1665_vm15, %v2804_v27  ;;  %7701 = vmatmul.mubr.msk.bf16.gmra.mrb[108].mxu0 %vm1865_vm7, %v3042_v50 }
 0x34b   : > { %v2806_v3 = vpop.permute.xlu1 %2805  ;;  %v3004_v52 = vld [vmem:[#allocation2 + $0x188] sm:$0xff] }
 0x34c   : > { %2944 = vst.msk [vmem:[#allocation2 + $0x1a8] sm:$0xff] %vm1665_vm15, %v2806_v3  ;;  %v3043_v29 = vpack.c.bf16 %v3004_v52, %v3003_v41 }
 0x34d   : > { %v2808_v1 = vpop.permute.xlu0 %2807  ;;  %v3005_v21 = vld [vmem:[#allocation2 + $0x190] sm:$0xff] }
 0x34e   : > { %2945 = vst.msk [vmem:[#allocation2 + $0x1b0] sm:$0xff] %vm1665_vm15, %v2808_v1  ;;  %7704 = vmatprep.mubr.msk.bf16.mxu0 %vm1865_vm7, %v3043_v29 }
 0x34f   : > { %v2810_v35 = vpop.permute.xlu1 %2809  ;;  %v3006_v34 = vld [vmem:[#allocation2 + $0x198] sm:$0xff] }
 0x350   : > { %2946 = vst.msk [vmem:[#allocation2 + $0x1b8] sm:$0xff] %vm1665_vm15, %v2810_v35  ;;  %v3044_v6 = vpack.c.bf16 %v3006_v34, %v3005_v21 }
 0x351   : > { %v2812_v8 = vpop.permute.xlu0 %2811  ;;  %v3007_v28 = vld [vmem:[#allocation2 + $0x1a0] sm:$0xff] }
 0x352   : > { %2947 = vst.msk [vmem:[#allocation2 + $0x1c0] sm:$0xff] %vm1665_vm15, %v2812_v8  ;;  %7705 = vmatmul.mubr.msk.bf16.gmra.mrb[112].mxu0 %vm1865_vm7, %v3044_v6 }
 0x353   : > { %v2814_v55 = vpop.permute.xlu1 %2813  ;;  %v3008_v9 = vld [vmem:[#allocation2 + $0x1a8] sm:$0xff] }
 0x354   : > { %2948 = vst.msk [vmem:[#allocation2 + $0x1c8] sm:$0xff] %vm1665_vm15, %v2814_v55  ;;  %v3045_v62 = vpack.c.bf16 %v3008_v9, %v3007_v28 }
 0x355   : > { %v2816_v16 = vpop.permute.xlu0 %2815  ;;  %v3009_v14 = vld [vmem:[#allocation2 + $0x1b0] sm:$0xff] }
 0x356   : > { %2949 = vst.msk [vmem:[#allocation2 + $0x1d0] sm:$0xff] %vm1665_vm15, %v2816_v16  ;;  %7708 = vmatprep.mubr.msk.bf16.mxu0 %vm1865_vm7, %v3045_v62 }
 0x357   : > { %v2818_v11 = vpop.permute.xlu1 %2817  ;;  %v3010_v46 = vld [vmem:[#allocation2 + $0x1b8] sm:$0xff] }
 0x358   : > { %2950 = vst.msk [vmem:[#allocation2 + $0x1d8] sm:$0xff] %vm1665_vm15, %v2818_v11  ;;  %v3046_v5 = vpack.c.bf16 %v3010_v46, %v3009_v14 }
 0x359   : > { %v2820_v58 = vpop.permute.xlu0 %2819  ;;  %v3011_v33 = vld [vmem:[#allocation2 + $0x1c0] sm:$0xff] }
 0x35a   : > { %2951 = vst.msk [vmem:[#allocation2 + $0x1e0] sm:$0xff] %vm1665_vm15, %v2820_v58  ;;  %7709 = vmatmul.mubr.msk.bf16.gmra.mrb[116].mxu0 %vm1865_vm7, %v3046_v5 }
 0x35b   : > { %v2822_v18 = vpop.permute.xlu1 %2821  ;;  %v3012_v63 = vld [vmem:[#allocation2 + $0x1c8] sm:$0xff] }
 0x35c   : > { %2952 = vst.msk [vmem:[#allocation2 + $0x1e8] sm:$0xff] %vm1665_vm15, %v2822_v18  ;;  %v3047_v23 = vpack.c.bf16 %v3012_v63, %v3011_v33 }
 0x35d   : > { %v2824_v2 = vpop.permute.xlu0 %2823  ;;  %v3013_v60 = vld [vmem:[#allocation2 + $0x1d0] sm:$0xff] }
 0x35e   : > { %2953 = vst.msk [vmem:[#allocation2 + $0x1f0] sm:$0xff] %vm1665_vm15, %v2824_v2  ;;  %7712 = vmatprep.mubr.msk.bf16.mxu0 %vm1865_vm7, %v3047_v23 }
 0x35f   : > { %v2826_v15 = vpop.permute.xlu1 %2825  ;;  %v3014_v17 = vld [vmem:[#allocation2 + $0x1d8] sm:$0xff] }
 0x360   : > { %2954 = vst.msk [vmem:[#allocation2 + $0x1f8] sm:$0xff] %vm1665_vm15, %v2826_v15  ;;  %v3048_v7 = vpack.c.bf16 %v3014_v17, %v3013_v60 }
 0x361   : > { %v3015_v31 = vld [vmem:[#allocation2 + $0x1e0] sm:$0xff] }
 0x362   : > { %7713 = vmatmul.mubr.msk.bf16.gmra.mrb[120].mxu0 %vm1865_vm7, %v3048_v7 }
 0x363   : > { %v3016_v37 = vld [vmem:[#allocation2 + $0x1e8] sm:$0xff] }
 0x364   : > { %v3049_v30 = vpack.c.bf16 %v3016_v37, %v3015_v31 }
 0x365   : > { %v3017_v36 = vld [vmem:[#allocation2 + $0x1f0] sm:$0xff] }
 0x366   : > { %7716 = vmatprep.mubr.msk.bf16.mxu0 %vm1865_vm7, %v3049_v30 }
 0x367   : > { %v3018_v59 = vld [vmem:[#allocation2 + $0x1f8] sm:$0xff] }
 0x368   : > { %v3050_v20 = vpack.c.bf16 %v3018_v59, %v3017_v36 }
 0x36a   : > { %7717 = vmatmul.mubr.msk.bf16.gmra.mrb[124].mxu0 %vm1865_vm7, %v3050_v20 }
 0x3c4   : > { %v7658_v61 = vpop.f32.mrb[64].mxu0 }
 0x3c5   : > { %v3231_v32 = vadd.f32 %v7658_v61, %v10182_v4  ;;  %v3222_v39 = vpop.f32.mrb[65].mxu0 }
 0x3c6   : > { %v3223_v0 = vadd.f32 %v10182_v4, %v3222_v39  ;;  %v7659_v25 = vpop.f32.mrb[66].mxu0 }
 0x3c7   : > { %v3543_v40 = vmin.f32 %v3231_v32, 0.0  ;;  %v3234_v19 = vadd.f32 %v7659_v25, %v10182_v4  ;;  %v3225_v47 = vpop.f32.mrb[67].mxu0  ;;  %vm3479_vm6 = vcmp.gt.f32.partialorder %v3231_v32, 0.0 }
 0x3c8   : > { %v3541_v42 = vmin.f32 %v3223_v0, 0.0  ;;  %v3226_v12 = vadd.f32 %v10182_v4, %v3225_v47  ;;  %vm3477_vm8 = vcmp.gt.f32.partialorder %v3223_v0, 0.0 }
 0x3c9   : > { %v3609_v13 = vmul.f32 1.442695, %v3543_v40  ;;  %v3544_v54 = vmin.f32 %v3234_v19, 0.0  ;;  %vm3480_vm9 = vcmp.gt.f32.partialorder %v3234_v19, 0.0 }
 0x3ca   : > { %v3605_v22 = vmul.f32 1.442695, %v3541_v42  ;;  %v3542_v26 = vmin.f32 %v3226_v12, 0.0  ;;  %vm3478_vm10 = vcmp.gt.f32.partialorder %v3226_v12, 0.0 }
 0x3cb   : > { %8281 = vpow2.f32 %v3609_v13  ;;  %v3611_v24 = vmul.f32 1.442695, %v3544_v54 }
 0x3cc   : > { %8283 = vpow2.f32 %v3605_v22  ;;  %v3607_v44 = vmul.f32 1.442695, %v3542_v26 }
 0x3cd   : > { %8285 = vpow2.f32 %v3611_v24  ;;  %v7662_v57 = vpop.f32.mrb[68].mxu0 }
 0x3ce   : > { %8287 = vpow2.f32 %v3607_v44  ;;  %v10189_v48 = vadd.f32 %v7662_v57, %v10182_v4  ;;  %v3238_v10 = vpop.f32.mrb[69].mxu0 }
 0x3cf   : > { %v10192_v53 = vadd.f32 %v10182_v4, %v3238_v10  ;;  %v7663_v38 = vpop.f32.mrb[70].mxu0 }
 0x3d0   : > { %v3547_v49 = vmin.f32 %v10189_v48, 0.0  ;;  %v10196_v56 = vadd.f32 %v7663_v38, %v10182_v4  ;;  %v3241_v43 = vpop.f32.mrb[71].mxu0  ;;  %vm3483_vm11 = vcmp.gt.f32.partialorder %v10189_v48, 0.0 }
 0x3d1   : > { %v3545_v51 = vmin.f32 %v10192_v53, 0.0  ;;  %v10200_v27 = vadd.f32 %v10182_v4, %v3241_v43  ;;  %vm3481_vm12 = vcmp.gt.f32.partialorder %v10192_v53, 0.0 }
 0x3d2   : > { %v3617_v50 = vmul.f32 1.442695, %v3547_v49  ;;  %v3548_v3 = vmin.f32 %v10196_v56, 0.0  ;;  %vm3484_vm13 = vcmp.gt.f32.partialorder %v10196_v56, 0.0 }
 0x3d3   : > { %v3613_v41 = vmul.f32 1.442695, %v3545_v51  ;;  %v3546_v52 = vmin.f32 %v10200_v27, 0.0  ;;  %vm3482_vm14 = vcmp.gt.f32.partialorder %v10200_v27, 0.0 }
 0x3d4   : > { %8289 = vpow2.f32 %v3617_v50  ;;  %v3619_v1 = vmul.f32 1.442695, %v3548_v3 }
 0x3d5   : > { %v8282_v29 = vpop.eup %8281  ;;  %8291 = vpow2.f32 %v3613_v41  ;;  %v3615_v35 = vmul.f32 1.442695, %v3546_v52  ;;  %v7666_v21 = vpop.f32.mrb[72].mxu0 }
 0x3d6   : > { %v8284_v34 = vpop.eup %8283  ;;  %v6985_v8 = vadd.f32 -1.0, %v8282_v29  ;;  %8293 = vpow2.f32 %v3619_v1  ;;  %v10205_v6 = vadd.f32 %v7666_v21, %v10182_v4  ;;  %v3254_v55 = vpop.f32.mrb[73].mxu0 }
 0x3d7   : > { %v8286_v28 = vpop.eup %8285  ;;  %v6983_v9 = vadd.f32 -1.0, %v8284_v34  ;;  %8295 = vpow2.f32 %v3615_v35  ;;  %v10208_v16 = vadd.f32 %v10182_v4, %v3254_v55  ;;  %v7667_v62 = vpop.f32.mrb[74].mxu0 }
 0x3d8   : > { %v8288_v11 = vpop.eup %8287  ;;  %v3799_v14 = vsel %vm3479_vm6, %v3231_v32, %v6985_v8  ;;  %v6986_v46 = vadd.f32 -1.0, %v8286_v28  ;;  %v3551_v58 = vmin.f32 %v10205_v6, 0.0  ;;  %v3257_v5 = vpop.f32.mrb[75].mxu0  ;;  %v10215_v23 = vadd.f32 %v7667_v62, %v10182_v4 }
 0x3d9   : > { %3863 = vst.msk [vmem:[#allocation2 + $0x10] sm:$0xff] %vm1344_vm2, %v3799_v14  ;;  %v3797_v18 = vsel %vm3477_vm8, %v3223_v0, %v6983_v9  ;;  %v6984_v33 = vadd.f32 -1.0, %v8288_v11  ;;  %v3549_v63 = vmin.f32 %v10208_v16, 0.0  ;;  %v10218_v15 = vadd.f32 %v10182_v4, %v3257_v5 }
 0x3da   : > { %3861 = vst.msk [vmem:[#allocation2] sm:$0xff] %vm1344_vm2, %v3797_v18  ;;  %v3800_v45 = vsel %vm3480_vm9, %v3234_v19, %v6986_v46  ;;  %v3625_v2 = vmul.f32 1.442695, %v3551_v58  ;;  %v3552_v7 = vmin.f32 %v10215_v23, 0.0  ;;  %vm3487_vm0 = vcmp.gt.f32.partialorder %v10205_v6, 0.0 }
 0x3db   : > { %3864 = vst.msk [vmem:[#allocation2 + $0x18] sm:$0xff] %vm1344_vm2, %v3800_v45  ;;  %v3798_v60 = vsel %vm3478_vm10, %v3226_v12, %v6984_v33  ;;  %v3621_v17 = vmul.f32 1.442695, %v3549_v63  ;;  %v3550_v31 = vmin.f32 %v10218_v15, 0.0  ;;  %vm3485_vm1 = vcmp.gt.f32.partialorder %v10208_v16, 0.0 }
 0x3dc   : > { %3862 = vst.msk [vmem:[#allocation2 + $0x8] sm:$0xff] %vm1344_vm2, %v3798_v60  ;;  %8297 = vpow2.f32 %v3625_v2  ;;  %v3627_v36 = vmul.f32 1.442695, %v3552_v7  ;;  %vm3488_vm3 = vcmp.gt.f32.partialorder %v10215_v23, 0.0  ;;  %vm3486_vm4 = vcmp.gt.f32.partialorder %v10218_v15, 0.0 }
 0x3dd   : > { %8299 = vpow2.f32 %v3621_v17  ;;  %v7670_v37 = vpop.f32.mrb[76].mxu0  ;;  %v3623_v39 = vmul.f32 1.442695, %v3550_v31 }
 0x3de   : > { %v8290_v30 = vpop.eup %8289  ;;  %v10225_v59 = vadd.f32 %v7670_v37, %v10182_v4  ;;  %v3270_v20 = vpop.f32.mrb[77].mxu0  ;;  %8301 = vpow2.f32 %v3627_v36 }
 0x3df   : > { %v8292_v61 = vpop.eup %8291  ;;  %v6989_v32 = vadd.f32 -1.0, %v8290_v30  ;;  %v10229_v0 = vadd.f32 %v10182_v4, %v3270_v20  ;;  %v7671_v25 = vpop.f32.mrb[78].mxu0  ;;  %8303 = vpow2.f32 %v3623_v39 }
 0x3e0   : > { %v8294_v40 = vpop.eup %8293  ;;  %v6987_v19 = vadd.f32 -1.0, %v8292_v61  ;;  %v3555_v47 = vmin.f32 %v10225_v59, 0.0  ;;  %v3273_v42 = vpop.f32.mrb[79].mxu0  ;;  %v3927_v3 = vld [vmem:[#allocation2 + $0x10] sm:$0xff]  ;;  %vm3491_vm5 = vcmp.gt.f32.partialorder %v10225_v59, 0.0 }
 0x3e1   : > { %v8296_v12 = vpop.eup %8295  ;;  %v3803_v13 = vsel %vm3483_vm11, %v10189_v48, %v6989_v32  ;;  %v6990_v54 = vadd.f32 -1.0, %v8294_v40  ;;  %v3553_v44 = vmin.f32 %v10229_v0, 0.0  ;;  %v10242_v48 = vadd.f32 %v7671_v25, %v10182_v4  ;;  %v3925_v49 = vld [vmem:[#allocation2] sm:$0xff] }
 0x3e2   : > { %3867 = vst.msk [vmem:[#allocation2 + $0x30] sm:$0xff] %vm1344_vm2, %v3803_v13  ;;  %v3801_v22 = vsel %vm3481_vm12, %v10192_v53, %v6987_v19  ;;  %v6988_v26 = vadd.f32 -1.0, %v8296_v12  ;;  %v3633_v24 = vmul.f32 1.442695, %v3555_v47  ;;  %v3928_v57 = vld [vmem:[#allocation2 + $0x18] sm:$0xff]  ;;  %v10245_v38 = vadd.f32 %v10182_v4, %v3273_v42 }
 0x3e3   : > { %3865 = vst.msk [vmem:[#allocation2 + $0x20] sm:$0xff] %vm1344_vm2, %v3801_v22  ;;  %v3804_v10 = vsel %vm3484_vm13, %v10196_v56, %v6990_v54  ;;  %v3926_v43 = vld [vmem:[#allocation2 + $0x8] sm:$0xff]  ;;  %v3629_v51 = vmul.f32 1.442695, %v3553_v44  ;;  %v3556_v56 = vmin.f32 %v10242_v48, 0.0  ;;  %v3990_v1 = vpack.c.bf16 %v3928_v57, %v3927_v3 }
 0x3e4   : > { %3868 = vst.msk [vmem:[#allocation2 + $0x38] sm:$0xff] %vm1344_vm2, %v3804_v10  ;;  %v3802_v53 = vsel %vm3482_vm14, %v10200_v27, %v6988_v26  ;;  %8305 = vpow2.f32 %v3633_v24  ;;  %v3989_v50 = vpack.c.bf16 %v3926_v43, %v3925_v49  ;;  %v3554_v41 = vmin.f32 %v10245_v38, 0.0 }
 0x3e5   : > { %3866 = vst.msk [vmem:[#allocation2 + $0x28] sm:$0xff] %vm1344_vm2, %v3802_v53  ;;  %v7674_v52 = vpop.f32.mrb[80].mxu0  ;;  %8307 = vpow2.f32 %v3629_v51  ;;  %v3635_v8 = vmul.f32 1.442695, %v3556_v56  ;;  %vm3489_vm6 = vcmp.gt.f32.partialorder %v10229_v0, 0.0  ;;  %vm3492_vm8 = vcmp.gt.f32.partialorder %v10242_v48, 0.0 }
 0x3e6   : > { %v8298_v29 = vpop.eup %8297  ;;  %v10253_v35 = vadd.f32 %v7674_v52, %v10182_v4  ;;  %v3286_v21 = vpop.f32.mrb[81].mxu0  ;;  %7728 = vmatprep.mubr.msk.bf16.mxu1 %vm1865_vm7, %v3989_v50  ;;  %v3631_v55 = vmul.f32 1.442695, %v3554_v41  ;;  %vm3490_vm9 = vcmp.gt.f32.partialorder %v10245_v38, 0.0 }
 0x3e7   : > { %v8300_v27 = vpop.eup %8299  ;;  %v6993_v34 = vadd.f32 -1.0, %v8298_v29  ;;  %v10257_v28 = vadd.f32 %v10182_v4, %v3286_v21  ;;  %v7675_v9 = vpop.f32.mrb[82].mxu0  ;;  %7729 = vmatmul.mubr.msk.bf16.vlgmr.msra.gmra.mrb[64].mxu1 %vm1865_vm7, %v3990_v1  ;;  %8309 = vpow2.f32 %v3635_v8 }
 0x3e8   : > { %v6991_v62 = vadd.f32 -1.0, %v8300_v27  ;;  %v3559_v11 = vmin.f32 %v10253_v35, 0.0  ;;  %v10263_v14 = vadd.f32 %v7675_v9, %v10182_v4  ;;  %v3289_v46 = vpop.f32.mrb[83].mxu0  ;;  %v8302_v18 = vpop.eup %8301  ;;  %8311 = vpow2.f32 %v3631_v55 }
 0x3e9   : > { %v3807_v58 = vsel %vm3487_vm0, %v10205_v6, %v6993_v34  ;;  %v3557_v5 = vmin.f32 %v10257_v28, 0.0  ;;  %v8304_v45 = vpop.eup %8303  ;;  %v6994_v2 = vadd.f32 -1.0, %v8302_v18  ;;  %v10273_v6 = vadd.f32 %v10182_v4, %v3289_v46  ;;  %v3931_v47 = vld [vmem:[#allocation2 + $0x30] sm:$0xff] }
 0x3ea   : > { %3871 = vst.msk [vmem:[#allocation2 + $0x50] sm:$0xff] %vm1344_vm2, %v3807_v58  ;;  %v3805_v33 = vsel %vm3485_vm1, %v10208_v16, %v6991_v62  ;;  %v3641_v63 = vmul.f32 1.442695, %v3559_v11  ;;  %v3560_v17 = vmin.f32 %v10263_v14, 0.0  ;;  %v6992_v7 = vadd.f32 -1.0, %v8304_v45  ;;  %v3929_v20 = vld [vmem:[#allocation2 + $0x20] sm:$0xff] }
 0x3eb   : > { %3869 = vst.msk [vmem:[#allocation2 + $0x40] sm:$0xff] %vm1344_vm2, %v3805_v33  ;;  %v3637_v60 = vmul.f32 1.442695, %v3557_v5  ;;  %v3932_v37 = vld [vmem:[#allocation2 + $0x38] sm:$0xff]  ;;  %v3808_v16 = vsel %vm3488_vm3, %v10215_v23, %v6994_v2  ;;  %v3558_v39 = vmin.f32 %v10273_v6, 0.0  ;;  %vm3495_vm10 = vcmp.gt.f32.partialorder %v10253_v35, 0.0 }
 0x3ec   : > { %8313 = vpow2.f32 %v3641_v63  ;;  %v3930_v31 = vld [vmem:[#allocation2 + $0x28] sm:$0xff]  ;;  %v3643_v30 = vmul.f32 1.442695, %v3560_v17  ;;  %3872 = vst.msk [vmem:[#allocation2 + $0x58] sm:$0xff] %vm1344_vm2, %v3808_v16  ;;  %v3806_v32 = vsel %vm3486_vm4, %v10218_v15, %v6992_v7  ;;  %v3992_v13 = vpack.c.bf16 %v3932_v37, %v3931_v47 }
 0x3ed   : > { %8315 = vpow2.f32 %v3637_v60  ;;  %v7678_v36 = vpop.f32.mrb[84].mxu0  ;;  %v3991_v19 = vpack.c.bf16 %v3930_v31, %v3929_v20  ;;  %3870 = vst.msk [vmem:[#allocation2 + $0x48] sm:$0xff] %vm1344_vm2, %v3806_v32  ;;  %v3639_v15 = vmul.f32 1.442695, %v3558_v39  ;;  %vm3493_vm11 = vcmp.gt.f32.partialorder %v10257_v28, 0.0 }
 0x3ee   : > { %v8306_v61 = vpop.eup %8305  ;;  %v10282_v25 = vadd.f32 %v7678_v36, %v10182_v4  ;;  %v3302_v40 = vpop.f32.mrb[85].mxu0  ;;  %8317 = vpow2.f32 %v3643_v30  ;;  %vm3496_vm12 = vcmp.gt.f32.partialorder %v10263_v14, 0.0  ;;  %vm3494_vm13 = vcmp.gt.f32.partialorder %v10273_v6, 0.0 }
 0x3ef   : > { %v6997_v23 = vadd.f32 -1.0, %v8306_v61  ;;  %v10286_v42 = vadd.f32 %v10182_v4, %v3302_v40  ;;  %v7679_v12 = vpop.f32.mrb[86].mxu0  ;;  %v8308_v54 = vpop.eup %8307  ;;  %7732 = vmatprep.mubr.msk.bf16.mxu1 %vm1865_vm7, %v3991_v19  ;;  %8319 = vpow2.f32 %v3639_v15 }
 0x3f0   : > { %v3563_v22 = vmin.f32 %v10282_v25, 0.0  ;;  %v10291_v26 = vadd.f32 %v7679_v12, %v10182_v4  ;;  %v3305_v24 = vpop.f32.mrb[87].mxu0  ;;  %v6995_v57 = vadd.f32 -1.0, %v8308_v54  ;;  %7733 = vmatmul.mubr.msk.bf16.gmra.mrb[68].mxu1 %vm1865_vm7, %v3992_v13  ;;  %vm3499_vm14 = vcmp.gt.f32.partialorder %v10282_v25, 0.0 }
 0x3f1   : > { %v3811_v44 = vsel %vm3491_vm5, %v10225_v59, %v6997_v23  ;;  %v3561_v10 = vmin.f32 %v10286_v42, 0.0  ;;  %v8310_v53 = vpop.eup %8309  ;;  %v10302_v3 = vadd.f32 %v10182_v4, %v3305_v24  ;;  %v3935_v63 = vld [vmem:[#allocation2 + $0x50] sm:$0xff]  ;;  %vm3497_vm0 = vcmp.gt.f32.partialorder %v10286_v42, 0.0 }
 0x3f2   : > { %3875 = vst.msk [vmem:[#allocation2 + $0x70] sm:$0xff] %vm1344_vm2, %v3811_v44  ;;  %v3649_v49 = vmul.f32 1.442695, %v3563_v22  ;;  %v3564_v43 = vmin.f32 %v10291_v26, 0.0  ;;  %v3809_v51 = vsel %vm3489_vm6, %v10229_v0, %v6995_v57  ;;  %v8312_v59 = vpop.eup %8311  ;;  %v6998_v56 = vadd.f32 -1.0, %v8310_v53 }
 0x3f3   : > { %v3645_v50 = vmul.f32 1.442695, %v3561_v10  ;;  %3873 = vst.msk [vmem:[#allocation2 + $0x60] sm:$0xff] %vm1344_vm2, %v3809_v51  ;;  %v6996_v52 = vadd.f32 -1.0, %v8312_v59  ;;  %v3562_v1 = vmin.f32 %v10302_v3, 0.0  ;;  %v3936_v34 = vld [vmem:[#allocation2 + $0x58] sm:$0xff] }
 0x3f4   : > { %8321 = vpow2.f32 %v3649_v49  ;;  %v3651_v41 = vmul.f32 1.442695, %v3564_v43  ;;  %v3812_v21 = vsel %vm3492_vm8, %v10242_v48, %v6998_v56  ;;  %v3934_v27 = vld [vmem:[#allocation2 + $0x48] sm:$0xff]  ;;  %v3933_v48 = vld [vmem:[#allocation2 + $0x40] sm:$0xff]  ;;  %v3994_v17 = vpack.c.bf16 %v3936_v34, %v3935_v63 }
 0x3f5   : > { %8323 = vpow2.f32 %v3645_v50  ;;  %v7682_v0 = vpop.f32.mrb[88].mxu0  ;;  %3876 = vst.msk [vmem:[#allocation2 + $0x78] sm:$0xff] %vm1344_vm2, %v3812_v21  ;;  %v3810_v55 = vsel %vm3490_vm9, %v10245_v38, %v6996_v52  ;;  %v3647_v62 = vmul.f32 1.442695, %v3562_v1  ;;  %v3993_v33 = vpack.c.bf16 %v3934_v27, %v3933_v48 }
 0x3f6   : > { %v8314_v29 = vpop.eup %8313  ;;  %8325 = vpow2.f32 %v3651_v41  ;;  %v10313_v11 = vadd.f32 %v7682_v0, %v10182_v4  ;;  %v3318_v46 = vpop.f32.mrb[89].mxu0  ;;  %3874 = vst.msk [vmem:[#allocation2 + $0x68] sm:$0xff] %vm1344_vm2, %v3810_v55  ;;  %vm3500_vm1 = vcmp.gt.f32.partialorder %v10291_v26, 0.0  ;;  %vm3498_vm3 = vcmp.gt.f32.partialorder %v10302_v3, 0.0 }
 0x3f7   : > { %v8316_v8 = vpop.eup %8315  ;;  %v7001_v9 = vadd.f32 -1.0, %v8314_v29  ;;  %v10318_v5 = vadd.f32 %v10182_v4, %v3318_v46  ;;  %v7683_v18 = vpop.f32.mrb[90].mxu0  ;;  %8327 = vpow2.f32 %v3647_v62  ;;  %7736 = vmatprep.mubr.msk.bf16.mxu1 %vm1865_vm7, %v3993_v33 }
 0x3f8   : > { %v6999_v58 = vadd.f32 -1.0, %v8316_v8  ;;  %v8318_v45 = vpop.eup %8317  ;;  %v3567_v2 = vmin.f32 %v10313_v11, 0.0  ;;  %v3321_v60 = vpop.f32.mrb[91].mxu0  ;;  %7737 = vmatmul.mubr.msk.bf16.gmra.mrb[72].mxu1 %vm1865_vm7, %v3994_v17  ;;  %vm3503_vm4 = vcmp.gt.f32.partialorder %v10313_v11, 0.0 }
 0x3f9   : > { %v3815_v38 = vsel %vm3495_vm10, %v10253_v35, %v7001_v9  ;;  %v7002_v31 = vadd.f32 -1.0, %v8318_v45  ;;  %v3565_v37 = vmin.f32 %v10318_v5, 0.0  ;;  %v10331_v35 = vadd.f32 %v7683_v18, %v10182_v4  ;;  %v8320_v36 = vpop.eup %8319 }
 0x3fa   : > { %3879 = vst.msk [vmem:[#allocation2 + $0x90] sm:$0xff] %vm1344_vm2, %v3815_v38  ;;  %v3813_v7 = vsel %vm3493_vm11, %v10257_v28, %v6999_v58  ;;  %v3657_v16 = vmul.f32 1.442695, %v3567_v2  ;;  %v10334_v30 = vadd.f32 %v10182_v4, %v3321_v60  ;;  %v7000_v61 = vadd.f32 -1.0, %v8320_v36  ;;  %v3937_v15 = vld [vmem:[#allocation2 + $0x60] sm:$0xff] }
 0x3fb   : > { %3877 = vst.msk [vmem:[#allocation2 + $0x80] sm:$0xff] %vm1344_vm2, %v3813_v7  ;;  %v3816_v28 = vsel %vm3496_vm12, %v10263_v14, %v7002_v31  ;;  %v3653_v20 = vmul.f32 1.442695, %v3565_v37  ;;  %v3568_v32 = vmin.f32 %v10331_v35, 0.0  ;;  %vm3501_vm5 = vcmp.gt.f32.partialorder %v10318_v5, 0.0 }
 0x3fc   : > { %3880 = vst.msk [vmem:[#allocation2 + $0x98] sm:$0xff] %vm1344_vm2, %v3816_v28  ;;  %8329 = vpow2.f32 %v3657_v16  ;;  %v3566_v40 = vmin.f32 %v10334_v30, 0.0  ;;  %v3814_v23 = vsel %vm3494_vm13, %v10273_v6, %v7000_v61  ;;  %v3940_v50 = vld [vmem:[#allocation2 + $0x78] sm:$0xff]  ;;  %vm3504_vm6 = vcmp.gt.f32.partialorder %v10331_v35, 0.0 }
 0x3fd   : > { %8331 = vpow2.f32 %v3653_v20  ;;  %v7686_v19 = vpop.f32.mrb[92].mxu0  ;;  %v3659_v12 = vmul.f32 1.442695, %v3568_v32  ;;  %v3938_v22 = vld [vmem:[#allocation2 + $0x68] sm:$0xff]  ;;  %3878 = vst.msk [vmem:[#allocation2 + $0x88] sm:$0xff] %vm1344_vm2, %v3814_v23  ;;  %vm3502_vm8 = vcmp.gt.f32.partialorder %v10334_v30, 0.0 }
 0x3fe   : > { %v8322_v39 = vpop.eup %8321  ;;  %v10345_v13 = vadd.f32 %v7686_v19, %v10182_v4  ;;  %v3334_v54 = vpop.f32.mrb[93].mxu0  ;;  %v3655_v57 = vmul.f32 1.442695, %v3566_v40  ;;  %v3995_v43 = vpack.c.bf16 %v3938_v22, %v3937_v15 }
 0x3ff   : > { %v8324_v47 = vpop.eup %8323  ;;  %v7005_v14 = vadd.f32 -1.0, %v8322_v39  ;;  %v10349_v10 = vadd.f32 %v10182_v4, %v3334_v54  ;;  %v7687_v49 = vpop.f32.mrb[94].mxu0  ;;  %8333 = vpow2.f32 %v3659_v12 }
 0x400   : > { %v8326_v24 = vpop.eup %8325  ;;  %v7003_v44 = vadd.f32 -1.0, %v8324_v47  ;;  %v3337_v51 = vpop.f32.mrb[95].mxu0  ;;  %8335 = vpow2.f32 %v3655_v57  ;;  %v3571_v56 = vmin.f32 %v10345_v13, 0.0  ;;  %7740 = vmatprep.mubr.msk.bf16.mxu1 %vm1865_vm7, %v3995_v43  ;;  %v10364_v1 = vadd.f32 %v7687_v49, %v10182_v4 }
 0x401   : > { %v3819_v6 = vsel %vm3499_vm14, %v10282_v25, %v7005_v14  ;;  %v7006_v53 = vadd.f32 -1.0, %v8326_v24  ;;  %v8328_v41 = vpop.eup %8327  ;;  %v3569_v52 = vmin.f32 %v10349_v10, 0.0  ;;  %v10367_v29 = vadd.f32 %v10182_v4, %v3337_v51 }
 0x402   : > { %3883 = vst.msk [vmem:[#allocation2 + $0xb0] sm:$0xff] %vm1344_vm2, %v3819_v6  ;;  %v3817_v59 = vsel %vm3497_vm0, %v10286_v42, %v7003_v44  ;;  %v3939_v42 = vld [vmem:[#allocation2 + $0x70] sm:$0xff]  ;;  %v7004_v21 = vadd.f32 -1.0, %v8328_v41  ;;  %v3665_v0 = vmul.f32 1.442695, %v3571_v56  ;;  %v3572_v8 = vmin.f32 %v10364_v1, 0.0 }
 0x403   : > { %3881 = vst.msk [vmem:[#allocation2 + $0xa0] sm:$0xff] %vm1344_vm2, %v3817_v59  ;;  %v3820_v25 = vsel %vm3500_vm1, %v10291_v26, %v7006_v53  ;;  %v3996_v27 = vpack.c.bf16 %v3940_v50, %v3939_v42  ;;  %v3661_v34 = vmul.f32 1.442695, %v3569_v52  ;;  %v3570_v55 = vmin.f32 %v10367_v29, 0.0  ;;  %v3941_v18 = vld [vmem:[#allocation2 + $0x80] sm:$0xff]  ;;  %v3944_v37 = vld [vmem:[#allocation2 + $0x98] sm:$0xff] }
 0x404   : > { %3884 = vst.msk [vmem:[#allocation2 + $0xb8] sm:$0xff] %vm1344_vm2, %v3820_v25  ;;  %v3818_v26 = vsel %vm3498_vm3, %v10302_v3, %v7004_v21  ;;  %8337 = vpow2.f32 %v3665_v0  ;;  %v3667_v46 = vmul.f32 1.442695, %v3572_v8  ;;  %v3942_v33 = vld [vmem:[#allocation2 + $0x88] sm:$0xff]  ;;  %vm3507_vm9 = vcmp.gt.f32.partialorder %v10345_v13, 0.0 }
 0x405   : > { %7741 = vmatmul.mubr.msk.bf16.gmra.mrb[76].mxu1 %vm1865_vm7, %v3996_v27  ;;  %v7690_v9 = vpop.f32.mrb[96].mxu0  ;;  %3882 = vst.msk [vmem:[#allocation2 + $0xa8] sm:$0xff] %vm1344_vm2, %v3818_v26  ;;  %8339 = vpow2.f32 %v3661_v34  ;;  %v3663_v3 = vmul.f32 1.442695, %v3570_v55  ;;  %v3997_v60 = vpack.c.bf16 %v3942_v33, %v3941_v18  ;;  %vm3505_vm10 = vcmp.gt.f32.partialorder %v10349_v10, 0.0 }
 0x406   : > { %v8330_v62 = vpop.eup %8329  ;;  %v10377_v48 = vadd.f32 %v7690_v9, %v10182_v4  ;;  %v3350_v58 = vpop.f32.mrb[97].mxu0  ;;  %8341 = vpow2.f32 %v3667_v46  ;;  %vm3508_vm11 = vcmp.gt.f32.partialorder %v10364_v1, 0.0  ;;  %vm3506_vm12 = vcmp.gt.f32.partialorder %v10367_v29, 0.0 }
 0x407   : > { %v8332_v63 = vpop.eup %8331  ;;  %v7009_v45 = vadd.f32 -1.0, %v8330_v62  ;;  %v10380_v38 = vadd.f32 %v10182_v4, %v3350_v58  ;;  %v7691_v2 = vpop.f32.mrb[98].mxu0  ;;  %8343 = vpow2.f32 %v3663_v3  ;;  %7744 = vmatprep.mubr.msk.bf16.mxu1 %vm1865_vm7, %v3997_v60 }
 0x408   : > { %v7007_v17 = vadd.f32 -1.0, %v8332_v63  ;;  %v3575_v7 = vmin.f32 %v10377_v48, 0.0  ;;  %v3353_v31 = vpop.f32.mrb[99].mxu0  ;;  %v10391_v32 = vadd.f32 %v7691_v2, %v10182_v4  ;;  %vm3511_vm13 = vcmp.gt.f32.partialorder %v10377_v48, 0.0 }
 0x409   : > { %v3823_v16 = vsel %vm3503_vm4, %v10313_v11, %v7009_v45  ;;  %v3573_v36 = vmin.f32 %v10380_v38, 0.0  ;;  %v8334_v28 = vpop.eup %8333  ;;  %v10394_v39 = vadd.f32 %v10182_v4, %v3353_v31  ;;  %v3943_v11 = vld [vmem:[#allocation2 + $0x90] sm:$0xff]  ;;  %vm3509_vm14 = vcmp.gt.f32.partialorder %v10380_v38, 0.0 }
 0x40a   : > { %3887 = vst.msk [vmem:[#allocation2 + $0xd0] sm:$0xff] %vm1344_vm2, %v3823_v16  ;;  %v3821_v20 = vsel %vm3501_vm5, %v10318_v5, %v7007_v17  ;;  %v3673_v61 = vmul.f32 1.442695, %v3575_v7  ;;  %v8336_v40 = vpop.eup %8335  ;;  %v7010_v19 = vadd.f32 -1.0, %v8334_v28  ;;  %v3998_v23 = vpack.c.bf16 %v3944_v37, %v3943_v11  ;;  %v3945_v22 = vld [vmem:[#allocation2 + $0xa0] sm:$0xff]  ;;  %v3947_v26 = vld [vmem:[#allocation2 + $0xb0] sm:$0xff] }
 0x40b   : > { %3885 = vst.msk [vmem:[#allocation2 + $0xc0] sm:$0xff] %vm1344_vm2, %v3821_v20  ;;  %v3669_v47 = vmul.f32 1.442695, %v3573_v36  ;;  %v7008_v14 = vadd.f32 -1.0, %v8336_v40  ;;  %v3576_v5 = vmin.f32 %v10391_v32, 0.0  ;;  %v3574_v54 = vmin.f32 %v10394_v39, 0.0 }
 0x40c   : > { %8345 = vpow2.f32 %v3673_v61  ;;  %v3824_v12 = vsel %vm3504_vm6, %v10331_v35, %v7010_v19  ;;  %v3946_v24 = vld [vmem:[#allocation2 + $0xa8] sm:$0xff]  ;;  %v3948_v25 = vld [vmem:[#allocation2 + $0xb8] sm:$0xff]  ;;  %vm3512_vm0 = vcmp.gt.f32.partialorder %v10391_v32, 0.0  ;;  %vm3510_vm1 = vcmp.gt.f32.partialorder %v10394_v39, 0.0 }
 0x40d   : > { %8347 = vpow2.f32 %v3669_v47  ;;  %7745 = vmatmul.mubr.msk.bf16.gmra.mrb[80].mxu1 %vm1865_vm7, %v3998_v23  ;;  %v7694_v15 = vpop.f32.mrb[100].mxu0  ;;  %3888 = vst.msk [vmem:[#allocation2 + $0xd8] sm:$0xff] %vm1344_vm2, %v3824_v12  ;;  %v3822_v44 = vsel %vm3502_vm8, %v10334_v30, %v7008_v14  ;;  %v3675_v57 = vmul.f32 1.442695, %v3576_v5  ;;  %v3999_v35 = vpack.c.bf16 %v3946_v24, %v3945_v22 }
 0x40e   : > { %v10406_v49 = vadd.f32 %v7694_v15, %v10182_v4  ;;  %v3366_v43 = vpop.f32.mrb[101].mxu0  ;;  %v8338_v6 = vpop.eup %8337  ;;  %3886 = vst.msk [vmem:[#allocation2 + $0xc8] sm:$0xff] %vm1344_vm2, %v3822_v44  ;;  %v3671_v53 = vmul.f32 1.442695, %v3574_v54  ;;  %v4000_v58 = vpack.c.bf16 %v3948_v25, %v3947_v26 }
 0x40f   : > { %v10410_v51 = vadd.f32 %v10182_v4, %v3366_v43  ;;  %v7695_v50 = vpop.f32.mrb[102].mxu0  ;;  %v8340_v59 = vpop.eup %8339  ;;  %v7013_v56 = vadd.f32 -1.0, %v8338_v6  ;;  %8349 = vpow2.f32 %v3675_v57  ;;  %7748 = vmatprep.mubr.msk.bf16.mxu1 %vm1865_vm7, %v3999_v35 }
 0x410   : > { %v3579_v30 = vmin.f32 %v10406_v49, 0.0  ;;  %v3369_v41 = vpop.f32.mrb[103].mxu0  ;;  %v7011_v52 = vadd.f32 -1.0, %v8340_v59  ;;  %8351 = vpow2.f32 %v3671_v53  ;;  %v8342_v21 = vpop.eup %8341  ;;  %v10419_v34 = vadd.f32 %v7695_v50, %v10182_v4 }
 0x411   : > { %v3577_v42 = vmin.f32 %v10410_v51, 0.0  ;;  %v3827_v0 = vsel %vm3507_vm9, %v10345_v13, %v7013_v56  ;;  %v10422_v8 = vadd.f32 %v10182_v4, %v3369_v41  ;;  %v8344_v55 = vpop.eup %8343  ;;  %v7014_v62 = vadd.f32 -1.0, %v8342_v21 }
 0x412   : > { %v3681_v27 = vmul.f32 1.442695, %v3579_v30  ;;  %3891 = vst.msk [vmem:[#allocation2 + $0xf0] sm:$0xff] %vm1344_vm2, %v3827_v0  ;;  %v3825_v9 = vsel %vm3505_vm10, %v10349_v10, %v7011_v52  ;;  %v7012_v13 = vadd.f32 -1.0, %v8344_v55  ;;  %v3580_v18 = vmin.f32 %v10419_v34, 0.0  ;;  %v3949_v7 = vld [vmem:[#allocation2 + $0xc0] sm:$0xff] }
 0x413   : > { %v3677_v46 = vmul.f32 1.442695, %v3577_v42  ;;  %3889 = vst.msk [vmem:[#allocation2 + $0xe0] sm:$0xff] %vm1344_vm2, %v3825_v9  ;;  %v3828_v33 = vsel %vm3508_vm11, %v10364_v1, %v7014_v62  ;;  %v3578_v63 = vmin.f32 %v10422_v8, 0.0  ;;  %vm3515_vm3 = vcmp.gt.f32.partialorder %v10406_v49, 0.0 }
 0x414   : > { %8353 = vpow2.f32 %v3681_v27  ;;  %3892 = vst.msk [vmem:[#allocation2 + $0xf8] sm:$0xff] %vm1344_vm2, %v3828_v33  ;;  %v3826_v3 = vsel %vm3506_vm12, %v10367_v29, %v7012_v13  ;;  %v3683_v2 = vmul.f32 1.442695, %v3580_v18  ;;  %v3952_v40 = vld [vmem:[#allocation2 + $0xd8] sm:$0xff]  ;;  %vm3513_vm4 = vcmp.gt.f32.partialorder %v10410_v51, 0.0 }
 0x415   : > { %8355 = vpow2.f32 %v3677_v46  ;;  %7749 = vmatmul.mubr.msk.bf16.gmra.mrb[84].mxu1 %vm1865_vm7, %v4000_v58  ;;  %v7698_v10 = vpop.f32.mrb[104].mxu0  ;;  %v3950_v1 = vld [vmem:[#allocation2 + $0xc8] sm:$0xff]  ;;  %3890 = vst.msk [vmem:[#allocation2 + $0xe8] sm:$0xff] %vm1344_vm2, %v3826_v3  ;;  %v3679_v16 = vmul.f32 1.442695, %v3578_v63  ;;  %vm3516_vm5 = vcmp.gt.f32.partialorder %v10419_v34, 0.0 }
 0x416   : > { %v8346_v45 = vpop.eup %8345  ;;  %v10436_v60 = vadd.f32 %v7698_v10, %v10182_v4  ;;  %v3382_v17 = vpop.f32.mrb[105].mxu0  ;;  %v4001_v20 = vpack.c.bf16 %v3950_v1, %v3949_v7  ;;  %8357 = vpow2.f32 %v3683_v2  ;;  %vm3514_vm6 = vcmp.gt.f32.partialorder %v10422_v8, 0.0 }
 0x417   : > { %v8348_v31 = vpop.eup %8347  ;;  %v7017_v37 = vadd.f32 -1.0, %v8346_v45  ;;  %v10440_v36 = vadd.f32 %v10182_v4, %v3382_v17  ;;  %v7699_v28 = vpop.f32.mrb[106].mxu0  ;;  %8359 = vpow2.f32 %v3679_v16 }
 0x418   : > { %v7015_v29 = vadd.f32 -1.0, %v8348_v31  ;;  %v3583_v61 = vmin.f32 %v10436_v60, 0.0  ;;  %v3385_v11 = vpop.f32.mrb[107].mxu0  ;;  %7752 = vmatprep.mubr.msk.bf16.mxu1 %vm1865_vm7, %v4001_v20  ;;  %v10451_v12 = vadd.f32 %v7699_v28, %v10182_v4  ;;  %vm3519_vm8 = vcmp.gt.f32.partialorder %v10436_v60, 0.0 }
 0x419   : > { %v3831_v19 = vsel %vm3511_vm13, %v10377_v48, %v7017_v37  ;;  %v3581_v47 = vmin.f32 %v10440_v36, 0.0  ;;  %v8350_v23 = vpop.eup %8349  ;;  %v10454_v54 = vadd.f32 %v10182_v4, %v3385_v11  ;;  %v3951_v48 = vld [vmem:[#allocation2 + $0xd0] sm:$0xff]  ;;  %vm3517_vm9 = vcmp.gt.f32.partialorder %v10440_v36, 0.0 }
 0x41a   : > { %3895 = vst.msk [vmem:[#allocation2 + $0x110] sm:$0xff] %vm1344_vm2, %v3831_v19  ;;  %v3829_v14 = vsel %vm3509_vm14, %v10380_v38, %v7015_v29  ;;  %v3689_v5 = vmul.f32 1.442695, %v3583_v61  ;;  %v8352_v15 = vpop.eup %8351  ;;  %v7018_v22 = vadd.f32 -1.0, %v8350_v23  ;;  %v4002_v44 = vpack.c.bf16 %v3952_v40, %v3951_v48  ;;  %v3953_v41 = vld [vmem:[#allocation2 + $0xe0] sm:$0xff] }
 0x41b   : > { %3893 = vst.msk [vmem:[#allocation2 + $0x100] sm:$0xff] %vm1344_vm2, %v3829_v14  ;;  %v3685_v24 = vmul.f32 1.442695, %v3581_v47  ;;  %v7016_v57 = vadd.f32 -1.0, %v8352_v15  ;;  %v3584_v38 = vmin.f32 %v10451_v12, 0.0  ;;  %v3582_v35 = vmin.f32 %v10454_v54, 0.0 }
 0x41c   : > { %8361 = vpow2.f32 %v3689_v5  ;;  %v3832_v43 = vsel %vm3512_vm0, %v10391_v32, %v7018_v22  ;;  %v3954_v32 = vld [vmem:[#allocation2 + $0xe8] sm:$0xff]  ;;  %v3956_v9 = vld [vmem:[#allocation2 + $0xf8] sm:$0xff]  ;;  %vm3520_vm10 = vcmp.gt.f32.partialorder %v10451_v12, 0.0  ;;  %vm3518_vm11 = vcmp.gt.f32.partialorder %v10454_v54, 0.0 }
 0x41d   : > { %8363 = vpow2.f32 %v3685_v24  ;;  %7753 = vmatmul.mubr.msk.bf16.gmra.mrb[88].mxu1 %vm1865_vm7, %v4002_v44  ;;  %v7702_v6 = vpop.f32.mrb[108].mxu0  ;;  %3896 = vst.msk [vmem:[#allocation2 + $0x118] sm:$0xff] %vm1344_vm2, %v3832_v43  ;;  %v3830_v50 = vsel %vm3510_vm1, %v10394_v39, %v7016_v57  ;;  %v3691_v59 = vmul.f32 1.442695, %v3584_v38  ;;  %v3687_v42 = vmul.f32 1.442695, %v3582_v35 }
 0x41e   : > { %v8354_v53 = vpop.eup %8353  ;;  %v10466_v56 = vadd.f32 %v7702_v6, %v10182_v4  ;;  %v3398_v30 = vpop.f32.mrb[109].mxu0  ;;  %3894 = vst.msk [vmem:[#allocation2 + $0x108] sm:$0xff] %vm1344_vm2, %v3830_v50  ;;  %v4003_v27 = vpack.c.bf16 %v3954_v32, %v3953_v41  ;;  %v10513_v38 = vld [vmem:[%s11857_s4 + $0x1] ss:$0 sm:$0xff] }
 0x41f   : > { %v8356_v25 = vpop.eup %8355  ;;  %v7021_v52 = vadd.f32 -1.0, %v8354_v53  ;;  %v10470_v21 = vadd.f32 %v10182_v4, %v3398_v30  ;;  %v7703_v0 = vpop.f32.mrb[110].mxu0  ;;  %8365 = vpow2.f32 %v3691_v59 }
 0x420   : > { %v7019_v39 = vadd.f32 -1.0, %v8356_v25  ;;  %v3587_v26 = vmin.f32 %v10466_v56, 0.0  ;;  %v3401_v55 = vpop.f32.mrb[111].mxu0  ;;  %8367 = vpow2.f32 %v3687_v42  ;;  %7756 = vmatprep.mubr.msk.bf16.mxu1 %vm1865_vm7, %v4003_v27  ;;  %v8358_v58 = vpop.eup %8357  ;;  %v10481_v33 = vadd.f32 %v7703_v0, %v10182_v4 }
 0x421   : > { %v3835_v62 = vsel %vm3515_vm3, %v10406_v49, %v7021_v52  ;;  %v3585_v46 = vmin.f32 %v10470_v21, 0.0  ;;  %v10484_v63 = vadd.f32 %v10182_v4, %v3401_v55  ;;  %v3955_v49 = vld [vmem:[#allocation2 + $0xf0] sm:$0xff]  ;;  %v8360_v10 = vpop.eup %8359  ;;  %v7022_v45 = vadd.f32 -1.0, %v8358_v58 }
 0x422   : > { %3899 = vst.msk [vmem:[#allocation2 + $0x130] sm:$0xff] %vm1344_vm2, %v3835_v62  ;;  %v3833_v13 = vsel %vm3513_vm4, %v10410_v51, %v7019_v39  ;;  %v3697_v18 = vmul.f32 1.442695, %v3587_v26  ;;  %v4004_v2 = vpack.c.bf16 %v3956_v9, %v3955_v49  ;;  %v7020_v17 = vadd.f32 -1.0, %v8360_v10  ;;  %v3957_v61 = vld [vmem:[#allocation2 + $0x100] sm:$0xff]  ;;  %v3959_v35 = vld [vmem:[#allocation2 + $0x110] sm:$0xff] }
 0x423   : > { %3897 = vst.msk [vmem:[#allocation2 + $0x120] sm:$0xff] %vm1344_vm2, %v3833_v13  ;;  %v3693_v3 = vmul.f32 1.442695, %v3585_v46  ;;  %v3588_v51 = vmin.f32 %v10481_v33, 0.0  ;;  %v3836_v7 = vsel %vm3516_vm5, %v10419_v34, %v7022_v45  ;;  %v3586_v1 = vmin.f32 %v10484_v63, 0.0 }
 0x424   : > { %8369 = vpow2.f32 %v3697_v18  ;;  %3900 = vst.msk [vmem:[#allocation2 + $0x138] sm:$0xff] %vm1344_vm2, %v3836_v7  ;;  %v3834_v16 = vsel %vm3514_vm6, %v10422_v8, %v7020_v17  ;;  %v3960_v15 = vld [vmem:[#allocation2 + $0x118] sm:$0xff]  ;;  %vm3523_vm12 = vcmp.gt.f32.partialorder %v10466_v56, 0.0  ;;  %vm3521_vm13 = vcmp.gt.f32.partialorder %v10470_v21, 0.0 }
 0x425   : > { %8371 = vpow2.f32 %v3693_v3  ;;  %7757 = vmatmul.mubr.msk.bf16.gmra.mrb[92].mxu1 %vm1865_vm7, %v4004_v2  ;;  %v7706_v31 = vpop.f32.mrb[112].mxu0  ;;  %v3699_v28 = vmul.f32 1.442695, %v3588_v51  ;;  %v3958_v34 = vld [vmem:[#allocation2 + $0x108] sm:$0xff]  ;;  %3898 = vst.msk [vmem:[#allocation2 + $0x128] sm:$0xff] %vm1344_vm2, %v3834_v16  ;;  %v4006_v59 = vpack.c.bf16 %v3960_v15, %v3959_v35  ;;  %vm3524_vm14 = vcmp.gt.f32.partialorder %v10481_v33, 0.0 }
 0x426   : > { %v8362_v37 = vpop.eup %8361  ;;  %v10496_v20 = vadd.f32 %v7706_v31, %v10182_v4  ;;  %v3414_v29 = vpop.f32.mrb[113].mxu0  ;;  %v3695_v19 = vmul.f32 1.442695, %v3586_v1  ;;  %v4005_v14 = vpack.c.bf16 %v3958_v34, %v3957_v61  ;;  %vm3522_vm0 = vcmp.gt.f32.partialorder %v10484_v63, 0.0 }
 0x427   : > { %v8364_v11 = vpop.eup %8363  ;;  %v7025_v40 = vadd.f32 -1.0, %v8362_v37  ;;  %v10500_v47 = vadd.f32 %v10182_v4, %v3414_v29  ;;  %v7707_v23 = vpop.f32.mrb[114].mxu0  ;;  %8373 = vpow2.f32 %v3699_v28 }
 0x428   : > { %v7023_v8 = vadd.f32 -1.0, %v8364_v11  ;;  %v3591_v5 = vmin.f32 %v10496_v20, 0.0  ;;  %v3417_v48 = vpop.f32.mrb[115].mxu0  ;;  %8375 = vpow2.f32 %v3695_v19  ;;  %7760 = vmatprep.mubr.msk.bf16.mxu1 %vm1865_vm7, %v4005_v14  ;;  %vm3527_vm1 = vcmp.gt.f32.partialorder %v10496_v20, 0.0 }
 0x429   : > { %v3839_v22 = vsel %vm3519_vm8, %v10436_v60, %v7025_v40  ;;  %v3589_v24 = vmin.f32 %v10500_v47, 0.0  ;;  %v8366_v4 = vpop.eup %8365  ;;  %v10516_v60 = vadd.f32 %v10513_v38, %v7707_v23  ;;  %v10519_v43 = vadd.f32 %v10513_v38, %v3417_v48 }
 0x42a   : > { %3903 = vst.msk [vmem:[#allocation2 + $0x150] sm:$0xff] %vm1344_vm2, %v3839_v22  ;;  %v3837_v44 = vsel %vm3517_vm9, %v10440_v36, %v7023_v8  ;;  %v3705_v57 = vmul.f32 1.442695, %v3591_v5  ;;  %v8368_v6 = vpop.eup %8367  ;;  %v7026_v53 = vadd.f32 -1.0, %v8366_v4  ;;  %v3961_v26 = vld [vmem:[#allocation2 + $0x120] sm:$0xff]  ;;  %vm3525_vm3 = vcmp.gt.f32.partialorder %v10500_v47, 0.0 }
 0x42b   : > { %3901 = vst.msk [vmem:[#allocation2 + $0x140] sm:$0xff] %vm1344_vm2, %v3837_v44  ;;  %v3701_v50 = vmul.f32 1.442695, %v3589_v24  ;;  %v7024_v36 = vadd.f32 -1.0, %v8368_v6  ;;  %v3592_v30 = vmin.f32 %v10516_v60, 0.0  ;;  %v3590_v32 = vmin.f32 %v10519_v43, 0.0 }
 0x42c   : > { %8377 = vpow2.f32 %v3705_v57  ;;  %v3840_v41 = vsel %vm3520_vm10, %v10451_v12, %v7026_v53  ;;  %v3962_v12 = vld [vmem:[#allocation2 + $0x128] sm:$0xff]  ;;  %v3964_v10 = vld [vmem:[#allocation2 + $0x138] sm:$0xff]  ;;  %vm3528_vm4 = vcmp.gt.f32.partialorder %v10516_v60, 0.0  ;;  %vm3526_vm5 = vcmp.gt.f32.partialorder %v10519_v43, 0.0 }
 0x42d   : > { %8379 = vpow2.f32 %v3701_v50  ;;  %7761 = vmatmul.mubr.msk.bf16.gmra.mrb[96].mxu1 %vm1865_vm7, %v4006_v59  ;;  %v7710_v25 = vpop.f32.mrb[116].mxu0  ;;  %3904 = vst.msk [vmem:[#allocation2 + $0x158] sm:$0xff] %vm1344_vm2, %v3840_v41  ;;  %v3838_v42 = vsel %vm3518_vm11, %v10454_v54, %v7024_v36  ;;  %v3707_v0 = vmul.f32 1.442695, %v3592_v30  ;;  %v3703_v62 = vmul.f32 1.442695, %v3590_v32 }
 0x42e   : > { %v8370_v52 = vpop.eup %8369  ;;  %v10531_v27 = vadd.f32 %v10513_v38, %v7710_v25  ;;  %v3430_v39 = vpop.f32.mrb[117].mxu0  ;;  %3902 = vst.msk [vmem:[#allocation2 + $0x148] sm:$0xff] %vm1344_vm2, %v3838_v42  ;;  %v4007_v13 = vpack.c.bf16 %v3962_v12, %v3961_v26 }
 0x42f   : > { %v8372_v55 = vpop.eup %8371  ;;  %v7029_v9 = vadd.f32 -1.0, %v8370_v52  ;;  %v10535_v46 = vadd.f32 %v10513_v38, %v3430_v39  ;;  %v7711_v58 = vpop.f32.mrb[118].mxu0  ;;  %8381 = vpow2.f32 %v3707_v0 }
 0x430   : > { %v7027_v54 = vadd.f32 -1.0, %v8372_v55  ;;  %v3595_v18 = vmin.f32 %v10531_v27, 0.0  ;;  %v3433_v49 = vpop.f32.mrb[119].mxu0  ;;  %8383 = vpow2.f32 %v3703_v62  ;;  %7764 = vmatprep.mubr.msk.bf16.mxu1 %vm1865_vm7, %v4007_v13  ;;  %v10546_v7 = vadd.f32 %v10513_v38, %v7711_v58 }
 0x431   : > { %v3843_v45 = vsel %vm3523_vm12, %v10466_v56, %v7029_v9  ;;  %v3593_v3 = vmin.f32 %v10535_v46, 0.0  ;;  %v8374_v2 = vpop.eup %8373  ;;  %v10549_v1 = vadd.f32 %v10513_v38, %v3433_v49  ;;  %v3963_v56 = vld [vmem:[#allocation2 + $0x130] sm:$0xff]  ;;  %vm3531_vm6 = vcmp.gt.f32.partialorder %v10531_v27, 0.0 }
 0x432   : > { %3907 = vst.msk [vmem:[#allocation2 + $0x170] sm:$0xff] %vm1344_vm2, %v3843_v45  ;;  %v3841_v17 = vsel %vm3521_vm13, %v10470_v21, %v7027_v54  ;;  %v3713_v51 = vmul.f32 1.442695, %v3595_v18  ;;  %v8376_v31 = vpop.eup %8375  ;;  %v7030_v37 = vadd.f32 -1.0, %v8374_v2  ;;  %v4008_v28 = vpack.c.bf16 %v3964_v10, %v3963_v56  ;;  %v3965_v5 = vld [vmem:[#allocation2 + $0x140] sm:$0xff] }
 0x433   : > { %3905 = vst.msk [vmem:[#allocation2 + $0x160] sm:$0xff] %vm1344_vm2, %v3841_v17  ;;  %v3709_v16 = vmul.f32 1.442695, %v3593_v3  ;;  %v7028_v29 = vadd.f32 -1.0, %v8376_v31  ;;  %v3596_v21 = vmin.f32 %v10546_v7, 0.0  ;;  %v3594_v34 = vmin.f32 %v10549_v1, 0.0 }
 0x434   : > { %8385 = vpow2.f32 %v3713_v51  ;;  %v3844_v61 = vsel %vm3524_vm14, %v10481_v33, %v7030_v37  ;;  %v3968_v6 = vld [vmem:[#allocation2 + $0x158] sm:$0xff]  ;;  %vm3529_vm8 = vcmp.gt.f32.partialorder %v10535_v46, 0.0  ;;  %vm3532_vm9 = vcmp.gt.f32.partialorder %v10546_v7, 0.0 }
 0x435   : > { %8387 = vpow2.f32 %v3709_v16  ;;  %7765 = vmatmul.mubr.msk.bf16.gmra.mrb[100].mxu1 %vm1865_vm7, %v4008_v28  ;;  %v7714_v11 = vpop.f32.mrb[120].mxu0  ;;  %3908 = vst.msk [vmem:[#allocation2 + $0x178] sm:$0xff] %vm1344_vm2, %v3844_v61  ;;  %v3842_v19 = vsel %vm3522_vm0, %v10484_v63, %v7028_v29  ;;  %v3715_v23 = vmul.f32 1.442695, %v3596_v21  ;;  %v3966_v33 = vld [vmem:[#allocation2 + $0x148] sm:$0xff]  ;;  %vm3530_vm10 = vcmp.gt.f32.partialorder %v10549_v1, 0.0 }
 0x436   : > { %v8378_v40 = vpop.eup %8377  ;;  %v10561_v14 = vadd.f32 %v10513_v38, %v7714_v11  ;;  %v3446_v8 = vpop.f32.mrb[121].mxu0  ;;  %3906 = vst.msk [vmem:[#allocation2 + $0x168] sm:$0xff] %vm1344_vm2, %v3842_v19  ;;  %v3711_v22 = vmul.f32 1.442695, %v3594_v34  ;;  %v4009_v44 = vpack.c.bf16 %v3966_v33, %v3965_v5 }
 0x437   : > { %v8380_v48 = vpop.eup %8379  ;;  %v7033_v15 = vadd.f32 -1.0, %v8378_v40  ;;  %v10565_v24 = vadd.f32 %v10513_v38, %v3446_v8  ;;  %v7715_v4 = vpop.f32.mrb[122].mxu0  ;;  %8389 = vpow2.f32 %v3715_v23 }
 0x438   : > { %v7031_v63 = vadd.f32 -1.0, %v8380_v48  ;;  %v3599_v57 = vmin.f32 %v10561_v14, 0.0  ;;  %v3449_v35 = vpop.f32.mrb[123].mxu0  ;;  %8391 = vpow2.f32 %v3711_v22  ;;  %7768 = vmatprep.mubr.msk.bf16.mxu1 %vm1865_vm7, %v4009_v44  ;;  %v10576_v41 = vadd.f32 %v10513_v38, %v7715_v4 }
 0x439   : > { %v3847_v53 = vsel %vm3527_vm1, %v10496_v20, %v7033_v15  ;;  %v3597_v50 = vmin.f32 %v10565_v24, 0.0  ;;  %v8382_v59 = vpop.eup %8381  ;;  %v10579_v32 = vadd.f32 %v10513_v38, %v3449_v35  ;;  %v3967_v20 = vld [vmem:[#allocation2 + $0x150] sm:$0xff]  ;;  %vm3535_vm11 = vcmp.gt.f32.partialorder %v10561_v14, 0.0 }
 0x43a   : > { %3911 = vst.msk [vmem:[#allocation2 + $0x190] sm:$0xff] %vm1344_vm2, %v3847_v53  ;;  %v3845_v36 = vsel %vm3525_vm3, %v10500_v47, %v7031_v63  ;;  %v3721_v30 = vmul.f32 1.442695, %v3599_v57  ;;  %v8384_v25 = vpop.eup %8383  ;;  %v7034_v52 = vadd.f32 -1.0, %v8382_v59  ;;  %v4010_v0 = vpack.c.bf16 %v3968_v6, %v3967_v20  ;;  %v3969_v18 = vld [vmem:[#allocation2 + $0x160] sm:$0xff] }
 0x43b   : > { %3909 = vst.msk [vmem:[#allocation2 + $0x180] sm:$0xff] %vm1344_vm2, %v3845_v36  ;;  %v3717_v42 = vmul.f32 1.442695, %v3597_v50  ;;  %v7032_v39 = vadd.f32 -1.0, %v8384_v25  ;;  %v3600_v47 = vmin.f32 %v10576_v41, 0.0  ;;  %v3598_v12 = vmin.f32 %v10579_v32, 0.0 }
 0x43c   : > { %8393 = vpow2.f32 %v3721_v30  ;;  %v3848_v26 = vsel %vm3528_vm4, %v10516_v60, %v7034_v52  ;;  %v3972_v31 = vld [vmem:[#allocation2 + $0x178] sm:$0xff]  ;;  %vm3533_vm12 = vcmp.gt.f32.partialorder %v10565_v24, 0.0  ;;  %vm3536_vm13 = vcmp.gt.f32.partialorder %v10576_v41, 0.0 }
 0x43d   : > { %8395 = vpow2.f32 %v3717_v42  ;;  %7769 = vmatmul.mubr.msk.bf16.gmra.mrb[104].mxu1 %vm1865_vm7, %v4010_v0  ;;  %v7718_v55 = vpop.f32.mrb[124].mxu0  ;;  %3912 = vst.msk [vmem:[#allocation2 + $0x198] sm:$0xff] %vm1344_vm2, %v3848_v26  ;;  %v3846_v62 = vsel %vm3526_vm5, %v10519_v43, %v7032_v39  ;;  %v3723_v58 = vmul.f32 1.442695, %v3600_v47  ;;  %v3970_v60 = vld [vmem:[#allocation2 + $0x168] sm:$0xff]  ;;  %vm3534_vm14 = vcmp.gt.f32.partialorder %v10579_v32, 0.0 }
 0x43e   : > { %v8386_v9 = vpop.eup %8385  ;;  %v10591_v13 = vadd.f32 %v10513_v38, %v7718_v55  ;;  %v3462_v54 = vpop.f32.mrb[125].mxu0  ;;  %3910 = vst.msk [vmem:[#allocation2 + $0x188] sm:$0xff] %vm1344_vm2, %v3846_v62  ;;  %v3719_v45 = vmul.f32 1.442695, %v3598_v12  ;;  %v4011_v17 = vpack.c.bf16 %v3970_v60, %v3969_v18 }
 0x43f   : > { %v8388_v49 = vpop.eup %8387  ;;  %v7037_v10 = vadd.f32 -1.0, %v8386_v9  ;;  %v10595_v3 = vadd.f32 %v10513_v38, %v3462_v54  ;;  %v7719_v2 = vpop.f32.mrb[126].mxu0  ;;  %8397 = vpow2.f32 %v3723_v58 }
 0x440   : > { %v7035_v43 = vadd.f32 -1.0, %v8388_v49  ;;  %v3603_v51 = vmin.f32 %v10591_v13, 0.0  ;;  %v3465_v56 = vpop.f32.mrb[127].mxu0  ;;  %8399 = vpow2.f32 %v3719_v45  ;;  %7772 = vmatprep.mubr.msk.bf16.mxu1 %vm1865_vm7, %v4011_v17  ;;  %v10606_v61 = vadd.f32 %v10513_v38, %v7719_v2 }
 0x441   : > { %v3851_v37 = vsel %vm3531_vm6, %v10531_v27, %v7037_v10  ;;  %v3601_v16 = vmin.f32 %v10595_v3, 0.0  ;;  %v8390_v28 = vpop.eup %8389  ;;  %v10609_v34 = vadd.f32 %v10513_v38, %v3465_v56  ;;  %v3971_v27 = vld [vmem:[#allocation2 + $0x170] sm:$0xff]  ;;  %vm3539_vm0 = vcmp.gt.f32.partialorder %v10591_v13, 0.0 }
 0x442   : > { %3915 = vst.msk [vmem:[#allocation2 + $0x1b0] sm:$0xff] %vm1344_vm2, %v3851_v37  ;;  %v3849_v29 = vsel %vm3529_vm8, %v10535_v46, %v7035_v43  ;;  %v3729_v21 = vmul.f32 1.442695, %v3603_v51  ;;  %v8392_v11 = vpop.eup %8391  ;;  %v7038_v40 = vadd.f32 -1.0, %v8390_v28  ;;  %v4012_v23 = vpack.c.bf16 %v3972_v31, %v3971_v27  ;;  %v3973_v22 = vld [vmem:[#allocation2 + $0x180] sm:$0xff]  ;;  %v3975_v59 = vld [vmem:[#allocation2 + $0x190] sm:$0xff] }
 0x443   : > { %3913 = vst.msk [vmem:[#allocation2 + $0x1a0] sm:$0xff] %vm1344_vm2, %v3849_v29  ;;  %v3725_v19 = vmul.f32 1.442695, %v3601_v16  ;;  %v7036_v8 = vadd.f32 -1.0, %v8392_v11  ;;  %v3604_v46 = vmin.f32 %v10606_v61, 0.0  ;;  %v3602_v38 = vmin.f32 %v10609_v34, 0.0 }
 0x444   : > { %8401 = vpow2.f32 %v3729_v21  ;;  %v3852_v5 = vsel %vm3532_vm9, %v10546_v7, %v7038_v40  ;;  %v3976_v6 = vld [vmem:[#allocation2 + $0x198] sm:$0xff]  ;;  %vm3537_vm1 = vcmp.gt.f32.partialorder %v10595_v3, 0.0  ;;  %vm3540_vm3 = vcmp.gt.f32.partialorder %v10606_v61, 0.0  ;;  %v8019_v37 = vld [vmem:[%s11858_s5] sm:$0xff]   ;;  %v8020_v21 = vld [vmem:[%s11858_s5 + $0x8] sm:$0xff]  }
 0x445   : > { %8403 = vpow2.f32 %v3725_v19  ;;  %7773 = vmatmul.mubr.msk.bf16.gmra.mrb[108].mxu1 %vm1865_vm7, %v4012_v23  ;;  %3916 = vst.msk [vmem:[#allocation2 + $0x1b8] sm:$0xff] %vm1344_vm2, %v3852_v5  ;;  %v3850_v48 = vsel %vm3530_vm10, %v10549_v1, %v7036_v8  ;;  %v3731_v15 = vmul.f32 1.442695, %v3604_v46  ;;  %v3974_v4 = vld [vmem:[#allocation2 + $0x188] sm:$0xff]  ;;  %v3727_v7 = vmul.f32 1.442695, %v3602_v38  ;;  %7792 = vmatprep.subr.bf16.mxu0 %v8019_v37 }
 0x446   : > { %v8394_v33 = vpop.eup %8393  ;;  %3914 = vst.msk [vmem:[#allocation2 + $0x1a8] sm:$0xff] %vm1344_vm2, %v3850_v48  ;;  %v4013_v57 = vpack.c.bf16 %v3974_v4, %v3973_v22  ;;  %v4014_v20 = vpack.c.bf16 %v3976_v6, %v3975_v59  ;;  %vm3538_vm4 = vcmp.gt.f32.partialorder %v10609_v34, 0.0  ;;  %7793 = vmatpush3.bf16.msra.mxu0 %v8019_v37  ;;  %v8022_v19 = vld [vmem:[%s11858_s5 + $0x18] sm:$0xff]  }
 0x447   : > { %v8396_v44 = vpop.eup %8395  ;;  %v7041_v63 = vadd.f32 -1.0, %v8394_v33  ;;  %8405 = vpow2.f32 %v3731_v15  ;;  %7794 = vmatprep.subr.bf16.mxu0 %v8020_v21 }
 0x448   : > { %v7039_v35 = vadd.f32 -1.0, %v8396_v44  ;;  %8407 = vpow2.f32 %v3727_v7  ;;  %7776 = vmatprep.mubr.msk.bf16.mxu1 %vm1865_vm7, %v4013_v57 }
 0x449   : > { %v3855_v53 = vsel %vm3535_vm11, %v10561_v14, %v7041_v63  ;;  %v8398_v1 = vpop.eup %8397  ;;  %v3979_v62 = vld [vmem:[#allocation2 + $0x1b0] sm:$0xff] }
 0x44a   : > { %3919 = vst.msk [vmem:[#allocation2 + $0x1d0] sm:$0xff] %vm1344_vm2, %v3855_v53  ;;  %v3853_v50 = vsel %vm3533_vm12, %v10565_v24, %v7039_v35  ;;  %v8400_v36 = vpop.eup %8399  ;;  %v7042_v30 = vadd.f32 -1.0, %v8398_v1  ;;  %v3977_v42 = vld [vmem:[#allocation2 + $0x1a0] sm:$0xff]  ;;  %7795 = vmatpush3.bf16.msra.mxu0 %v8020_v21 }
 0x44b   : > { %3917 = vst.msk [vmem:[#allocation2 + $0x1c0] sm:$0xff] %vm1344_vm2, %v3853_v50  ;;  %v7040_v25 = vadd.f32 -1.0, %v8400_v36 }
 0x44c   : > { %v3856_v14 = vsel %vm3536_vm13, %v10576_v41, %v7042_v30  ;;  %v3980_v41 = vld [vmem:[#allocation2 + $0x1b8] sm:$0xff] }
 0x44d   : > { %7777 = vmatmul.mubr.msk.bf16.gmra.mrb[112].mxu1 %vm1865_vm7, %v4014_v20  ;;  %3920 = vst.msk [vmem:[#allocation2 + $0x1d8] sm:$0xff] %vm1344_vm2, %v3856_v14  ;;  %v3854_v24 = vsel %vm3534_vm14, %v10579_v32, %v7040_v25  ;;  %v3978_v0 = vld [vmem:[#allocation2 + $0x1a8] sm:$0xff]  ;;  %v4016_v18 = vpack.c.bf16 %v3980_v41, %v3979_v62 }
 0x44e   : > { %v8402_v52 = vpop.eup %8401  ;;  %3918 = vst.msk [vmem:[#allocation2 + $0x1c8] sm:$0xff] %vm1344_vm2, %v3854_v24  ;;  %v4015_v26 = vpack.c.bf16 %v3978_v0, %v3977_v42 }
 0x44f   : > { %v8404_v39 = vpop.eup %8403  ;;  %v7045_v47 = vadd.f32 -1.0, %v8402_v52 }
 0x450   : > { %v7043_v12 = vadd.f32 -1.0, %v8404_v39  ;;  %7780 = vmatprep.mubr.msk.bf16.mxu1 %vm1865_vm7, %v4015_v26 }
 0x451   : > { %v3859_v55 = vsel %vm3539_vm0, %v10591_v13, %v7045_v47  ;;  %v8406_v9 = vpop.eup %8405  ;;  %v3983_v17 = vld [vmem:[#allocation2 + $0x1d0] sm:$0xff] }
 0x452   : > { %3923 = vst.msk [vmem:[#allocation2 + $0x1f0] sm:$0xff] %vm1344_vm2, %v3859_v55  ;;  %v3857_v32 = vsel %vm3537_vm1, %v10595_v3, %v7043_v12  ;;  %v8408_v58 = vpop.eup %8407  ;;  %v7046_v54 = vadd.f32 -1.0, %v8406_v9  ;;  %v3981_v10 = vld [vmem:[#allocation2 + $0x1c0] sm:$0xff] }
 0x453   : > { %3921 = vst.msk [vmem:[#allocation2 + $0x1e0] sm:$0xff] %vm1344_vm2, %v3857_v32  ;;  %v7044_v60 = vadd.f32 -1.0, %v8408_v58 }
 0x454   : > { %v3860_v13 = vsel %vm3540_vm3, %v10606_v61, %v7046_v54  ;;  %v3984_v2 = vld [vmem:[#allocation2 + $0x1d8] sm:$0xff]  ;;  %v8021_v61 = vld [vmem:[%s11858_s5 + $0x10] sm:$0xff]  }
 0x455   : > { %7781 = vmatmul.mubr.msk.bf16.gmra.mrb[116].mxu1 %vm1865_vm7, %v4016_v18  ;;  %3924 = vst.msk [vmem:[#allocation2 + $0x1f8] sm:$0xff] %vm1344_vm2, %v3860_v13  ;;  %v3858_v49 = vsel %vm3538_vm4, %v10609_v34, %v7044_v60  ;;  %v3982_v45 = vld [vmem:[#allocation2 + $0x1c8] sm:$0xff]  ;;  %v4018_v43 = vpack.c.bf16 %v3984_v2, %v3983_v17  ;;  %7796 = vmatprep.subr.bf16.mxu0 %v8021_v61  ;;  %v10665_v34 = vld [vmem:[%s11857_s4 + $0x2] ss:$0 sm:$0xff] }
 0x456   : > { %3922 = vst.msk [vmem:[#allocation2 + $0x1e8] sm:$0xff] %vm1344_vm2, %v3858_v49  ;;  %v4017_v3 = vpack.c.bf16 %v3982_v45, %v3981_v10  ;;  %7797 = vmatpush3.bf16.msra.mxu0 %v8021_v61 }
 0x457   : > { %7798 = vmatprep.subr.bf16.mxu0 %v8022_v19 }
 0x458   : > { %7784 = vmatprep.mubr.msk.bf16.mxu1 %vm1865_vm7, %v4017_v3 }
 0x459   : > { %v3987_v28 = vld [vmem:[#allocation2 + $0x1f0] sm:$0xff] }
 0x45a   : > { %v3985_v51 = vld [vmem:[#allocation2 + $0x1e0] sm:$0xff]  ;;  %7799 = vmatpush3.bf16.msra.mxu0 %v8022_v19 }
 0x45c   : > { %v3988_v16 = vld [vmem:[#allocation2 + $0x1f8] sm:$0xff] }
 0x45d   : > { %7785 = vmatmul.mubr.msk.bf16.gmra.mrb[120].mxu1 %vm1865_vm7, %v4018_v43  ;;  %v3986_v56 = vld [vmem:[#allocation2 + $0x1e8] sm:$0xff]  ;;  %v4020_v29 = vpack.c.bf16 %v3988_v16, %v3987_v28 }
 0x45e   : > { %v4019_v31 = vpack.c.bf16 %v3986_v56, %v3985_v51 }
 0x460   : > { %7788 = vmatprep.mubr.msk.bf16.mxu1 %vm1865_vm7, %v4019_v31 }
 0x465   : > { %7789 = vmatmul.mubr.msk.bf16.gmra.mrb[124].mxu1 %vm1865_vm7, %v4020_v29 }
 0x4ba   : > { %v7730_v27 = vpop.f32.mrb[64].mxu1 }
 0x4bb   : > { %v10668_v11 = vadd.f32 %v7730_v27, %v10665_v34  ;;  %v4192_v40 = vpop.f32.mrb[65].mxu1 }
 0x4bc   : > { %v4193_v23 = vadd.f32 %v10665_v34, %v4192_v40  ;;  %v7731_v8 = vpop.f32.mrb[66].mxu1 }
 0x4bd   : > { %v4513_v46 = vmin.f32 %v10668_v11, 0.0  ;;  %v10676_v5 = vadd.f32 %v7731_v8, %v10665_v34  ;;  %v4195_v38 = vpop.f32.mrb[67].mxu1  ;;  %vm4449_vm8 = vcmp.gt.f32.partialorder %v10668_v11, 0.0 }
 0x4be   : > { %v4511_v33 = vmin.f32 %v4193_v23, 0.0  ;;  %v4196_v48 = vadd.f32 %v10665_v34, %v4195_v38  ;;  %vm4447_vm5 = vcmp.gt.f32.partialorder %v4193_v23, 0.0 }
 0x4bf   : > { %v4579_v15 = vmul.f32 1.442695, %v4513_v46  ;;  %v4514_v22 = vmin.f32 %v10676_v5, 0.0  ;;  %vm4450_vm9 = vcmp.gt.f32.partialorder %v10676_v5, 0.0 }
 0x4c0   : > { %v4575_v4 = vmul.f32 1.442695, %v4511_v33  ;;  %v4512_v44 = vmin.f32 %v4196_v48, 0.0  ;;  %vm4448_vm6 = vcmp.gt.f32.partialorder %v4196_v48, 0.0 }
 0x4c1   : > { %8409 = vpow2.f32 %v4579_v15  ;;  %v4581_v63 = vmul.f32 1.442695, %v4514_v22 }
 0x4c2   : > { %8411 = vpow2.f32 %v4575_v4  ;;  %v4577_v7 = vmul.f32 1.442695, %v4512_v44 }
 0x4c3   : > { %8413 = vpow2.f32 %v4581_v63  ;;  %v7734_v57 = vpop.f32.mrb[68].mxu1 }
 0x4c4   : > { %8415 = vpow2.f32 %v4577_v7  ;;  %v10681_v35 = vadd.f32 %v7734_v57, %v10665_v34  ;;  %v4208_v6 = vpop.f32.mrb[69].mxu1 }
 0x4c5   : > { %v10684_v53 = vadd.f32 %v10665_v34, %v4208_v6  ;;  %v7735_v1 = vpop.f32.mrb[70].mxu1 }
 0x4c6   : > { %v4517_v50 = vmin.f32 %v10681_v35, 0.0  ;;  %v10688_v59 = vadd.f32 %v7735_v1, %v10665_v34  ;;  %v4211_v36 = vpop.f32.mrb[71].mxu1  ;;  %vm4453_vm12 = vcmp.gt.f32.partialorder %v10681_v35, 0.0 }
 0x4c7   : > { %v4515_v30 = vmin.f32 %v10684_v53, 0.0  ;;  %v10692_v20 = vadd.f32 %v10665_v34, %v4211_v36  ;;  %vm4451_vm10 = vcmp.gt.f32.partialorder %v10684_v53, 0.0 }
 0x4c8   : > { %v4587_v25 = vmul.f32 1.442695, %v4517_v50  ;;  %v4518_v14 = vmin.f32 %v10688_v59, 0.0  ;;  %vm4454_vm13 = vcmp.gt.f32.partialorder %v10688_v59, 0.0 }
 0x4c9   : > { %v4583_v52 = vmul.f32 1.442695, %v4515_v30  ;;  %v4516_v24 = vmin.f32 %v10692_v20, 0.0  ;;  %vm4452_vm11 = vcmp.gt.f32.partialorder %v10692_v20, 0.0 }
 0x4ca   : > { %8417 = vpow2.f32 %v4587_v25  ;;  %v4589_v0 = vmul.f32 1.442695, %v4518_v14 }
 0x4cb   : > { %v8410_v42 = vpop.eup %8409  ;;  %8419 = vpow2.f32 %v4583_v52  ;;  %v4585_v47 = vmul.f32 1.442695, %v4516_v24  ;;  %v7738_v55 = vpop.f32.mrb[72].mxu1 }
 0x4cc   : > { %v8412_v39 = vpop.eup %8411  ;;  %8421 = vpow2.f32 %v4589_v0  ;;  %v10697_v9 = vadd.f32 %v7738_v55, %v10665_v34  ;;  %v4224_v32 = vpop.f32.mrb[73].mxu1  ;;  %v7095_v54 = vadd.f32 -1.0, %v8410_v42 }
 0x4cd   : > { %v8414_v26 = vpop.eup %8413  ;;  %v7093_v12 = vadd.f32 -1.0, %v8412_v39  ;;  %8423 = vpow2.f32 %v4585_v47  ;;  %v10700_v18 = vadd.f32 %v10665_v34, %v4224_v32  ;;  %v7739_v60 = vpop.f32.mrb[74].mxu1 }
 0x4ce   : > { %v8416_v41 = vpop.eup %8415  ;;  %v4521_v13 = vmin.f32 %v10697_v9, 0.0  ;;  %v10705_v49 = vadd.f32 %v7739_v60, %v10665_v34  ;;  %v4227_v10 = vpop.f32.mrb[75].mxu1  ;;  %v7096_v3 = vadd.f32 -1.0, %v8414_v26  ;;  %v4769_v56 = vsel %vm4449_vm8, %v10668_v11, %v7095_v54 }
 0x4cf   : > { %v4767_v62 = vsel %vm4447_vm5, %v4193_v23, %v7093_v12  ;;  %v7094_v58 = vadd.f32 -1.0, %v8416_v41  ;;  %v4519_v2 = vmin.f32 %v10700_v18, 0.0  ;;  %v10710_v17 = vadd.f32 %v10665_v34, %v4227_v10 }
 0x4d0   : > { %4895 = vrot.lane.b32.xlu0 %v4767_v62, %s8734_s26  ;;  %v4595_v43 = vmul.f32 1.442695, %v4521_v13  ;;  %v4522_v51 = vmin.f32 %v10705_v49, 0.0  ;;  %v4770_v29 = vsel %vm4450_vm9, %v10676_v5, %v7096_v3  ;;  %vm4455_vm14 = vcmp.gt.f32.partialorder %v10700_v18, 0.0 }
 0x4d1   : > { %v4768_v45 = vsel %vm4448_vm6, %v4196_v48, %v7094_v58  ;;  %v4591_v31 = vmul.f32 1.442695, %v4519_v2  ;;  %v4520_v37 = vmin.f32 %v10710_v17, 0.0  ;;  %vm4456_vm0 = vcmp.gt.f32.partialorder %v10710_v17, 0.0 }
 0x4d2   : > { %4897 = vrot.lane.b32.xlu1 %v4768_v45, %s8734_s26  ;;  %8425 = vpow2.f32 %v4595_v43  ;;  %v4597_v28 = vmul.f32 1.442695, %v4522_v51  ;;  %vm4457_vm1 = vcmp.gt.f32.partialorder %v10697_v9, 0.0  ;;  %vm4458_vm3 = vcmp.gt.f32.partialorder %v10705_v49, 0.0 }
 0x4d3   : > { %8427 = vpow2.f32 %v4591_v31  ;;  %v4593_v61 = vmul.f32 1.442695, %v4520_v37 }
 0x4d4   : > { %4899 = vrot.lane.b32.xlu0 %v4769_v56, %s8734_s26  ;;  %v8418_v16 = vpop.eup %8417  ;;  %8429 = vpow2.f32 %v4597_v28 }
 0x4d5   : > { %v8420_v21 = vpop.eup %8419  ;;  %8431 = vpow2.f32 %v4593_v61  ;;  %v7099_v46 = vadd.f32 -1.0, %v8418_v16 }
 0x4d6   : > { %4901 = vrot.lane.b32.xlu1 %v4770_v29, %s8734_s26  ;;  %v8422_v27 = vpop.eup %8421  ;;  %v7097_v11 = vadd.f32 -1.0, %v8420_v21 }
 0x4d7   : > { %v8424_v40 = vpop.eup %8423  ;;  %v7100_v22 = vadd.f32 -1.0, %v8422_v27  ;;  %v4773_v6 = vsel %vm4453_vm12, %v10681_v35, %v7099_v46 }
 0x4d8   : > { %v7742_v19 = vpop.f32.mrb[76].mxu1  ;;  %v4771_v23 = vsel %vm4451_vm10, %v10684_v53, %v7097_v11  ;;  %v7098_v8 = vadd.f32 -1.0, %v8424_v40 }
 0x4d9   : > { %v10724_v5 = vadd.f32 %v7742_v19, %v10665_v34  ;;  %v4240_v38 = vpop.f32.mrb[77].mxu1  ;;  %4903 = vrot.lane.b32.xlu0 %v4771_v23, %s8734_s26 }
 0x4da   : > { %v10728_v33 = vadd.f32 %v10665_v34, %v4240_v38  ;;  %v7743_v48 = vpop.f32.mrb[78].mxu1  ;;  %v4772_v15 = vsel %vm4452_vm11, %v10692_v20, %v7098_v8  ;;  %v4774_v20 = vsel %vm4454_vm13, %v10688_v59, %v7100_v22 }
 0x4db   : > { %v4525_v4 = vmin.f32 %v10724_v5, 0.0  ;;  %v10734_v44 = vadd.f32 %v7743_v48, %v10665_v34  ;;  %v4243_v63 = vpop.f32.mrb[79].mxu1  ;;  %4905 = vrot.lane.b32.xlu1 %v4772_v15, %s8734_s26  ;;  %vm4461_vm5 = vcmp.gt.f32.partialorder %v10724_v5, 0.0 }
 0x4dc   : > { %v4523_v7 = vmin.f32 %v10728_v33, 0.0  ;;  %v10739_v57 = vadd.f32 %v10665_v34, %v4243_v63  ;;  %v8426_v50 = vpop.eup %8425  ;;  %vm4459_vm4 = vcmp.gt.f32.partialorder %v10728_v33, 0.0 }
 0x4dd   : > { %v4603_v53 = vmul.f32 1.442695, %v4525_v4  ;;  %v4526_v1 = vmin.f32 %v10734_v44, 0.0  ;;  %4907 = vrot.lane.b32.xlu0 %v4773_v6, %s8734_s26  ;;  %v8428_v25 = vpop.eup %8427  ;;  %v7103_v26 = vadd.f32 -1.0, %v8426_v50  ;;  %vm4462_vm8 = vcmp.gt.f32.partialorder %v10734_v44, 0.0 }
 0x4de   : > { %v4599_v36 = vmul.f32 1.442695, %v4523_v7  ;;  %v4524_v30 = vmin.f32 %v10739_v57, 0.0  ;;  %v8430_v52 = vpop.eup %8429  ;;  %v7101_v42 = vadd.f32 -1.0, %v8428_v25  ;;  %vm4460_vm6 = vcmp.gt.f32.partialorder %v10739_v57, 0.0 }
 0x4df   : > { %8433 = vpow2.f32 %v4603_v53  ;;  %v4605_v14 = vmul.f32 1.442695, %v4526_v1  ;;  %4909 = vrot.lane.b32.xlu1 %v4774_v20, %s8734_s26  ;;  %v8432_v0 = vpop.eup %8431  ;;  %v4777_v43 = vsel %vm4457_vm1, %v10697_v9, %v7103_v26 }
 0x4e0   : > { %8435 = vpow2.f32 %v4599_v36  ;;  %v4601_v35 = vmul.f32 1.442695, %v4524_v30  ;;  %v7746_v24 = vpop.f32.mrb[80].mxu1  ;;  %v4775_v41 = vsel %vm4455_vm14, %v10700_v18, %v7101_v42  ;;  %v7102_v55 = vadd.f32 -1.0, %v8432_v0 }
 0x4e1   : > { %v10750_v39 = vadd.f32 %v7746_v24, %v10665_v34  ;;  %v4256_v47 = vpop.f32.mrb[81].mxu1  ;;  %4911 = vrot.lane.b32.xlu0 %v4775_v41, %s8734_s26  ;;  %v7104_v18 = vadd.f32 -1.0, %v8430_v52 }
 0x4e2   : > { %8437 = vpow2.f32 %v4601_v35  ;;  %v10753_v59 = vadd.f32 %v10665_v34, %v4256_v47  ;;  %v7747_v12 = vpop.f32.mrb[82].mxu1  ;;  %v4776_v13 = vsel %vm4456_vm0, %v10710_v17, %v7102_v55 }
 0x4e3   : > { %8439 = vpow2.f32 %v4605_v14  ;;  %v4529_v32 = vmin.f32 %v10750_v39, 0.0  ;;  %v10759_v62 = vadd.f32 %v7747_v12, %v10665_v34  ;;  %v4259_v58 = vpop.f32.mrb[83].mxu1  ;;  %4913 = vrot.lane.b32.xlu1 %v4776_v13, %s8734_s26  ;;  %v4778_v31 = vsel %vm4458_vm3, %v10705_v49, %v7104_v18 }
 0x4e4   : > { %v4527_v54 = vmin.f32 %v10753_v59, 0.0  ;;  %v10764_v60 = vadd.f32 %v10665_v34, %v4259_v58  ;;  %vm4463_vm9 = vcmp.gt.f32.partialorder %v10753_v59, 0.0  ;;  %vm4465_vm10 = vcmp.gt.f32.partialorder %v10750_v39, 0.0 }
 0x4e5   : > { %v4611_v10 = vmul.f32 1.442695, %v4529_v32  ;;  %v4530_v45 = vmin.f32 %v10759_v62, 0.0  ;;  %4915 = vrot.lane.b32.xlu0 %v4777_v43, %s8734_s26  ;;  %vm4466_vm12 = vcmp.gt.f32.partialorder %v10759_v62, 0.0 }
 0x4e6   : > { %v4607_v3 = vmul.f32 1.442695, %v4527_v54  ;;  %v4528_v2 = vmin.f32 %v10764_v60, 0.0  ;;  %vm4464_vm11 = vcmp.gt.f32.partialorder %v10764_v60, 0.0 }
 0x4e7   : > { %8441 = vpow2.f32 %v4611_v10  ;;  %v4613_v51 = vmul.f32 1.442695, %v4530_v45  ;;  %4917 = vrot.lane.b32.xlu1 %v4778_v31, %s8734_s26 }
 0x4e8   : > { %8443 = vpow2.f32 %v4607_v3  ;;  %v4609_v17 = vmul.f32 1.442695, %v4528_v2  ;;  %v7750_v56 = vpop.f32.mrb[84].mxu1 }
 0x4e9   : > { %v8434_v37 = vpop.eup %8433  ;;  %v10776_v16 = vadd.f32 %v7750_v56, %v10665_v34  ;;  %v4272_v28 = vpop.f32.mrb[85].mxu1 }
 0x4ea   : > { %v8436_v29 = vpop.eup %8435  ;;  %8445 = vpow2.f32 %v4609_v17  ;;  %v10780_v9 = vadd.f32 %v10665_v34, %v4272_v28  ;;  %v7751_v21 = vpop.f32.mrb[86].mxu1  ;;  %v7107_v15 = vadd.f32 -1.0, %v8434_v37 }
 0x4eb   : > { %8447 = vpow2.f32 %v4613_v51  ;;  %v4533_v61 = vmin.f32 %v10776_v16, 0.0  ;;  %v10784_v27 = vadd.f32 %v7751_v21, %v10665_v34  ;;  %v4275_v49 = vpop.f32.mrb[87].mxu1  ;;  %v7105_v11 = vadd.f32 -1.0, %v8436_v29 }
 0x4ec   : > { %v8438_v40 = vpop.eup %8437  ;;  %v4531_v19 = vmin.f32 %v10780_v9, 0.0  ;;  %v10789_v23 = vadd.f32 %v10665_v34, %v4275_v49  ;;  %v4781_v20 = vsel %vm4461_vm5, %v10724_v5, %v7107_v15  ;;  %vm4467_vm13 = vcmp.gt.f32.partialorder %v10780_v9, 0.0 }
 0x4ed   : > { %v8440_v8 = vpop.eup %8439  ;;  %v4619_v46 = vmul.f32 1.442695, %v4533_v61  ;;  %v4534_v38 = vmin.f32 %v10784_v27, 0.0  ;;  %v4779_v48 = vsel %vm4459_vm4, %v10728_v33, %v7105_v11  ;;  %v7106_v63 = vadd.f32 -1.0, %v8438_v40 }
 0x4ee   : > { %v4615_v22 = vmul.f32 1.442695, %v4531_v19  ;;  %v4532_v4 = vmin.f32 %v10789_v23, 0.0  ;;  %4919 = vrot.lane.b32.xlu0 %v4779_v48, %s8734_s26  ;;  %v7108_v50 = vadd.f32 -1.0, %v8440_v8  ;;  %vm4469_vm14 = vcmp.gt.f32.partialorder %v10776_v16, 0.0 }
 0x4ef   : > { %8449 = vpow2.f32 %v4619_v46  ;;  %v4621_v7 = vmul.f32 1.442695, %v4534_v38  ;;  %v4780_v53 = vsel %vm4460_vm6, %v10739_v57, %v7106_v63  ;;  %vm4468_vm0 = vcmp.gt.f32.partialorder %v10789_v23, 0.0 }
 0x4f0   : > { %8451 = vpow2.f32 %v4615_v22  ;;  %v4617_v6 = vmul.f32 1.442695, %v4532_v4  ;;  %v7754_v1 = vpop.f32.mrb[88].mxu1  ;;  %4921 = vrot.lane.b32.xlu1 %v4780_v53, %s8734_s26  ;;  %v4782_v26 = vsel %vm4462_vm8, %v10734_v44, %v7108_v50  ;;  %vm4470_vm1 = vcmp.gt.f32.partialorder %v10784_v27, 0.0 }
 0x4f1   : > { %v8442_v33 = vpop.eup %8441  ;;  %v10800_v36 = vadd.f32 %v7754_v1, %v10665_v34  ;;  %v4288_v30 = vpop.f32.mrb[89].mxu1 }
 0x4f2   : > { %v8444_v25 = vpop.eup %8443  ;;  %8453 = vpow2.f32 %v4617_v6  ;;  %v10805_v14 = vadd.f32 %v10665_v34, %v4288_v30  ;;  %4923 = vrot.lane.b32.xlu0 %v4781_v20, %s8734_s26  ;;  %v7755_v57 = vpop.f32.mrb[90].mxu1  ;;  %v7111_v58 = vadd.f32 -1.0, %v8442_v33 }
 0x4f3   : > { %8455 = vpow2.f32 %v4621_v7  ;;  %v4537_v52 = vmin.f32 %v10800_v36, 0.0  ;;  %v10810_v35 = vadd.f32 %v7755_v57, %v10665_v34  ;;  %v4291_v24 = vpop.f32.mrb[91].mxu1  ;;  %v7109_v42 = vadd.f32 -1.0, %v8444_v25 }
 0x4f4   : > { %v8446_v0 = vpop.eup %8445  ;;  %v4535_v5 = vmin.f32 %v10805_v14, 0.0  ;;  %v10815_v47 = vadd.f32 %v10665_v34, %v4291_v24  ;;  %4925 = vrot.lane.b32.xlu1 %v4782_v26, %s8734_s26  ;;  %v4785_v17 = vsel %vm4465_vm10, %v10750_v39, %v7111_v58  ;;  %vm4471_vm3 = vcmp.gt.f32.partialorder %v10805_v14, 0.0 }
 0x4f5   : > { %v8448_v12 = vpop.eup %8447  ;;  %v4627_v41 = vmul.f32 1.442695, %v4537_v52  ;;  %v4538_v55 = vmin.f32 %v10810_v35, 0.0  ;;  %v4783_v32 = vsel %vm4463_vm9, %v10753_v59, %v7109_v42  ;;  %v7110_v18 = vadd.f32 -1.0, %v8446_v0 }
 0x4f6   : > { %v4623_v54 = vmul.f32 1.442695, %v4535_v5  ;;  %v4536_v13 = vmin.f32 %v10815_v47, 0.0  ;;  %4927 = vrot.lane.b32.xlu0 %v4783_v32, %s8734_s26  ;;  %v7112_v2 = vadd.f32 -1.0, %v8448_v12  ;;  %vm4473_vm4 = vcmp.gt.f32.partialorder %v10800_v36, 0.0 }
 0x4f7   : > { %8457 = vpow2.f32 %v4627_v41  ;;  %v4629_v44 = vmul.f32 1.442695, %v4538_v55  ;;  %v4784_v45 = vsel %vm4464_vm11, %v10764_v60, %v7110_v18  ;;  %vm4472_vm5 = vcmp.gt.f32.partialorder %v10815_v47, 0.0 }
 0x4f8   : > { %8459 = vpow2.f32 %v4623_v54  ;;  %v4625_v10 = vmul.f32 1.442695, %v4536_v13  ;;  %v7758_v3 = vpop.f32.mrb[92].mxu1  ;;  %4929 = vrot.lane.b32.xlu1 %v4784_v45, %s8734_s26  ;;  %v4786_v11 = vsel %vm4466_vm12, %v10759_v62, %v7112_v2  ;;  %vm4474_vm6 = vcmp.gt.f32.partialorder %v10810_v35, 0.0 }
 0x4f9   : > { %v8450_v59 = vpop.eup %8449  ;;  %v10828_v43 = vadd.f32 %v7758_v3, %v10665_v34  ;;  %v4304_v51 = vpop.f32.mrb[93].mxu1 }
 0x4fa   : > { %v8452_v56 = vpop.eup %8451  ;;  %8461 = vpow2.f32 %v4625_v10  ;;  %v10833_v31 = vadd.f32 %v10665_v34, %v4304_v51  ;;  %4931 = vrot.lane.b32.xlu0 %v4785_v17, %s8734_s26  ;;  %v7759_v60 = vpop.f32.mrb[94].mxu1  ;;  %v7115_v38 = vadd.f32 -1.0, %v8450_v59 }
 0x4fb   : > { %8463 = vpow2.f32 %v4629_v44  ;;  %v4541_v37 = vmin.f32 %v10828_v43, 0.0  ;;  %v10838_v28 = vadd.f32 %v7759_v60, %v10665_v34  ;;  %v4307_v29 = vpop.f32.mrb[95].mxu1  ;;  %v7113_v21 = vadd.f32 -1.0, %v8452_v56 }
 0x4fc   : > { %v8454_v61 = vpop.eup %8453  ;;  %v4539_v39 = vmin.f32 %v10833_v31, 0.0  ;;  %v10843_v49 = vadd.f32 %v10665_v34, %v4307_v29  ;;  %4933 = vrot.lane.b32.xlu1 %v4786_v11, %s8734_s26  ;;  %v4789_v50 = vsel %vm4469_vm14, %v10776_v16, %v7115_v38  ;;  %vm4475_vm8 = vcmp.gt.f32.partialorder %v10833_v31, 0.0 }
 0x4fd   : > { %v8456_v40 = vpop.eup %8455  ;;  %v4635_v19 = vmul.f32 1.442695, %v4541_v37  ;;  %v4542_v8 = vmin.f32 %v10838_v28, 0.0  ;;  %v4787_v46 = vsel %vm4467_vm13, %v10780_v9, %v7113_v21  ;;  %v7114_v22 = vadd.f32 -1.0, %v8454_v61 }
 0x4fe   : > { %v4631_v48 = vmul.f32 1.442695, %v4539_v39  ;;  %v4540_v15 = vmin.f32 %v10843_v49, 0.0  ;;  %4935 = vrot.lane.b32.xlu0 %v4787_v46, %s8734_s26  ;;  %v7116_v6 = vadd.f32 -1.0, %v8456_v40  ;;  %vm4477_vm9 = vcmp.gt.f32.partialorder %v10828_v43, 0.0 }
 0x4ff   : > { %8465 = vpow2.f32 %v4635_v19  ;;  %v4637_v62 = vmul.f32 1.442695, %v4542_v8  ;;  %v4788_v63 = vsel %vm4468_vm0, %v10789_v23, %v7114_v22  ;;  %vm4476_vm10 = vcmp.gt.f32.partialorder %v10843_v49, 0.0 }
 0x500   : > { %8467 = vpow2.f32 %v4631_v48  ;;  %v4633_v4 = vmul.f32 1.442695, %v4540_v15  ;;  %v7762_v7 = vpop.f32.mrb[96].mxu1  ;;  %4937 = vrot.lane.b32.xlu1 %v4788_v63, %s8734_s26  ;;  %v4790_v0 = vsel %vm4470_vm1, %v10784_v27, %v7116_v6  ;;  %vm4478_vm11 = vcmp.gt.f32.partialorder %v10838_v28, 0.0 }
 0x501   : > { %v8458_v9 = vpop.eup %8457  ;;  %v10856_v53 = vadd.f32 %v7762_v7, %v10665_v34  ;;  %v4320_v1 = vpop.f32.mrb[97].mxu1 }
 0x502   : > { %v8460_v33 = vpop.eup %8459  ;;  %8469 = vpow2.f32 %v4633_v4  ;;  %v10861_v30 = vadd.f32 %v10665_v34, %v4320_v1  ;;  %4939 = vrot.lane.b32.xlu0 %v4789_v50, %s8734_s26  ;;  %v7763_v23 = vpop.f32.mrb[98].mxu1  ;;  %v7119_v55 = vadd.f32 -1.0, %v8458_v9 }
 0x503   : > { %8471 = vpow2.f32 %v4637_v62  ;;  %v4545_v20 = vmin.f32 %v10856_v53, 0.0  ;;  %v10866_v25 = vadd.f32 %v7763_v23, %v10665_v34  ;;  %v4323_v57 = vpop.f32.mrb[99].mxu1  ;;  %v7117_v52 = vadd.f32 -1.0, %v8460_v33 }
 0x504   : > { %v8462_v24 = vpop.eup %8461  ;;  %v4543_v16 = vmin.f32 %v10861_v30, 0.0  ;;  %v10871_v42 = vadd.f32 %v10665_v34, %v4323_v57  ;;  %4941 = vrot.lane.b32.xlu1 %v4790_v0, %s8734_s26  ;;  %v4793_v2 = vsel %vm4473_vm4, %v10800_v36, %v7119_v55  ;;  %vm4479_vm12 = vcmp.gt.f32.partialorder %v10861_v30, 0.0 }
 0x505   : > { %v8464_v5 = vpop.eup %8463  ;;  %v4643_v26 = vmul.f32 1.442695, %v4545_v20  ;;  %v4546_v12 = vmin.f32 %v10866_v25, 0.0  ;;  %v4791_v41 = vsel %vm4471_vm3, %v10805_v14, %v7117_v52  ;;  %v7118_v54 = vadd.f32 -1.0, %v8462_v24 }
 0x506   : > { %v4639_v32 = vmul.f32 1.442695, %v4543_v16  ;;  %v4544_v58 = vmin.f32 %v10871_v42, 0.0  ;;  %4943 = vrot.lane.b32.xlu0 %v4791_v41, %s8734_s26  ;;  %v7120_v10 = vadd.f32 -1.0, %v8464_v5  ;;  %vm4481_vm13 = vcmp.gt.f32.partialorder %v10856_v53, 0.0 }
 0x507   : > { %8473 = vpow2.f32 %v4643_v26  ;;  %v4645_v27 = vmul.f32 1.442695, %v4546_v12  ;;  %v4792_v18 = vsel %vm4472_vm5, %v10815_v47, %v7118_v54  ;;  %vm4480_vm14 = vcmp.gt.f32.partialorder %v10871_v42, 0.0 }
 0x508   : > { %8475 = vpow2.f32 %v4639_v32  ;;  %v4641_v13 = vmul.f32 1.442695, %v4544_v58  ;;  %v7766_v44 = vpop.f32.mrb[100].mxu1  ;;  %4945 = vrot.lane.b32.xlu1 %v4792_v18, %s8734_s26  ;;  %v4794_v61 = vsel %vm4474_vm6, %v10810_v35, %v7120_v10  ;;  %vm4482_vm0 = vcmp.gt.f32.partialorder %v10866_v25, 0.0 }
 0x509   : > { %v8466_v14 = vpop.eup %8465  ;;  %v10884_v45 = vadd.f32 %v7766_v44, %v10665_v34  ;;  %v4336_v3 = vpop.f32.mrb[101].mxu1 }
 0x50a   : > { %v8468_v59 = vpop.eup %8467  ;;  %8477 = vpow2.f32 %v4641_v13  ;;  %v10889_v51 = vadd.f32 %v10665_v34, %v4336_v3  ;;  %4947 = vrot.lane.b32.xlu0 %v4793_v2, %s8734_s26  ;;  %v7767_v47 = vpop.f32.mrb[102].mxu1  ;;  %v7123_v8 = vadd.f32 -1.0, %v8466_v14 }
 0x50b   : > { %8479 = vpow2.f32 %v4645_v27  ;;  %v4549_v17 = vmin.f32 %v10884_v45, 0.0  ;;  %v10894_v56 = vadd.f32 %v7767_v47, %v10665_v34  ;;  %v4339_v60 = vpop.f32.mrb[103].mxu1  ;;  %v7121_v37 = vadd.f32 -1.0, %v8468_v59 }
 0x50c   : > { %v8470_v29 = vpop.eup %8469  ;;  %v4547_v36 = vmin.f32 %v10889_v51, 0.0  ;;  %v10899_v21 = vadd.f32 %v10665_v34, %v4339_v60  ;;  %4949 = vrot.lane.b32.xlu1 %v4794_v61, %s8734_s26  ;;  %v4797_v6 = vsel %vm4477_vm9, %v10828_v43, %v7123_v8  ;;  %vm4483_vm1 = vcmp.gt.f32.partialorder %v10889_v51, 0.0 }
 0x50d   : > { %v8472_v39 = vpop.eup %8471  ;;  %v4651_v11 = vmul.f32 1.442695, %v4549_v17  ;;  %v4550_v40 = vmin.f32 %v10894_v56, 0.0  ;;  %v4795_v19 = vsel %vm4475_vm8, %v10833_v31, %v7121_v37  ;;  %v7122_v48 = vadd.f32 -1.0, %v8470_v29 }
 0x50e   : > { %v4647_v46 = vmul.f32 1.442695, %v4547_v36  ;;  %v4548_v38 = vmin.f32 %v10899_v21, 0.0  ;;  %4951 = vrot.lane.b32.xlu0 %v4795_v19, %s8734_s26  ;;  %v7124_v4 = vadd.f32 -1.0, %v8472_v39  ;;  %vm4485_vm3 = vcmp.gt.f32.partialorder %v10884_v45, 0.0 }
 0x50f   : > { %8481 = vpow2.f32 %v4651_v11  ;;  %v4653_v35 = vmul.f32 1.442695, %v4550_v40  ;;  %v4796_v22 = vsel %vm4476_vm10, %v10843_v49, %v7122_v48  ;;  %vm4484_vm4 = vcmp.gt.f32.partialorder %v10899_v21, 0.0 }
 0x510   : > { %8483 = vpow2.f32 %v4647_v46  ;;  %v4649_v15 = vmul.f32 1.442695, %v4548_v38  ;;  %v7770_v62 = vpop.f32.mrb[104].mxu1  ;;  %4953 = vrot.lane.b32.xlu1 %v4796_v22, %s8734_s26  ;;  %v4798_v24 = vsel %vm4478_vm11, %v10838_v28, %v7124_v4  ;;  %vm4486_vm5 = vcmp.gt.f32.partialorder %v10894_v56, 0.0 }
 0x511   : > { %v8474_v31 = vpop.eup %8473  ;;  %v10912_v63 = vadd.f32 %v7770_v62, %v10665_v34  ;;  %v4352_v7 = vpop.f32.mrb[105].mxu1 }
 0x512   : > { %v8476_v9 = vpop.eup %8475  ;;  %8485 = vpow2.f32 %v4649_v15  ;;  %v10917_v1 = vadd.f32 %v10665_v34, %v4352_v7  ;;  %4955 = vrot.lane.b32.xlu0 %v4797_v6, %s8734_s26  ;;  %v7771_v49 = vpop.f32.mrb[106].mxu1  ;;  %v7127_v12 = vadd.f32 -1.0, %v8474_v31 }
 0x513   : > { %8487 = vpow2.f32 %v4653_v35  ;;  %v4553_v50 = vmin.f32 %v10912_v63, 0.0  ;;  %v10922_v33 = vadd.f32 %v7771_v49, %v10665_v34  ;;  %v4355_v23 = vpop.f32.mrb[107].mxu1  ;;  %v7125_v20 = vadd.f32 -1.0, %v8476_v9 }
 0x514   : > { %v8478_v57 = vpop.eup %8477  ;;  %v4551_v43 = vmin.f32 %v10917_v1, 0.0  ;;  %v10927_v52 = vadd.f32 %v10665_v34, %v4355_v23  ;;  %4957 = vrot.lane.b32.xlu1 %v4798_v24, %s8734_s26  ;;  %v4801_v10 = vsel %vm4481_vm13, %v10856_v53, %v7127_v12  ;;  %vm4487_vm6 = vcmp.gt.f32.partialorder %v10917_v1, 0.0 }
 0x515   : > { %v8480_v16 = vpop.eup %8479  ;;  %v4659_v0 = vmul.f32 1.442695, %v4553_v50  ;;  %v4554_v5 = vmin.f32 %v10922_v33, 0.0  ;;  %v4799_v26 = vsel %vm4479_vm12, %v10861_v30, %v7125_v20  ;;  %v7126_v32 = vadd.f32 -1.0, %v8478_v57 }
 0x516   : > { %v4655_v41 = vmul.f32 1.442695, %v4551_v43  ;;  %v4552_v55 = vmin.f32 %v10927_v52, 0.0  ;;  %4959 = vrot.lane.b32.xlu0 %v4799_v26, %s8734_s26  ;;  %v7128_v13 = vadd.f32 -1.0, %v8480_v16  ;;  %vm4489_vm8 = vcmp.gt.f32.partialorder %v10912_v63, 0.0 }
 0x517   : > { %8489 = vpow2.f32 %v4659_v0  ;;  %v4661_v28 = vmul.f32 1.442695, %v4554_v5  ;;  %v4800_v54 = vsel %vm4480_vm14, %v10871_v42, %v7126_v32  ;;  %vm4488_vm9 = vcmp.gt.f32.partialorder %v10927_v52, 0.0 }
 0x518   : > { %8491 = vpow2.f32 %v4655_v41  ;;  %v4657_v58 = vmul.f32 1.442695, %v4552_v55  ;;  %v7774_v27 = vpop.f32.mrb[108].mxu1  ;;  %4961 = vrot.lane.b32.xlu1 %v4800_v54, %s8734_s26  ;;  %v4802_v29 = vsel %vm4482_vm0, %v10866_v25, %v7128_v13  ;;  %vm4490_vm10 = vcmp.gt.f32.partialorder %v10922_v33, 0.0 }
 0x519   : > { %v8482_v30 = vpop.eup %8481  ;;  %v10940_v18 = vadd.f32 %v7774_v27, %v10665_v34  ;;  %v4368_v44 = vpop.f32.mrb[109].mxu1 }
 0x51a   : > { %v8484_v14 = vpop.eup %8483  ;;  %8493 = vpow2.f32 %v4657_v58  ;;  %v10945_v3 = vadd.f32 %v10665_v34, %v4368_v44  ;;  %4963 = vrot.lane.b32.xlu0 %v4801_v10, %s8734_s26  ;;  %v7775_v42 = vpop.f32.mrb[110].mxu1  ;;  %v7131_v40 = vadd.f32 -1.0, %v8482_v30 }
 0x51b   : > { %8495 = vpow2.f32 %v4661_v28  ;;  %v4557_v2 = vmin.f32 %v10940_v18, 0.0  ;;  %v10950_v59 = vadd.f32 %v7775_v42, %v10665_v34  ;;  %v4371_v47 = vpop.f32.mrb[111].mxu1  ;;  %v7129_v17 = vadd.f32 -1.0, %v8484_v14 }
 0x51c   : > { %v8486_v60 = vpop.eup %8485  ;;  %v4555_v53 = vmin.f32 %v10945_v3, 0.0  ;;  %v10955_v37 = vadd.f32 %v10665_v34, %v4371_v47  ;;  %4965 = vrot.lane.b32.xlu1 %v4802_v29, %s8734_s26  ;;  %v4805_v4 = vsel %vm4485_vm3, %v10884_v45, %v7131_v40  ;;  %vm4491_vm11 = vcmp.gt.f32.partialorder %v10945_v3, 0.0 }
 0x51d   : > { %v8488_v36 = vpop.eup %8487  ;;  %v4667_v61 = vmul.f32 1.442695, %v4557_v2  ;;  %v4558_v39 = vmin.f32 %v10950_v59, 0.0  ;;  %v4803_v11 = vsel %vm4483_vm1, %v10889_v51, %v7129_v17  ;;  %v7130_v46 = vadd.f32 -1.0, %v8486_v60 }
 0x51e   : > { %v4663_v19 = vmul.f32 1.442695, %v4555_v53  ;;  %v4556_v8 = vmin.f32 %v10955_v37, 0.0  ;;  %4967 = vrot.lane.b32.xlu0 %v4803_v11, %s8734_s26  ;;  %v7132_v15 = vadd.f32 -1.0, %v8488_v36  ;;  %vm4493_vm12 = vcmp.gt.f32.partialorder %v10940_v18, 0.0 }
 0x51f   : > { %8497 = vpow2.f32 %v4667_v61  ;;  %v4669_v25 = vmul.f32 1.442695, %v4558_v39  ;;  %v4804_v48 = vsel %vm4484_vm4, %v10899_v21, %v7130_v46  ;;  %vm4492_vm13 = vcmp.gt.f32.partialorder %v10955_v37, 0.0 }
 0x520   : > { %8499 = vpow2.f32 %v4663_v19  ;;  %v4665_v38 = vmul.f32 1.442695, %v4556_v8  ;;  %v7778_v35 = vpop.f32.mrb[112].mxu1  ;;  %4969 = vrot.lane.b32.xlu1 %v4804_v48, %s8734_s26  ;;  %v4806_v57 = vsel %vm4486_vm5, %v10894_v56, %v7132_v15  ;;  %vm4494_vm14 = vcmp.gt.f32.partialorder %v10950_v59, 0.0 }
 0x521   : > { %v8490_v51 = vpop.eup %8489  ;;  %v10968_v22 = vadd.f32 %v7778_v35, %v10665_v34  ;;  %v4384_v62 = vpop.f32.mrb[113].mxu1 }
 0x522   : > { %v8492_v31 = vpop.eup %8491  ;;  %8501 = vpow2.f32 %v4665_v38  ;;  %v10973_v7 = vadd.f32 %v10665_v34, %v4384_v62  ;;  %4971 = vrot.lane.b32.xlu0 %v4805_v4, %s8734_s26  ;;  %v7779_v21 = vpop.f32.mrb[114].mxu1  ;;  %v7135_v5 = vadd.f32 -1.0, %v8490_v51  ;;  %v8668_v38 = vld [vmem:[%s11857_s4 + $0x2] ss:$0 sm:$0xff] }
 0x523   : > { %8503 = vpow2.f32 %v4669_v25  ;;  %v4561_v6 = vmin.f32 %v10968_v22, 0.0  ;;  %v10978_v9 = vadd.f32 %v7779_v21, %v10665_v34  ;;  %v4387_v49 = vpop.f32.mrb[115].mxu1  ;;  %v7133_v50 = vadd.f32 -1.0, %v8492_v31 }
 0x524   : > { %v8494_v23 = vpop.eup %8493  ;;  %v4559_v45 = vmin.f32 %v10973_v7, 0.0  ;;  %v10983_v20 = vadd.f32 %v10665_v34, %v4387_v49  ;;  %4973 = vrot.lane.b32.xlu1 %v4806_v57, %s8734_s26  ;;  %v4809_v13 = vsel %vm4489_vm8, %v10912_v63, %v7135_v5  ;;  %vm4495_vm0 = vcmp.gt.f32.partialorder %v10973_v7, 0.0 }
 0x525   : > { %v8496_v43 = vpop.eup %8495  ;;  %v4675_v24 = vmul.f32 1.442695, %v4561_v6  ;;  %v4562_v16 = vmin.f32 %v10978_v9, 0.0  ;;  %v4807_v0 = vsel %vm4487_vm6, %v10917_v1, %v7133_v50  ;;  %v7134_v41 = vadd.f32 -1.0, %v8494_v23 }
 0x526   : > { %v4671_v26 = vmul.f32 1.442695, %v4559_v45  ;;  %v4560_v12 = vmin.f32 %v10983_v20, 0.0  ;;  %4975 = vrot.lane.b32.xlu0 %v4807_v0, %s8734_s26  ;;  %v7136_v58 = vadd.f32 -1.0, %v8496_v43  ;;  %vm4497_vm1 = vcmp.gt.f32.partialorder %v10968_v22, 0.0 }
 0x527   : > { %8505 = vpow2.f32 %v4675_v24  ;;  %v4677_v56 = vmul.f32 1.442695, %v4562_v16  ;;  %v4808_v32 = vsel %vm4488_vm9, %v10927_v52, %v7134_v41  ;;  %vm4496_vm3 = vcmp.gt.f32.partialorder %v10983_v20, 0.0 }
 0x528   : > { %8507 = vpow2.f32 %v4671_v26  ;;  %v4673_v55 = vmul.f32 1.442695, %v4560_v12  ;;  %v7782_v28 = vpop.f32.mrb[116].mxu1  ;;  %4977 = vrot.lane.b32.xlu1 %v4808_v32, %s8734_s26  ;;  %v4810_v60 = vsel %vm4490_vm10, %v10922_v33, %v7136_v58  ;;  %vm4498_vm4 = vcmp.gt.f32.partialorder %v10978_v9, 0.0 }
 0x529   : > { %v8498_v1 = vpop.eup %8497  ;;  %v10996_v54 = vadd.f32 %v7782_v28, %v10665_v34  ;;  %v4400_v27 = vpop.f32.mrb[117].mxu1 }
 0x52a   : > { %v8500_v30 = vpop.eup %8499  ;;  %8509 = vpow2.f32 %v4673_v55  ;;  %v11001_v44 = vadd.f32 %v10665_v34, %v4400_v27  ;;  %4979 = vrot.lane.b32.xlu0 %v4809_v13, %s8734_s26  ;;  %v7783_v52 = vpop.f32.mrb[118].mxu1  ;;  %v7139_v39 = vadd.f32 -1.0, %v8498_v1 }
 0x52b   : > { %8511 = vpow2.f32 %v4677_v56  ;;  %v4565_v10 = vmin.f32 %v10996_v54, 0.0  ;;  %v11006_v14 = vadd.f32 %v7783_v52, %v10665_v34  ;;  %v4403_v42 = vpop.f32.mrb[119].mxu1  ;;  %v7137_v2 = vadd.f32 -1.0, %v8500_v30 }
 0x52c   : > { %v8502_v47 = vpop.eup %8501  ;;  %v4563_v63 = vmin.f32 %v11001_v44, 0.0  ;;  %v11011_v17 = vadd.f32 %v10665_v34, %v4403_v42  ;;  %4981 = vrot.lane.b32.xlu1 %v4810_v60, %s8734_s26  ;;  %v4813_v15 = vsel %vm4493_vm12, %v10940_v18, %v7139_v39  ;;  %vm4499_vm5 = vcmp.gt.f32.partialorder %v11001_v44, 0.0 }
 0x52d   : > { %v8504_v53 = vpop.eup %8503  ;;  %v4683_v29 = vmul.f32 1.442695, %v4565_v10  ;;  %v4566_v36 = vmin.f32 %v11006_v14, 0.0  ;;  %v4811_v61 = vsel %vm4491_vm11, %v10945_v3, %v7137_v2  ;;  %v7138_v19 = vadd.f32 -1.0, %v8502_v47 }
 0x52e   : > { %v4679_v11 = vmul.f32 1.442695, %v4563_v63  ;;  %v4564_v40 = vmin.f32 %v11011_v17, 0.0  ;;  %4983 = vrot.lane.b32.xlu0 %v4811_v61, %s8734_s26  ;;  %v7140_v25 = vadd.f32 -1.0, %v8504_v53  ;;  %vm4501_vm6 = vcmp.gt.f32.partialorder %v10996_v54, 0.0 }
 0x52f   : > { %8513 = vpow2.f32 %v4683_v29  ;;  %v4685_v34 = vmul.f32 1.442695, %v4566_v36  ;;  %v4812_v8 = vsel %vm4492_vm13, %v10955_v37, %v7138_v19  ;;  %vm4500_vm8 = vcmp.gt.f32.partialorder %v11011_v17, 0.0 }
 0x530   : > { %8515 = vpow2.f32 %v4679_v11  ;;  %v4681_v33 = vmul.f32 1.442695, %v4564_v40  ;;  %v7786_v46 = vpop.f32.mrb[120].mxu1  ;;  %4985 = vrot.lane.b32.xlu1 %v4812_v8, %s8734_s26  ;;  %v4814_v23 = vsel %vm4494_vm14, %v10950_v59, %v7140_v25  ;;  %vm4502_vm9 = vcmp.gt.f32.partialorder %v11006_v14, 0.0 }
 0x531   : > { %v8506_v3 = vpop.eup %8505  ;;  %v11026_v48 = vadd.f32 %v8668_v38, %v7786_v46  ;;  %v4416_v35 = vpop.f32.mrb[121].mxu1 }
 0x532   : > { %v8508_v51 = vpop.eup %8507  ;;  %8517 = vpow2.f32 %v4681_v33  ;;  %v11030_v62 = vadd.f32 %v8668_v38, %v4416_v35  ;;  %4987 = vrot.lane.b32.xlu0 %v4813_v15, %s8734_s26  ;;  %v7787_v37 = vpop.f32.mrb[122].mxu1  ;;  %v7143_v16 = vadd.f32 -1.0, %v8506_v3 }
 0x533   : > { %8519 = vpow2.f32 %v4685_v34  ;;  %v4569_v4 = vmin.f32 %v11026_v48, 0.0  ;;  %v11034_v31 = vadd.f32 %v8668_v38, %v7787_v37  ;;  %v4419_v21 = vpop.f32.mrb[123].mxu1  ;;  %v7141_v6 = vadd.f32 -1.0, %v8508_v51 }
 0x534   : > { %v8510_v49 = vpop.eup %8509  ;;  %v4567_v18 = vmin.f32 %v11030_v62, 0.0  ;;  %v11038_v50 = vadd.f32 %v8668_v38, %v4419_v21  ;;  %4989 = vrot.lane.b32.xlu1 %v4814_v23, %s8734_s26  ;;  %v4817_v58 = vsel %vm4497_vm1, %v10968_v22, %v7143_v16  ;;  %vm4503_vm10 = vcmp.gt.f32.partialorder %v11030_v62, 0.0 }
 0x535   : > { %v8512_v45 = vpop.eup %8511  ;;  %v4691_v57 = vmul.f32 1.442695, %v4569_v4  ;;  %v4570_v43 = vmin.f32 %v11034_v31, 0.0  ;;  %v4815_v24 = vsel %vm4495_vm0, %v10973_v7, %v7141_v6  ;;  %v7142_v26 = vadd.f32 -1.0, %v8510_v49 }
 0x536   : > { %v4687_v0 = vmul.f32 1.442695, %v4567_v18  ;;  %v4568_v5 = vmin.f32 %v11038_v50, 0.0  ;;  %4991 = vrot.lane.b32.xlu0 %v4815_v24, %s8734_s26  ;;  %v7144_v55 = vadd.f32 -1.0, %v8512_v45  ;;  %vm4504_vm11 = vcmp.gt.f32.partialorder %v11038_v50, 0.0 }
 0x537   : > { %8521 = vpow2.f32 %v4691_v57  ;;  %v4693_v59 = vmul.f32 1.442695, %v4570_v43  ;;  %v4816_v41 = vsel %vm4496_vm3, %v10983_v20, %v7142_v26  ;;  %vm4505_vm12 = vcmp.gt.f32.partialorder %v11026_v48, 0.0 }
 0x538   : > { %8523 = vpow2.f32 %v4687_v0  ;;  %v4689_v12 = vmul.f32 1.442695, %v4568_v5  ;;  %v7790_v56 = vpop.f32.mrb[124].mxu1  ;;  %4993 = vrot.lane.b32.xlu1 %v4816_v41, %s8734_s26  ;;  %v4818_v47 = vsel %vm4498_vm4, %v10978_v9, %v7144_v55  ;;  %vm4506_vm13 = vcmp.gt.f32.partialorder %v11034_v31, 0.0 }
 0x539   : > { %v8514_v7 = vpop.eup %8513  ;;  %v11050_v32 = vadd.f32 %v8668_v38, %v7790_v56  ;;  %v4432_v28 = vpop.f32.mrb[125].mxu1 }
 0x53a   : > { %v8516_v1 = vpop.eup %8515  ;;  %8525 = vpow2.f32 %v4689_v12  ;;  %v11054_v27 = vadd.f32 %v8668_v38, %v4432_v28  ;;  %4995 = vrot.lane.b32.xlu0 %v4817_v58, %s8734_s26  ;;  %v7791_v13 = vpop.f32.mrb[126].mxu1  ;;  %v7147_v36 = vadd.f32 -1.0, %v8514_v7 }
 0x53b   : > { %8527 = vpow2.f32 %v4693_v59  ;;  %v4573_v20 = vmin.f32 %v11050_v32, 0.0  ;;  %v11058_v30 = vadd.f32 %v8668_v38, %v7791_v13  ;;  %v4435_v52 = vpop.f32.mrb[127].mxu1  ;;  %v7145_v10 = vadd.f32 -1.0, %v8516_v1  ;;  %v8024_v1 = vld [vmem:[%s11860_s7 + $0x8] sm:$0xff]  }
 0x53c   : > { %v8518_v42 = vpop.eup %8517  ;;  %v4571_v22 = vmin.f32 %v11054_v27, 0.0  ;;  %v11062_v2 = vadd.f32 %v8668_v38, %v4435_v52  ;;  %4997 = vrot.lane.b32.xlu1 %v4818_v47, %s8734_s26  ;;  %vm4507_vm14 = vcmp.gt.f32.partialorder %v11054_v27, 0.0  ;;  %vm4509_vm1 = vcmp.gt.f32.partialorder %v11050_v32, 0.0 }
 0x53d   : > { %v8520_v63 = vpop.eup %8519  ;;  %v4699_v60 = vmul.f32 1.442695, %v4573_v20  ;;  %v4574_v53 = vmin.f32 %v11058_v30, 0.0  ;;  %v4819_v29 = vsel %vm4499_vm5, %v11001_v44, %v7145_v10  ;;  %v7146_v11 = vadd.f32 -1.0, %v8518_v42 }
 0x53e   : > { %v4695_v61 = vmul.f32 1.442695, %v4571_v22  ;;  %v4572_v39 = vmin.f32 %v11062_v2, 0.0  ;;  %4999 = vrot.lane.b32.xlu0 %v4819_v29, %s8734_s26  ;;  %v7148_v34 = vadd.f32 -1.0, %v8520_v63  ;;  %v4821_v44 = vsel %vm4501_vm6, %v10996_v54, %v7147_v36 }
 0x53f   : > { %8529 = vpow2.f32 %v4699_v60  ;;  %v4701_v9 = vmul.f32 1.442695, %v4574_v53  ;;  %v4820_v19 = vsel %vm4500_vm8, %v11011_v17, %v7146_v11  ;;  %vm4508_vm0 = vcmp.gt.f32.partialorder %v11062_v2, 0.0 }
 0x540   : > { %8531 = vpow2.f32 %v4695_v61  ;;  %v4697_v40 = vmul.f32 1.442695, %v4572_v39  ;;  %5001 = vrot.lane.b32.xlu1 %v4820_v19, %s8734_s26  ;;  %v4822_v17 = vsel %vm4502_vm9, %v11006_v14, %v7148_v34  ;;  %vm4510_vm3 = vcmp.gt.f32.partialorder %v11058_v30, 0.0 }
 0x541   : > { %v8522_v33 = vpop.eup %8521 }
 0x542   : > { %v4896_v8 = vpop.permute.xlu0 %4895  ;;  %v8524_v46 = vpop.eup %8523  ;;  %8533 = vpow2.f32 %v4697_v40  ;;  %5003 = vrot.lane.b32.xlu0 %v4821_v44, %s8734_s26  ;;  %v7151_v51 = vadd.f32 -1.0, %v8522_v33 }
 0x543   : > { %5087 = vst.msk [vmem:[#allocation2] sm:$0xff] %vm1665_vm15, %v4896_v8  ;;  %8535 = vpow2.f32 %v4701_v9  ;;  %v7149_v25 = vadd.f32 -1.0, %v8524_v46 }
 0x544   : > { %v4898_v3 = vpop.permute.xlu1 %4897  ;;  %v8526_v38 = vpop.eup %8525  ;;  %5005 = vrot.lane.b32.xlu1 %v4822_v17, %s8734_s26  ;;  %v4825_v49 = vsel %vm4505_vm12, %v11026_v48, %v7151_v51 }
 0x545   : > { %5088 = vst.msk [vmem:[#allocation2 + $0x8] sm:$0xff] %vm1665_vm15, %v4898_v3  ;;  %v8528_v54 = vpop.eup %8527  ;;  %v4823_v35 = vsel %vm4503_vm10, %v11030_v62, %v7149_v25  ;;  %v7150_v15 = vadd.f32 -1.0, %v8526_v38  ;;  %v8023_v62 = vld [vmem:[%s11860_s7] sm:$0xff]  }
 0x546   : > { %v4900_v37 = vpop.permute.xlu0 %4899  ;;  %5007 = vrot.lane.b32.xlu0 %v4823_v35, %s8734_s26  ;;  %v7152_v14 = vadd.f32 -1.0, %v8528_v54  ;;  %7864 = vmatprep.subr.bf16.mxu1 %v8023_v62 }
 0x547   : > { %5089 = vst.msk [vmem:[#allocation2 + $0x10] sm:$0xff] %vm1665_vm15, %v4900_v37  ;;  %v4824_v4 = vsel %vm4504_vm11, %v11038_v50, %v7150_v15  ;;  %7865 = vmatpush3.bf16.msra.mxu1 %v8023_v62 }
 0x548   : > { %v4902_v21 = vpop.permute.xlu1 %4901  ;;  %5009 = vrot.lane.b32.xlu1 %v4824_v4, %s8734_s26  ;;  %v4826_v24 = vsel %vm4506_vm13, %v11034_v31, %v7152_v14  ;;  %7866 = vmatprep.subr.bf16.mxu1 %v8024_v1 }
 0x549   : > { %5090 = vst.msk [vmem:[#allocation2 + $0x18] sm:$0xff] %vm1665_vm15, %v4902_v21  ;;  %v8530_v6 = vpop.eup %8529 }
 0x54a   : > { %v8532_v18 = vpop.eup %8531  ;;  %5011 = vrot.lane.b32.xlu0 %v4825_v49, %s8734_s26  ;;  %v5151_v45 = vld [vmem:[#allocation2] sm:$0xff]  ;;  %v7155_v59 = vadd.f32 -1.0, %v8530_v6 }
 0x54b   : > { %v7153_v50 = vadd.f32 -1.0, %v8532_v18  ;;  %v4904_v23 = vpop.permute.xlu0 %4903  ;;  %7867 = vmatpush3.bf16.msra.mxu1 %v8024_v1 }
 0x54c   : > { %v5152_v57 = vld [vmem:[#allocation2 + $0x8] sm:$0xff]  ;;  %v8534_v43 = vpop.eup %8533  ;;  %5091 = vst.msk [vmem:[#allocation2 + $0x20] sm:$0xff] %vm1665_vm15, %v4904_v23  ;;  %5013 = vrot.lane.b32.xlu1 %v4826_v24, %s8734_s26  ;;  %v4829_v28 = vsel %vm4509_vm1, %v11050_v32, %v7155_v59 }
 0x54d   : > { %v5215_v16 = vpack.c.bf16 %v5152_v57, %v5151_v45  ;;  %v8536_v48 = vpop.eup %8535  ;;  %v4827_v0 = vsel %vm4507_vm14, %v11054_v27, %v7153_v50  ;;  %v7154_v5 = vadd.f32 -1.0, %v8534_v43  ;;  %v4906_v26 = vpop.permute.xlu1 %4905 }
 0x54e   : > { %5015 = vrot.lane.b32.xlu0 %v4827_v0, %s8734_s26  ;;  %5092 = vst.msk [vmem:[#allocation2 + $0x28] sm:$0xff] %vm1665_vm15, %v4906_v26  ;;  %v5153_v41 = vld [vmem:[#allocation2 + $0x10] sm:$0xff]  ;;  %v7156_v55 = vadd.f32 -1.0, %v8536_v48 }
 0x54f   : > { %7800 = vmatprep.mubr.msk.bf16.mxu0 %vm1865_vm7, %v5215_v16  ;;  %v4828_v31 = vsel %vm4508_vm0, %v11062_v2, %v7154_v5  ;;  %v4908_v12 = vpop.permute.xlu0 %4907 }
 0x550   : > { %v5154_v56 = vld [vmem:[#allocation2 + $0x18] sm:$0xff]  ;;  %5093 = vst.msk [vmem:[#allocation2 + $0x30] sm:$0xff] %vm1665_vm15, %v4908_v12  ;;  %5017 = vrot.lane.b32.xlu1 %v4828_v31, %s8734_s26  ;;  %v4830_v27 = vsel %vm4510_vm3, %v11058_v30, %v7156_v55 }
 0x551   : > { %v5216_v7 = vpack.c.bf16 %v5154_v56, %v5153_v41  ;;  %v4910_v58 = vpop.permute.xlu1 %4909 }
 0x552   : > { %5019 = vrot.lane.b32.xlu0 %v4829_v28, %s8734_s26  ;;  %5094 = vst.msk [vmem:[#allocation2 + $0x38] sm:$0xff] %vm1665_vm15, %v4910_v58 }
 0x553   : > { %7801 = vmatmul.mubr.msk.bf16.vlgmr.msra.gmra.mrb[128].mxu0 %vm1865_vm7, %v5216_v7  ;;  %v4912_v13 = vpop.permute.xlu0 %4911  ;;  %v5155_v32 = vld [vmem:[#allocation2 + $0x20] sm:$0xff] }
 0x554   : > { %5021 = vrot.lane.b32.xlu1 %v4830_v27, %s8734_s26  ;;  %5095 = vst.msk [vmem:[#allocation2 + $0x40] sm:$0xff] %vm1665_vm15, %v4912_v13 }
 0x555   : > { %v5156_v20 = vld [vmem:[#allocation2 + $0x28] sm:$0xff]  ;;  %v4914_v10 = vpop.permute.xlu1 %4913 }
 0x556   : > { %v5217_v52 = vpack.c.bf16 %v5156_v20, %v5155_v32  ;;  %5096 = vst.msk [vmem:[#allocation2 + $0x48] sm:$0xff] %vm1665_vm15, %v4914_v10 }
 0x557   : > { %v4916_v42 = vpop.permute.xlu0 %4915  ;;  %v5157_v22 = vld [vmem:[#allocation2 + $0x30] sm:$0xff] }
 0x558   : > { %7804 = vmatprep.mubr.msk.bf16.mxu0 %vm1865_vm7, %v5217_v52  ;;  %5097 = vst.msk [vmem:[#allocation2 + $0x50] sm:$0xff] %vm1665_vm15, %v4916_v42 }
 0x559   : > { %v5158_v2 = vld [vmem:[#allocation2 + $0x38] sm:$0xff]  ;;  %v4918_v47 = vpop.permute.xlu1 %4917 }
 0x55a   : > { %v5218_v30 = vpack.c.bf16 %v5158_v2, %v5157_v22  ;;  %5098 = vst.msk [vmem:[#allocation2 + $0x58] sm:$0xff] %vm1665_vm15, %v4918_v47 }
 0x55b   : > { %v5159_v63 = vld [vmem:[#allocation2 + $0x40] sm:$0xff] }
 0x55c   : > { %7805 = vmatmul.mubr.msk.bf16.gmra.mrb[132].mxu0 %vm1865_vm7, %v5218_v30 }
 0x55d   : > { %v5160_v60 = vld [vmem:[#allocation2 + $0x48] sm:$0xff] }
 0x55e   : > { %v5219_v29 = vpack.c.bf16 %v5160_v60, %v5159_v63 }
 0x55f   : > { %v5161_v61 = vld [vmem:[#allocation2 + $0x50] sm:$0xff] }
 0x560   : > { %v4920_v53 = vpop.permute.xlu0 %4919  ;;  %7808 = vmatprep.mubr.msk.bf16.mxu0 %vm1865_vm7, %v5219_v29 }
 0x561   : > { %5099 = vst.msk [vmem:[#allocation2 + $0x60] sm:$0xff] %vm1665_vm15, %v4920_v53  ;;  %v5162_v39 = vld [vmem:[#allocation2 + $0x58] sm:$0xff] }
 0x562   : > { %v4922_v36 = vpop.permute.xlu1 %4921  ;;  %v5220_v9 = vpack.c.bf16 %v5162_v39, %v5161_v61 }
 0x563   : > { %5100 = vst.msk [vmem:[#allocation2 + $0x68] sm:$0xff] %vm1665_vm15, %v4922_v36 }
 0x564   : > { %v4924_v11 = vpop.permute.xlu0 %4923  ;;  %7809 = vmatmul.mubr.msk.bf16.gmra.mrb[136].mxu0 %vm1865_vm7, %v5220_v9 }
 0x565   : > { %5101 = vst.msk [vmem:[#allocation2 + $0x70] sm:$0xff] %vm1665_vm15, %v4924_v11 }
 0x566   : > { %v4926_v40 = vpop.permute.xlu1 %4925 }
 0x567   : > { %5102 = vst.msk [vmem:[#allocation2 + $0x78] sm:$0xff] %vm1665_vm15, %v4926_v40 }
 0x568   : > { %v4928_v19 = vpop.permute.xlu0 %4927  ;;  %v5163_v33 = vld [vmem:[#allocation2 + $0x60] sm:$0xff] }
 0x569   : > { %5103 = vst.msk [vmem:[#allocation2 + $0x80] sm:$0xff] %vm1665_vm15, %v4928_v19 }
 0x56a   : > { %v4930_v34 = vpop.permute.xlu1 %4929  ;;  %v5164_v44 = vld [vmem:[#allocation2 + $0x68] sm:$0xff] }
 0x56b   : > { %5104 = vst.msk [vmem:[#allocation2 + $0x88] sm:$0xff] %vm1665_vm15, %v4930_v34  ;;  %v5221_v46 = vpack.c.bf16 %v5164_v44, %v5163_v33 }
 0x56c   : > { %v4932_v8 = vpop.permute.xlu0 %4931  ;;  %v5165_v3 = vld [vmem:[#allocation2 + $0x70] sm:$0xff] }
 0x56d   : > { %5105 = vst.msk [vmem:[#allocation2 + $0x90] sm:$0xff] %vm1665_vm15, %v4932_v8  ;;  %7812 = vmatprep.mubr.msk.bf16.mxu0 %vm1865_vm7, %v5221_v46 }
 0x56e   : > { %v4934_v25 = vpop.permute.xlu1 %4933  ;;  %v5166_v38 = vld [vmem:[#allocation2 + $0x78] sm:$0xff] }
 0x56f   : > { %5106 = vst.msk [vmem:[#allocation2 + $0x98] sm:$0xff] %vm1665_vm15, %v4934_v25  ;;  %v5222_v54 = vpack.c.bf16 %v5166_v38, %v5165_v3 }
 0x570   : > { %v4936_v17 = vpop.permute.xlu0 %4935  ;;  %v5167_v15 = vld [vmem:[#allocation2 + $0x80] sm:$0xff] }
 0x571   : > { %5107 = vst.msk [vmem:[#allocation2 + $0xa0] sm:$0xff] %vm1665_vm15, %v4936_v17  ;;  %7813 = vmatmul.mubr.msk.bf16.gmra.mrb[140].mxu0 %vm1865_vm7, %v5222_v54 }
 0x572   : > { %v4938_v35 = vpop.permute.xlu1 %4937  ;;  %v5168_v51 = vld [vmem:[#allocation2 + $0x88] sm:$0xff] }
 0x573   : > { %5108 = vst.msk [vmem:[#allocation2 + $0xa8] sm:$0xff] %vm1665_vm15, %v4938_v35  ;;  %v5223_v4 = vpack.c.bf16 %v5168_v51, %v5167_v15 }
 0x574   : > { %v4940_v37 = vpop.permute.xlu0 %4939  ;;  %v5169_v14 = vld [vmem:[#allocation2 + $0x90] sm:$0xff] }
 0x575   : > { %5109 = vst.msk [vmem:[#allocation2 + $0xb0] sm:$0xff] %vm1665_vm15, %v4940_v37  ;;  %7816 = vmatprep.mubr.msk.bf16.mxu0 %vm1865_vm7, %v5223_v4 }
 0x576   : > { %v4942_v21 = vpop.permute.xlu1 %4941  ;;  %v5170_v62 = vld [vmem:[#allocation2 + $0x98] sm:$0xff] }
 0x577   : > { %5110 = vst.msk [vmem:[#allocation2 + $0xb8] sm:$0xff] %vm1665_vm15, %v4942_v21  ;;  %v5224_v49 = vpack.c.bf16 %v5170_v62, %v5169_v14 }
 0x578   : > { %v4944_v6 = vpop.permute.xlu0 %4943  ;;  %v5171_v50 = vld [vmem:[#allocation2 + $0xa0] sm:$0xff] }
 0x579   : > { %5111 = vst.msk [vmem:[#allocation2 + $0xc0] sm:$0xff] %vm1665_vm15, %v4944_v6  ;;  %7817 = vmatmul.mubr.msk.bf16.gmra.mrb[144].mxu0 %vm1865_vm7, %v5224_v49 }
 0x57a   : > { %v4946_v18 = vpop.permute.xlu1 %4945  ;;  %v5172_v23 = vld [vmem:[#allocation2 + $0xa8] sm:$0xff] }
 0x57b   : > { %5112 = vst.msk [vmem:[#allocation2 + $0xc8] sm:$0xff] %vm1665_vm15, %v4946_v18  ;;  %v5225_v57 = vpack.c.bf16 %v5172_v23, %v5171_v50 }
 0x57c   : > { %v4948_v45 = vpop.permute.xlu0 %4947  ;;  %v5173_v24 = vld [vmem:[#allocation2 + $0xb0] sm:$0xff] }
 0x57d   : > { %5113 = vst.msk [vmem:[#allocation2 + $0xd0] sm:$0xff] %vm1665_vm15, %v4948_v45  ;;  %7820 = vmatprep.mubr.msk.bf16.mxu0 %vm1865_vm7, %v5225_v57 }
 0x57e   : > { %v4950_v43 = vpop.permute.xlu1 %4949  ;;  %v5174_v16 = vld [vmem:[#allocation2 + $0xb8] sm:$0xff] }
 0x57f   : > { %5114 = vst.msk [vmem:[#allocation2 + $0xd8] sm:$0xff] %vm1665_vm15, %v4950_v43  ;;  %v5226_v0 = vpack.c.bf16 %v5174_v16, %v5173_v24 }
 0x580   : > { %v4952_v48 = vpop.permute.xlu0 %4951  ;;  %v5175_v26 = vld [vmem:[#allocation2 + $0xc0] sm:$0xff] }
 0x581   : > { %5115 = vst.msk [vmem:[#allocation2 + $0xe0] sm:$0xff] %vm1665_vm15, %v4952_v48  ;;  %7821 = vmatmul.mubr.msk.bf16.gmra.mrb[148].mxu0 %vm1865_vm7, %v5226_v0 }
 0x582   : > { %v4954_v5 = vpop.permute.xlu1 %4953  ;;  %v5176_v59 = vld [vmem:[#allocation2 + $0xc8] sm:$0xff] }
 0x583   : > { %5116 = vst.msk [vmem:[#allocation2 + $0xe8] sm:$0xff] %vm1665_vm15, %v4954_v5  ;;  %v5227_v12 = vpack.c.bf16 %v5176_v59, %v5175_v26 }
 0x584   : > { %v4956_v31 = vpop.permute.xlu0 %4955  ;;  %v5177_v56 = vld [vmem:[#allocation2 + $0xd0] sm:$0xff] }
 0x585   : > { %5117 = vst.msk [vmem:[#allocation2 + $0xf0] sm:$0xff] %vm1665_vm15, %v4956_v31  ;;  %7824 = vmatprep.mubr.msk.bf16.mxu0 %vm1865_vm7, %v5227_v12 }
 0x586   : > { %v4958_v41 = vpop.permute.xlu1 %4957  ;;  %v5178_v55 = vld [vmem:[#allocation2 + $0xd8] sm:$0xff] }
 0x587   : > { %5118 = vst.msk [vmem:[#allocation2 + $0xf8] sm:$0xff] %vm1665_vm15, %v4958_v41  ;;  %v5228_v28 = vpack.c.bf16 %v5178_v55, %v5177_v56 }
 0x588   : > { %v4960_v7 = vpop.permute.xlu0 %4959  ;;  %v5179_v1 = vld [vmem:[#allocation2 + $0xe0] sm:$0xff] }
 0x589   : > { %5119 = vst.msk [vmem:[#allocation2 + $0x100] sm:$0xff] %vm1665_vm15, %v4960_v7  ;;  %7825 = vmatmul.mubr.msk.bf16.gmra.mrb[152].mxu0 %vm1865_vm7, %v5228_v28 }
 0x58a   : > { %v4962_v58 = vpop.permute.xlu1 %4961  ;;  %v5180_v27 = vld [vmem:[#allocation2 + $0xe8] sm:$0xff] }
 0x58b   : > { %5120 = vst.msk [vmem:[#allocation2 + $0x108] sm:$0xff] %vm1665_vm15, %v4962_v58  ;;  %v5229_v32 = vpack.c.bf16 %v5180_v27, %v5179_v1 }
 0x58c   : > { %v4964_v13 = vpop.permute.xlu0 %4963  ;;  %v5181_v52 = vld [vmem:[#allocation2 + $0xf0] sm:$0xff] }
 0x58d   : > { %5121 = vst.msk [vmem:[#allocation2 + $0x110] sm:$0xff] %vm1665_vm15, %v4964_v13  ;;  %7828 = vmatprep.mubr.msk.bf16.mxu0 %vm1865_vm7, %v5229_v32 }
 0x58e   : > { %v4966_v20 = vpop.permute.xlu1 %4965  ;;  %v5182_v10 = vld [vmem:[#allocation2 + $0xf8] sm:$0xff] }
 0x58f   : > { %5122 = vst.msk [vmem:[#allocation2 + $0x118] sm:$0xff] %vm1665_vm15, %v4966_v20  ;;  %v5230_v22 = vpack.c.bf16 %v5182_v10, %v5181_v52 }
 0x590   : > { %v4968_v42 = vpop.permute.xlu0 %4967  ;;  %v5183_v30 = vld [vmem:[#allocation2 + $0x100] sm:$0xff] }
 0x591   : > { %5123 = vst.msk [vmem:[#allocation2 + $0x120] sm:$0xff] %vm1665_vm15, %v4968_v42  ;;  %7829 = vmatmul.mubr.msk.bf16.gmra.mrb[156].mxu0 %vm1865_vm7, %v5230_v22 }
 0x592   : > { %v4970_v2 = vpop.permute.xlu1 %4969  ;;  %v5184_v47 = vld [vmem:[#allocation2 + $0x108] sm:$0xff] }
 0x593   : > { %5124 = vst.msk [vmem:[#allocation2 + $0x128] sm:$0xff] %vm1665_vm15, %v4970_v2  ;;  %v5231_v60 = vpack.c.bf16 %v5184_v47, %v5183_v30 }
 0x594   : > { %v4972_v63 = vpop.permute.xlu0 %4971  ;;  %v5185_v29 = vld [vmem:[#allocation2 + $0x110] sm:$0xff] }
 0x595   : > { %5125 = vst.msk [vmem:[#allocation2 + $0x130] sm:$0xff] %vm1665_vm15, %v4972_v63  ;;  %7832 = vmatprep.mubr.msk.bf16.mxu0 %vm1865_vm7, %v5231_v60 }
 0x596   : > { %v4974_v53 = vpop.permute.xlu1 %4973  ;;  %v5186_v36 = vld [vmem:[#allocation2 + $0x118] sm:$0xff] }
 0x597   : > { %5126 = vst.msk [vmem:[#allocation2 + $0x138] sm:$0xff] %vm1665_vm15, %v4974_v53  ;;  %v5232_v39 = vpack.c.bf16 %v5186_v36, %v5185_v29 }
 0x598   : > { %v4976_v61 = vpop.permute.xlu0 %4975  ;;  %v5187_v9 = vld [vmem:[#allocation2 + $0x120] sm:$0xff] }
 0x599   : > { %5127 = vst.msk [vmem:[#allocation2 + $0x140] sm:$0xff] %vm1665_vm15, %v4976_v61  ;;  %7833 = vmatmul.mubr.msk.bf16.gmra.mrb[160].mxu0 %vm1865_vm7, %v5232_v39 }
 0x59a   : > { %v4978_v11 = vpop.permute.xlu1 %4977  ;;  %v5188_v40 = vld [vmem:[#allocation2 + $0x128] sm:$0xff] }
 0x59b   : > { %5128 = vst.msk [vmem:[#allocation2 + $0x148] sm:$0xff] %vm1665_vm15, %v4978_v11  ;;  %v5233_v34 = vpack.c.bf16 %v5188_v40, %v5187_v9  ;;  %v11208_v9 = vld [vmem:[%s11859_s6] ss:$0 sm:$0xff] }
 0x59c   : > { %v4980_v19 = vpop.permute.xlu0 %4979  ;;  %v5189_v44 = vld [vmem:[#allocation2 + $0x130] sm:$0xff] }
 0x59d   : > { %5129 = vst.msk [vmem:[#allocation2 + $0x150] sm:$0xff] %vm1665_vm15, %v4980_v19  ;;  %7836 = vmatprep.mubr.msk.bf16.mxu0 %vm1865_vm7, %v5233_v34 }
 0x59e   : > { %v4982_v33 = vpop.permute.xlu1 %4981  ;;  %v5190_v8 = vld [vmem:[#allocation2 + $0x138] sm:$0xff] }
 0x59f   : > { %5130 = vst.msk [vmem:[#allocation2 + $0x158] sm:$0xff] %vm1665_vm15, %v4982_v33  ;;  %v5234_v25 = vpack.c.bf16 %v5190_v8, %v5189_v44 }
 0x5a0   : > { %v4984_v46 = vpop.permute.xlu0 %4983  ;;  %v5191_v38 = vld [vmem:[#allocation2 + $0x140] sm:$0xff] }
 0x5a1   : > { %5131 = vst.msk [vmem:[#allocation2 + $0x160] sm:$0xff] %vm1665_vm15, %v4984_v46  ;;  %7837 = vmatmul.mubr.msk.bf16.gmra.mrb[164].mxu0 %vm1865_vm7, %v5234_v25 }
 0x5a2   : > { %v4986_v3 = vpop.permute.xlu1 %4985  ;;  %v5192_v17 = vld [vmem:[#allocation2 + $0x148] sm:$0xff] }
 0x5a3   : > { %5132 = vst.msk [vmem:[#allocation2 + $0x168] sm:$0xff] %vm1665_vm15, %v4986_v3  ;;  %v5235_v35 = vpack.c.bf16 %v5192_v17, %v5191_v38 }
 0x5a4   : > { %v4988_v54 = vpop.permute.xlu0 %4987  ;;  %v5193_v51 = vld [vmem:[#allocation2 + $0x150] sm:$0xff] }
 0x5a5   : > { %5133 = vst.msk [vmem:[#allocation2 + $0x170] sm:$0xff] %vm1665_vm15, %v4988_v54  ;;  %7840 = vmatprep.mubr.msk.bf16.mxu0 %vm1865_vm7, %v5235_v35 }
 0x5a6   : > { %v4990_v15 = vpop.permute.xlu1 %4989  ;;  %v5194_v37 = vld [vmem:[#allocation2 + $0x158] sm:$0xff] }
 0x5a7   : > { %5134 = vst.msk [vmem:[#allocation2 + $0x178] sm:$0xff] %vm1665_vm15, %v4990_v15  ;;  %v5236_v21 = vpack.c.bf16 %v5194_v37, %v5193_v51 }
 0x5a8   : > { %v4992_v4 = vpop.permute.xlu0 %4991  ;;  %v5195_v62 = vld [vmem:[#allocation2 + $0x160] sm:$0xff] }
 0x5a9   : > { %5135 = vst.msk [vmem:[#allocation2 + $0x180] sm:$0xff] %vm1665_vm15, %v4992_v4  ;;  %7841 = vmatmul.mubr.msk.bf16.gmra.mrb[168].mxu0 %vm1865_vm7, %v5236_v21 }
 0x5aa   : > { %v4994_v14 = vpop.permute.xlu1 %4993  ;;  %v5196_v6 = vld [vmem:[#allocation2 + $0x168] sm:$0xff] }
 0x5ab   : > { %5136 = vst.msk [vmem:[#allocation2 + $0x188] sm:$0xff] %vm1665_vm15, %v4994_v14  ;;  %v5237_v18 = vpack.c.bf16 %v5196_v6, %v5195_v62 }
 0x5ac   : > { %v4996_v49 = vpop.permute.xlu0 %4995  ;;  %v5197_v23 = vld [vmem:[#allocation2 + $0x170] sm:$0xff] }
 0x5ad   : > { %5137 = vst.msk [vmem:[#allocation2 + $0x190] sm:$0xff] %vm1665_vm15, %v4996_v49  ;;  %7844 = vmatprep.mubr.msk.bf16.mxu0 %vm1865_vm7, %v5237_v18 }
 0x5ae   : > { %v4998_v50 = vpop.permute.xlu1 %4997  ;;  %v5198_v45 = vld [vmem:[#allocation2 + $0x178] sm:$0xff] }
 0x5af   : > { %5138 = vst.msk [vmem:[#allocation2 + $0x198] sm:$0xff] %vm1665_vm15, %v4998_v50  ;;  %v5238_v43 = vpack.c.bf16 %v5198_v45, %v5197_v23 }
 0x5b0   : > { %v5000_v57 = vpop.permute.xlu0 %4999  ;;  %v5199_v16 = vld [vmem:[#allocation2 + $0x180] sm:$0xff] }
 0x5b1   : > { %5139 = vst.msk [vmem:[#allocation2 + $0x1a0] sm:$0xff] %vm1665_vm15, %v5000_v57  ;;  %7845 = vmatmul.mubr.msk.bf16.gmra.mrb[172].mxu0 %vm1865_vm7, %v5238_v43 }
 0x5b2   : > { %v5002_v24 = vpop.permute.xlu1 %5001  ;;  %v5200_v48 = vld [vmem:[#allocation2 + $0x188] sm:$0xff] }
 0x5b3   : > { %5140 = vst.msk [vmem:[#allocation2 + $0x1a8] sm:$0xff] %vm1665_vm15, %v5002_v24  ;;  %v5239_v5 = vpack.c.bf16 %v5200_v48, %v5199_v16 }
 0x5b4   : > { %v5004_v0 = vpop.permute.xlu0 %5003  ;;  %v5201_v59 = vld [vmem:[#allocation2 + $0x190] sm:$0xff] }
 0x5b5   : > { %5141 = vst.msk [vmem:[#allocation2 + $0x1b0] sm:$0xff] %vm1665_vm15, %v5004_v0  ;;  %7848 = vmatprep.mubr.msk.bf16.mxu0 %vm1865_vm7, %v5239_v5 }
 0x5b6   : > { %v5006_v26 = vpop.permute.xlu1 %5005  ;;  %v5202_v31 = vld [vmem:[#allocation2 + $0x198] sm:$0xff] }
 0x5b7   : > { %5142 = vst.msk [vmem:[#allocation2 + $0x1b8] sm:$0xff] %vm1665_vm15, %v5006_v26  ;;  %v5240_v41 = vpack.c.bf16 %v5202_v31, %v5201_v59 }
 0x5b8   : > { %v5008_v12 = vpop.permute.xlu0 %5007  ;;  %v5203_v55 = vld [vmem:[#allocation2 + $0x1a0] sm:$0xff] }
 0x5b9   : > { %5143 = vst.msk [vmem:[#allocation2 + $0x1c0] sm:$0xff] %vm1665_vm15, %v5008_v12  ;;  %7849 = vmatmul.mubr.msk.bf16.gmra.mrb[176].mxu0 %vm1865_vm7, %v5240_v41 }
 0x5ba   : > { %v5010_v56 = vpop.permute.xlu1 %5009  ;;  %v5204_v7 = vld [vmem:[#allocation2 + $0x1a8] sm:$0xff] }
 0x5bb   : > { %5144 = vst.msk [vmem:[#allocation2 + $0x1c8] sm:$0xff] %vm1665_vm15, %v5010_v56  ;;  %v5241_v58 = vpack.c.bf16 %v5204_v7, %v5203_v55 }
 0x5bc   : > { %v5012_v28 = vpop.permute.xlu0 %5011  ;;  %v5205_v27 = vld [vmem:[#allocation2 + $0x1b0] sm:$0xff] }
 0x5bd   : > { %5145 = vst.msk [vmem:[#allocation2 + $0x1d0] sm:$0xff] %vm1665_vm15, %v5012_v28  ;;  %7852 = vmatprep.mubr.msk.bf16.mxu0 %vm1865_vm7, %v5241_v58 }
 0x5be   : > { %v5014_v1 = vpop.permute.xlu1 %5013  ;;  %v5206_v13 = vld [vmem:[#allocation2 + $0x1b8] sm:$0xff] }
 0x5bf   : > { %5146 = vst.msk [vmem:[#allocation2 + $0x1d8] sm:$0xff] %vm1665_vm15, %v5014_v1  ;;  %v5242_v20 = vpack.c.bf16 %v5206_v13, %v5205_v27 }
 0x5c0   : > { %v5016_v32 = vpop.permute.xlu0 %5015  ;;  %v5207_v10 = vld [vmem:[#allocation2 + $0x1c0] sm:$0xff] }
 0x5c1   : > { %5147 = vst.msk [vmem:[#allocation2 + $0x1e0] sm:$0xff] %vm1665_vm15, %v5016_v32  ;;  %7853 = vmatmul.mubr.msk.bf16.gmra.mrb[180].mxu0 %vm1865_vm7, %v5242_v20 }
 0x5c2   : > { %v5018_v52 = vpop.permute.xlu1 %5017  ;;  %v5208_v42 = vld [vmem:[#allocation2 + $0x1c8] sm:$0xff] }
 0x5c3   : > { %5148 = vst.msk [vmem:[#allocation2 + $0x1e8] sm:$0xff] %vm1665_vm15, %v5018_v52  ;;  %v5243_v2 = vpack.c.bf16 %v5208_v42, %v5207_v10 }
 0x5c4   : > { %v5020_v22 = vpop.permute.xlu0 %5019  ;;  %v5209_v47 = vld [vmem:[#allocation2 + $0x1d0] sm:$0xff] }
 0x5c5   : > { %5149 = vst.msk [vmem:[#allocation2 + $0x1f0] sm:$0xff] %vm1665_vm15, %v5020_v22  ;;  %7856 = vmatprep.mubr.msk.bf16.mxu0 %vm1865_vm7, %v5243_v2 }
 0x5c6   : > { %v5022_v30 = vpop.permute.xlu1 %5021  ;;  %v5210_v63 = vld [vmem:[#allocation2 + $0x1d8] sm:$0xff] }
 0x5c7   : > { %5150 = vst.msk [vmem:[#allocation2 + $0x1f8] sm:$0xff] %vm1665_vm15, %v5022_v30  ;;  %v5244_v60 = vpack.c.bf16 %v5210_v63, %v5209_v47 }
 0x5c8   : > { %v5211_v53 = vld [vmem:[#allocation2 + $0x1e0] sm:$0xff] }
 0x5c9   : > { %7857 = vmatmul.mubr.msk.bf16.gmra.mrb[184].mxu0 %vm1865_vm7, %v5244_v60 }
 0x5ca   : > { %v5212_v29 = vld [vmem:[#allocation2 + $0x1e8] sm:$0xff] }
 0x5cb   : > { %v5245_v36 = vpack.c.bf16 %v5212_v29, %v5211_v53 }
 0x5cc   : > { %v5213_v61 = vld [vmem:[#allocation2 + $0x1f0] sm:$0xff] }
 0x5cd   : > { %7860 = vmatprep.mubr.msk.bf16.mxu0 %vm1865_vm7, %v5245_v36 }
 0x5ce   : > { %v5214_v39 = vld [vmem:[#allocation2 + $0x1f8] sm:$0xff] }
 0x5cf   : > { %v5246_v11 = vpack.c.bf16 %v5214_v39, %v5213_v61 }
 0x5d1   : > { %7861 = vmatmul.mubr.msk.bf16.gmra.mrb[188].mxu0 %vm1865_vm7, %v5246_v11 }
 0x626   : > { %v7802_v40 = vpop.f32.mrb[128].mxu0 }
 0x627   : > { %v5425_v19 = vadd.f32 %v7802_v40, %v11208_v9  ;;  %v5416_v34 = vpop.f32.mrb[129].mxu0 }
 0x628   : > { %v5417_v33 = vadd.f32 %v11208_v9, %v5416_v34  ;;  %v7803_v44 = vpop.f32.mrb[130].mxu0 }
 0x629   : > { %v5737_v8 = vmin.f32 %v5425_v19, 0.0  ;;  %v5428_v46 = vadd.f32 %v7803_v44, %v11208_v9  ;;  %v5419_v25 = vpop.f32.mrb[131].mxu0  ;;  %vm5673_vm15 = vcmp.gt.f32.partialorder %v5425_v19, 0.0 }
 0x62a   : > { %v5735_v3 = vmin.f32 %v5417_v33, 0.0  ;;  %v5420_v38 = vadd.f32 %v11208_v9, %v5419_v25  ;;  %vm5671_vm7 = vcmp.gt.f32.partialorder %v5417_v33, 0.0 }
 0x62b   : > { %v5803_v17 = vmul.f32 1.442695, %v5737_v8  ;;  %v5738_v54 = vmin.f32 %v5428_v46, 0.0  ;;  %vm5674_vm4 = vcmp.gt.f32.partialorder %v5428_v46, 0.0 }
 0x62c   : > { %v5799_v35 = vmul.f32 1.442695, %v5735_v3  ;;  %v5736_v15 = vmin.f32 %v5420_v38, 0.0  ;;  %vm5672_vm5 = vcmp.gt.f32.partialorder %v5420_v38, 0.0 }
 0x62d   : > { %8537 = vpow2.f32 %v5803_v17  ;;  %v5805_v51 = vmul.f32 1.442695, %v5738_v54 }
 0x62e   : > { %8539 = vpow2.f32 %v5799_v35  ;;  %v5801_v37 = vmul.f32 1.442695, %v5736_v15 }
 0x62f   : > { %8541 = vpow2.f32 %v5805_v51  ;;  %v7806_v4 = vpop.f32.mrb[132].mxu0 }
 0x630   : > { %8543 = vpow2.f32 %v5801_v37  ;;  %v11215_v21 = vadd.f32 %v7806_v4, %v11208_v9  ;;  %v5432_v14 = vpop.f32.mrb[133].mxu0 }
 0x631   : > { %v11218_v62 = vadd.f32 %v11208_v9, %v5432_v14  ;;  %v7807_v6 = vpop.f32.mrb[134].mxu0 }
 0x632   : > { %v5741_v49 = vmin.f32 %v11215_v21, 0.0  ;;  %v11222_v18 = vadd.f32 %v7807_v6, %v11208_v9  ;;  %v5435_v50 = vpop.f32.mrb[135].mxu0  ;;  %vm5677_vm6 = vcmp.gt.f32.partialorder %v11215_v21, 0.0 }
 0x633   : > { %v5739_v23 = vmin.f32 %v11218_v62, 0.0  ;;  %v11226_v45 = vadd.f32 %v11208_v9, %v5435_v50  ;;  %vm5675_vm8 = vcmp.gt.f32.partialorder %v11218_v62, 0.0 }
 0x634   : > { %v5811_v57 = vmul.f32 1.442695, %v5741_v49  ;;  %v5742_v43 = vmin.f32 %v11222_v18, 0.0  ;;  %vm5678_vm9 = vcmp.gt.f32.partialorder %v11222_v18, 0.0 }
 0x635   : > { %v5807_v24 = vmul.f32 1.442695, %v5739_v23  ;;  %v5740_v16 = vmin.f32 %v11226_v45, 0.0  ;;  %vm5676_vm10 = vcmp.gt.f32.partialorder %v11226_v45, 0.0 }
 0x636   : > { %8545 = vpow2.f32 %v5811_v57  ;;  %v5813_v0 = vmul.f32 1.442695, %v5742_v43 }
 0x637   : > { %v8538_v48 = vpop.eup %8537  ;;  %8547 = vpow2.f32 %v5807_v24  ;;  %v5809_v59 = vmul.f32 1.442695, %v5740_v16  ;;  %v7810_v7 = vpop.f32.mrb[136].mxu0 }
 0x638   : > { %v8540_v5 = vpop.eup %8539  ;;  %v7196_v26 = vadd.f32 -1.0, %v8538_v48  ;;  %8549 = vpow2.f32 %v5813_v0  ;;  %v11231_v1 = vadd.f32 %v7810_v7, %v11208_v9  ;;  %v5448_v27 = vpop.f32.mrb[137].mxu0 }
 0x639   : > { %v8542_v31 = vpop.eup %8541  ;;  %v7194_v12 = vadd.f32 -1.0, %v8540_v5  ;;  %8551 = vpow2.f32 %v5809_v59  ;;  %v11234_v32 = vadd.f32 %v11208_v9, %v5448_v27  ;;  %v7811_v20 = vpop.f32.mrb[138].mxu0 }
 0x63a   : > { %v8544_v41 = vpop.eup %8543  ;;  %v5993_v56 = vmul.f32 0.1, %v7196_v26  ;;  %v7197_v55 = vadd.f32 -1.0, %v8542_v31  ;;  %v5745_v42 = vmin.f32 %v11231_v1, 0.0  ;;  %v5451_v22 = vpop.f32.mrb[139].mxu0  ;;  %v11239_v63 = vadd.f32 %v7811_v20, %v11208_v9 }
 0x63b   : > { %v5991_v28 = vmul.f32 0.1, %v7194_v12  ;;  %v7195_v58 = vadd.f32 -1.0, %v8544_v41  ;;  %v5743_v47 = vmin.f32 %v11234_v32, 0.0  ;;  %v11242_v36 = vadd.f32 %v11208_v9, %v5451_v22 }
 0x63c   : > { %v5994_v13 = vmul.f32 0.1, %v7197_v55  ;;  %v6057_v52 = vsel %vm5673_vm15, %v5425_v19, %v5993_v56  ;;  %v5819_v29 = vmul.f32 1.442695, %v5745_v42  ;;  %v5746_v11 = vmin.f32 %v11239_v63, 0.0 }
 0x63d   : > { %v5992_v10 = vmul.f32 0.1, %v7195_v58  ;;  %v6055_v2 = vsel %vm5671_vm7, %v5417_v33, %v5991_v28  ;;  %v5815_v39 = vmul.f32 1.442695, %v5743_v47  ;;  %v5744_v19 = vmin.f32 %v11242_v36, 0.0 }
 0x63e   : > { %v6058_v30 = vsel %vm5674_vm4, %v5428_v46, %v5994_v13  ;;  %8553 = vpow2.f32 %v5819_v29  ;;  %v5821_v44 = vmul.f32 1.442695, %v5746_v11  ;;  %vm5681_vm11 = vcmp.gt.f32.partialorder %v11231_v1, 0.0 }
 0x63f   : > { %v6120_v60 = vpack.c.bf16 %v6058_v30, %v6057_v52  ;;  %v6056_v53 = vsel %vm5672_vm5, %v5420_v38, %v5992_v10  ;;  %8555 = vpow2.f32 %v5815_v39  ;;  %v5817_v25 = vmul.f32 1.442695, %v5744_v19 }
 0x640   : > { %v6119_v61 = vpack.c.bf16 %v6056_v53, %v6055_v2  ;;  %v8546_v40 = vpop.eup %8545  ;;  %8557 = vpow2.f32 %v5821_v44  ;;  %vm5679_vm12 = vcmp.gt.f32.partialorder %v11234_v32, 0.0  ;;  %vm5682_vm13 = vcmp.gt.f32.partialorder %v11239_v63, 0.0 }
 0x641   : > { %v8548_v34 = vpop.eup %8547  ;;  %v7200_v33 = vadd.f32 -1.0, %v8546_v40  ;;  %8559 = vpow2.f32 %v5817_v25  ;;  %vm5680_vm14 = vcmp.gt.f32.partialorder %v11242_v36, 0.0 }
 0x642   : > { %7868 = vmatprep.mubr.msk.bf16.mxu1 %vm1344_vm2, %v6119_v61  ;;  %v8550_v8 = vpop.eup %8549  ;;  %v7198_v46 = vadd.f32 -1.0, %v8548_v34 }
 0x643   : > { %7869 = vmatmul.mubr.msk.bf16.vlgmr.msra.gmra.mrb[128].mxu1 %vm1344_vm2, %v6120_v60  ;;  %v8552_v3 = vpop.eup %8551  ;;  %v5997_v38 = vmul.f32 0.1, %v7200_v33  ;;  %v7201_v17 = vadd.f32 -1.0, %v8550_v8 }
 0x644   : > { %v5995_v54 = vmul.f32 0.1, %v7198_v46  ;;  %v7199_v35 = vadd.f32 -1.0, %v8552_v3  ;;  %v7814_v51 = vpop.f32.mrb[140].mxu0 }
 0x645   : > { %v5998_v15 = vmul.f32 0.1, %v7201_v17  ;;  %v11252_v4 = vadd.f32 %v7814_v51, %v11208_v9  ;;  %v5464_v14 = vpop.f32.mrb[141].mxu0  ;;  %v6061_v6 = vsel %vm5677_vm6, %v11215_v21, %v5997_v38 }
 0x646   : > { %v5996_v37 = vmul.f32 0.1, %v7199_v35  ;;  %v11258_v50 = vadd.f32 %v11208_v9, %v5464_v14  ;;  %v7815_v23 = vpop.f32.mrb[142].mxu0  ;;  %v6059_v57 = vsel %vm5675_vm8, %v11218_v62, %v5995_v54 }
 0x647   : > { %v6062_v49 = vsel %vm5678_vm9, %v11222_v18, %v5998_v15  ;;  %v5749_v16 = vmin.f32 %v11252_v4, 0.0  ;;  %v5467_v48 = vpop.f32.mrb[143].mxu0  ;;  %v11265_v21 = vadd.f32 %v7815_v23, %v11208_v9  ;;  %vm5685_vm0 = vcmp.gt.f32.partialorder %v11252_v4, 0.0 }
 0x648   : > { %v6122_v43 = vpack.c.bf16 %v6062_v49, %v6061_v6  ;;  %v6060_v24 = vsel %vm5676_vm10, %v11226_v45, %v5996_v37  ;;  %v5747_v5 = vmin.f32 %v11258_v50, 0.0  ;;  %v8554_v18 = vpop.eup %8553  ;;  %v11268_v59 = vadd.f32 %v11208_v9, %v5467_v48 }
 0x649   : > { %v6121_v0 = vpack.c.bf16 %v6060_v24, %v6059_v57  ;;  %v5827_v26 = vmul.f32 1.442695, %v5749_v16  ;;  %v8556_v31 = vpop.eup %8555  ;;  %v7204_v12 = vadd.f32 -1.0, %v8554_v18  ;;  %v5750_v41 = vmin.f32 %v11265_v21, 0.0 }
 0x64a   : > { %v5823_v62 = vmul.f32 1.442695, %v5747_v5  ;;  %v7202_v45 = vadd.f32 -1.0, %v8556_v31  ;;  %v5748_v56 = vmin.f32 %v11268_v59, 0.0  ;;  %v8558_v55 = vpop.eup %8557  ;;  %vm5683_vm1 = vcmp.gt.f32.partialorder %v11258_v50, 0.0 }
 0x64b   : > { %7872 = vmatprep.mubr.msk.bf16.mxu1 %vm1344_vm2, %v6121_v0  ;;  %8561 = vpow2.f32 %v5827_v26  ;;  %v6001_v7 = vmul.f32 0.1, %v7204_v12  ;;  %v5829_v28 = vmul.f32 1.442695, %v5750_v41  ;;  %v8560_v27 = vpop.eup %8559  ;;  %v7205_v20 = vadd.f32 -1.0, %v8558_v55 }
 0x64c   : > { %7873 = vmatmul.mubr.msk.bf16.gmra.mrb[132].mxu1 %vm1344_vm2, %v6122_v43  ;;  %8563 = vpow2.f32 %v5823_v62  ;;  %v7818_v58 = vpop.f32.mrb[144].mxu0  ;;  %v5999_v13 = vmul.f32 0.1, %v7202_v45  ;;  %v5825_v52 = vmul.f32 1.442695, %v5748_v56  ;;  %v7203_v22 = vadd.f32 -1.0, %v8560_v27 }
 0x64d   : > { %v11276_v10 = vadd.f32 %v7818_v58, %v11208_v9  ;;  %v5480_v42 = vpop.f32.mrb[145].mxu0  ;;  %8565 = vpow2.f32 %v5829_v28  ;;  %v6002_v47 = vmul.f32 0.1, %v7205_v20  ;;  %v6065_v53 = vsel %vm5681_vm11, %v11231_v1, %v6001_v7 }
 0x64e   : > { %v11280_v2 = vadd.f32 %v11208_v9, %v5480_v42  ;;  %v7819_v30 = vpop.f32.mrb[146].mxu0  ;;  %8567 = vpow2.f32 %v5825_v52  ;;  %v6000_v29 = vmul.f32 0.1, %v7203_v22  ;;  %v6063_v11 = vsel %vm5679_vm12, %v11234_v32, %v5999_v13 }
 0x64f   : > { %v5483_v60 = vpop.f32.mrb[147].mxu0  ;;  %v5753_v61 = vmin.f32 %v11276_v10, 0.0  ;;  %v6066_v40 = vsel %vm5682_vm13, %v11239_v63, %v6002_v47  ;;  %v11292_v19 = vadd.f32 %v7819_v30, %v11208_v9  ;;  %vm5686_vm3 = vcmp.gt.f32.partialorder %v11265_v21, 0.0 }
 0x650   : > { %v5751_v39 = vmin.f32 %v11280_v2, 0.0  ;;  %v11295_v34 = vadd.f32 %v11208_v9, %v5483_v60  ;;  %v6124_v33 = vpack.c.bf16 %v6066_v40, %v6065_v53  ;;  %v6064_v44 = vsel %vm5680_vm14, %v11242_v36, %v6000_v29 }
 0x651   : > { %v5835_v8 = vmul.f32 1.442695, %v5753_v61  ;;  %v6123_v46 = vpack.c.bf16 %v6064_v44, %v6063_v11  ;;  %v5754_v25 = vmin.f32 %v11292_v19, 0.0  ;;  %vm5684_vm15 = vcmp.gt.f32.partialorder %v11268_v59, 0.0 }
 0x652   : > { %v5831_v1 = vmul.f32 1.442695, %v5751_v39  ;;  %v5752_v3 = vmin.f32 %v11295_v34, 0.0  ;;  %vm5689_vm7 = vcmp.gt.f32.partialorder %v11276_v10, 0.0  ;;  %vm5687_vm4 = vcmp.gt.f32.partialorder %v11280_v2, 0.0 }
 0x653   : > { %8569 = vpow2.f32 %v5835_v8  ;;  %v5837_v63 = vmul.f32 1.442695, %v5754_v25  ;;  %7876 = vmatprep.mubr.msk.bf16.mxu1 %vm1344_vm2, %v6123_v46  ;;  %vm5690_vm5 = vcmp.gt.f32.partialorder %v11292_v19, 0.0  ;;  %vm5688_vm6 = vcmp.gt.f32.partialorder %v11295_v34, 0.0 }
 0x654   : > { %v7822_v32 = vpop.f32.mrb[148].mxu0  ;;  %8571 = vpow2.f32 %v5831_v1  ;;  %v5833_v15 = vmul.f32 1.442695, %v5752_v3  ;;  %7877 = vmatmul.mubr.msk.bf16.gmra.mrb[136].mxu1 %vm1344_vm2, %v6124_v33 }
 0x655   : > { %v8562_v38 = vpop.eup %8561  ;;  %v11301_v17 = vadd.f32 %v7822_v32, %v11208_v9  ;;  %v5496_v54 = vpop.f32.mrb[149].mxu0  ;;  %8573 = vpow2.f32 %v5837_v63 }
 0x656   : > { %v8564_v35 = vpop.eup %8563  ;;  %v7208_v36 = vadd.f32 -1.0, %v8562_v38  ;;  %v11305_v51 = vadd.f32 %v11208_v9, %v5496_v54  ;;  %v7823_v37 = vpop.f32.mrb[150].mxu0  ;;  %8575 = vpow2.f32 %v5833_v15 }
 0x657   : > { %v7206_v14 = vadd.f32 -1.0, %v8564_v35  ;;  %v5757_v6 = vmin.f32 %v11301_v17, 0.0  ;;  %v5499_v49 = vpop.f32.mrb[151].mxu0  ;;  %v8566_v23 = vpop.eup %8565  ;;  %v11312_v5 = vadd.f32 %v7823_v37, %v11208_v9  ;;  %vm5693_vm8 = vcmp.gt.f32.partialorder %v11301_v17, 0.0 }
 0x658   : > { %v6005_v57 = vmul.f32 0.1, %v7208_v36  ;;  %v5755_v43 = vmin.f32 %v11305_v51, 0.0  ;;  %v8568_v24 = vpop.eup %8567  ;;  %v7209_v48 = vadd.f32 -1.0, %v8566_v23  ;;  %v11316_v31 = vadd.f32 %v11208_v9, %v5499_v49 }
 0x659   : > { %v6003_v16 = vmul.f32 0.1, %v7206_v14  ;;  %v5843_v0 = vmul.f32 1.442695, %v5757_v6  ;;  %v7207_v18 = vadd.f32 -1.0, %v8568_v24  ;;  %v5758_v45 = vmin.f32 %v11312_v5, 0.0 }
 0x65a   : > { %v5839_v26 = vmul.f32 1.442695, %v5755_v43  ;;  %v6006_v12 = vmul.f32 0.1, %v7209_v48  ;;  %v6069_v62 = vsel %vm5685_vm0, %v11252_v4, %v6005_v57  ;;  %v5756_v28 = vmin.f32 %v11316_v31, 0.0 }
 0x65b   : > { %8577 = vpow2.f32 %v5843_v0  ;;  %v6004_v41 = vmul.f32 0.1, %v7207_v18  ;;  %v6067_v55 = vsel %vm5683_vm1, %v11258_v50, %v6003_v16  ;;  %v5845_v4 = vmul.f32 1.442695, %v5758_v45 }
 0x65c   : > { %8579 = vpow2.f32 %v5839_v26  ;;  %v7826_v56 = vpop.f32.mrb[152].mxu0  ;;  %v6070_v7 = vsel %vm5686_vm3, %v11265_v21, %v6006_v12  ;;  %v5841_v21 = vmul.f32 1.442695, %v5756_v28  ;;  %vm5691_vm9 = vcmp.gt.f32.partialorder %v11305_v51, 0.0 }
 0x65d   : > { %v11328_v58 = vadd.f32 %v7826_v56, %v11208_v9  ;;  %v5512_v27 = vpop.f32.mrb[153].mxu0  ;;  %v8570_v13 = vpop.eup %8569  ;;  %v6126_v20 = vpack.c.bf16 %v6070_v7, %v6069_v62  ;;  %v6068_v52 = vsel %vm5684_vm15, %v11268_v59, %v6004_v41  ;;  %8581 = vpow2.f32 %v5845_v4 }
 0x65e   : > { %v11332_v42 = vadd.f32 %v11208_v9, %v5512_v27  ;;  %v7827_v22 = vpop.f32.mrb[154].mxu0  ;;  %v8572_v30 = vpop.eup %8571  ;;  %v6125_v47 = vpack.c.bf16 %v6068_v52, %v6067_v55  ;;  %v7212_v50 = vadd.f32 -1.0, %v8570_v13  ;;  %8583 = vpow2.f32 %v5841_v21 }
 0x65f   : > { %v5515_v60 = vpop.f32.mrb[155].mxu0  ;;  %v7210_v53 = vadd.f32 -1.0, %v8572_v30  ;;  %v5761_v29 = vmin.f32 %v11328_v58, 0.0  ;;  %v8574_v61 = vpop.eup %8573  ;;  %v11339_v11 = vadd.f32 %v7827_v22, %v11208_v9  ;;  %vm5694_vm10 = vcmp.gt.f32.partialorder %v11312_v5, 0.0 }
 0x660   : > { %v6009_v59 = vmul.f32 0.1, %v7212_v50  ;;  %v5759_v39 = vmin.f32 %v11332_v42, 0.0  ;;  %7880 = vmatprep.mubr.msk.bf16.mxu1 %vm1344_vm2, %v6125_v47  ;;  %v8576_v40 = vpop.eup %8575  ;;  %v7213_v44 = vadd.f32 -1.0, %v8574_v61  ;;  %v11343_v1 = vadd.f32 %v11208_v9, %v5515_v60 }
 0x661   : > { %v6007_v33 = vmul.f32 0.1, %v7210_v53  ;;  %v5851_v8 = vmul.f32 1.442695, %v5761_v29  ;;  %7881 = vmatmul.mubr.msk.bf16.gmra.mrb[140].mxu1 %vm1344_vm2, %v6126_v20  ;;  %v7211_v46 = vadd.f32 -1.0, %v8576_v40  ;;  %v5762_v38 = vmin.f32 %v11339_v11, 0.0 }
 0x662   : > { %v5847_v25 = vmul.f32 1.442695, %v5759_v39  ;;  %v6073_v3 = vsel %vm5689_vm7, %v11276_v10, %v6009_v59  ;;  %v6010_v32 = vmul.f32 0.1, %v7213_v44  ;;  %v5760_v15 = vmin.f32 %v11343_v1, 0.0 }
 0x663   : > { %8585 = vpow2.f32 %v5851_v8  ;;  %v6071_v35 = vsel %vm5687_vm4, %v11280_v2, %v6007_v33  ;;  %v6008_v36 = vmul.f32 0.1, %v7211_v46  ;;  %v5853_v49 = vmul.f32 1.442695, %v5762_v38 }
 0x664   : > { %v7830_v63 = vpop.f32.mrb[156].mxu0  ;;  %8587 = vpow2.f32 %v5847_v25  ;;  %v6074_v10 = vsel %vm5690_vm5, %v11292_v19, %v6010_v32  ;;  %v5849_v16 = vmul.f32 1.442695, %v5760_v15  ;;  %vm5692_vm11 = vcmp.gt.f32.partialorder %v11316_v31, 0.0 }
 0x665   : > { %v8578_v54 = vpop.eup %8577  ;;  %v5528_v37 = vpop.f32.mrb[157].mxu0  ;;  %v11360_v23 = vadd.f32 %v7830_v63, %v11208_v9  ;;  %v6128_v43 = vpack.c.bf16 %v6074_v10, %v6073_v3  ;;  %v6072_v2 = vsel %vm5688_vm6, %v11295_v34, %v6008_v36  ;;  %8589 = vpow2.f32 %v5853_v49 }
 0x666   : > { %v8580_v14 = vpop.eup %8579  ;;  %v7216_v6 = vadd.f32 -1.0, %v8578_v54  ;;  %v7831_v57 = vpop.f32.mrb[158].mxu0  ;;  %v6127_v0 = vpack.c.bf16 %v6072_v2, %v6071_v35  ;;  %8591 = vpow2.f32 %v5849_v16  ;;  %v11367_v12 = vadd.f32 %v11208_v9, %v5528_v37 }
 0x667   : > { %v7214_v24 = vadd.f32 -1.0, %v8580_v14  ;;  %v5531_v48 = vpop.f32.mrb[159].mxu0  ;;  %v5765_v19 = vmin.f32 %v11360_v23, 0.0  ;;  %v8582_v62 = vpop.eup %8581  ;;  %v11372_v34 = vadd.f32 %v7831_v57, %v11208_v9  ;;  %vm5697_vm12 = vcmp.gt.f32.partialorder %v11328_v58, 0.0 }
 0x668   : > { %v6013_v18 = vmul.f32 0.1, %v7216_v6  ;;  %v11375_v41 = vadd.f32 %v11208_v9, %v5531_v48  ;;  %7884 = vmatprep.mubr.msk.bf16.mxu1 %vm1344_vm2, %v6127_v0  ;;  %v8584_v45 = vpop.eup %8583  ;;  %v7217_v56 = vadd.f32 -1.0, %v8582_v62  ;;  %v5763_v27 = vmin.f32 %v11367_v12, 0.0 }
 0x669   : > { %v6011_v26 = vmul.f32 0.1, %v7214_v24  ;;  %v5859_v55 = vmul.f32 1.442695, %v5765_v19  ;;  %7885 = vmatmul.mubr.msk.bf16.gmra.mrb[144].mxu1 %vm1344_vm2, %v6128_v43  ;;  %v7215_v28 = vadd.f32 -1.0, %v8584_v45  ;;  %v5766_v13 = vmin.f32 %v11372_v34, 0.0 }
 0x66a   : > { %v6077_v7 = vsel %vm5693_vm8, %v11301_v17, %v6013_v18  ;;  %v6014_v4 = vmul.f32 0.1, %v7217_v56  ;;  %v5764_v22 = vmin.f32 %v11375_v41, 0.0  ;;  %v5855_v21 = vmul.f32 1.442695, %v5763_v27 }
 0x66b   : > { %v6075_v52 = vsel %vm5691_vm9, %v11305_v51, %v6011_v26  ;;  %8593 = vpow2.f32 %v5859_v55  ;;  %v6012_v50 = vmul.f32 0.1, %v7215_v28  ;;  %v5861_v60 = vmul.f32 1.442695, %v5766_v13 }
 0x66c   : > { %v7834_v20 = vpop.f32.mrb[160].mxu0  ;;  %v6078_v29 = vsel %vm5694_vm10, %v11312_v5, %v6014_v4  ;;  %v5857_v59 = vmul.f32 1.442695, %v5764_v22  ;;  %8595 = vpow2.f32 %v5855_v21  ;;  %vm5695_vm13 = vcmp.gt.f32.partialorder %v11332_v42, 0.0 }
 0x66d   : > { %v5544_v30 = vpop.f32.mrb[161].mxu0  ;;  %v8586_v47 = vpop.eup %8585  ;;  %v11387_v53 = vadd.f32 %v7834_v20, %v11208_v9  ;;  %v6130_v40 = vpack.c.bf16 %v6078_v29, %v6077_v7  ;;  %v6076_v33 = vsel %vm5692_vm11, %v11316_v31, %v6012_v50  ;;  %8597 = vpow2.f32 %v5861_v60 }
 0x66e   : > { %v8588_v17 = vpop.eup %8587  ;;  %v7220_v61 = vadd.f32 -1.0, %v8586_v47  ;;  %v11393_v51 = vadd.f32 %v11208_v9, %v5544_v30  ;;  %v7835_v39 = vpop.f32.mrb[162].mxu0  ;;  %v6129_v46 = vpack.c.bf16 %v6076_v33, %v6075_v52  ;;  %8599 = vpow2.f32 %v5857_v59 }
 0x66f   : > { %v7218_v44 = vadd.f32 -1.0, %v8588_v17  ;;  %v5547_v8 = vpop.f32.mrb[163].mxu0  ;;  %v8590_v5 = vpop.eup %8589  ;;  %v5769_v32 = vmin.f32 %v11387_v53, 0.0  ;;  %vm5698_vm14 = vcmp.gt.f32.partialorder %v11339_v11, 0.0  ;;  %v11404_v54 = vadd.f32 %v7835_v39, %v11208_v9 }
 0x670   : > { %v6017_v25 = vmul.f32 0.1, %v7220_v61  ;;  %v8592_v38 = vpop.eup %8591  ;;  %v7221_v63 = vadd.f32 -1.0, %v8590_v5  ;;  %v5767_v31 = vmin.f32 %v11393_v51, 0.0  ;;  %7888 = vmatprep.mubr.msk.bf16.mxu1 %vm1344_vm2, %v6129_v46  ;;  %vm5696_vm0 = vcmp.gt.f32.partialorder %v11343_v1, 0.0 }
 0x671   : > { %v6015_v3 = vmul.f32 0.1, %v7218_v44  ;;  %v7219_v35 = vadd.f32 -1.0, %v8592_v38  ;;  %v5867_v36 = vmul.f32 1.442695, %v5769_v32  ;;  %v11409_v15 = vadd.f32 %v11208_v9, %v5547_v8  ;;  %7889 = vmatmul.mubr.msk.bf16.gmra.mrb[148].mxu1 %vm1344_vm2, %v6130_v40 }
 0x672   : > { %v6081_v14 = vsel %vm5697_vm12, %v11328_v58, %v6017_v25  ;;  %v6018_v10 = vmul.f32 0.1, %v7221_v63  ;;  %v5863_v6 = vmul.f32 1.442695, %v5767_v31  ;;  %v5770_v49 = vmin.f32 %v11404_v54, 0.0 }
 0x673   : > { %v6079_v57 = vsel %vm5695_vm13, %v11332_v42, %v6015_v3  ;;  %v6016_v43 = vmul.f32 0.1, %v7219_v35  ;;  %8601 = vpow2.f32 %v5867_v36  ;;  %v5768_v2 = vmin.f32 %v11409_v15, 0.0 }
 0x674   : > { %v7838_v37 = vpop.f32.mrb[164].mxu0  ;;  %v6082_v48 = vsel %vm5698_vm14, %v11339_v11, %v6018_v10  ;;  %8603 = vpow2.f32 %v5863_v6  ;;  %v5869_v58 = vmul.f32 1.442695, %v5770_v49  ;;  %vm5701_vm1 = vcmp.gt.f32.partialorder %v11360_v23, 0.0 }
 0x675   : > { %v5560_v24 = vpop.f32.mrb[165].mxu0  ;;  %v8594_v16 = vpop.eup %8593  ;;  %v11424_v0 = vadd.f32 %v7838_v37, %v11208_v9  ;;  %v6132_v26 = vpack.c.bf16 %v6082_v48, %v6081_v14  ;;  %v6080_v42 = vsel %vm5696_vm0, %v11343_v1, %v6016_v43  ;;  %v5865_v62 = vmul.f32 1.442695, %v5768_v2 }
 0x676   : > { %v7839_v18 = vpop.f32.mrb[166].mxu0  ;;  %v7224_v19 = vadd.f32 -1.0, %v8594_v16  ;;  %v6131_v56 = vpack.c.bf16 %v6080_v42, %v6079_v57  ;;  %8605 = vpow2.f32 %v5869_v58  ;;  %v8596_v7 = vpop.eup %8595  ;;  %v11431_v28 = vadd.f32 %v11208_v9, %v5560_v24 }
 0x677   : > { %v5563_v45 = vpop.f32.mrb[167].mxu0  ;;  %v5773_v55 = vmin.f32 %v11424_v0, 0.0  ;;  %8607 = vpow2.f32 %v5865_v62  ;;  %v11434_v27 = vadd.f32 %v7839_v18, %v11208_v9  ;;  %v8598_v13 = vpop.eup %8597  ;;  %v7222_v1 = vadd.f32 -1.0, %v8596_v7 }
 0x678   : > { %v6021_v11 = vmul.f32 0.1, %v7224_v19  ;;  %v11438_v52 = vadd.f32 %v11208_v9, %v5563_v45  ;;  %7892 = vmatprep.mubr.msk.bf16.mxu1 %vm1344_vm2, %v6131_v56  ;;  %v8600_v4 = vpop.eup %8599  ;;  %vm5699_vm3 = vcmp.gt.f32.partialorder %v11367_v12, 0.0  ;;  %vm5702_vm15 = vcmp.gt.f32.partialorder %v11372_v34, 0.0 }
 0x679   : > { %v5875_v20 = vmul.f32 1.442695, %v5773_v55  ;;  %v7225_v22 = vadd.f32 -1.0, %v8598_v13  ;;  %v5771_v30 = vmin.f32 %v11431_v28, 0.0  ;;  %7893 = vmatmul.mubr.msk.bf16.gmra.mrb[152].mxu1 %vm1344_vm2, %v6132_v26  ;;  %v6019_v50 = vmul.f32 0.1, %v7222_v1 }
 0x67a   : > { %vm5700_vm7 = vcmp.gt.f32.partialorder %v11375_v41, 0.0  ;;  %v7223_v21 = vadd.f32 -1.0, %v8600_v4  ;;  %v6085_v17 = vsel %vm5701_vm1, %v11360_v23, %v6021_v11  ;;  %v5774_v59 = vmin.f32 %v11434_v27, 0.0 }
 0x67b   : > { %8609 = vpow2.f32 %v5875_v20  ;;  %v6022_v29 = vmul.f32 0.1, %v7225_v22  ;;  %v5871_v61 = vmul.f32 1.442695, %v5771_v30  ;;  %v6083_v39 = vsel %vm5699_vm3, %v11367_v12, %v6019_v50 }
 0x67c   : > { %v7842_v47 = vpop.f32.mrb[168].mxu0  ;;  %v6020_v40 = vmul.f32 0.1, %v7223_v21  ;;  %v5772_v33 = vmin.f32 %v11438_v52, 0.0  ;;  %v5877_v23 = vmul.f32 1.442695, %v5774_v59 }
 0x67d   : > { %v5576_v60 = vpop.f32.mrb[169].mxu0  ;;  %v11453_v44 = vadd.f32 %v7842_v47, %v11208_v9  ;;  %v8602_v46 = vpop.eup %8601  ;;  %v6086_v25 = vsel %vm5702_vm15, %v11372_v34, %v6022_v29  ;;  %8611 = vpow2.f32 %v5871_v61  ;;  %vm5705_vm4 = vcmp.gt.f32.partialorder %v11387_v53, 0.0 }
 0x67e   : > { %v7843_v8 = vpop.f32.mrb[170].mxu0  ;;  %v11459_v5 = vadd.f32 %v11208_v9, %v5576_v60  ;;  %v8604_v32 = vpop.eup %8603  ;;  %v6134_v12 = vpack.c.bf16 %v6086_v25, %v6085_v17  ;;  %v6084_v38 = vsel %vm5700_vm7, %v11375_v41, %v6020_v40  ;;  %v7228_v63 = vadd.f32 -1.0, %v8602_v46 }
 0x67f   : > { %v5579_v3 = vpop.f32.mrb[171].mxu0  ;;  %v5873_v31 = vmul.f32 1.442695, %v5772_v33  ;;  %v6133_v35 = vpack.c.bf16 %v6084_v38, %v6083_v39  ;;  %v7226_v36 = vadd.f32 -1.0, %v8604_v32  ;;  %8613 = vpow2.f32 %v5877_v23 }
 0x680   : > { %v8606_v34 = vpop.eup %8605  ;;  %v6025_v37 = vmul.f32 0.1, %v7228_v63  ;;  %vm5703_vm5 = vcmp.gt.f32.partialorder %v11393_v51, 0.0  ;;  %v5777_v14 = vmin.f32 %v11453_v44, 0.0  ;;  %v5775_v57 = vmin.f32 %v11459_v5, 0.0 }
 0x681   : > { %8615 = vpow2.f32 %v5873_v31  ;;  %v8608_v10 = vpop.eup %8607  ;;  %v6023_v6 = vmul.f32 0.1, %v7226_v36  ;;  %v7229_v49 = vadd.f32 -1.0, %v8606_v34  ;;  %v11469_v41 = vadd.f32 %v7843_v8, %v11208_v9  ;;  %7896 = vmatprep.mubr.msk.bf16.mxu1 %vm1344_vm2, %v6133_v35 }
 0x682   : > { %vm5706_vm6 = vcmp.gt.f32.partialorder %v11404_v54, 0.0  ;;  %v7227_v2 = vadd.f32 -1.0, %v8608_v10  ;;  %v5883_v24 = vmul.f32 1.442695, %v5777_v14  ;;  %v11474_v16 = vadd.f32 %v11208_v9, %v5579_v3  ;;  %7897 = vmatmul.mubr.msk.bf16.gmra.mrb[156].mxu1 %vm1344_vm2, %v6134_v12 }
 0x683   : > { %v6089_v58 = vsel %vm5705_vm4, %v11387_v53, %v6025_v37  ;;  %v6026_v18 = vmul.f32 0.1, %v7229_v49  ;;  %vm5704_vm8 = vcmp.gt.f32.partialorder %v11409_v15, 0.0  ;;  %v5879_v26 = vmul.f32 1.442695, %v5775_v57 }
 0x684   : > { %v7846_v43 = vpop.f32.mrb[172].mxu0  ;;  %v6087_v62 = vsel %vm5703_vm5, %v11393_v51, %v6023_v6  ;;  %v6024_v45 = vmul.f32 0.1, %v7227_v2  ;;  %8617 = vpow2.f32 %v5883_v24  ;;  %v5778_v56 = vmin.f32 %v11469_v41, 0.0 }
 0x685   : > { %v5592_v48 = vpop.f32.mrb[173].mxu0  ;;  %v8610_v19 = vpop.eup %8609  ;;  %v6090_v7 = vsel %vm5706_vm6, %v11404_v54, %v6026_v18  ;;  %8619 = vpow2.f32 %v5879_v26  ;;  %v5776_v11 = vmin.f32 %v11474_v16, 0.0  ;;  %v11491_v4 = vadd.f32 %v7846_v43, %v11208_v9 }
 0x686   : > { %v7847_v42 = vpop.f32.mrb[174].mxu0  ;;  %v7232_v53 = vadd.f32 -1.0, %v8610_v19  ;;  %v6136_v13 = vpack.c.bf16 %v6090_v7, %v6089_v58  ;;  %v6088_v1 = vsel %vm5704_vm8, %v11409_v15, %v6024_v45  ;;  %v5885_v20 = vmul.f32 1.442695, %v5778_v56 }
 0x687   : > { %v5595_v55 = vpop.f32.mrb[175].mxu0  ;;  %v8612_v51 = vpop.eup %8611  ;;  %v6135_v22 = vpack.c.bf16 %v6088_v1, %v6087_v62  ;;  %v5881_v30 = vmul.f32 1.442695, %v5776_v11  ;;  %v11494_v47 = vadd.f32 %v11208_v9, %v5592_v48  ;;  %vm5709_vm9 = vcmp.gt.f32.partialorder %v11424_v0, 0.0 }
 0x688   : > { %v7230_v54 = vadd.f32 -1.0, %v8612_v51  ;;  %8621 = vpow2.f32 %v5885_v20  ;;  %v5781_v50 = vmin.f32 %v11491_v4, 0.0  ;;  %v6029_v60 = vmul.f32 0.1, %v7232_v53 }
 0x689   : > { %v8614_v21 = vpop.eup %8613  ;;  %vm5707_vm10 = vcmp.gt.f32.partialorder %v11431_v28, 0.0  ;;  %8623 = vpow2.f32 %v5881_v30  ;;  %v5779_v15 = vmin.f32 %v11494_v47, 0.0  ;;  %7900 = vmatprep.mubr.msk.bf16.mxu1 %vm1344_vm2, %v6135_v22  ;;  %v11502_v40 = vadd.f32 %v7847_v42, %v11208_v9 }
 0x68a   : > { %v6027_v61 = vmul.f32 0.1, %v7230_v54  ;;  %v7233_v59 = vadd.f32 -1.0, %v8614_v21  ;;  %v5891_v39 = vmul.f32 1.442695, %v5781_v50  ;;  %7901 = vmatmul.mubr.msk.bf16.gmra.mrb[160].mxu1 %vm1344_vm2, %v6136_v13  ;;  %v11506_v25 = vadd.f32 %v11208_v9, %v5595_v55 }
 0x68b   : > { %v8616_v29 = vpop.eup %8615  ;;  %v5887_v46 = vmul.f32 1.442695, %v5779_v15  ;;  %vm5710_vm11 = vcmp.gt.f32.partialorder %v11434_v27, 0.0  ;;  %vm5708_vm12 = vcmp.gt.f32.partialorder %v11438_v52, 0.0  ;;  %v6093_v38 = vsel %vm5709_vm9, %v11424_v0, %v6029_v60 }
 0x68c   : > { %v7850_v17 = vpop.f32.mrb[176].mxu0  ;;  %v7231_v8 = vadd.f32 -1.0, %v8616_v29  ;;  %v6030_v32 = vmul.f32 0.1, %v7233_v59  ;;  %8625 = vpow2.f32 %v5891_v39  ;;  %v5782_v31 = vmin.f32 %v11502_v40, 0.0 }
 0x68d   : > { %v5608_v33 = vpop.f32.mrb[177].mxu0  ;;  %v11509_v23 = vadd.f32 %v7850_v17, %v11208_v9  ;;  %8627 = vpow2.f32 %v5887_v46  ;;  %v6091_v36 = vsel %vm5707_vm10, %v11431_v28, %v6027_v61  ;;  %v5780_v37 = vmin.f32 %v11506_v25, 0.0 }
 0x68e   : > { %v7851_v3 = vpop.f32.mrb[178].mxu0  ;;  %v6028_v63 = vmul.f32 0.1, %v7231_v8  ;;  %v8618_v35 = vpop.eup %8617  ;;  %v6094_v34 = vsel %vm5710_vm11, %v11434_v27, %v6030_v32  ;;  %v5893_v57 = vmul.f32 1.442695, %v5782_v31  ;;  %v11525_v28 = vadd.f32 %v11208_v9, %v5608_v33 }
 0x68f   : > { %v5611_v12 = vpop.f32.mrb[179].mxu0  ;;  %v5785_v14 = vmin.f32 %v11509_v23, 0.0  ;;  %v8620_v10 = vpop.eup %8619  ;;  %v6138_v6 = vpack.c.bf16 %v6094_v34, %v6093_v38  ;;  %v7236_v0 = vadd.f32 -1.0, %v8618_v35  ;;  %v5889_v24 = vmul.f32 1.442695, %v5780_v37 }
 0x690   : > { %v6092_v49 = vsel %vm5708_vm12, %v11438_v52, %v6028_v63  ;;  %v7234_v2 = vadd.f32 -1.0, %v8620_v10  ;;  %8629 = vpow2.f32 %v5893_v57  ;;  %v11528_v27 = vadd.f32 %v7851_v3, %v11208_v9 }
 0x691   : > { %v6137_v43 = vpack.c.bf16 %v6092_v49, %v6091_v36  ;;  %v5899_v48 = vmul.f32 1.442695, %v5785_v14  ;;  %v6033_v58 = vmul.f32 0.1, %v7236_v0  ;;  %8631 = vpow2.f32 %v5889_v24 }
 0x692   : > { %v8622_v26 = vpop.eup %8621  ;;  %v6031_v42 = vmul.f32 0.1, %v7234_v2  ;;  %v11531_v52 = vadd.f32 %v11208_v9, %v5611_v12  ;;  %vm5713_vm13 = vcmp.gt.f32.partialorder %v11453_v44, 0.0  ;;  %vm5711_vm14 = vcmp.gt.f32.partialorder %v11459_v5, 0.0 }
 0x693   : > { %7904 = vmatprep.mubr.msk.bf16.mxu1 %vm1344_vm2, %v6137_v43  ;;  %v8624_v45 = vpop.eup %8623  ;;  %v7237_v56 = vadd.f32 -1.0, %v8622_v26  ;;  %8633 = vpow2.f32 %v5899_v48  ;;  %vm5714_vm0 = vcmp.gt.f32.partialorder %v11469_v41, 0.0  ;;  %vm5712_vm1 = vcmp.gt.f32.partialorder %v11474_v16, 0.0 }
 0x694   : > { %v7854_v18 = vpop.f32.mrb[180].mxu0  ;;  %7905 = vmatmul.mubr.msk.bf16.gmra.mrb[164].mxu1 %vm1344_vm2, %v6138_v6  ;;  %v7235_v7 = vadd.f32 -1.0, %v8624_v45  ;;  %v5783_v53 = vmin.f32 %v11525_v28, 0.0  ;;  %v6097_v11 = vsel %vm5713_vm13, %v11453_v44, %v6033_v58  ;;  %v5786_v1 = vmin.f32 %v11528_v27, 0.0 }
 0x695   : > { %v11535_v19 = vadd.f32 %v7854_v18, %v11208_v9  ;;  %v5624_v62 = vpop.f32.mrb[181].mxu0  ;;  %v6034_v13 = vmul.f32 0.1, %v7237_v56  ;;  %v5784_v20 = vmin.f32 %v11531_v52, 0.0  ;;  %v6095_v22 = vsel %vm5711_vm14, %v11459_v5, %v6031_v42 }
 0x696   : > { %v7855_v55 = vpop.f32.mrb[182].mxu0  ;;  %v8626_v51 = vpop.eup %8625  ;;  %v6032_v30 = vmul.f32 0.1, %v7235_v7  ;;  %v5895_v54 = vmul.f32 1.442695, %v5783_v53  ;;  %vm5717_vm3 = vcmp.gt.f32.partialorder %v11491_v4, 0.0 }
 0x697   : > { %v5627_v9 = vpop.f32.mrb[183].mxu0  ;;  %v5789_v50 = vmin.f32 %v11535_v19, 0.0  ;;  %v8628_v21 = vpop.eup %8627  ;;  %v6098_v60 = vsel %vm5714_vm0, %v11469_v41, %v6034_v13  ;;  %v7240_v15 = vadd.f32 -1.0, %v8626_v51  ;;  %v5901_v17 = vmul.f32 1.442695, %v5786_v1 }
 0x698   : > { %v5897_v29 = vmul.f32 1.442695, %v5784_v20  ;;  %v6140_v61 = vpack.c.bf16 %v6098_v60, %v6097_v11  ;;  %v6096_v44 = vsel %vm5712_vm1, %v11474_v16, %v6032_v30  ;;  %v7238_v59 = vadd.f32 -1.0, %v8628_v21  ;;  %v11555_v41 = vld [vmem:[%s11859_s6] ss:$0 sm:$0xff] }
 0x699   : > { %8635 = vpow2.f32 %v5895_v54  ;;  %v6139_v39 = vpack.c.bf16 %v6096_v44, %v6095_v22  ;;  %v5907_v5 = vmul.f32 1.442695, %v5789_v50  ;;  %v6037_v8 = vmul.f32 0.1, %v7240_v15 }
 0x69a   : > { %8637 = vpow2.f32 %v5901_v17  ;;  %v11558_v46 = vadd.f32 %v11555_v41, %v5624_v62  ;;  %v11561_v3 = vadd.f32 %v11555_v41, %v7855_v55  ;;  %v8630_v32 = vpop.eup %8629  ;;  %v6035_v12 = vmul.f32 0.1, %v7238_v59 }
 0x69b   : > { %8639 = vpow2.f32 %v5897_v29  ;;  %v11564_v38 = vadd.f32 %v11555_v41, %v5627_v9  ;;  %7908 = vmatprep.mubr.msk.bf16.mxu1 %vm1344_vm2, %v6139_v39  ;;  %v8632_v35 = vpop.eup %8631  ;;  %vm5715_vm15 = vcmp.gt.f32.partialorder %v11494_v47, 0.0  ;;  %v7241_v36 = vadd.f32 -1.0, %v8630_v32 }
 0x69c   : > { %v7858_v33 = vpop.f32.mrb[184].mxu0  ;;  %8641 = vpow2.f32 %v5907_v5  ;;  %v5787_v34 = vmin.f32 %v11558_v46, 0.0  ;;  %7909 = vmatmul.mubr.msk.bf16.gmra.mrb[168].mxu1 %vm1344_vm2, %v6140_v61  ;;  %vm5718_vm7 = vcmp.gt.f32.partialorder %v11502_v40, 0.0  ;;  %vm5716_vm4 = vcmp.gt.f32.partialorder %v11506_v25, 0.0 }
 0x69d   : > { %v5640_v16 = vpop.f32.mrb[185].mxu0  ;;  %v11568_v63 = vadd.f32 %v11555_v41, %v7858_v33  ;;  %v8634_v14 = vpop.eup %8633  ;;  %v7239_v10 = vadd.f32 -1.0, %v8632_v35  ;;  %v5790_v6 = vmin.f32 %v11561_v3, 0.0  ;;  %v6101_v49 = vsel %vm5717_vm3, %v11491_v4, %v6037_v8 }
 0x69e   : > { %v7859_v31 = vpop.f32.mrb[186].mxu0  ;;  %v6038_v0 = vmul.f32 0.1, %v7241_v36  ;;  %v5903_v57 = vmul.f32 1.442695, %v5787_v34  ;;  %v5788_v43 = vmin.f32 %v11564_v38, 0.0  ;;  %v6099_v2 = vsel %vm5715_vm15, %v11494_v47, %v6035_v12 }
 0x69f   : > { %v5643_v37 = vpop.f32.mrb[187].mxu0  ;;  %v6036_v24 = vmul.f32 0.1, %v7239_v10  ;;  %v5909_v48 = vmul.f32 1.442695, %v5790_v6  ;;  %v5793_v58 = vmin.f32 %v11568_v63, 0.0  ;;  %v11587_v47 = vadd.f32 %v11555_v41, %v5640_v16 }
 0x6a0   : > { %v6102_v18 = vsel %vm5718_vm7, %v11502_v40, %v6038_v0  ;;  %v7244_v26 = vadd.f32 -1.0, %v8634_v14  ;;  %8643 = vpow2.f32 %v5903_v57  ;;  %v5905_v42 = vmul.f32 1.442695, %v5788_v43 }
 0x6a1   : > { %v6142_v62 = vpack.c.bf16 %v6102_v18, %v6101_v49  ;;  %v6100_v4 = vsel %vm5716_vm4, %v11506_v25, %v6036_v24  ;;  %8645 = vpow2.f32 %v5909_v48  ;;  %v5915_v45 = vmul.f32 1.442695, %v5793_v58 }
 0x6a2   : > { %v6141_v7 = vpack.c.bf16 %v6100_v4, %v6099_v2  ;;  %vm5721_vm5 = vcmp.gt.f32.partialorder %v11509_v23, 0.0  ;;  %8647 = vpow2.f32 %v5905_v42  ;;  %v11590_v11 = vadd.f32 %v11555_v41, %v7859_v31 }
 0x6a3   : > { %v8636_v55 = vpop.eup %8635  ;;  %8649 = vpow2.f32 %v5915_v45  ;;  %v11593_v25 = vadd.f32 %v11555_v41, %v5643_v37  ;;  %v6041_v20 = vmul.f32 0.1, %v7244_v26  ;;  %vm5719_vm6 = vcmp.gt.f32.partialorder %v11525_v28, 0.0 }
 0x6a4   : > { %v7862_v56 = vpop.f32.mrb[188].mxu0  ;;  %v8638_v53 = vpop.eup %8637  ;;  %v7242_v9 = vadd.f32 -1.0, %v8636_v55  ;;  %v5791_v22 = vmin.f32 %v11587_v47, 0.0  ;;  %7912 = vmatprep.mubr.msk.bf16.mxu1 %vm1344_vm2, %v6141_v7  ;;  %vm5722_vm8 = vcmp.gt.f32.partialorder %v11528_v27, 0.0  ;;  %v5794_v60 = vmin.f32 %v11590_v11, 0.0 }
 0x6a5   : > { %v5656_v40 = vpop.f32.mrb[189].mxu0  ;;  %v8640_v1 = vpop.eup %8639  ;;  %v7245_v51 = vadd.f32 -1.0, %v8638_v53  ;;  %7913 = vmatmul.mubr.msk.bf16.gmra.mrb[172].mxu1 %vm1344_vm2, %v6142_v62  ;;  %vm5720_vm9 = vcmp.gt.f32.partialorder %v11531_v52, 0.0  ;;  %v11603_v29 = vadd.f32 %v11555_v41, %v7862_v56  ;;  %v5792_v39 = vmin.f32 %v11593_v25, 0.0 }
 0x6a6   : > { %v7863_v13 = vpop.f32.mrb[190].mxu0  ;;  %v8642_v54 = vpop.eup %8641  ;;  %v6039_v50 = vmul.f32 0.1, %v7242_v9  ;;  %v7243_v21 = vadd.f32 -1.0, %v8640_v1  ;;  %v5911_v17 = vmul.f32 1.442695, %v5791_v22  ;;  %v6105_v5 = vsel %vm5721_vm5, %v11509_v23, %v6041_v20 }
 0x6a7   : > { %v5659_v30 = vpop.f32.mrb[191].mxu0  ;;  %v6042_v15 = vmul.f32 0.1, %v7245_v51  ;;  %v7248_v44 = vadd.f32 -1.0, %v8642_v54  ;;  %v5917_v59 = vmul.f32 1.442695, %v5794_v60  ;;  %v11617_v23 = vadd.f32 %v11555_v41, %v5656_v40 }
 0x6a8   : > { %v6040_v61 = vmul.f32 0.1, %v7243_v21  ;;  %v6103_v33 = vsel %vm5719_vm6, %v11525_v28, %v6039_v50  ;;  %8651 = vpow2.f32 %v5911_v17  ;;  %v5913_v12 = vmul.f32 1.442695, %v5792_v39 }
 0x6a9   : > { %v6106_v8 = vsel %vm5722_vm8, %v11528_v27, %v6042_v15  ;;  %8653 = vpow2.f32 %v5917_v59  ;;  %vm5725_vm10 = vcmp.gt.f32.partialorder %v11535_v19, 0.0  ;;  %v5797_v36 = vmin.f32 %v11603_v29, 0.0 }
 0x6aa   : > { %v6144_v16 = vpack.c.bf16 %v6106_v8, %v6105_v5  ;;  %v6104_v32 = vsel %vm5720_vm9, %v11531_v52, %v6040_v61  ;;  %v8644_v31 = vpop.eup %8643  ;;  %v6045_v37 = vmul.f32 0.1, %v7248_v44  ;;  %8655 = vpow2.f32 %v5913_v12 }
 0x6ab   : > { %v6143_v35 = vpack.c.bf16 %v6104_v32, %v6103_v33  ;;  %v8646_v34 = vpop.eup %8645  ;;  %v7246_v28 = vadd.f32 -1.0, %v8644_v31  ;;  %v11620_v27 = vadd.f32 %v11555_v41, %v7863_v13  ;;  %v5923_v10 = vmul.f32 1.442695, %v5797_v36 }
 0x6ac   : > { %v8648_v14 = vpop.eup %8647  ;;  %v7249_v52 = vadd.f32 -1.0, %v8646_v34  ;;  %v5795_v6 = vmin.f32 %v11617_v23, 0.0  ;;  %v11624_v49 = vadd.f32 %v11555_v41, %v5659_v30  ;;  %vm5723_vm11 = vcmp.gt.f32.partialorder %v11558_v46, 0.0 }
 0x6ad   : > { %7916 = vmatprep.mubr.msk.bf16.mxu1 %vm1344_vm2, %v6143_v35  ;;  %v8650_v0 = vpop.eup %8649  ;;  %v6043_v57 = vmul.f32 0.1, %v7246_v28  ;;  %v7247_v43 = vadd.f32 -1.0, %v8648_v14  ;;  %v5798_v2 = vmin.f32 %v11620_v27, 0.0  ;;  %vm5726_vm12 = vcmp.gt.f32.partialorder %v11561_v3, 0.0 }
 0x6ae   : > { %7917 = vmatmul.mubr.msk.bf16.gmra.mrb[176].mxu1 %vm1344_vm2, %v6144_v16  ;;  %v6046_v24 = vmul.f32 0.1, %v7249_v52  ;;  %8657 = vpow2.f32 %v5923_v10  ;;  %v5919_v48 = vmul.f32 1.442695, %v5795_v6  ;;  %v6109_v41 = vsel %vm5725_vm10, %v11535_v19, %v6045_v37 }
 0x6af   : > { %vm5724_vm13 = vcmp.gt.f32.partialorder %v11564_v38, 0.0  ;;  %v6044_v58 = vmul.f32 0.1, %v7247_v43  ;;  %v5925_v18 = vmul.f32 1.442695, %v5798_v2  ;;  %v7252_v42 = vadd.f32 -1.0, %v8650_v0 }
 0x6b0   : > { %v6110_v26 = vsel %vm5726_vm12, %v11561_v3, %v6046_v24  ;;  %8659 = vpow2.f32 %v5919_v48  ;;  %v5796_v62 = vmin.f32 %v11624_v49, 0.0  ;;  %v6107_v4 = vsel %vm5723_vm11, %v11558_v46, %v6043_v57 }
 0x6b1   : > { %v6146_v45 = vpack.c.bf16 %v6110_v26, %v6109_v41  ;;  %v6108_v56 = vsel %vm5724_vm13, %v11564_v38, %v6044_v58  ;;  %8661 = vpow2.f32 %v5925_v18  ;;  %v6049_v9 = vmul.f32 0.1, %v7252_v42 }
 0x6b2   : > { %v8652_v55 = vpop.eup %8651  ;;  %v6145_v19 = vpack.c.bf16 %v6108_v56, %v6107_v4  ;;  %v5921_v7 = vmul.f32 1.442695, %v5796_v62  ;;  %vm5729_vm14 = vcmp.gt.f32.partialorder %v11568_v63, 0.0  ;;  %vm5730_vm0 = vcmp.gt.f32.partialorder %v11590_v11, 0.0 }
 0x6b3   : > { %v8654_v40 = vpop.eup %8653  ;;  %v7250_v53 = vadd.f32 -1.0, %v8652_v55  ;;  %v6113_v51 = vsel %vm5729_vm14, %v11568_v63, %v6049_v9  ;;  %vm5727_vm1 = vcmp.gt.f32.partialorder %v11587_v47, 0.0  ;;  %vm5728_vm3 = vcmp.gt.f32.partialorder %v11593_v25, 0.0 }
 0x6b4   : > { %v7253_v13 = vadd.f32 -1.0, %v8654_v40  ;;  %8663 = vpow2.f32 %v5921_v7  ;;  %7920 = vmatprep.mubr.msk.bf16.mxu1 %vm1344_vm2, %v6145_v19  ;;  %v8656_v3 = vpop.eup %8655  ;;  %vm5733_vm15 = vcmp.gt.f32.partialorder %v11603_v29, 0.0  ;;  %vm5734_vm7 = vcmp.gt.f32.partialorder %v11620_v27, 0.0 }
 0x6b5   : > { %v6047_v1 = vmul.f32 0.1, %v7250_v53  ;;  %v7251_v46 = vadd.f32 -1.0, %v8656_v3  ;;  %vm5731_vm4 = vcmp.gt.f32.partialorder %v11617_v23, 0.0  ;;  %vm5732_vm5 = vcmp.gt.f32.partialorder %v11624_v49, 0.0 }
 0x6b6   : > { %7921 = vmatmul.mubr.msk.bf16.gmra.mrb[180].mxu1 %vm1344_vm2, %v6146_v45  ;;  %v6050_v20 = vmul.f32 0.1, %v7253_v13 }
 0x6b7   : > { %v6048_v30 = vmul.f32 0.1, %v7251_v46  ;;  %v6111_v60 = vsel %vm5727_vm1, %v11587_v47, %v6047_v1 }
 0x6b8   : > { %v8658_v38 = vpop.eup %8657  ;;  %v6114_v22 = vsel %vm5730_vm0, %v11590_v11, %v6050_v20 }
 0x6b9   : > { %v6148_v54 = vpack.c.bf16 %v6114_v22, %v6113_v51  ;;  %v7256_v50 = vadd.f32 -1.0, %v8658_v38  ;;  %v6112_v15 = vsel %vm5728_vm3, %v11593_v25, %v6048_v30 }
 0x6ba   : > { %v8660_v21 = vpop.eup %8659  ;;  %v6147_v61 = vpack.c.bf16 %v6112_v15, %v6111_v60 }
 0x6bb   : > { %v8662_v17 = vpop.eup %8661  ;;  %v7254_v44 = vadd.f32 -1.0, %v8660_v21  ;;  %v6053_v59 = vmul.f32 0.1, %v7256_v50 }
 0x6bc   : > { %v7257_v39 = vadd.f32 -1.0, %v8662_v17  ;;  %7924 = vmatprep.mubr.msk.bf16.mxu1 %vm1344_vm2, %v6147_v61 }
 0x6bd   : > { %v6051_v5 = vmul.f32 0.1, %v7254_v44  ;;  %v6117_v25 = vsel %vm5733_vm15, %v11603_v29, %v6053_v59  ;;  %v11669_v29 = vld [vmem:[%s11861_s8] ss:$0 sm:$0xff] }
 0x6be   : > { %v8664_v63 = vpop.eup %8663  ;;  %v6054_v11 = vmul.f32 0.1, %v7257_v39  ;;  %7925 = vmatmul.mubr.msk.bf16.gmra.mrb[184].mxu1 %vm1344_vm2, %v6148_v54 }
 0x6bf   : > { %v7255_v47 = vadd.f32 -1.0, %v8664_v63  ;;  %v6115_v32 = vsel %vm5731_vm4, %v11617_v23, %v6051_v5 }
 0x6c0   : > { %v6118_v33 = vsel %vm5734_vm7, %v11620_v27, %v6054_v11 }
 0x6c1   : > { %v6150_v8 = vpack.c.bf16 %v6118_v33, %v6117_v25  ;;  %v6052_v16 = vmul.f32 0.1, %v7255_v47 }
 0x6c3   : > { %v6116_v12 = vsel %vm5732_vm5, %v11624_v49, %v6052_v16 }
 0x6c4   : > { %v6149_v31 = vpack.c.bf16 %v6116_v12, %v6115_v32 }
 0x6c6   : > { %7928 = vmatprep.mubr.msk.bf16.mxu1 %vm1344_vm2, %v6149_v31 }
 0x6c7   : > { %7929 = vmatmul.mubr.msk.bf16.gmra.mrb[188].mxu1 %vm1344_vm2, %v6150_v8 }
 0x716   : > { %v7870_v35 = vpop.f32.mrb[128].mxu1 }
 0x717   : > { %v6313_v36 = vadd.f32 %v7870_v35, %v11669_v29  ;;  %v6304_v34 = vpop.f32.mrb[129].mxu1 }
 0x718   : > { %v6305_v23 = vadd.f32 %v11669_v29, %v6304_v34  ;;  %v7871_v37 = vpop.f32.mrb[130].mxu1 }
 0x719   : > { %6561 = vst [vmem:[%s11673_s17 + $0x10] sm:$0xff] %v6313_v36  ;;  %v6316_v28 = vadd.f32 %v7871_v37, %v11669_v29  ;;  %v6307_v27 = vpop.f32.mrb[131].mxu1 }
 0x71a   : > { %6559 = vst [vmem:[%s11673_s17] sm:$0xff] %v6305_v23  ;;  %v6308_v14 = vadd.f32 %v11669_v29, %v6307_v27 }
 0x71b   : > { %6562 = vst [vmem:[%s11673_s17 + $0x18] sm:$0xff] %v6316_v28 }
 0x71c   : > { %6560 = vst [vmem:[%s11673_s17 + $0x8] sm:$0xff] %v6308_v14 }
 0x71f   : > { %v7874_v52 = vpop.f32.mrb[132].mxu1 }
 0x720   : > { %v6329_v10 = vadd.f32 %v7874_v52, %v11669_v29  ;;  %v6320_v6 = vpop.f32.mrb[133].mxu1 }
 0x721   : > { %v6321_v49 = vadd.f32 %v11669_v29, %v6320_v6  ;;  %v7875_v0 = vpop.f32.mrb[134].mxu1 }
 0x722   : > { %6565 = vst [vmem:[%s11673_s17 + $0x30] sm:$0xff] %v6329_v10  ;;  %v6332_v57 = vadd.f32 %v7875_v0, %v11669_v29  ;;  %v6323_v43 = vpop.f32.mrb[135].mxu1 }
 0x723   : > { %6563 = vst [vmem:[%s11673_s17 + $0x20] sm:$0xff] %v6321_v49  ;;  %v6324_v2 = vadd.f32 %v11669_v29, %v6323_v43 }
 0x724   : > { %6566 = vst [vmem:[%s11673_s17 + $0x38] sm:$0xff] %v6332_v57 }
 0x725   : > { %6564 = vst [vmem:[%s11673_s17 + $0x28] sm:$0xff] %v6324_v2 }
 0x727   : > { %v7878_v24 = vpop.f32.mrb[136].mxu1 }
 0x728   : > { %v6345_v48 = vadd.f32 %v7878_v24, %v11669_v29  ;;  %v6336_v41 = vpop.f32.mrb[137].mxu1 }
 0x729   : > { %v6337_v58 = vadd.f32 %v11669_v29, %v6336_v41  ;;  %v7879_v18 = vpop.f32.mrb[138].mxu1 }
 0x72a   : > { %6569 = vst [vmem:[%s11673_s17 + $0x50] sm:$0xff] %v6345_v48  ;;  %v6348_v26 = vadd.f32 %v7879_v18, %v11669_v29  ;;  %v6339_v42 = vpop.f32.mrb[139].mxu1 }
 0x72b   : > { %6567 = vst [vmem:[%s11673_s17 + $0x40] sm:$0xff] %v6337_v58  ;;  %v6340_v62 = vadd.f32 %v11669_v29, %v6339_v42 }
 0x72c   : > { %6570 = vst [vmem:[%s11673_s17 + $0x58] sm:$0xff] %v6348_v26 }
 0x72d   : > { %6568 = vst [vmem:[%s11673_s17 + $0x48] sm:$0xff] %v6340_v62 }
 0x734   : > { %v7882_v4 = vpop.f32.mrb[140].mxu1 }
 0x735   : > { %v6361_v45 = vadd.f32 %v7882_v4, %v11669_v29  ;;  %v6352_v56 = vpop.f32.mrb[141].mxu1 }
 0x736   : > { %v6353_v55 = vadd.f32 %v11669_v29, %v6352_v56  ;;  %v7883_v19 = vpop.f32.mrb[142].mxu1 }
 0x737   : > { %6573 = vst [vmem:[%s11673_s17 + $0x70] sm:$0xff] %v6361_v45  ;;  %v6364_v7 = vadd.f32 %v7883_v19, %v11669_v29  ;;  %v6355_v40 = vpop.f32.mrb[143].mxu1 }
 0x738   : > { %6571 = vst [vmem:[%s11673_s17 + $0x60] sm:$0xff] %v6353_v55  ;;  %v6356_v53 = vadd.f32 %v11669_v29, %v6355_v40 }
 0x739   : > { %6574 = vst [vmem:[%s11673_s17 + $0x78] sm:$0xff] %v6364_v7 }
 0x73a   : > { %6572 = vst [vmem:[%s11673_s17 + $0x68] sm:$0xff] %v6356_v53 }
 0x73c   : > { %v7886_v9 = vpop.f32.mrb[144].mxu1 }
 0x73d   : > { %v6377_v13 = vadd.f32 %v7886_v9, %v11669_v29  ;;  %v6368_v3 = vpop.f32.mrb[145].mxu1 }
 0x73e   : > { %v6369_v1 = vadd.f32 %v11669_v29, %v6368_v3  ;;  %v7887_v20 = vpop.f32.mrb[146].mxu1 }
 0x73f   : > { %6577 = vst [vmem:[%s11673_s17 + $0x90] sm:$0xff] %v6377_v13  ;;  %v6380_v46 = vadd.f32 %v7887_v20, %v11669_v29  ;;  %v6371_v38 = vpop.f32.mrb[147].mxu1 }
 0x740   : > { %6575 = vst [vmem:[%s11673_s17 + $0x80] sm:$0xff] %v6369_v1  ;;  %v6372_v51 = vadd.f32 %v11669_v29, %v6371_v38 }
 0x741   : > { %6578 = vst [vmem:[%s11673_s17 + $0x98] sm:$0xff] %v6380_v46 }
 0x742   : > { %6576 = vst [vmem:[%s11673_s17 + $0x88] sm:$0xff] %v6372_v51 }
 0x744   : > { %v7890_v22 = vpop.f32.mrb[148].mxu1 }
 0x745   : > { %v6393_v30 = vadd.f32 %v7890_v22, %v11669_v29  ;;  %v6384_v54 = vpop.f32.mrb[149].mxu1 }
 0x746   : > { %v6385_v50 = vadd.f32 %v11669_v29, %v6384_v54  ;;  %v7891_v21 = vpop.f32.mrb[150].mxu1 }
 0x747   : > { %6581 = vst [vmem:[%s11673_s17 + $0xb0] sm:$0xff] %v6393_v30  ;;  %v6396_v60 = vadd.f32 %v7891_v21, %v11669_v29  ;;  %v6387_v15 = vpop.f32.mrb[151].mxu1 }
 0x748   : > { %6579 = vst [vmem:[%s11673_s17 + $0xa0] sm:$0xff] %v6385_v50  ;;  %v6388_v17 = vadd.f32 %v11669_v29, %v6387_v15 }
 0x749   : > { %6582 = vst [vmem:[%s11673_s17 + $0xb8] sm:$0xff] %v6396_v60 }
 0x74a   : > { %6580 = vst [vmem:[%s11673_s17 + $0xa8] sm:$0xff] %v6388_v17 }
 0x74c   : > { %v7894_v61 = vpop.f32.mrb[152].mxu1 }
 0x74d   : > { %v6409_v44 = vadd.f32 %v7894_v61, %v11669_v29  ;;  %v6400_v59 = vpop.f32.mrb[153].mxu1 }
 0x74e   : > { %v6401_v39 = vadd.f32 %v11669_v29, %v6400_v59  ;;  %v7895_v63 = vpop.f32.mrb[154].mxu1 }
 0x74f   : > { %6585 = vst [vmem:[%s11673_s17 + $0xd0] sm:$0xff] %v6409_v44  ;;  %v6412_v11 = vadd.f32 %v7895_v63, %v11669_v29  ;;  %v6403_v5 = vpop.f32.mrb[155].mxu1 }
 0x750   : > { %6583 = vst [vmem:[%s11673_s17 + $0xc0] sm:$0xff] %v6401_v39  ;;  %v6404_v47 = vadd.f32 %v11669_v29, %v6403_v5 }
 0x751   : > { %6586 = vst [vmem:[%s11673_s17 + $0xd8] sm:$0xff] %v6412_v11 }
 0x752   : > { %6584 = vst [vmem:[%s11673_s17 + $0xc8] sm:$0xff] %v6404_v47 }
 0x755   : > { %v7898_v25 = vpop.f32.mrb[156].mxu1 }
 0x756   : > { %v6425_v33 = vadd.f32 %v7898_v25, %v11669_v29  ;;  %v6416_v8 = vpop.f32.mrb[157].mxu1 }
 0x757   : > { %v6417_v16 = vadd.f32 %v11669_v29, %v6416_v8  ;;  %v7899_v32 = vpop.f32.mrb[158].mxu1 }
 0x758   : > { %6589 = vst [vmem:[%s11673_s17 + $0xf0] sm:$0xff] %v6425_v33  ;;  %v6428_v12 = vadd.f32 %v7899_v32, %v11669_v29  ;;  %v6419_v31 = vpop.f32.mrb[159].mxu1 }
 0x759   : > { %6587 = vst [vmem:[%s11673_s17 + $0xe0] sm:$0xff] %v6417_v16  ;;  %v6420_v35 = vadd.f32 %v11669_v29, %v6419_v31 }
 0x75a   : > { %6590 = vst [vmem:[%s11673_s17 + $0xf8] sm:$0xff] %v6428_v12 }
 0x75b   : > { %6588 = vst [vmem:[%s11673_s17 + $0xe8] sm:$0xff] %v6420_v35 }
 0x75d   : > { %v7902_v36 = vpop.f32.mrb[160].mxu1 }
 0x75e   : > { %v6441_v34 = vadd.f32 %v7902_v36, %v11669_v29  ;;  %v6432_v23 = vpop.f32.mrb[161].mxu1 }
 0x75f   : > { %v6433_v37 = vadd.f32 %v11669_v29, %v6432_v23  ;;  %v7903_v28 = vpop.f32.mrb[162].mxu1 }
 0x760   : > { %6593 = vst [vmem:[%s11673_s17 + $0x110] sm:$0xff] %v6441_v34  ;;  %v6444_v27 = vadd.f32 %v7903_v28, %v11669_v29  ;;  %v6435_v14 = vpop.f32.mrb[163].mxu1 }
 0x761   : > { %6591 = vst [vmem:[%s11673_s17 + $0x100] sm:$0xff] %v6433_v37  ;;  %v6436_v52 = vadd.f32 %v11669_v29, %v6435_v14 }
 0x762   : > { %6594 = vst [vmem:[%s11673_s17 + $0x118] sm:$0xff] %v6444_v27 }
 0x763   : > { %6592 = vst [vmem:[%s11673_s17 + $0x108] sm:$0xff] %v6436_v52 }
 0x767   : > { %v7906_v10 = vpop.f32.mrb[164].mxu1 }
 0x768   : > { %v6457_v6 = vadd.f32 %v7906_v10, %v11669_v29  ;;  %v6448_v49 = vpop.f32.mrb[165].mxu1 }
 0x769   : > { %v6449_v0 = vadd.f32 %v11669_v29, %v6448_v49  ;;  %v7907_v57 = vpop.f32.mrb[166].mxu1 }
 0x76a   : > { %6597 = vst [vmem:[%s11673_s17 + $0x130] sm:$0xff] %v6457_v6  ;;  %v6460_v43 = vadd.f32 %v7907_v57, %v11669_v29  ;;  %v6451_v2 = vpop.f32.mrb[167].mxu1 }
 0x76b   : > { %6595 = vst [vmem:[%s11673_s17 + $0x120] sm:$0xff] %v6449_v0  ;;  %v6452_v24 = vadd.f32 %v11669_v29, %v6451_v2 }
 0x76c   : > { %6598 = vst [vmem:[%s11673_s17 + $0x138] sm:$0xff] %v6460_v43 }
 0x76d   : > { %6596 = vst [vmem:[%s11673_s17 + $0x128] sm:$0xff] %v6452_v24 }
 0x76f   : > { %v7910_v48 = vpop.f32.mrb[168].mxu1 }
 0x770   : > { %v6473_v41 = vadd.f32 %v7910_v48, %v11669_v29  ;;  %v6464_v58 = vpop.f32.mrb[169].mxu1 }
 0x771   : > { %v6465_v18 = vadd.f32 %v11669_v29, %v6464_v58  ;;  %v7911_v26 = vpop.f32.mrb[170].mxu1 }
 0x772   : > { %6601 = vst [vmem:[%s11673_s17 + $0x150] sm:$0xff] %v6473_v41  ;;  %v6476_v42 = vadd.f32 %v7911_v26, %v11669_v29  ;;  %v6467_v62 = vpop.f32.mrb[171].mxu1 }
 0x773   : > { %6599 = vst [vmem:[%s11673_s17 + $0x140] sm:$0xff] %v6465_v18  ;;  %v6468_v4 = vadd.f32 %v11669_v29, %v6467_v62 }
 0x774   : > { %6602 = vst [vmem:[%s11673_s17 + $0x158] sm:$0xff] %v6476_v42 }
 0x775   : > { %6600 = vst [vmem:[%s11673_s17 + $0x148] sm:$0xff] %v6468_v4 }
 0x778   : > { %v7914_v45 = vpop.f32.mrb[172].mxu1 }
 0x779   : > { %v6489_v56 = vadd.f32 %v7914_v45, %v11669_v29  ;;  %v6480_v55 = vpop.f32.mrb[173].mxu1 }
 0x77a   : > { %v6481_v19 = vadd.f32 %v11669_v29, %v6480_v55  ;;  %v7915_v7 = vpop.f32.mrb[174].mxu1 }
 0x77b   : > { %6605 = vst [vmem:[%s11673_s17 + $0x170] sm:$0xff] %v6489_v56  ;;  %v6492_v40 = vadd.f32 %v7915_v7, %v11669_v29  ;;  %v6483_v53 = vpop.f32.mrb[175].mxu1 }
 0x77c   : > { %6603 = vst [vmem:[%s11673_s17 + $0x160] sm:$0xff] %v6481_v19  ;;  %v6484_v9 = vadd.f32 %v11669_v29, %v6483_v53 }
 0x77d   : > { %6606 = vst [vmem:[%s11673_s17 + $0x178] sm:$0xff] %v6492_v40 }
 0x77e   : > { %6604 = vst [vmem:[%s11673_s17 + $0x168] sm:$0xff] %v6484_v9 }
 0x781   : > { %v7918_v13 = vpop.f32.mrb[176].mxu1 }
 0x782   : > { %v6505_v3 = vadd.f32 %v7918_v13, %v11669_v29  ;;  %v6496_v1 = vpop.f32.mrb[177].mxu1 }
 0x783   : > { %v6497_v20 = vadd.f32 %v11669_v29, %v6496_v1  ;;  %v7919_v46 = vpop.f32.mrb[178].mxu1 }
 0x784   : > { %6609 = vst [vmem:[%s11673_s17 + $0x190] sm:$0xff] %v6505_v3  ;;  %v6508_v38 = vadd.f32 %v7919_v46, %v11669_v29  ;;  %v6499_v51 = vpop.f32.mrb[179].mxu1 }
 0x785   : > { %6607 = vst [vmem:[%s11673_s17 + $0x180] sm:$0xff] %v6497_v20  ;;  %v6500_v22 = vadd.f32 %v11669_v29, %v6499_v51 }
 0x786   : > { %6610 = vst [vmem:[%s11673_s17 + $0x198] sm:$0xff] %v6508_v38 }
 0x787   : > { %6608 = vst [vmem:[%s11673_s17 + $0x188] sm:$0xff] %v6500_v22 }
 0x789   : > { %v7922_v30 = vpop.f32.mrb[180].mxu1 }
 0x78a   : > { %v6521_v54 = vadd.f32 %v7922_v30, %v11669_v29  ;;  %v6512_v50 = vpop.f32.mrb[181].mxu1 }
 0x78b   : > { %v6513_v21 = vadd.f32 %v11669_v29, %v6512_v50  ;;  %v7923_v60 = vpop.f32.mrb[182].mxu1 }
 0x78c   : > { %6613 = vst [vmem:[%s11673_s17 + $0x1b0] sm:$0xff] %v6521_v54  ;;  %v6524_v15 = vadd.f32 %v7923_v60, %v11669_v29  ;;  %v6515_v17 = vpop.f32.mrb[183].mxu1 }
 0x78d   : > { %6611 = vst [vmem:[%s11673_s17 + $0x1a0] sm:$0xff] %v6513_v21  ;;  %v6516_v61 = vadd.f32 %v11669_v29, %v6515_v17 }
 0x78e   : > { %6614 = vst [vmem:[%s11673_s17 + $0x1b8] sm:$0xff] %v6524_v15 }
 0x78f   : > { %6612 = vst [vmem:[%s11673_s17 + $0x1a8] sm:$0xff] %v6516_v61 }
 0x791   : > { %v7926_v44 = vpop.f32.mrb[184].mxu1 }
 0x792   : > { %v6537_v59 = vadd.f32 %v7926_v44, %v11669_v29  ;;  %v6528_v39 = vpop.f32.mrb[185].mxu1 }
 0x793   : > { %v6529_v63 = vadd.f32 %v11669_v29, %v6528_v39  ;;  %v7927_v11 = vpop.f32.mrb[186].mxu1 }
 0x794   : > { %6617 = vst [vmem:[%s11673_s17 + $0x1d0] sm:$0xff] %v6537_v59  ;;  %v6540_v5 = vadd.f32 %v7927_v11, %v11669_v29  ;;  %v6531_v47 = vpop.f32.mrb[187].mxu1 }
 0x795   : > { %6615 = vst [vmem:[%s11673_s17 + $0x1c0] sm:$0xff] %v6529_v63  ;;  %v6532_v25 = vadd.f32 %v11669_v29, %v6531_v47 }
 0x796   : > { %6618 = vst [vmem:[%s11673_s17 + $0x1d8] sm:$0xff] %v6540_v5 }
 0x797   : > { %6616 = vst [vmem:[%s11673_s17 + $0x1c8] sm:$0xff] %v6532_v25 }
 0x79a   : > { %v7930_v33 = vpop.f32.mrb[188].mxu1 }
 0x79b   : > { %v6553_v8 = vadd.f32 %v7930_v33, %v11669_v29  ;;  %v6544_v16 = vpop.f32.mrb[189].mxu1 }
 0x79c   : > { %v6545_v32 = vadd.f32 %v11669_v29, %v6544_v16  ;;  %v7931_v12 = vpop.f32.mrb[190].mxu1 }
 0x79d   : > { %6621 = vst [vmem:[%s11673_s17 + $0x1f0] sm:$0xff] %v6553_v8  ;;  %v6556_v31 = vadd.f32 %v7931_v12, %v11669_v29  ;;  %v6547_v35 = vpop.f32.mrb[191].mxu1 }
 0x79e   : > { %6619 = vst [vmem:[%s11673_s17 + $0x1e0] sm:$0xff] %v6545_v32  ;;  %v6548_v36 = vadd.f32 %v11669_v29, %v6547_v35 }
 0x79f   : > { %6622 = vst [vmem:[%s11673_s17 + $0x1f8] sm:$0xff] %v6556_v31 }
 0x7a0   : > { %6620 = vst [vmem:[%s11673_s17 + $0x1e8] sm:$0xff] %v6548_v36 }
 0x7a1   : > { %8683 = shalt.err (!%p8680_p3)
}
 0x7a2   : > { %s8684_s28 = scalar_lea.hbm %s11802_s24, 8192  ;;  %s8688_s21 = scalar_lea.hbm %s11862_s9, 16384 }
 0x7a3   : > { %p8685_p4 = scmp.ne.s32.totalorder %s11802_s24, %s8684_s28  ;;  %p8689_p9 = scmp.lt.u32.totalorder %s11802_s24, %s11862_s9 }
 0x7a4   : > { %p8690_p10 = scmp.lt.u32.totalorder %s8688_s21, %s8684_s28  ;;  %p8692_p12 = scmp.lt.u32.totalorder %s8684_s28, %s11802_s24 }
 0x7a5   : > { %p8686_p7 = pnand %p8685_p4, %p8826_p5 }
 0x7a6   : > { %p8691_p11 = por %p8690_p10, %p8689_p9 }
 0x7a7   : > { %p8687_p8 = pneg %p8686_p7 }
 0x7a8   : > { %p8693_p13 = por %p8692_p12, %p8691_p11 }
 0x7aa   : > { %p8694_p0 = pnand %p8693_p13, %p8687_p8 }
 0x7ac   : > { %8697 = shalt.err (!%p8694_p0)
}
 0x7ad   : > { %s8736_s25 = smov 128   ;;  %s8737_s27 = smov 8  }
 0x7ae   : > { %7932 = dma.vmem_to_hbm [thread:$0]  (%p8826_p5), %s11804_s22, 8192, %s11802_s24, %s11812_s13, %s8736_s25, %s8736_s25, %s8737_s27  }
 0x7af PF: > { %p7938_p1 = scmp.ge.s32.totalorder %s8732_s12, 2  ;;  %s6652_s29 = sand.u32 1, %s8720_s30  }
 0x7b0   : > { %s6653_s14 = scalar_lea.sflag [#allocation4], %s6652_s29 }
 0x7b1   : > { %p7935_p2 = pnand %p7938_p1, %p8830_p6 }
 0x7b3   : > { %8715 = dma.done.wait (!%p7935_p2), %s6653_s14, 8192  }
 0x7b4   : > { %8717 = vsyncadd (!%p7935_p2), %s6653_s14, 4294959104  ;;  %p19_p3 = scmp.ge.s32.totalorder %s8813_s15, 4   ;;  %s11865_s30 = smov %s8724_s10 }
 0x7b5   : > { %s11866_s10 = smov %s8728_s11  ;;  %s11867_s11 = smov %s8824_s18 }
 0x7b6   : > { %s11868_s12 = smov %s8813_s15  ;;  %21 = sbr.rel (!%p19_p3) target bundleno = 3 (0x3), region = 95 }
 0x7bd   :  { %6658 = vsyncpa [#allocation4], 1 }
 0x7be   :  { %6660 = vsyncpa [#allocation4 + $0x1], 1 }

</bundles_post_ra>
